<compile_context>
chip_gen: v5e
topology: v5e:2x2
jax: 0.10.0
libtpu: 0.0.40
codegen_flags: <defaults>
</compile_context>

<pallas_src>
import jax
import jax.numpy as jnp
from jax.experimental import pallas as pl
from jax.experimental.pallas import tpu as pltpu

# Leave headroom below physical VMEM on every generation (v7x TC has 64 MiB).
_VMEM_LIMIT = 48 * 1024 * 1024


def _pick_tile(n, candidates):
    """Largest candidate that divides n, else the full extent (always legal)."""
    for c in candidates:
        if n % c == 0:
            return c
    return n


def _round_up(n, m):
    return ((n + m - 1) // m) * m


def _pick_time_block(seq, b_blk, gate_dim, budget_bytes=2 * 1024 * 1024):
    """Largest time block whose double-buffered xp slab stays under budget."""
    for c in (32, 16, 8, 4, 2):
        if seq % c == 0 and 2 * c * b_blk * gate_dim * 4 <= budget_bytes:
            return c
    return 1


def _pick_batch_block(b):
    """Split batch across TensorCores (v7x) only if each half keeps full sublane tiles."""
    if b % 2 == 0 and (b // 2) % 8 == 0:
        return b // 2
    return b


# ----------------------------------------------------------------------------
# Hoisted input projection: one big GEMM  (seq*B, Din) @ (Din, 4H) + b
# ----------------------------------------------------------------------------
def _input_proj_kernel(x_ref, w_ref, b_ref, out_ref):
    out_ref[...] = (
        jnp.dot(x_ref[...], w_ref[...], preferred_element_type=jnp.float32)
        + b_ref[...]
    ).astype(out_ref.dtype)


def input_projection(x, w_t, b):
    """x: (M, Din), w_t: (Din, G), b: (1, G) -> (M, G) float32."""
    M, Din = x.shape
    G = w_t.shape[1]
    tm = _pick_tile(M, (512, 256, 128, 64, 32, 16, 8))
    tg = _pick_tile(G, (512, 256, 128))
    return pl.pallas_call(
        _input_proj_kernel,
        out_shape=jax.ShapeDtypeStruct((M, G), jnp.float32),
        grid_spec=pltpu.PrefetchScalarGridSpec(
            num_scalar_prefetch=0,
            grid=(M // tm, G // tg),
            in_specs=[
                pl.BlockSpec((tm, Din), lambda i, j: (i, 0)),
                pl.BlockSpec((Din, tg), lambda i, j: (0, j)),
                pl.BlockSpec((1, tg), lambda i, j: (0, j)),
            ],
            out_specs=pl.BlockSpec((tm, tg), lambda i, j: (i, j)),
        ),
        compiler_params=pltpu.CompilerParams(
            dimension_semantics=("parallel", "parallel"),
            vmem_limit_bytes=_VMEM_LIMIT),
    )(x, w_t, b)


# ----------------------------------------------------------------------------
# LSTM recurrence: batch-parallel x time-blocked grid.
#   xp:     (seq, B, 4H)  precomputed x@W_ih + (b_ih + b_hh)   [natural layout]
#   w_hh_t: (H, 4H)       fused recurrent weight -> one MXU push per timestep
# ----------------------------------------------------------------------------
def _lstm_rec_kernel(xp_ref, h0_ref, c0_ref, whh_ref, y_ref, hn_ref, cn_ref,
                     h_scr, c_scr):
    t = pl.program_id(1)

    @pl.when(t == 0)
    def _():
        h_scr[...] = h0_ref[...].astype(jnp.float32)
        c_scr[...] = c0_ref[...].astype(jnp.float32)

    # Hoisted out of the static time unroll (one VMEM load, not t_blk loads).
    whh = whh_ref[...]                               # (H, 4H)
    H = whh.shape[0]
    t_blk = xp_ref.shape[0]
    for i in range(t_blk):                           # static unroll over time block
        h = h_scr[...]
        c = c_scr[...]
        # Single fused (b, H) @ (H, 4H) MXU matmul per timestep.
        pre = xp_ref[i] + jnp.dot(h, whh, preferred_element_type=jnp.float32)
        # Two full-width EUP ops, then static lane slices (gate order i,f,g,o
        # matches PyTorch).
        sig = jax.nn.sigmoid(pre)
        tnh = jnp.tanh(pre)
        i_g = sig[:, 0 * H:1 * H]
        f_g = sig[:, 1 * H:2 * H]
        g_g = tnh[:, 2 * H:3 * H]
        o_g = sig[:, 3 * H:4 * H]
        c_new = f_g * c + i_g * g_g
        h_new = o_g * jnp.tanh(c_new)
        c_scr[...] = c_new
        h_scr[...] = h_new
        y_ref[i] = h_new.astype(y_ref.dtype)

    @pl.when(t == pl.num_programs(1) - 1)
    def _():
        hn_ref[...] = h_scr[...].astype(hn_ref.dtype)
        cn_ref[...] = c_scr[...].astype(cn_ref.dtype)


def lstm_recurrence(xp, h0, c0, w_hh_t):
    """xp: (seq, B, 4H) f32, h0/c0: (B, H), w_hh_t: (H, 4H) -> (y, h_n, c_n)."""
    seq, B, G = xp.shape
    H = w_hh_t.shape[0]
    b_blk = _pick_batch_block(B)
    t_blk = _pick_time_block(seq, b_blk, G)
    return pl.pallas_call(
        _lstm_rec_kernel,
        out_shape=(
            jax.ShapeDtypeStruct((seq, B, H), jnp.float32),
            jax.ShapeDtypeStruct((B, H), jnp.float32),
            jax.ShapeDtypeStruct((B, H), jnp.float32),
        ),
        grid_spec=pltpu.PrefetchScalarGridSpec(
            num_scalar_prefetch=0,
            grid=(B // b_blk, seq // t_blk),
            in_specs=[
                pl.BlockSpec((t_blk, b_blk, G), lambda b, t: (t, b, 0)),
                pl.BlockSpec((b_blk, H), lambda b, t: (b, 0)),
                pl.BlockSpec((b_blk, H), lambda b, t: (b, 0)),
                pl.BlockSpec((H, G), lambda b, t: (0, 0)),
            ],
            out_specs=(
                pl.BlockSpec((t_blk, b_blk, H), lambda b, t: (t, b, 0)),
                pl.BlockSpec((b_blk, H), lambda b, t: (b, 0)),
                pl.BlockSpec((b_blk, H), lambda b, t: (b, 0)),
            ),
            scratch_shapes=[
                pltpu.VMEM((b_blk, H), jnp.float32),
                pltpu.VMEM((b_blk, H), jnp.float32),
            ],
        ),
        compiler_params=pltpu.CompilerParams(
            # batch blocks are independent (megacore on v7x); time is sequential
            dimension_semantics=("parallel", "arbitrary"),
            vmem_limit_bytes=_VMEM_LIMIT),
    )(xp, h0, c0, w_hh_t)


# ----------------------------------------------------------------------------
# Fused decoder: tiled Linear(nhid -> ntoken) + streaming LSE + in-VMEM
# log_softmax.  The (tn, V) output block is resident across the vocab sweep;
# logits are written to HBM exactly once, already normalized.
# ----------------------------------------------------------------------------
def _dec_logsoftmax_kernel(x_ref, w_ref, b_ref, out_ref, m_scr, l_scr):
    j = pl.program_id(1)
    tv = w_ref.shape[1]

    @pl.when(j == 0)
    def _():
        m_scr[...] = jnp.full(m_scr.shape, -jnp.inf, jnp.float32)
        l_scr[...] = jnp.zeros(l_scr.shape, jnp.float32)

    logits = (jnp.dot(x_ref[...], w_ref[...], preferred_element_type=jnp.float32)
              + b_ref[...])                                   # (tn, tv)
    col = pl.multiple_of(j * tv, tv)                          # tv is a 128-multiple
    out_ref[:, pl.ds(col, tv)] = logits.astype(out_ref.dtype)

    m_prev = m_scr[...]
    m_new = jnp.maximum(m_prev, jnp.max(logits, axis=-1, keepdims=True))
    l_scr[...] = (l_scr[...] * jnp.exp(m_prev - m_new)
                  + jnp.sum(jnp.exp(logits - m_new), axis=-1, keepdims=True))
    m_scr[...] = m_new

    @pl.when(j == pl.num_programs(1) - 1)
    def _():
        lse = m_scr[...] + jnp.log(l_scr[...])
        out_ref[...] = out_ref[...] - lse                     # in-VMEM normalize


def decoder_log_probs(x, w_t, b, *, out_slab_budget=16 * 1024 * 1024):
    """x: (N, H), w_t: (H, V), b: (1, V) -> log_probs (N, V)."""
    N, H = x.shape
    V = w_t.shape[1]
    # Pad vocab to a lane multiple so the weight tile never falls back to full V.
    V_pad = _round_up(V, 128)
    if V_pad != V:
        w_t = jnp.pad(w_t, ((0, 0), (0, V_pad - V)))
        b = jnp.pad(b, ((0, 0), (0, V_pad - V)), constant_values=-1e30)
    tv = _pick_tile(V_pad, (512, 256, 128))
    # Cap the resident (tn, V_pad) double-buffered output slab by a VMEM budget.
    tn = 256
    while tn > 8 and 2 * tn * V_pad * 4 > out_slab_budget:
        tn //= 2
    if N < tn:
        tn = max(8, _round_up(N, 8))
    N_pad = _round_up(N, tn)
    x_p = jnp.pad(x, ((0, N_pad - N), (0, 0))) if N_pad != N else x

    out = pl.pallas_call(
        _dec_logsoftmax_kernel,
        out_shape=jax.ShapeDtypeStruct((N_pad, V_pad), jnp.float32),
        grid_spec=pltpu.PrefetchScalarGridSpec(
            num_scalar_prefetch=0,
            grid=(N_pad // tn, V_pad // tv),
            in_specs=[
                pl.BlockSpec((tn, H), lambda i, j: (i, 0)),
                pl.BlockSpec((H, tv), lambda i, j: (0, j)),
                pl.BlockSpec((1, tv), lambda i, j: (0, j)),
            ],
            # Resident across the vocab sweep -> logits written to HBM once.
            out_specs=pl.BlockSpec((tn, V_pad), lambda i, j: (i, 0)),
            scratch_shapes=[
                pltpu.VMEM((tn, 1), jnp.float32),
                pltpu.VMEM((tn, 1), jnp.float32),
            ],
        ),
        compiler_params=pltpu.CompilerParams(
            dimension_semantics=("parallel", "arbitrary"),
            vmem_limit_bytes=_VMEM_LIMIT),
    )(x_p, w_t, b)
    return out[:N, :V]


# ----------------------------------------------------------------------------
# Parameters & full forward (LSTM variant of MyRNNModel).
# ----------------------------------------------------------------------------
def make_params(key, ntoken, ninp, nhid, nlayers):
    initrange = 0.1
    keys = jax.random.split(key, 2 + 4 * nlayers)
    params = {
        "encoder_w": jax.random.uniform(keys[0], (ntoken, ninp), jnp.float32,
                                        -initrange, initrange),
        "decoder_w_t": jax.random.uniform(keys[1], (nhid, ntoken), jnp.float32,
                                          -initrange, initrange),
        "decoder_b": jnp.zeros((1, ntoken), jnp.float32),
        "lstm": [],
    }
    for l in range(nlayers):
        d_in = ninp if l == 0 else nhid
        std = 1.0 / float(nhid) ** 0.5
        k = keys[2 + 4 * l: 2 + 4 * (l + 1)]
        params["lstm"].append({
            # (Din, 4H): gate blocks [i|f|g|o] along 4H (PyTorch W_ih, transposed).
            "w_ih_t": jax.random.uniform(k[0], (d_in, 4 * nhid), jnp.float32, -std, std),
            # (H, 4H): fused recurrent weight (PyTorch W_hh, transposed) -> one
            # lane-dense MXU matmul per timestep.
            "w_hh_t": jax.random.uniform(k[1], (nhid, 4 * nhid), jnp.float32, -std, std),
            # b_ih + b_hh folded into one bias row (added in the hoisted projection).
            "b": (jax.random.uniform(k[2], (1, 4 * nhid), jnp.float32, -std, std)
                  + jax.random.uniform(k[3], (1, 4 * nhid), jnp.float32, -std, std)),
        })
    return params


@jax.jit
def my_rnn_model_forward(params, tokens, hidden):
    """tokens: (seq, B) int32; hidden: (h0, c0) each (nlayers, B, nhid)."""
    h0_all, c0_all = hidden
    # Embedding gather (glue, plain JAX); dropout is eval-mode identity.
    emb = jnp.take(params["encoder_w"], tokens, axis=0)        # (seq, B, ninp)

    seq, B, _ = emb.shape
    x = emb
    h_finals, c_finals = [], []
    for lp in params["lstm"]:
        Din = x.shape[-1]
        H = lp["w_hh_t"].shape[0]
        # Hoisted input projection for the whole sequence (bias folded in).
        xp = input_projection(x.reshape(seq * B, Din), lp["w_ih_t"], lp["b"])
        xp = xp.reshape(seq, B, 4 * H)     # free reshape; no transpose round-trip
        x, h_n, c_n = lstm_recurrence(xp, h0_all[lp is None], c0_all[0], lp["w_hh_t"]) \
            if False else lstm_recurrence(xp, h0_all[len(h_finals)], c0_all[len(c_finals)], lp["w_hh_t"])
        h_finals.append(h_n)
        c_finals.append(c_n)
        # inter-layer dropout: eval-mode identity

    H = x.shape[-1]
    flat = x.reshape(seq * B, H)                               # matches decoded.view(-1, ntoken)
    log_probs = decoder_log_probs(flat, params["decoder_w_t"], params["decoder_b"])
    return log_probs, (jnp.stack(h_finals, axis=0), jnp.stack(c_finals, axis=0))


# ----------------------------------------------------------------------------
# Pure-JAX reference for a correctness sanity check.
# ----------------------------------------------------------------------------
def _reference_forward(params, tokens, hidden):
    h0_all, c0_all = hidden
    x = jnp.take(params["encoder_w"], tokens, axis=0)
    hs, cs = [], []
    for l, lp in enumerate(params["lstm"]):
        H = lp["w_hh_t"].shape[0]

        def step(carry, x_t, lp=lp, H=H):
            h, c = carry
            pre = x_t @ lp["w_ih_t"] + lp["b"][0] + h @ lp["w_hh_t"]
            i_g = jax.nn.sigmoid(pre[:, 0 * H:1 * H])
            f_g = jax.nn.sigmoid(pre[:, 1 * H:2 * H])
            g_g = jnp.tanh(pre[:, 2 * H:3 * H])
            o_g = jax.nn.sigmoid(pre[:, 3 * H:4 * H])
            c = f_g * c + i_g * g_g
            h = o_g * jnp.tanh(c)
            return (h, c), h

        (h_n, c_n), x = jax.lax.scan(step, (h0_all[l], c0_all[l]), x)
        hs.append(h_n)
        cs.append(c_n)
    seq, B, H = x.shape
    logits = x.reshape(seq * B, H) @ params["decoder_w_t"] + params["decoder_b"]
    return jax.nn.log_softmax(logits, axis=1), (jnp.stack(hs), jnp.stack(cs))


if __name__ == "__main__":
    ntoken, ninp, nhid, nlayers = 384, 32, 32, 2
    seq_len, batch = 32, 8

    key = jax.random.PRNGKey(0)
    k_param, k_tok, k_h, k_c = jax.random.split(key, 4)
    params = make_params(k_param, ntoken, ninp, nhid, nlayers)

    tokens = jax.random.randint(k_tok, (seq_len, batch), 0, ntoken, dtype=jnp.int32)
    hidden = (0.1 * jax.random.normal(k_h, (nlayers, batch, nhid), jnp.float32),
              0.1 * jax.random.normal(k_c, (nlayers, batch, nhid), jnp.float32))

    log_probs, (h_n, c_n) = my_rnn_model_forward(params, tokens, hidden)
    jax.block_until_ready((log_probs, h_n, c_n))

    ref_lp, (ref_h, ref_c) = _reference_forward(params, tokens, hidden)
    assert log_probs.shape == (seq_len * batch, ntoken)
    assert h_n.shape == (nlayers, batch, nhid) and c_n.shape == (nlayers, batch, nhid)
    assert jnp.allclose(log_probs, ref_lp, atol=1e-4, rtol=1e-4)
    assert jnp.allclose(h_n, ref_h, atol=1e-4, rtol=1e-4)
    assert jnp.allclose(c_n, ref_c, atol=1e-4, rtol=1e-4)

    print("KERNEL_OK")
</pallas_src>

<mosaic_0001>
module attributes {stable_mosaic.version = 11 : i64} {
  func.func @_input_proj_kernel(%arg0: i32, %arg1: i32, %arg2: memref<256x32xf32, #tpu.memory_space<vmem>>, %arg3: memref<32x128xf32, #tpu.memory_space<vmem>>, %arg4: memref<1x128xf32, #tpu.memory_space<vmem>>, %arg5: memref<256x128xf32, #tpu.memory_space<vmem>>) attributes {dimension_semantics = [#tpu.dimension_semantics<parallel>, #tpu.dimension_semantics<parallel>], iteration_bounds = array<i64: 1, 1>, scalar_prefetch = 0 : i64, scratch_operands = 0 : i64, tpu.core_type = #tpu.core_type<tc>, window_params = [{transform_indices = @transform_0, window_bounds = array<i64: 256, 32>}, {transform_indices = @transform_1, window_bounds = array<i64: 32, 128>}, {transform_indices = @transform_2, window_bounds = array<i64: 1, 128>}, {transform_indices = @transform_3, window_bounds = array<i64: 256, 128>}]} {
    %c0 = arith.constant 0 : index
    %c0_0 = arith.constant 0 : index
    %0 = vector.load %arg2[%c0, %c0_0] : memref<256x32xf32, #tpu.memory_space<vmem>>, vector<256x32xf32>
    %c0_1 = arith.constant 0 : index
    %c0_2 = arith.constant 0 : index
    %1 = vector.load %arg3[%c0_1, %c0_2] : memref<32x128xf32, #tpu.memory_space<vmem>>, vector<32x128xf32>
    %cst = arith.constant dense<0.000000e+00> : vector<256x128xf32>
    %2 = tpu.matmul %0, %1, %cst {dimension_numbers = #tpu.dot_dimension_numbers<[1], [0], [0], [1], [0, 0, 1, 1], [], []>} : vector<256x32xf32>, vector<32x128xf32>, vector<256x128xf32> -> vector<256x128xf32>
    %c0_3 = arith.constant 0 : index
    %c0_4 = arith.constant 0 : index
    %3 = vector.load %arg4[%c0_3, %c0_4] : memref<1x128xf32, #tpu.memory_space<vmem>>, vector<1x128xf32>
    %4 = vector.broadcast %3 : vector<1x128xf32> to vector<256x128xf32>
    %5 = arith.addf %2, %4 : vector<256x128xf32>
    %c0_5 = arith.constant 0 : index
    %c0_6 = arith.constant 0 : index
    %6 = vector.load %arg5[%c0_5, %c0_6] : memref<256x128xf32, #tpu.memory_space<vmem>>, vector<256x128xf32>
    tpu.vector_store %arg5[%c0_5, %c0_6], %5 {strides = array<i32>} : memref<256x128xf32, #tpu.memory_space<vmem>>, vector<256x128xf32>,
    return
  }
  func.func @transform_0(%arg0: i32, %arg1: i32) -> (i32, i32) {
    %c0_i32 = arith.constant 0 : i32
    %c0_i32_0 = arith.constant 0 : i32
    return %arg0, %c0_i32 : i32, i32
  }
  func.func @transform_1(%arg0: i32, %arg1: i32) -> (i32, i32) {
    %c0_i32 = arith.constant 0 : i32
    %c0_i32_0 = arith.constant 0 : i32
    return %c0_i32, %arg1 : i32, i32
  }
  func.func @transform_2(%arg0: i32, %arg1: i32) -> (i32, i32) {
    %c0_i32 = arith.constant 0 : i32
    %c0_i32_0 = arith.constant 0 : i32
    return %c0_i32, %arg1 : i32, i32
  }
  func.func @transform_3(%arg0: i32, %arg1: i32) -> (i32, i32) {
    %c0_i32 = arith.constant 0 : i32
    return %arg0, %arg1 : i32, i32
  }
}

module attributes {stable_mosaic.version = 11 : i64} {
  func.func @_lstm_rec_kernel(%arg0: i32, %arg1: i32, %arg2: memref<32x8x128xf32, #tpu.memory_space<vmem>>, %arg3: memref<8x32xf32, #tpu.memory_space<vmem>>, %arg4: memref<8x32xf32, #tpu.memory_space<vmem>>, %arg5: memref<32x128xf32, #tpu.memory_space<vmem>>, %arg6: memref<32x8x32xf32, #tpu.memory_space<vmem>>, %arg7: memref<8x32xf32, #tpu.memory_space<vmem>>, %arg8: memref<8x32xf32, #tpu.memory_space<vmem>>, %arg9: memref<8x32xf32, #tpu.memory_space<vmem>>, %arg10: memref<8x32xf32, #tpu.memory_space<vmem>>) attributes {dimension_semantics = [#tpu.dimension_semantics<parallel>, #tpu.dimension_semantics<arbitrary>], iteration_bounds = array<i64: 1, 1>, scalar_prefetch = 0 : i64, scratch_operands = 2 : i64, tpu.core_type = #tpu.core_type<tc>, window_params = [{transform_indices = @transform_0, window_bounds = array<i64: 32, 8, 128>}, {transform_indices = @transform_1, window_bounds = array<i64: 8, 32>}, {transform_indices = @transform_2, window_bounds = array<i64: 8, 32>}, {pipeline_mode = #tpu.pipeline_mode<synchronous>, transform_indices = @transform_3, window_bounds = array<i64: 32, 128>}, {transform_indices = @transform_4, window_bounds = array<i64: 32, 8, 32>}, {transform_indices = @transform_5, window_bounds = array<i64: 8, 32>}, {transform_indices = @transform_6, window_bounds = array<i64: 8, 32>}]} {
    %c0_i32 = arith.constant 0 : i32
    %0 = arith.cmpi eq, %arg1, %c0_i32 : i32
    %1 = arith.extui %0 : i1 to i32
    %c0_i32_0 = arith.constant 0 : i32
    %2 = arith.cmpi ne, %1, %c0_i32_0 : i32
    scf.if %2 {
      %c0_484 = arith.constant 0 : index
      %c0_485 = arith.constant 0 : index
      %839 = vector.load %arg3[%c0_484, %c0_485] : memref<8x32xf32, #tpu.memory_space<vmem>>, vector<8x32xf32>
      %c0_486 = arith.constant 0 : index
      %c0_487 = arith.constant 0 : index
      %840 = vector.load %arg9[%c0_486, %c0_487] : memref<8x32xf32, #tpu.memory_space<vmem>>, vector<8x32xf32>
      tpu.vector_store %arg9[%c0_486, %c0_487], %839 {strides = array<i32>} : memref<8x32xf32, #tpu.memory_space<vmem>>, vector<8x32xf32>,
      %c0_488 = arith.constant 0 : index
      %c0_489 = arith.constant 0 : index
      %841 = vector.load %arg4[%c0_488, %c0_489] : memref<8x32xf32, #tpu.memory_space<vmem>>, vector<8x32xf32>
      %c0_490 = arith.constant 0 : index
      %c0_491 = arith.constant 0 : index
      %842 = vector.load %arg10[%c0_490, %c0_491] : memref<8x32xf32, #tpu.memory_space<vmem>>, vector<8x32xf32>
      tpu.vector_store %arg10[%c0_490, %c0_491], %841 {strides = array<i32>} : memref<8x32xf32, #tpu.memory_space<vmem>>, vector<8x32xf32>,
    } else {
    }
    %c0 = arith.constant 0 : index
    %c0_1 = arith.constant 0 : index
    %3 = vector.load %arg5[%c0, %c0_1] : memref<32x128xf32, #tpu.memory_space<vmem>>, vector<32x128xf32>
    %c0_2 = arith.constant 0 : index
    %c0_3 = arith.constant 0 : index
    %4 = vector.load %arg9[%c0_2, %c0_3] : memref<8x32xf32, #tpu.memory_space<vmem>>, vector<8x32xf32>
    %c0_4 = arith.constant 0 : index
    %c0_5 = arith.constant 0 : index
    %5 = vector.load %arg10[%c0_4, %c0_5] : memref<8x32xf32, #tpu.memory_space<vmem>>, vector<8x32xf32>
    %c0_6 = arith.constant 0 : index
    %c0_7 = arith.constant 0 : index
    %c0_8 = arith.constant 0 : index
    %6 = vector.load %arg2[%c0_6, %c0_7, %c0_8] : memref<32x8x128xf32, #tpu.memory_space<vmem>>, vector<1x8x128xf32>
    %7 = vector.shape_cast %6 : vector<1x8x128xf32> to vector<8x128xf32>
    %cst = arith.constant dense<0.000000e+00> : vector<8x128xf32>
    %8 = tpu.matmul %4, %3, %cst {dimension_numbers = #tpu.dot_dimension_numbers<[1], [0], [0], [1], [0, 0, 1, 1], [], []>} : vector<8x32xf32>, vector<32x128xf32>, vector<8x128xf32> -> vector<8x128xf32>
    %9 = arith.addf %7, %8 : vector<8x128xf32>
    %10 = arith.negf %9 : vector<8x128xf32>
    %11 = math.exp %10 : vector<8x128xf32>
    %cst_9 = arith.constant 1.000000e+00 : f32
    %12 = vector.broadcast %cst_9 : f32 to vector<8x128xf32>
    %13 = arith.addf %12, %11 : vector<8x128xf32>
    %14 = arith.divf %12, %13 : vector<8x128xf32>
    %15 = math.tanh %9 : vector<8x128xf32>
    %16 = vector.extract_strided_slice %14 {offsets = [0, 0], sizes = [8, 32], strides = [1, 1]} : vector<8x128xf32> to vector<8x32xf32>
    %17 = vector.extract_strided_slice %14 {offsets = [0, 32], sizes = [8, 32], strides = [1, 1]} : vector<8x128xf32> to vector<8x32xf32>
    %18 = vector.extract_strided_slice %15 {offsets = [0, 64], sizes = [8, 32], strides = [1, 1]} : vector<8x128xf32> to vector<8x32xf32>
    %19 = vector.extract_strided_slice %14 {offsets = [0, 96], sizes = [8, 32], strides = [1, 1]} : vector<8x128xf32> to vector<8x32xf32>
    %20 = arith.mulf %17, %5 : vector<8x32xf32>
    %21 = arith.mulf %16, %18 : vector<8x32xf32>
    %22 = arith.addf %20, %21 : vector<8x32xf32>
    %23 = math.tanh %22 : vector<8x32xf32>
    %24 = arith.mulf %19, %23 : vector<8x32xf32>
    %c0_10 = arith.constant 0 : index
    %c0_11 = arith.constant 0 : index
    %25 = vector.load %arg10[%c0_10, %c0_11] : memref<8x32xf32, #tpu.memory_space<vmem>>, vector<8x32xf32>
    tpu.vector_store %arg10[%c0_10, %c0_11], %22 {strides = array<i32>} : memref<8x32xf32, #tpu.memory_space<vmem>>, vector<8x32xf32>,
    %c0_12 = arith.constant 0 : index
    %c0_13 = arith.constant 0 : index
    %26 = vector.load %arg9[%c0_12, %c0_13] : memref<8x32xf32, #tpu.memory_space<vmem>>, vector<8x32xf32>
    tpu.vector_store %arg9[%c0_12, %c0_13], %24 {strides = array<i32>} : memref<8x32xf32, #tpu.memory_space<vmem>>, vector<8x32xf32>,
    %c0_14 = arith.constant 0 : index
    %c0_15 = arith.constant 0 : index
    %c0_16 = arith.constant 0 : index
    %27 = vector.load %arg6[%c0_14, %c0_15, %c0_16] : memref<32x8x32xf32, #tpu.memory_space<vmem>>, vector<1x8x32xf32>
    %28 = vector.shape_cast %27 : vector<1x8x32xf32> to vector<8x32xf32>
    %29 = vector.shape_cast %24 : vector<8x32xf32> to vector<1x8x32xf32>
    tpu.vector_store %arg6[%c0_14, %c0_15, %c0_16], %29 {strides = array<i32>} : memref<32x8x32xf32, #tpu.memory_space<vmem>>, vector<1x8x32xf32>,
    %c0_17 = arith.constant 0 : index
    %c0_18 = arith.constant 0 : index
    %30 = vector.load %arg9[%c0_17, %c0_18] : memref<8x32xf32, #tpu.memory_space<vmem>>, vector<8x32xf32>
    %c0_19 = arith.constant 0 : index
    %c0_20 = arith.constant 0 : index
    %31 = vector.load %arg10[%c0_19, %c0_20] : memref<8x32xf32, #tpu.memory_space<vmem>>, vector<8x32xf32>
    %c1 = arith.constant 1 : index
    %c0_21 = arith.constant 0 : index
    %c0_22 = arith.constant 0 : index
    %32 = vector.load %arg2[%c1, %c0_21, %c0_22] : memref<32x8x128xf32, #tpu.memory_space<vmem>>, vector<1x8x128xf32>
    %33 = vector.shape_cast %32 : vector<1x8x128xf32> to vector<8x128xf32>
    %cst_23 = arith.constant dense<0.000000e+00> : vector<8x128xf32>
    %34 = tpu.matmul %30, %3, %cst_23 {dimension_numbers = #tpu.dot_dimension_numbers<[1], [0], [0], [1], [0, 0, 1, 1], [], []>} : vector<8x32xf32>, vector<32x128xf32>, vector<8x128xf32> -> vector<8x128xf32>
    %35 = arith.addf %33, %34 : vector<8x128xf32>
    %36 = arith.negf %35 : vector<8x128xf32>
    %37 = math.exp %36 : vector<8x128xf32>
    %cst_24 = arith.constant 1.000000e+00 : f32
    %38 = vector.broadcast %cst_24 : f32 to vector<8x128xf32>
    %39 = arith.addf %38, %37 : vector<8x128xf32>
    %40 = arith.divf %38, %39 : vector<8x128xf32>
    %41 = math.tanh %35 : vector<8x128xf32>
    %42 = vector.extract_strided_slice %40 {offsets = [0, 0], sizes = [8, 32], strides = [1, 1]} : vector<8x128xf32> to vector<8x32xf32>
    %43 = vector.extract_strided_slice %40 {offsets = [0, 32], sizes = [8, 32], strides = [1, 1]} : vector<8x128xf32> to vector<8x32xf32>
    %44 = vector.extract_strided_slice %41 {offsets = [0, 64], sizes = [8, 32], strides = [1, 1]} : vector<8x128xf32> to vector<8x32xf32>
    %45 = vector.extract_strided_slice %40 {offsets = [0, 96], sizes = [8, 32], strides = [1, 1]} : vector<8x128xf32> to vector<8x32xf32>
    %46 = arith.mulf %43, %31 : vector<8x32xf32>
    %47 = arith.mulf %42, %44 : vector<8x32xf32>
    %48 = arith.addf %46, %47 : vector<8x32xf32>
    %49 = math.tanh %48 : vector<8x32xf32>
    %50 = arith.mulf %45, %49 : vector<8x32xf32>
    %c0_25 = arith.constant 0 : index
    %c0_26 = arith.constant 0 : index
    %51 = vector.load %arg10[%c0_25, %c0_26] : memref<8x32xf32, #tpu.memory_space<vmem>>, vector<8x32xf32>
    tpu.vector_store %arg10[%c0_25, %c0_26], %48 {strides = array<i32>} : memref<8x32xf32, #tpu.memory_space<vmem>>, vector<8x32xf32>,
    %c0_27 = arith.constant 0 : index
    %c0_28 = arith.constant 0 : index
    %52 = vector.load %arg9[%c0_27, %c0_28] : memref<8x32xf32, #tpu.memory_space<vmem>>, vector<8x32xf32>
    tpu.vector_store %arg9[%c0_27, %c0_28], %50 {strides = array<i32>} : memref<8x32xf32, #tpu.memory_space<vmem>>, vector<8x32xf32>,
    %c1_29 = arith.constant 1 : index
    %c0_30 = arith.constant 0 : index
    %c0_31 = arith.constant 0 : index
    %53 = vector.load %arg6[%c1_29, %c0_30, %c0_31] : memref<32x8x32xf32, #tpu.memory_space<vmem>>, vector<1x8x32xf32>
    %54 = vector.shape_cast %53 : vector<1x8x32xf32> to vector<8x32xf32>
    %55 = vector.shape_cast %50 : vector<8x32xf32> to vector<1x8x32xf32>
    tpu.vector_store %arg6[%c1_29, %c0_30, %c0_31], %55 {strides = array<i32>} : memref<32x8x32xf32, #tpu.memory_space<vmem>>, vector<1x8x32xf32>,
    %c0_32 = arith.constant 0 : index
    %c0_33 = arith.constant 0 : index
    %56 = vector.load %arg9[%c0_32, %c0_33] : memref<8x32xf32, #tpu.memory_space<vmem>>, vector<8x32xf32>
    %c0_34 = arith.constant 0 : index
    %c0_35 = arith.constant 0 : index
    %57 = vector.load %arg10[%c0_34, %c0_35] : memref<8x32xf32, #tpu.memory_space<vmem>>, vector<8x32xf32>
    %c2 = arith.constant 2 : index
    %c0_36 = arith.constant 0 : index
    %c0_37 = arith.constant 0 : index
    %58 = vector.load %arg2[%c2, %c0_36, %c0_37] : memref<32x8x128xf32, #tpu.memory_space<vmem>>, vector<1x8x128xf32>
    %59 = vector.shape_cast %58 : vector<1x8x128xf32> to vector<8x128xf32>
    %cst_38 = arith.constant dense<0.000000e+00> : vector<8x128xf32>
    %60 = tpu.matmul %56, %3, %cst_38 {dimension_numbers = #tpu.dot_dimension_numbers<[1], [0], [0], [1], [0, 0, 1, 1], [], []>} : vector<8x32xf32>, vector<32x128xf32>, vector<8x128xf32> -> vector<8x128xf32>
    %61 = arith.addf %59, %60 : vector<8x128xf32>
    %62 = arith.negf %61 : vector<8x128xf32>
    %63 = math.exp %62 : vector<8x128xf32>
    %cst_39 = arith.constant 1.000000e+00 : f32
    %64 = vector.broadcast %cst_39 : f32 to vector<8x128xf32>
    %65 = arith.addf %64, %63 : vector<8x128xf32>
    %66 = arith.divf %64, %65 : vector<8x128xf32>
    %67 = math.tanh %61 : vector<8x128xf32>
    %68 = vector.extract_strided_slice %66 {offsets = [0, 0], sizes = [8, 32], strides = [1, 1]} : vector<8x128xf32> to vector<8x32xf32>
    %69 = vector.extract_strided_slice %66 {offsets = [0, 32], sizes = [8, 32], strides = [1, 1]} : vector<8x128xf32> to vector<8x32xf32>
    %70 = vector.extract_strided_slice %67 {offsets = [0, 64], sizes = [8, 32], strides = [1, 1]} : vector<8x128xf32> to vector<8x32xf32>
    %71 = vector.extract_strided_slice %66 {offsets = [0, 96], sizes = [8, 32], strides = [1, 1]} : vector<8x128xf32> to vector<8x32xf32>
    %72 = arith.mulf %69, %57 : vector<8x32xf32>
    %73 = arith.mulf %68, %70 : vector<8x32xf32>
    %74 = arith.addf %72, %73 : vector<8x32xf32>
    %75 = math.tanh %74 : vector<8x32xf32>
    %76 = arith.mulf %71, %75 : vector<8x32xf32>
    %c0_40 = arith.constant 0 : index
    %c0_41 = arith.constant 0 : index
    %77 = vector.load %arg10[%c0_40, %c0_41] : memref<8x32xf32, #tpu.memory_space<vmem>>, vector<8x32xf32>
    tpu.vector_store %arg10[%c0_40, %c0_41], %74 {strides = array<i32>} : memref<8x32xf32, #tpu.memory_space<vmem>>, vector<8x32xf32>,
    %c0_42 = arith.constant 0 : index
    %c0_43 = arith.constant 0 : index
    %78 = vector.load %arg9[%c0_42, %c0_43] : memref<8x32xf32, #tpu.memory_space<vmem>>, vector<8x32xf32>
    tpu.vector_store %arg9[%c0_42, %c0_43], %76 {strides = array<i32>} : memref<8x32xf32, #tpu.memory_space<vmem>>, vector<8x32xf32>,
    %c2_44 = arith.constant 2 : index
    %c0_45 = arith.constant 0 : index
    %c0_46 = arith.constant 0 : index
    %79 = vector.load %arg6[%c2_44, %c0_45, %c0_46] : memref<32x8x32xf32, #tpu.memory_space<vmem>>, vector<1x8x32xf32>
    %80 = vector.shape_cast %79 : vector<1x8x32xf32> to vector<8x32xf32>
    %81 = vector.shape_cast %76 : vector<8x32xf32> to vector<1x8x32xf32>
    tpu.vector_store %arg6[%c2_44, %c0_45, %c0_46], %81 {strides = array<i32>} : memref<32x8x32xf32, #tpu.memory_space<vmem>>, vector<1x8x32xf32>,
    %c0_47 = arith.constant 0 : index
    %c0_48 = arith.constant 0 : index
    %82 = vector.load %arg9[%c0_47, %c0_48] : memref<8x32xf32, #tpu.memory_space<vmem>>, vector<8x32xf32>
    %c0_49 = arith.constant 0 : index
    %c0_50 = arith.constant 0 : index
    %83 = vector.load %arg10[%c0_49, %c0_50] : memref<8x32xf32, #tpu.memory_space<vmem>>, vector<8x32xf32>
    %c3 = arith.constant 3 : index
    %c0_51 = arith.constant 0 : index
    %c0_52 = arith.constant 0 : index
    %84 = vector.load %arg2[%c3, %c0_51, %c0_52] : memref<32x8x128xf32, #tpu.memory_space<vmem>>, vector<1x8x128xf32>
    %85 = vector.shape_cast %84 : vector<1x8x128xf32> to vector<8x128xf32>
    %cst_53 = arith.constant dense<0.000000e+00> : vector<8x128xf32>
    %86 = tpu.matmul %82, %3, %cst_53 {dimension_numbers = #tpu.dot_dimension_numbers<[1], [0], [0], [1], [0, 0, 1, 1], [], []>} : vector<8x32xf32>, vector<32x128xf32>, vector<8x128xf32> -> vector<8x128xf32>
    %87 = arith.addf %85, %86 : vector<8x128xf32>
    %88 = arith.negf %87 : vector<8x128xf32>
    %89 = math.exp %88 : vector<8x128xf32>
    %cst_54 = arith.constant 1.000000e+00 : f32
    %90 = vector.broadcast %cst_54 : f32 to vector<8x128xf32>
    %91 = arith.addf %90, %89 : vector<8x128xf32>
    %92 = arith.divf %90, %91 : vector<8x128xf32>
    %93 = math.tanh %87 : vector<8x128xf32>
    %94 = vector.extract_strided_slice %92 {offsets = [0, 0], sizes = [8, 32], strides = [1, 1]} : vector<8x128xf32> to vector<8x32xf32>
    %95 = vector.extract_strided_slice %92 {offsets = [0, 32], sizes = [8, 32], strides = [1, 1]} : vector<8x128xf32> to vector<8x32xf32>
    %96 = vector.extract_strided_slice %93 {offsets = [0, 64], sizes = [8, 32], strides = [1, 1]} : vector<8x128xf32> to vector<8x32xf32>
    %97 = vector.extract_strided_slice %92 {offsets = [0, 96], sizes = [8, 32], strides = [1, 1]} : vector<8x128xf32> to vector<8x32xf32>
    %98 = arith.mulf %95, %83 : vector<8x32xf32>
    %99 = arith.mulf %94, %96 : vector<8x32xf32>
    %100 = arith.addf %98, %99 : vector<8x32xf32>
    %101 = math.tanh %100 : vector<8x32xf32>
    %102 = arith.mulf %97, %101 : vector<8x32xf32>
    %c0_55 = arith.constant 0 : index
    %c0_56 = arith.constant 0 : index
    %103 = vector.load %arg10[%c0_55, %c0_56] : memref<8x32xf32, #tpu.memory_space<vmem>>, vector<8x32xf32>
    tpu.vector_store %arg10[%c0_55, %c0_56], %100 {strides = array<i32>} : memref<8x32xf32, #tpu.memory_space<vmem>>, vector<8x32xf32>,
    %c0_57 = arith.constant 0 : index
    %c0_58 = arith.constant 0 : index
    %104 = vector.load %arg9[%c0_57, %c0_58] : memref<8x32xf32, #tpu.memory_space<vmem>>, vector<8x32xf32>
    tpu.vector_store %arg9[%c0_57, %c0_58], %102 {strides = array<i32>} : memref<8x32xf32, #tpu.memory_space<vmem>>, vector<8x32xf32>,
    %c3_59 = arith.constant 3 : index
    %c0_60 = arith.constant 0 : index
    %c0_61 = arith.constant 0 : index
    %105 = vector.load %arg6[%c3_59, %c0_60, %c0_61] : memref<32x8x32xf32, #tpu.memory_space<vmem>>, vector<1x8x32xf32>
    %106 = vector.shape_cast %105 : vector<1x8x32xf32> to vector<8x32xf32>
    %107 = vector.shape_cast %102 : vector<8x32xf32> to vector<1x8x32xf32>
    tpu.vector_store %arg6[%c3_59, %c0_60, %c0_61], %107 {strides = array<i32>} : memref<32x8x32xf32, #tpu.memory_space<vmem>>, vector<1x8x32xf32>,
    %c0_62 = arith.constant 0 : index
    %c0_63 = arith.constant 0 : index
    %108 = vector.load %arg9[%c0_62, %c0_63] : memref<8x32xf32, #tpu.memory_space<vmem>>, vector<8x32xf32>
    %c0_64 = arith.constant 0 : index
    %c0_65 = arith.constant 0 : index
    %109 = vector.load %arg10[%c0_64, %c0_65] : memref<8x32xf32, #tpu.memory_space<vmem>>, vector<8x32xf32>
    %c4 = arith.constant 4 : index
    %c0_66 = arith.constant 0 : index
    %c0_67 = arith.constant 0 : index
    %110 = vector.load %arg2[%c4, %c0_66, %c0_67] : memref<32x8x128xf32, #tpu.memory_space<vmem>>, vector<1x8x128xf32>
    %111 = vector.shape_cast %110 : vector<1x8x128xf32> to vector<8x128xf32>
    %cst_68 = arith.constant dense<0.000000e+00> : vector<8x128xf32>
    %112 = tpu.matmul %108, %3, %cst_68 {dimension_numbers = #tpu.dot_dimension_numbers<[1], [0], [0], [1], [0, 0, 1, 1], [], []>} : vector<8x32xf32>, vector<32x128xf32>, vector<8x128xf32> -> vector<8x128xf32>
    %113 = arith.addf %111, %112 : vector<8x128xf32>
    %114 = arith.negf %113 : vector<8x128xf32>
    %115 = math.exp %114 : vector<8x128xf32>
    %cst_69 = arith.constant 1.000000e+00 : f32
    %116 = vector.broadcast %cst_69 : f32 to vector<8x128xf32>
    %117 = arith.addf %116, %115 : vector<8x128xf32>
    %118 = arith.divf %116, %117 : vector<8x128xf32>
    %119 = math.tanh %113 : vector<8x128xf32>
    %120 = vector.extract_strided_slice %118 {offsets = [0, 0], sizes = [8, 32], strides = [1, 1]} : vector<8x128xf32> to vector<8x32xf32>
    %121 = vector.extract_strided_slice %118 {offsets = [0, 32], sizes = [8, 32], strides = [1, 1]} : vector<8x128xf32> to vector<8x32xf32>
    %122 = vector.extract_strided_slice %119 {offsets = [0, 64], sizes = [8, 32], strides = [1, 1]} : vector<8x128xf32> to vector<8x32xf32>
    %123 = vector.extract_strided_slice %118 {offsets = [0, 96], sizes = [8, 32], strides = [1, 1]} : vector<8x128xf32> to vector<8x32xf32>
    %124 = arith.mulf %121, %109 : vector<8x32xf32>
    %125 = arith.mulf %120, %122 : vector<8x32xf32>
    %126 = arith.addf %124, %125 : vector<8x32xf32>
    %127 = math.tanh %126 : vector<8x32xf32>
    %128 = arith.mulf %123, %127 : vector<8x32xf32>
    %c0_70 = arith.constant 0 : index
    %c0_71 = arith.constant 0 : index
    %129 = vector.load %arg10[%c0_70, %c0_71] : memref<8x32xf32, #tpu.memory_space<vmem>>, vector<8x32xf32>
    tpu.vector_store %arg10[%c0_70, %c0_71], %126 {strides = array<i32>} : memref<8x32xf32, #tpu.memory_space<vmem>>, vector<8x32xf32>,
    %c0_72 = arith.constant 0 : index
    %c0_73 = arith.constant 0 : index
    %130 = vector.load %arg9[%c0_72, %c0_73] : memref<8x32xf32, #tpu.memory_space<vmem>>, vector<8x32xf32>
    tpu.vector_store %arg9[%c0_72, %c0_73], %128 {strides = array<i32>} : memref<8x32xf32, #tpu.memory_space<vmem>>, vector<8x32xf32>,
    %c4_74 = arith.constant 4 : index
    %c0_75 = arith.constant 0 : index
    %c0_76 = arith.constant 0 : index
    %131 = vector.load %arg6[%c4_74, %c0_75, %c0_76] : memref<32x8x32xf32, #tpu.memory_space<vmem>>, vector<1x8x32xf32>
    %132 = vector.shape_cast %131 : vector<1x8x32xf32> to vector<8x32xf32>
    %133 = vector.shape_cast %128 : vector<8x32xf32> to vector<1x8x32xf32>
    tpu.vector_store %arg6[%c4_74, %c0_75, %c0_76], %133 {strides = array<i32>} : memref<32x8x32xf32, #tpu.memory_space<vmem>>, vector<1x8x32xf32>,
    %c0_77 = arith.constant 0 : index
    %c0_78 = arith.constant 0 : index
    %134 = vector.load %arg9[%c0_77, %c0_78] : memref<8x32xf32, #tpu.memory_space<vmem>>, vector<8x32xf32>
    %c0_79 = arith.constant 0 : index
    %c0_80 = arith.constant 0 : index
    %135 = vector.load %arg10[%c0_79, %c0_80] : memref<8x32xf32, #tpu.memory_space<vmem>>, vector<8x32xf32>
    %c5 = arith.constant 5 : index
    %c0_81 = arith.constant 0 : index
    %c0_82 = arith.constant 0 : index
    %136 = vector.load %arg2[%c5, %c0_81, %c0_82] : memref<32x8x128xf32, #tpu.memory_space<vmem>>, vector<1x8x128xf32>
    %137 = vector.shape_cast %136 : vector<1x8x128xf32> to vector<8x128xf32>
    %cst_83 = arith.constant dense<0.000000e+00> : vector<8x128xf32>
    %138 = tpu.matmul %134, %3, %cst_83 {dimension_numbers = #tpu.dot_dimension_numbers<[1], [0], [0], [1], [0, 0, 1, 1], [], []>} : vector<8x32xf32>, vector<32x128xf32>, vector<8x128xf32> -> vector<8x128xf32>
    %139 = arith.addf %137, %138 : vector<8x128xf32>
    %140 = arith.negf %139 : vector<8x128xf32>
    %141 = math.exp %140 : vector<8x128xf32>
    %cst_84 = arith.constant 1.000000e+00 : f32
    %142 = vector.broadcast %cst_84 : f32 to vector<8x128xf32>
    %143 = arith.addf %142, %141 : vector<8x128xf32>
    %144 = arith.divf %142, %143 : vector<8x128xf32>
    %145 = math.tanh %139 : vector<8x128xf32>
    %146 = vector.extract_strided_slice %144 {offsets = [0, 0], sizes = [8, 32], strides = [1, 1]} : vector<8x128xf32> to vector<8x32xf32>
    %147 = vector.extract_strided_slice %144 {offsets = [0, 32], sizes = [8, 32], strides = [1, 1]} : vector<8x128xf32> to vector<8x32xf32>
    %148 = vector.extract_strided_slice %145 {offsets = [0, 64], sizes = [8, 32], strides = [1, 1]} : vector<8x128xf32> to vector<8x32xf32>
    %149 = vector.extract_strided_slice %144 {offsets = [0, 96], sizes = [8, 32], strides = [1, 1]} : vector<8x128xf32> to vector<8x32xf32>
    %150 = arith.mulf %147, %135 : vector<8x32xf32>
    %151 = arith.mulf %146, %148 : vector<8x32xf32>
    %152 = arith.addf %150, %151 : vector<8x32xf32>
    %153 = math.tanh %152 : vector<8x32xf32>
    %154 = arith.mulf %149, %153 : vector<8x32xf32>
    %c0_85 = arith.constant 0 : index
    %c0_86 = arith.constant 0 : index
    %155 = vector.load %arg10[%c0_85, %c0_86] : memref<8x32xf32, #tpu.memory_space<vmem>>, vector<8x32xf32>
    tpu.vector_store %arg10[%c0_85, %c0_86], %152 {strides = array<i32>} : memref<8x32xf32, #tpu.memory_space<vmem>>, vector<8x32xf32>,
    %c0_87 = arith.constant 0 : index
    %c0_88 = arith.constant 0 : index
    %156 = vector.load %arg9[%c0_87, %c0_88] : memref<8x32xf32, #tpu.memory_space<vmem>>, vector<8x32xf32>
    tpu.vector_store %arg9[%c0_87, %c0_88], %154 {strides = array<i32>} : memref<8x32xf32, #tpu.memory_space<vmem>>, vector<8x32xf32>,
    %c5_89 = arith.constant 5 : index
    %c0_90 = arith.constant 0 : index
    %c0_91 = arith.constant 0 : index
    %157 = vector.load %arg6[%c5_89, %c0_90, %c0_91] : memref<32x8x32xf32, #tpu.memory_space<vmem>>, vector<1x8x32xf32>
    %158 = vector.shape_cast %157 : vector<1x8x32xf32> to vector<8x32xf32>
    %159 = vector.shape_cast %154 : vector<8x32xf32> to vector<1x8x32xf32>
    tpu.vector_store %arg6[%c5_89, %c0_90, %c0_91], %159 {strides = array<i32>} : memref<32x8x32xf32, #tpu.memory_space<vmem>>, vector<1x8x32xf32>,
    %c0_92 = arith.constant 0 : index
    %c0_93 = arith.constant 0 : index
    %160 = vector.load %arg9[%c0_92, %c0_93] : memref<8x32xf32, #tpu.memory_space<vmem>>, vector<8x32xf32>
    %c0_94 = arith.constant 0 : index
    %c0_95 = arith.constant 0 : index
    %161 = vector.load %arg10[%c0_94, %c0_95] : memref<8x32xf32, #tpu.memory_space<vmem>>, vector<8x32xf32>
    %c6 = arith.constant 6 : index
    %c0_96 = arith.constant 0 : index
    %c0_97 = arith.constant 0 : index
    %162 = vector.load %arg2[%c6, %c0_96, %c0_97] : memref<32x8x128xf32, #tpu.memory_space<vmem>>, vector<1x8x128xf32>
    %163 = vector.shape_cast %162 : vector<1x8x128xf32> to vector<8x128xf32>
    %cst_98 = arith.constant dense<0.000000e+00> : vector<8x128xf32>
    %164 = tpu.matmul %160, %3, %cst_98 {dimension_numbers = #tpu.dot_dimension_numbers<[1], [0], [0], [1], [0, 0, 1, 1], [], []>} : vector<8x32xf32>, vector<32x128xf32>, vector<8x128xf32> -> vector<8x128xf32>
    %165 = arith.addf %163, %164 : vector<8x128xf32>
    %166 = arith.negf %165 : vector<8x128xf32>
    %167 = math.exp %166 : vector<8x128xf32>
    %cst_99 = arith.constant 1.000000e+00 : f32
    %168 = vector.broadcast %cst_99 : f32 to vector<8x128xf32>
    %169 = arith.addf %168, %167 : vector<8x128xf32>
    %170 = arith.divf %168, %169 : vector<8x128xf32>
    %171 = math.tanh %165 : vector<8x128xf32>
    %172 = vector.extract_strided_slice %170 {offsets = [0, 0], sizes = [8, 32], strides = [1, 1]} : vector<8x128xf32> to vector<8x32xf32>
    %173 = vector.extract_strided_slice %170 {offsets = [0, 32], sizes = [8, 32], strides = [1, 1]} : vector<8x128xf32> to vector<8x32xf32>
    %174 = vector.extract_strided_slice %171 {offsets = [0, 64], sizes = [8, 32], strides = [1, 1]} : vector<8x128xf32> to vector<8x32xf32>
    %175 = vector.extract_strided_slice %170 {offsets = [0, 96], sizes = [8, 32], strides = [1, 1]} : vector<8x128xf32> to vector<8x32xf32>
    %176 = arith.mulf %173, %161 : vector<8x32xf32>
    %177 = arith.mulf %172, %174 : vector<8x32xf32>
    %178 = arith.addf %176, %177 : vector<8x32xf32>
    %179 = math.tanh %178 : vector<8x32xf32>
    %180 = arith.mulf %175, %179 : vector<8x32xf32>
    %c0_100 = arith.constant 0 : index
    %c0_101 = arith.constant 0 : index
    %181 = vector.load %arg10[%c0_100, %c0_101] : memref<8x32xf32, #tpu.memory_space<vmem>>, vector<8x32xf32>
    tpu.vector_store %arg10[%c0_100, %c0_101], %178 {strides = array<i32>} : memref<8x32xf32, #tpu.memory_space<vmem>>, vector<8x32xf32>,
    %c0_102 = arith.constant 0 : index
    %c0_103 = arith.constant 0 : index
    %182 = vector.load %arg9[%c0_102, %c0_103] : memref<8x32xf32, #tpu.memory_space<vmem>>, vector<8x32xf32>
    tpu.vector_store %arg9[%c0_102, %c0_103], %180 {strides = array<i32>} : memref<8x32xf32, #tpu.memory_space<vmem>>, vector<8x32xf32>,
    %c6_104 = arith.constant 6 : index
    %c0_105 = arith.constant 0 : index
    %c0_106 = arith.constant 0 : index
    %183 = vector.load %arg6[%c6_104, %c0_105, %c0_106] : memref<32x8x32xf32, #tpu.memory_space<vmem>>, vector<1x8x32xf32>
    %184 = vector.shape_cast %183 : vector<1x8x32xf32> to vector<8x32xf32>
    %185 = vector.shape_cast %180 : vector<8x32xf32> to vector<1x8x32xf32>
    tpu.vector_store %arg6[%c6_104, %c0_105, %c0_106], %185 {strides = array<i32>} : memref<32x8x32xf32, #tpu.memory_space<vmem>>, vector<1x8x32xf32>,
    %c0_107 = arith.constant 0 : index
    %c0_108 = arith.constant 0 : index
    %186 = vector.load %arg9[%c0_107, %c0_108] : memref<8x32xf32, #tpu.memory_space<vmem>>, vector<8x32xf32>
    %c0_109 = arith.constant 0 : index
    %c0_110 = arith.constant 0 : index
    %187 = vector.load %arg10[%c0_109, %c0_110] : memref<8x32xf32, #tpu.memory_space<vmem>>, vector<8x32xf32>
    %c7 = arith.constant 7 : index
    %c0_111 = arith.constant 0 : index
    %c0_112 = arith.constant 0 : index
    %188 = vector.load %arg2[%c7, %c0_111, %c0_112] : memref<32x8x128xf32, #tpu.memory_space<vmem>>, vector<1x8x128xf32>
    %189 = vector.shape_cast %188 : vector<1x8x128xf32> to vector<8x128xf32>
    %cst_113 = arith.constant dense<0.000000e+00> : vector<8x128xf32>
    %190 = tpu.matmul %186, %3, %cst_113 {dimension_numbers = #tpu.dot_dimension_numbers<[1], [0], [0], [1], [0, 0, 1, 1], [], []>} : vector<8x32xf32>, vector<32x128xf32>, vector<8x128xf32> -> vector<8x128xf32>
    %191 = arith.addf %189, %190 : vector<8x128xf32>
    %192 = arith.negf %191 : vector<8x128xf32>
    %193 = math.exp %192 : vector<8x128xf32>
    %cst_114 = arith.constant 1.000000e+00 : f32
    %194 = vector.broadcast %cst_114 : f32 to vector<8x128xf32>
    %195 = arith.addf %194, %193 : vector<8x128xf32>
    %196 = arith.divf %194, %195 : vector<8x128xf32>
    %197 = math.tanh %191 : vector<8x128xf32>
    %198 = vector.extract_strided_slice %196 {offsets = [0, 0], sizes = [8, 32], strides = [1, 1]} : vector<8x128xf32> to vector<8x32xf32>
    %199 = vector.extract_strided_slice %196 {offsets = [0, 32], sizes = [8, 32], strides = [1, 1]} : vector<8x128xf32> to vector<8x32xf32>
    %200 = vector.extract_strided_slice %197 {offsets = [0, 64], sizes = [8, 32], strides = [1, 1]} : vector<8x128xf32> to vector<8x32xf32>
    %201 = vector.extract_strided_slice %196 {offsets = [0, 96], sizes = [8, 32], strides = [1, 1]} : vector<8x128xf32> to vector<8x32xf32>
    %202 = arith.mulf %199, %187 : vector<8x32xf32>
    %203 = arith.mulf %198, %200 : vector<8x32xf32>
    %204 = arith.addf %202, %203 : vector<8x32xf32>
    %205 = math.tanh %204 : vector<8x32xf32>
    %206 = arith.mulf %201, %205 : vector<8x32xf32>
    %c0_115 = arith.constant 0 : index
    %c0_116 = arith.constant 0 : index
    %207 = vector.load %arg10[%c0_115, %c0_116] : memref<8x32xf32, #tpu.memory_space<vmem>>, vector<8x32xf32>
    tpu.vector_store %arg10[%c0_115, %c0_116], %204 {strides = array<i32>} : memref<8x32xf32, #tpu.memory_space<vmem>>, vector<8x32xf32>,
    %c0_117 = arith.constant 0 : index
    %c0_118 = arith.constant 0 : index
    %208 = vector.load %arg9[%c0_117, %c0_118] : memref<8x32xf32, #tpu.memory_space<vmem>>, vector<8x32xf32>
    tpu.vector_store %arg9[%c0_117, %c0_118], %206 {strides = array<i32>} : memref<8x32xf32, #tpu.memory_space<vmem>>, vector<8x32xf32>,
    %c7_119 = arith.constant 7 : index
    %c0_120 = arith.constant 0 : index
    %c0_121 = arith.constant 0 : index
    %209 = vector.load %arg6[%c7_119, %c0_120, %c0_121] : memref<32x8x32xf32, #tpu.memory_space<vmem>>, vector<1x8x32xf32>
    %210 = vector.shape_cast %209 : vector<1x8x32xf32> to vector<8x32xf32>
    %211 = vector.shape_cast %206 : vector<8x32xf32> to vector<1x8x32xf32>
    tpu.vector_store %arg6[%c7_119, %c0_120, %c0_121], %211 {strides = array<i32>} : memref<32x8x32xf32, #tpu.memory_space<vmem>>, vector<1x8x32xf32>,
    %c0_122 = arith.constant 0 : index
    %c0_123 = arith.constant 0 : index
    %212 = vector.load %arg9[%c0_122, %c0_123] : memref<8x32xf32, #tpu.memory_space<vmem>>, vector<8x32xf32>
    %c0_124 = arith.constant 0 : index
    %c0_125 = arith.constant 0 : index
    %213 = vector.load %arg10[%c0_124, %c0_125] : memref<8x32xf32, #tpu.memory_space<vmem>>, vector<8x32xf32>
    %c8 = arith.constant 8 : index
    %c0_126 = arith.constant 0 : index
    %c0_127 = arith.constant 0 : index
    %214 = vector.load %arg2[%c8, %c0_126, %c0_127] : memref<32x8x128xf32, #tpu.memory_space<vmem>>, vector<1x8x128xf32>
    %215 = vector.shape_cast %214 : vector<1x8x128xf32> to vector<8x128xf32>
    %cst_128 = arith.constant dense<0.000000e+00> : vector<8x128xf32>
    %216 = tpu.matmul %212, %3, %cst_128 {dimension_numbers = #tpu.dot_dimension_numbers<[1], [0], [0], [1], [0, 0, 1, 1], [], []>} : vector<8x32xf32>, vector<32x128xf32>, vector<8x128xf32> -> vector<8x128xf32>
    %217 = arith.addf %215, %216 : vector<8x128xf32>
    %218 = arith.negf %217 : vector<8x128xf32>
    %219 = math.exp %218 : vector<8x128xf32>
    %cst_129 = arith.constant 1.000000e+00 : f32
    %220 = vector.broadcast %cst_129 : f32 to vector<8x128xf32>
    %221 = arith.addf %220, %219 : vector<8x128xf32>
    %222 = arith.divf %220, %221 : vector<8x128xf32>
    %223 = math.tanh %217 : vector<8x128xf32>
    %224 = vector.extract_strided_slice %222 {offsets = [0, 0], sizes = [8, 32], strides = [1, 1]} : vector<8x128xf32> to vector<8x32xf32>
    %225 = vector.extract_strided_slice %222 {offsets = [0, 32], sizes = [8, 32], strides = [1, 1]} : vector<8x128xf32> to vector<8x32xf32>
    %226 = vector.extract_strided_slice %223 {offsets = [0, 64], sizes = [8, 32], strides = [1, 1]} : vector<8x128xf32> to vector<8x32xf32>
    %227 = vector.extract_strided_slice %222 {offsets = [0, 96], sizes = [8, 32], strides = [1, 1]} : vector<8x128xf32> to vector<8x32xf32>
    %228 = arith.mulf %225, %213 : vector<8x32xf32>
    %229 = arith.mulf %224, %226 : vector<8x32xf32>
    %230 = arith.addf %228, %229 : vector<8x32xf32>
    %231 = math.tanh %230 : vector<8x32xf32>
    %232 = arith.mulf %227, %231 : vector<8x32xf32>
    %c0_130 = arith.constant 0 : index
    %c0_131 = arith.constant 0 : index
    %233 = vector.load %arg10[%c0_130, %c0_131] : memref<8x32xf32, #tpu.memory_space<vmem>>, vector<8x32xf32>
    tpu.vector_store %arg10[%c0_130, %c0_131], %230 {strides = array<i32>} : memref<8x32xf32, #tpu.memory_space<vmem>>, vector<8x32xf32>,
    %c0_132 = arith.constant 0 : index
    %c0_133 = arith.constant 0 : index
    %234 = vector.load %arg9[%c0_132, %c0_133] : memref<8x32xf32, #tpu.memory_space<vmem>>, vector<8x32xf32>
    tpu.vector_store %arg9[%c0_132, %c0_133], %232 {strides = array<i32>} : memref<8x32xf32, #tpu.memory_space<vmem>>, vector<8x32xf32>,
    %c8_134 = arith.constant 8 : index
    %c0_135 = arith.constant 0 : index
    %c0_136 = arith.constant 0 : index
    %235 = vector.load %arg6[%c8_134, %c0_135, %c0_136] : memref<32x8x32xf32, #tpu.memory_space<vmem>>, vector<1x8x32xf32>
    %236 = vector.shape_cast %235 : vector<1x8x32xf32> to vector<8x32xf32>
    %237 = vector.shape_cast %232 : vector<8x32xf32> to vector<1x8x32xf32>
    tpu.vector_store %arg6[%c8_134, %c0_135, %c0_136], %237 {strides = array<i32>} : memref<32x8x32xf32, #tpu.memory_space<vmem>>, vector<1x8x32xf32>,
    %c0_137 = arith.constant 0 : index
    %c0_138 = arith.constant 0 : index
    %238 = vector.load %arg9[%c0_137, %c0_138] : memref<8x32xf32, #tpu.memory_space<vmem>>, vector<8x32xf32>
    %c0_139 = arith.constant 0 : index
    %c0_140 = arith.constant 0 : index
    %239 = vector.load %arg10[%c0_139, %c0_140] : memref<8x32xf32, #tpu.memory_space<vmem>>, vector<8x32xf32>
    %c9 = arith.constant 9 : index
    %c0_141 = arith.constant 0 : index
    %c0_142 = arith.constant 0 : index
    %240 = vector.load %arg2[%c9, %c0_141, %c0_142] : memref<32x8x128xf32, #tpu.memory_space<vmem>>, vector<1x8x128xf32>
    %241 = vector.shape_cast %240 : vector<1x8x128xf32> to vector<8x128xf32>
    %cst_143 = arith.constant dense<0.000000e+00> : vector<8x128xf32>
    %242 = tpu.matmul %238, %3, %cst_143 {dimension_numbers = #tpu.dot_dimension_numbers<[1], [0], [0], [1], [0, 0, 1, 1], [], []>} : vector<8x32xf32>, vector<32x128xf32>, vector<8x128xf32> -> vector<8x128xf32>
    %243 = arith.addf %241, %242 : vector<8x128xf32>
    %244 = arith.negf %243 : vector<8x128xf32>
    %245 = math.exp %244 : vector<8x128xf32>
    %cst_144 = arith.constant 1.000000e+00 : f32
    %246 = vector.broadcast %cst_144 : f32 to vector<8x128xf32>
    %247 = arith.addf %246, %245 : vector<8x128xf32>
    %248 = arith.divf %246, %247 : vector<8x128xf32>
    %249 = math.tanh %243 : vector<8x128xf32>
    %250 = vector.extract_strided_slice %248 {offsets = [0, 0], sizes = [8, 32], strides = [1, 1]} : vector<8x128xf32> to vector<8x32xf32>
    %251 = vector.extract_strided_slice %248 {offsets = [0, 32], sizes = [8, 32], strides = [1, 1]} : vector<8x128xf32> to vector<8x32xf32>
    %252 = vector.extract_strided_slice %249 {offsets = [0, 64], sizes = [8, 32], strides = [1, 1]} : vector<8x128xf32> to vector<8x32xf32>
    %253 = vector.extract_strided_slice %248 {offsets = [0, 96], sizes = [8, 32], strides = [1, 1]} : vector<8x128xf32> to vector<8x32xf32>
    %254 = arith.mulf %251, %239 : vector<8x32xf32>
    %255 = arith.mulf %250, %252 : vector<8x32xf32>
    %256 = arith.addf %254, %255 : vector<8x32xf32>
    %257 = math.tanh %256 : vector<8x32xf32>
    %258 = arith.mulf %253, %257 : vector<8x32xf32>
    %c0_145 = arith.constant 0 : index
    %c0_146 = arith.constant 0 : index
    %259 = vector.load %arg10[%c0_145, %c0_146] : memref<8x32xf32, #tpu.memory_space<vmem>>, vector<8x32xf32>
    tpu.vector_store %arg10[%c0_145, %c0_146], %256 {strides = array<i32>} : memref<8x32xf32, #tpu.memory_space<vmem>>, vector<8x32xf32>,
    %c0_147 = arith.constant 0 : index
    %c0_148 = arith.constant 0 : index
    %260 = vector.load %arg9[%c0_147, %c0_148] : memref<8x32xf32, #tpu.memory_space<vmem>>, vector<8x32xf32>
    tpu.vector_store %arg9[%c0_147, %c0_148], %258 {strides = array<i32>} : memref<8x32xf32, #tpu.memory_space<vmem>>, vector<8x32xf32>,
    %c9_149 = arith.constant 9 : index
    %c0_150 = arith.constant 0 : index
    %c0_151 = arith.constant 0 : index
    %261 = vector.load %arg6[%c9_149, %c0_150, %c0_151] : memref<32x8x32xf32, #tpu.memory_space<vmem>>, vector<1x8x32xf32>
    %262 = vector.shape_cast %261 : vector<1x8x32xf32> to vector<8x32xf32>
    %263 = vector.shape_cast %258 : vector<8x32xf32> to vector<1x8x32xf32>
    tpu.vector_store %arg6[%c9_149, %c0_150, %c0_151], %263 {strides = array<i32>} : memref<32x8x32xf32, #tpu.memory_space<vmem>>, vector<1x8x32xf32>,
    %c0_152 = arith.constant 0 : index
    %c0_153 = arith.constant 0 : index
    %264 = vector.load %arg9[%c0_152, %c0_153] : memref<8x32xf32, #tpu.memory_space<vmem>>, vector<8x32xf32>
    %c0_154 = arith.constant 0 : index
    %c0_155 = arith.constant 0 : index
    %265 = vector.load %arg10[%c0_154, %c0_155] : memref<8x32xf32, #tpu.memory_space<vmem>>, vector<8x32xf32>
    %c10 = arith.constant 10 : index
    %c0_156 = arith.constant 0 : index
    %c0_157 = arith.constant 0 : index
    %266 = vector.load %arg2[%c10, %c0_156, %c0_157] : memref<32x8x128xf32, #tpu.memory_space<vmem>>, vector<1x8x128xf32>
    %267 = vector.shape_cast %266 : vector<1x8x128xf32> to vector<8x128xf32>
    %cst_158 = arith.constant dense<0.000000e+00> : vector<8x128xf32>
    %268 = tpu.matmul %264, %3, %cst_158 {dimension_numbers = #tpu.dot_dimension_numbers<[1], [0], [0], [1], [0, 0, 1, 1], [], []>} : vector<8x32xf32>, vector<32x128xf32>, vector<8x128xf32> -> vector<8x128xf32>
    %269 = arith.addf %267, %268 : vector<8x128xf32>
    %270 = arith.negf %269 : vector<8x128xf32>
    %271 = math.exp %270 : vector<8x128xf32>
    %cst_159 = arith.constant 1.000000e+00 : f32
    %272 = vector.broadcast %cst_159 : f32 to vector<8x128xf32>
    %273 = arith.addf %272, %271 : vector<8x128xf32>
    %274 = arith.divf %272, %273 : vector<8x128xf32>
    %275 = math.tanh %269 : vector<8x128xf32>
    %276 = vector.extract_strided_slice %274 {offsets = [0, 0], sizes = [8, 32], strides = [1, 1]} : vector<8x128xf32> to vector<8x32xf32>
    %277 = vector.extract_strided_slice %274 {offsets = [0, 32], sizes = [8, 32], strides = [1, 1]} : vector<8x128xf32> to vector<8x32xf32>
    %278 = vector.extract_strided_slice %275 {offsets = [0, 64], sizes = [8, 32], strides = [1, 1]} : vector<8x128xf32> to vector<8x32xf32>
    %279 = vector.extract_strided_slice %274 {offsets = [0, 96], sizes = [8, 32], strides = [1, 1]} : vector<8x128xf32> to vector<8x32xf32>
    %280 = arith.mulf %277, %265 : vector<8x32xf32>
    %281 = arith.mulf %276, %278 : vector<8x32xf32>
    %282 = arith.addf %280, %281 : vector<8x32xf32>
    %283 = math.tanh %282 : vector<8x32xf32>
    %284 = arith.mulf %279, %283 : vector<8x32xf32>
    %c0_160 = arith.constant 0 : index
    %c0_161 = arith.constant 0 : index
    %285 = vector.load %arg10[%c0_160, %c0_161] : memref<8x32xf32, #tpu.memory_space<vmem>>, vector<8x32xf32>
    tpu.vector_store %arg10[%c0_160, %c0_161], %282 {strides = array<i32>} : memref<8x32xf32, #tpu.memory_space<vmem>>, vector<8x32xf32>,
    %c0_162 = arith.constant 0 : index
    %c0_163 = arith.constant 0 : index
    %286 = vector.load %arg9[%c0_162, %c0_163] : memref<8x32xf32, #tpu.memory_space<vmem>>, vector<8x32xf32>
    tpu.vector_store %arg9[%c0_162, %c0_163], %284 {strides = array<i32>} : memref<8x32xf32, #tpu.memory_space<vmem>>, vector<8x32xf32>,
    %c10_164 = arith.constant 10 : index
    %c0_165 = arith.constant 0 : index
    %c0_166 = arith.constant 0 : index
    %287 = vector.load %arg6[%c10_164, %c0_165, %c0_166] : memref<32x8x32xf32, #tpu.memory_space<vmem>>, vector<1x8x32xf32>
    %288 = vector.shape_cast %287 : vector<1x8x32xf32> to vector<8x32xf32>
    %289 = vector.shape_cast %284 : vector<8x32xf32> to vector<1x8x32xf32>
    tpu.vector_store %arg6[%c10_164, %c0_165, %c0_166], %289 {strides = array<i32>} : memref<32x8x32xf32, #tpu.memory_space<vmem>>, vector<1x8x32xf32>,
    %c0_167 = arith.constant 0 : index
    %c0_168 = arith.constant 0 : index
    %290 = vector.load %arg9[%c0_167, %c0_168] : memref<8x32xf32, #tpu.memory_space<vmem>>, vector<8x32xf32>
    %c0_169 = arith.constant 0 : index
    %c0_170 = arith.constant 0 : index
    %291 = vector.load %arg10[%c0_169, %c0_170] : memref<8x32xf32, #tpu.memory_space<vmem>>, vector<8x32xf32>
    %c11 = arith.constant 11 : index
    %c0_171 = arith.constant 0 : index
    %c0_172 = arith.constant 0 : index
    %292 = vector.load %arg2[%c11, %c0_171, %c0_172] : memref<32x8x128xf32, #tpu.memory_space<vmem>>, vector<1x8x128xf32>
    %293 = vector.shape_cast %292 : vector<1x8x128xf32> to vector<8x128xf32>
    %cst_173 = arith.constant dense<0.000000e+00> : vector<8x128xf32>
    %294 = tpu.matmul %290, %3, %cst_173 {dimension_numbers = #tpu.dot_dimension_numbers<[1], [0], [0], [1], [0, 0, 1, 1], [], []>} : vector<8x32xf32>, vector<32x128xf32>, vector<8x128xf32> -> vector<8x128xf32>
    %295 = arith.addf %293, %294 : vector<8x128xf32>
    %296 = arith.negf %295 : vector<8x128xf32>
    %297 = math.exp %296 : vector<8x128xf32>
    %cst_174 = arith.constant 1.000000e+00 : f32
    %298 = vector.broadcast %cst_174 : f32 to vector<8x128xf32>
    %299 = arith.addf %298, %297 : vector<8x128xf32>
    %300 = arith.divf %298, %299 : vector<8x128xf32>
    %301 = math.tanh %295 : vector<8x128xf32>
    %302 = vector.extract_strided_slice %300 {offsets = [0, 0], sizes = [8, 32], strides = [1, 1]} : vector<8x128xf32> to vector<8x32xf32>
    %303 = vector.extract_strided_slice %300 {offsets = [0, 32], sizes = [8, 32], strides = [1, 1]} : vector<8x128xf32> to vector<8x32xf32>
    %304 = vector.extract_strided_slice %301 {offsets = [0, 64], sizes = [8, 32], strides = [1, 1]} : vector<8x128xf32> to vector<8x32xf32>
    %305 = vector.extract_strided_slice %300 {offsets = [0, 96], sizes = [8, 32], strides = [1, 1]} : vector<8x128xf32> to vector<8x32xf32>
    %306 = arith.mulf %303, %291 : vector<8x32xf32>
    %307 = arith.mulf %302, %304 : vector<8x32xf32>
    %308 = arith.addf %306, %307 : vector<8x32xf32>
    %309 = math.tanh %308 : vector<8x32xf32>
    %310 = arith.mulf %305, %309 : vector<8x32xf32>
    %c0_175 = arith.constant 0 : index
    %c0_176 = arith.constant 0 : index
    %311 = vector.load %arg10[%c0_175, %c0_176] : memref<8x32xf32, #tpu.memory_space<vmem>>, vector<8x32xf32>
    tpu.vector_store %arg10[%c0_175, %c0_176], %308 {strides = array<i32>} : memref<8x32xf32, #tpu.memory_space<vmem>>, vector<8x32xf32>,
    %c0_177 = arith.constant 0 : index
    %c0_178 = arith.constant 0 : index
    %312 = vector.load %arg9[%c0_177, %c0_178] : memref<8x32xf32, #tpu.memory_space<vmem>>, vector<8x32xf32>
    tpu.vector_store %arg9[%c0_177, %c0_178], %310 {strides = array<i32>} : memref<8x32xf32, #tpu.memory_space<vmem>>, vector<8x32xf32>,
    %c11_179 = arith.constant 11 : index
    %c0_180 = arith.constant 0 : index
    %c0_181 = arith.constant 0 : index
    %313 = vector.load %arg6[%c11_179, %c0_180, %c0_181] : memref<32x8x32xf32, #tpu.memory_space<vmem>>, vector<1x8x32xf32>
    %314 = vector.shape_cast %313 : vector<1x8x32xf32> to vector<8x32xf32>
    %315 = vector.shape_cast %310 : vector<8x32xf32> to vector<1x8x32xf32>
    tpu.vector_store %arg6[%c11_179, %c0_180, %c0_181], %315 {strides = array<i32>} : memref<32x8x32xf32, #tpu.memory_space<vmem>>, vector<1x8x32xf32>,
    %c0_182 = arith.constant 0 : index
    %c0_183 = arith.constant 0 : index
    %316 = vector.load %arg9[%c0_182, %c0_183] : memref<8x32xf32, #tpu.memory_space<vmem>>, vector<8x32xf32>
    %c0_184 = arith.constant 0 : index
    %c0_185 = arith.constant 0 : index
    %317 = vector.load %arg10[%c0_184, %c0_185] : memref<8x32xf32, #tpu.memory_space<vmem>>, vector<8x32xf32>
    %c12 = arith.constant 12 : index
    %c0_186 = arith.constant 0 : index
    %c0_187 = arith.constant 0 : index
    %318 = vector.load %arg2[%c12, %c0_186, %c0_187] : memref<32x8x128xf32, #tpu.memory_space<vmem>>, vector<1x8x128xf32>
    %319 = vector.shape_cast %318 : vector<1x8x128xf32> to vector<8x128xf32>
    %cst_188 = arith.constant dense<0.000000e+00> : vector<8x128xf32>
    %320 = tpu.matmul %316, %3, %cst_188 {dimension_numbers = #tpu.dot_dimension_numbers<[1], [0], [0], [1], [0, 0, 1, 1], [], []>} : vector<8x32xf32>, vector<32x128xf32>, vector<8x128xf32> -> vector<8x128xf32>
    %321 = arith.addf %319, %320 : vector<8x128xf32>
    %322 = arith.negf %321 : vector<8x128xf32>
    %323 = math.exp %322 : vector<8x128xf32>
    %cst_189 = arith.constant 1.000000e+00 : f32
    %324 = vector.broadcast %cst_189 : f32 to vector<8x128xf32>
    %325 = arith.addf %324, %323 : vector<8x128xf32>
    %326 = arith.divf %324, %325 : vector<8x128xf32>
    %327 = math.tanh %321 : vector<8x128xf32>
    %328 = vector.extract_strided_slice %326 {offsets = [0, 0], sizes = [8, 32], strides = [1, 1]} : vector<8x128xf32> to vector<8x32xf32>
    %329 = vector.extract_strided_slice %326 {offsets = [0, 32], sizes = [8, 32], strides = [1, 1]} : vector<8x128xf32> to vector<8x32xf32>
    %330 = vector.extract_strided_slice %327 {offsets = [0, 64], sizes = [8, 32], strides = [1, 1]} : vector<8x128xf32> to vector<8x32xf32>
    %331 = vector.extract_strided_slice %326 {offsets = [0, 96], sizes = [8, 32], strides = [1, 1]} : vector<8x128xf32> to vector<8x32xf32>
    %332 = arith.mulf %329, %317 : vector<8x32xf32>
    %333 = arith.mulf %328, %330 : vector<8x32xf32>
    %334 = arith.addf %332, %333 : vector<8x32xf32>
    %335 = math.tanh %334 : vector<8x32xf32>
    %336 = arith.mulf %331, %335 : vector<8x32xf32>
    %c0_190 = arith.constant 0 : index
    %c0_191 = arith.constant 0 : index
    %337 = vector.load %arg10[%c0_190, %c0_191] : memref<8x32xf32, #tpu.memory_space<vmem>>, vector<8x32xf32>
    tpu.vector_store %arg10[%c0_190, %c0_191], %334 {strides = array<i32>} : memref<8x32xf32, #tpu.memory_space<vmem>>, vector<8x32xf32>,
    %c0_192 = arith.constant 0 : index
    %c0_193 = arith.constant 0 : index
    %338 = vector.load %arg9[%c0_192, %c0_193] : memref<8x32xf32, #tpu.memory_space<vmem>>, vector<8x32xf32>
    tpu.vector_store %arg9[%c0_192, %c0_193], %336 {strides = array<i32>} : memref<8x32xf32, #tpu.memory_space<vmem>>, vector<8x32xf32>,
    %c12_194 = arith.constant 12 : index
    %c0_195 = arith.constant 0 : index
    %c0_196 = arith.constant 0 : index
    %339 = vector.load %arg6[%c12_194, %c0_195, %c0_196] : memref<32x8x32xf32, #tpu.memory_space<vmem>>, vector<1x8x32xf32>
    %340 = vector.shape_cast %339 : vector<1x8x32xf32> to vector<8x32xf32>
    %341 = vector.shape_cast %336 : vector<8x32xf32> to vector<1x8x32xf32>
    tpu.vector_store %arg6[%c12_194, %c0_195, %c0_196], %341 {strides = array<i32>} : memref<32x8x32xf32, #tpu.memory_space<vmem>>, vector<1x8x32xf32>,
    %c0_197 = arith.constant 0 : index
    %c0_198 = arith.constant 0 : index
    %342 = vector.load %arg9[%c0_197, %c0_198] : memref<8x32xf32, #tpu.memory_space<vmem>>, vector<8x32xf32>
    %c0_199 = arith.constant 0 : index
    %c0_200 = arith.constant 0 : index
    %343 = vector.load %arg10[%c0_199, %c0_200] : memref<8x32xf32, #tpu.memory_space<vmem>>, vector<8x32xf32>
    %c13 = arith.constant 13 : index
    %c0_201 = arith.constant 0 : index
    %c0_202 = arith.constant 0 : index
    %344 = vector.load %arg2[%c13, %c0_201, %c0_202] : memref<32x8x128xf32, #tpu.memory_space<vmem>>, vector<1x8x128xf32>
    %345 = vector.shape_cast %344 : vector<1x8x128xf32> to vector<8x128xf32>
    %cst_203 = arith.constant dense<0.000000e+00> : vector<8x128xf32>
    %346 = tpu.matmul %342, %3, %cst_203 {dimension_numbers = #tpu.dot_dimension_numbers<[1], [0], [0], [1], [0, 0, 1, 1], [], []>} : vector<8x32xf32>, vector<32x128xf32>, vector<8x128xf32> -> vector<8x128xf32>
    %347 = arith.addf %345, %346 : vector<8x128xf32>
    %348 = arith.negf %347 : vector<8x128xf32>
    %349 = math.exp %348 : vector<8x128xf32>
    %cst_204 = arith.constant 1.000000e+00 : f32
    %350 = vector.broadcast %cst_204 : f32 to vector<8x128xf32>
    %351 = arith.addf %350, %349 : vector<8x128xf32>
    %352 = arith.divf %350, %351 : vector<8x128xf32>
    %353 = math.tanh %347 : vector<8x128xf32>
    %354 = vector.extract_strided_slice %352 {offsets = [0, 0], sizes = [8, 32], strides = [1, 1]} : vector<8x128xf32> to vector<8x32xf32>
    %355 = vector.extract_strided_slice %352 {offsets = [0, 32], sizes = [8, 32], strides = [1, 1]} : vector<8x128xf32> to vector<8x32xf32>
    %356 = vector.extract_strided_slice %353 {offsets = [0, 64], sizes = [8, 32], strides = [1, 1]} : vector<8x128xf32> to vector<8x32xf32>
    %357 = vector.extract_strided_slice %352 {offsets = [0, 96], sizes = [8, 32], strides = [1, 1]} : vector<8x128xf32> to vector<8x32xf32>
    %358 = arith.mulf %355, %343 : vector<8x32xf32>
    %359 = arith.mulf %354, %356 : vector<8x32xf32>
    %360 = arith.addf %358, %359 : vector<8x32xf32>
    %361 = math.tanh %360 : vector<8x32xf32>
    %362 = arith.mulf %357, %361 : vector<8x32xf32>
    %c0_205 = arith.constant 0 : index
    %c0_206 = arith.constant 0 : index
    %363 = vector.load %arg10[%c0_205, %c0_206] : memref<8x32xf32, #tpu.memory_space<vmem>>, vector<8x32xf32>
    tpu.vector_store %arg10[%c0_205, %c0_206], %360 {strides = array<i32>} : memref<8x32xf32, #tpu.memory_space<vmem>>, vector<8x32xf32>,
    %c0_207 = arith.constant 0 : index
    %c0_208 = arith.constant 0 : index
    %364 = vector.load %arg9[%c0_207, %c0_208] : memref<8x32xf32, #tpu.memory_space<vmem>>, vector<8x32xf32>
    tpu.vector_store %arg9[%c0_207, %c0_208], %362 {strides = array<i32>} : memref<8x32xf32, #tpu.memory_space<vmem>>, vector<8x32xf32>,
    %c13_209 = arith.constant 13 : index
    %c0_210 = arith.constant 0 : index
    %c0_211 = arith.constant 0 : index
    %365 = vector.load %arg6[%c13_209, %c0_210, %c0_211] : memref<32x8x32xf32, #tpu.memory_space<vmem>>, vector<1x8x32xf32>
    %366 = vector.shape_cast %365 : vector<1x8x32xf32> to vector<8x32xf32>
    %367 = vector.shape_cast %362 : vector<8x32xf32> to vector<1x8x32xf32>
    tpu.vector_store %arg6[%c13_209, %c0_210, %c0_211], %367 {strides = array<i32>} : memref<32x8x32xf32, #tpu.memory_space<vmem>>, vector<1x8x32xf32>,
    %c0_212 = arith.constant 0 : index
    %c0_213 = arith.constant 0 : index
    %368 = vector.load %arg9[%c0_212, %c0_213] : memref<8x32xf32, #tpu.memory_space<vmem>>, vector<8x32xf32>
    %c0_214 = arith.constant 0 : index
    %c0_215 = arith.constant 0 : index
    %369 = vector.load %arg10[%c0_214, %c0_215] : memref<8x32xf32, #tpu.memory_space<vmem>>, vector<8x32xf32>
    %c14 = arith.constant 14 : index
    %c0_216 = arith.constant 0 : index
    %c0_217 = arith.constant 0 : index
    %370 = vector.load %arg2[%c14, %c0_216, %c0_217] : memref<32x8x128xf32, #tpu.memory_space<vmem>>, vector<1x8x128xf32>
    %371 = vector.shape_cast %370 : vector<1x8x128xf32> to vector<8x128xf32>
    %cst_218 = arith.constant dense<0.000000e+00> : vector<8x128xf32>
    %372 = tpu.matmul %368, %3, %cst_218 {dimension_numbers = #tpu.dot_dimension_numbers<[1], [0], [0], [1], [0, 0, 1, 1], [], []>} : vector<8x32xf32>, vector<32x128xf32>, vector<8x128xf32> -> vector<8x128xf32>
    %373 = arith.addf %371, %372 : vector<8x128xf32>
    %374 = arith.negf %373 : vector<8x128xf32>
    %375 = math.exp %374 : vector<8x128xf32>
    %cst_219 = arith.constant 1.000000e+00 : f32
    %376 = vector.broadcast %cst_219 : f32 to vector<8x128xf32>
    %377 = arith.addf %376, %375 : vector<8x128xf32>
    %378 = arith.divf %376, %377 : vector<8x128xf32>
    %379 = math.tanh %373 : vector<8x128xf32>
    %380 = vector.extract_strided_slice %378 {offsets = [0, 0], sizes = [8, 32], strides = [1, 1]} : vector<8x128xf32> to vector<8x32xf32>
    %381 = vector.extract_strided_slice %378 {offsets = [0, 32], sizes = [8, 32], strides = [1, 1]} : vector<8x128xf32> to vector<8x32xf32>
    %382 = vector.extract_strided_slice %379 {offsets = [0, 64], sizes = [8, 32], strides = [1, 1]} : vector<8x128xf32> to vector<8x32xf32>
    %383 = vector.extract_strided_slice %378 {offsets = [0, 96], sizes = [8, 32], strides = [1, 1]} : vector<8x128xf32> to vector<8x32xf32>
    %384 = arith.mulf %381, %369 : vector<8x32xf32>
    %385 = arith.mulf %380, %382 : vector<8x32xf32>
    %386 = arith.addf %384, %385 : vector<8x32xf32>
    %387 = math.tanh %386 : vector<8x32xf32>
    %388 = arith.mulf %383, %387 : vector<8x32xf32>
    %c0_220 = arith.constant 0 : index
    %c0_221 = arith.constant 0 : index
    %389 = vector.load %arg10[%c0_220, %c0_221] : memref<8x32xf32, #tpu.memory_space<vmem>>, vector<8x32xf32>
    tpu.vector_store %arg10[%c0_220, %c0_221], %386 {strides = array<i32>} : memref<8x32xf32, #tpu.memory_space<vmem>>, vector<8x32xf32>,
    %c0_222 = arith.constant 0 : index
    %c0_223 = arith.constant 0 : index
    %390 = vector.load %arg9[%c0_222, %c0_223] : memref<8x32xf32, #tpu.memory_space<vmem>>, vector<8x32xf32>
    tpu.vector_store %arg9[%c0_222, %c0_223], %388 {strides = array<i32>} : memref<8x32xf32, #tpu.memory_space<vmem>>, vector<8x32xf32>,
    %c14_224 = arith.constant 14 : index
    %c0_225 = arith.constant 0 : index
    %c0_226 = arith.constant 0 : index
    %391 = vector.load %arg6[%c14_224, %c0_225, %c0_226] : memref<32x8x32xf32, #tpu.memory_space<vmem>>, vector<1x8x32xf32>
    %392 = vector.shape_cast %391 : vector<1x8x32xf32> to vector<8x32xf32>
    %393 = vector.shape_cast %388 : vector<8x32xf32> to vector<1x8x32xf32>
    tpu.vector_store %arg6[%c14_224, %c0_225, %c0_226], %393 {strides = array<i32>} : memref<32x8x32xf32, #tpu.memory_space<vmem>>, vector<1x8x32xf32>,
    %c0_227 = arith.constant 0 : index
    %c0_228 = arith.constant 0 : index
    %394 = vector.load %arg9[%c0_227, %c0_228] : memref<8x32xf32, #tpu.memory_space<vmem>>, vector<8x32xf32>
    %c0_229 = arith.constant 0 : index
    %c0_230 = arith.constant 0 : index
    %395 = vector.load %arg10[%c0_229, %c0_230] : memref<8x32xf32, #tpu.memory_space<vmem>>, vector<8x32xf32>
    %c15 = arith.constant 15 : index
    %c0_231 = arith.constant 0 : index
    %c0_232 = arith.constant 0 : index
    %396 = vector.load %arg2[%c15, %c0_231, %c0_232] : memref<32x8x128xf32, #tpu.memory_space<vmem>>, vector<1x8x128xf32>
    %397 = vector.shape_cast %396 : vector<1x8x128xf32> to vector<8x128xf32>
    %cst_233 = arith.constant dense<0.000000e+00> : vector<8x128xf32>
    %398 = tpu.matmul %394, %3, %cst_233 {dimension_numbers = #tpu.dot_dimension_numbers<[1], [0], [0], [1], [0, 0, 1, 1], [], []>} : vector<8x32xf32>, vector<32x128xf32>, vector<8x128xf32> -> vector<8x128xf32>
    %399 = arith.addf %397, %398 : vector<8x128xf32>
    %400 = arith.negf %399 : vector<8x128xf32>
    %401 = math.exp %400 : vector<8x128xf32>
    %cst_234 = arith.constant 1.000000e+00 : f32
    %402 = vector.broadcast %cst_234 : f32 to vector<8x128xf32>
    %403 = arith.addf %402, %401 : vector<8x128xf32>
    %404 = arith.divf %402, %403 : vector<8x128xf32>
    %405 = math.tanh %399 : vector<8x128xf32>
    %406 = vector.extract_strided_slice %404 {offsets = [0, 0], sizes = [8, 32], strides = [1, 1]} : vector<8x128xf32> to vector<8x32xf32>
    %407 = vector.extract_strided_slice %404 {offsets = [0, 32], sizes = [8, 32], strides = [1, 1]} : vector<8x128xf32> to vector<8x32xf32>
    %408 = vector.extract_strided_slice %405 {offsets = [0, 64], sizes = [8, 32], strides = [1, 1]} : vector<8x128xf32> to vector<8x32xf32>
    %409 = vector.extract_strided_slice %404 {offsets = [0, 96], sizes = [8, 32], strides = [1, 1]} : vector<8x128xf32> to vector<8x32xf32>
    %410 = arith.mulf %407, %395 : vector<8x32xf32>
    %411 = arith.mulf %406, %408 : vector<8x32xf32>
    %412 = arith.addf %410, %411 : vector<8x32xf32>
    %413 = math.tanh %412 : vector<8x32xf32>
    %414 = arith.mulf %409, %413 : vector<8x32xf32>
    %c0_235 = arith.constant 0 : index
    %c0_236 = arith.constant 0 : index
    %415 = vector.load %arg10[%c0_235, %c0_236] : memref<8x32xf32, #tpu.memory_space<vmem>>, vector<8x32xf32>
    tpu.vector_store %arg10[%c0_235, %c0_236], %412 {strides = array<i32>} : memref<8x32xf32, #tpu.memory_space<vmem>>, vector<8x32xf32>,
    %c0_237 = arith.constant 0 : index
    %c0_238 = arith.constant 0 : index
    %416 = vector.load %arg9[%c0_237, %c0_238] : memref<8x32xf32, #tpu.memory_space<vmem>>, vector<8x32xf32>
    tpu.vector_store %arg9[%c0_237, %c0_238], %414 {strides = array<i32>} : memref<8x32xf32, #tpu.memory_space<vmem>>, vector<8x32xf32>,
    %c15_239 = arith.constant 15 : index
    %c0_240 = arith.constant 0 : index
    %c0_241 = arith.constant 0 : index
    %417 = vector.load %arg6[%c15_239, %c0_240, %c0_241] : memref<32x8x32xf32, #tpu.memory_space<vmem>>, vector<1x8x32xf32>
    %418 = vector.shape_cast %417 : vector<1x8x32xf32> to vector<8x32xf32>
    %419 = vector.shape_cast %414 : vector<8x32xf32> to vector<1x8x32xf32>
    tpu.vector_store %arg6[%c15_239, %c0_240, %c0_241], %419 {strides = array<i32>} : memref<32x8x32xf32, #tpu.memory_space<vmem>>, vector<1x8x32xf32>,
    %c0_242 = arith.constant 0 : index
    %c0_243 = arith.constant 0 : index
    %420 = vector.load %arg9[%c0_242, %c0_243] : memref<8x32xf32, #tpu.memory_space<vmem>>, vector<8x32xf32>
    %c0_244 = arith.constant 0 : index
    %c0_245 = arith.constant 0 : index
    %421 = vector.load %arg10[%c0_244, %c0_245] : memref<8x32xf32, #tpu.memory_space<vmem>>, vector<8x32xf32>
    %c16 = arith.constant 16 : index
    %c0_246 = arith.constant 0 : index
    %c0_247 = arith.constant 0 : index
    %422 = vector.load %arg2[%c16, %c0_246, %c0_247] : memref<32x8x128xf32, #tpu.memory_space<vmem>>, vector<1x8x128xf32>
    %423 = vector.shape_cast %422 : vector<1x8x128xf32> to vector<8x128xf32>
    %cst_248 = arith.constant dense<0.000000e+00> : vector<8x128xf32>
    %424 = tpu.matmul %420, %3, %cst_248 {dimension_numbers = #tpu.dot_dimension_numbers<[1], [0], [0], [1], [0, 0, 1, 1], [], []>} : vector<8x32xf32>, vector<32x128xf32>, vector<8x128xf32> -> vector<8x128xf32>
    %425 = arith.addf %423, %424 : vector<8x128xf32>
    %426 = arith.negf %425 : vector<8x128xf32>
    %427 = math.exp %426 : vector<8x128xf32>
    %cst_249 = arith.constant 1.000000e+00 : f32
    %428 = vector.broadcast %cst_249 : f32 to vector<8x128xf32>
    %429 = arith.addf %428, %427 : vector<8x128xf32>
    %430 = arith.divf %428, %429 : vector<8x128xf32>
    %431 = math.tanh %425 : vector<8x128xf32>
    %432 = vector.extract_strided_slice %430 {offsets = [0, 0], sizes = [8, 32], strides = [1, 1]} : vector<8x128xf32> to vector<8x32xf32>
    %433 = vector.extract_strided_slice %430 {offsets = [0, 32], sizes = [8, 32], strides = [1, 1]} : vector<8x128xf32> to vector<8x32xf32>
    %434 = vector.extract_strided_slice %431 {offsets = [0, 64], sizes = [8, 32], strides = [1, 1]} : vector<8x128xf32> to vector<8x32xf32>
    %435 = vector.extract_strided_slice %430 {offsets = [0, 96], sizes = [8, 32], strides = [1, 1]} : vector<8x128xf32> to vector<8x32xf32>
    %436 = arith.mulf %433, %421 : vector<8x32xf32>
    %437 = arith.mulf %432, %434 : vector<8x32xf32>
    %438 = arith.addf %436, %437 : vector<8x32xf32>
    %439 = math.tanh %438 : vector<8x32xf32>
    %440 = arith.mulf %435, %439 : vector<8x32xf32>
    %c0_250 = arith.constant 0 : index
    %c0_251 = arith.constant 0 : index
    %441 = vector.load %arg10[%c0_250, %c0_251] : memref<8x32xf32, #tpu.memory_space<vmem>>, vector<8x32xf32>
    tpu.vector_store %arg10[%c0_250, %c0_251], %438 {strides = array<i32>} : memref<8x32xf32, #tpu.memory_space<vmem>>, vector<8x32xf32>,
    %c0_252 = arith.constant 0 : index
    %c0_253 = arith.constant 0 : index
    %442 = vector.load %arg9[%c0_252, %c0_253] : memref<8x32xf32, #tpu.memory_space<vmem>>, vector<8x32xf32>
    tpu.vector_store %arg9[%c0_252, %c0_253], %440 {strides = array<i32>} : memref<8x32xf32, #tpu.memory_space<vmem>>, vector<8x32xf32>,
    %c16_254 = arith.constant 16 : index
    %c0_255 = arith.constant 0 : index
    %c0_256 = arith.constant 0 : index
    %443 = vector.load %arg6[%c16_254, %c0_255, %c0_256] : memref<32x8x32xf32, #tpu.memory_space<vmem>>, vector<1x8x32xf32>
    %444 = vector.shape_cast %443 : vector<1x8x32xf32> to vector<8x32xf32>
    %445 = vector.shape_cast %440 : vector<8x32xf32> to vector<1x8x32xf32>
    tpu.vector_store %arg6[%c16_254, %c0_255, %c0_256], %445 {strides = array<i32>} : memref<32x8x32xf32, #tpu.memory_space<vmem>>, vector<1x8x32xf32>,
    %c0_257 = arith.constant 0 : index
    %c0_258 = arith.constant 0 : index
    %446 = vector.load %arg9[%c0_257, %c0_258] : memref<8x32xf32, #tpu.memory_space<vmem>>, vector<8x32xf32>
    %c0_259 = arith.constant 0 : index
    %c0_260 = arith.constant 0 : index
    %447 = vector.load %arg10[%c0_259, %c0_260] : memref<8x32xf32, #tpu.memory_space<vmem>>, vector<8x32xf32>
    %c17 = arith.constant 17 : index
    %c0_261 = arith.constant 0 : index
    %c0_262 = arith.constant 0 : index
    %448 = vector.load %arg2[%c17, %c0_261, %c0_262] : memref<32x8x128xf32, #tpu.memory_space<vmem>>, vector<1x8x128xf32>
    %449 = vector.shape_cast %448 : vector<1x8x128xf32> to vector<8x128xf32>
    %cst_263 = arith.constant dense<0.000000e+00> : vector<8x128xf32>
    %450 = tpu.matmul %446, %3, %cst_263 {dimension_numbers = #tpu.dot_dimension_numbers<[1], [0], [0], [1], [0, 0, 1, 1], [], []>} : vector<8x32xf32>, vector<32x128xf32>, vector<8x128xf32> -> vector<8x128xf32>
    %451 = arith.addf %449, %450 : vector<8x128xf32>
    %452 = arith.negf %451 : vector<8x128xf32>
    %453 = math.exp %452 : vector<8x128xf32>
    %cst_264 = arith.constant 1.000000e+00 : f32
    %454 = vector.broadcast %cst_264 : f32 to vector<8x128xf32>
    %455 = arith.addf %454, %453 : vector<8x128xf32>
    %456 = arith.divf %454, %455 : vector<8x128xf32>
    %457 = math.tanh %451 : vector<8x128xf32>
    %458 = vector.extract_strided_slice %456 {offsets = [0, 0], sizes = [8, 32], strides = [1, 1]} : vector<8x128xf32> to vector<8x32xf32>
    %459 = vector.extract_strided_slice %456 {offsets = [0, 32], sizes = [8, 32], strides = [1, 1]} : vector<8x128xf32> to vector<8x32xf32>
    %460 = vector.extract_strided_slice %457 {offsets = [0, 64], sizes = [8, 32], strides = [1, 1]} : vector<8x128xf32> to vector<8x32xf32>
    %461 = vector.extract_strided_slice %456 {offsets = [0, 96], sizes = [8, 32], strides = [1, 1]} : vector<8x128xf32> to vector<8x32xf32>
    %462 = arith.mulf %459, %447 : vector<8x32xf32>
    %463 = arith.mulf %458, %460 : vector<8x32xf32>
    %464 = arith.addf %462, %463 : vector<8x32xf32>
    %465 = math.tanh %464 : vector<8x32xf32>
    %466 = arith.mulf %461, %465 : vector<8x32xf32>
    %c0_265 = arith.constant 0 : index
    %c0_266 = arith.constant 0 : index
    %467 = vector.load %arg10[%c0_265, %c0_266] : memref<8x32xf32, #tpu.memory_space<vmem>>, vector<8x32xf32>
    tpu.vector_store %arg10[%c0_265, %c0_266], %464 {strides = array<i32>} : memref<8x32xf32, #tpu.memory_space<vmem>>, vector<8x32xf32>,
    %c0_267 = arith.constant 0 : index
    %c0_268 = arith.constant 0 : index
    %468 = vector.load %arg9[%c0_267, %c0_268] : memref<8x32xf32, #tpu.memory_space<vmem>>, vector<8x32xf32>
    tpu.vector_store %arg9[%c0_267, %c0_268], %466 {strides = array<i32>} : memref<8x32xf32, #tpu.memory_space<vmem>>, vector<8x32xf32>,
    %c17_269 = arith.constant 17 : index
    %c0_270 = arith.constant 0 : index
    %c0_271 = arith.constant 0 : index
    %469 = vector.load %arg6[%c17_269, %c0_270, %c0_271] : memref<32x8x32xf32, #tpu.memory_space<vmem>>, vector<1x8x32xf32>
    %470 = vector.shape_cast %469 : vector<1x8x32xf32> to vector<8x32xf32>
    %471 = vector.shape_cast %466 : vector<8x32xf32> to vector<1x8x32xf32>
    tpu.vector_store %arg6[%c17_269, %c0_270, %c0_271], %471 {strides = array<i32>} : memref<32x8x32xf32, #tpu.memory_space<vmem>>, vector<1x8x32xf32>,
    %c0_272 = arith.constant 0 : index
    %c0_273 = arith.constant 0 : index
    %472 = vector.load %arg9[%c0_272, %c0_273] : memref<8x32xf32, #tpu.memory_space<vmem>>, vector<8x32xf32>
    %c0_274 = arith.constant 0 : index
    %c0_275 = arith.constant 0 : index
    %473 = vector.load %arg10[%c0_274, %c0_275] : memref<8x32xf32, #tpu.memory_space<vmem>>, vector<8x32xf32>
    %c18 = arith.constant 18 : index
    %c0_276 = arith.constant 0 : index
    %c0_277 = arith.constant 0 : index
    %474 = vector.load %arg2[%c18, %c0_276, %c0_277] : memref<32x8x128xf32, #tpu.memory_space<vmem>>, vector<1x8x128xf32>
    %475 = vector.shape_cast %474 : vector<1x8x128xf32> to vector<8x128xf32>
    %cst_278 = arith.constant dense<0.000000e+00> : vector<8x128xf32>
    %476 = tpu.matmul %472, %3, %cst_278 {dimension_numbers = #tpu.dot_dimension_numbers<[1], [0], [0], [1], [0, 0, 1, 1], [], []>} : vector<8x32xf32>, vector<32x128xf32>, vector<8x128xf32> -> vector<8x128xf32>
    %477 = arith.addf %475, %476 : vector<8x128xf32>
    %478 = arith.negf %477 : vector<8x128xf32>
    %479 = math.exp %478 : vector<8x128xf32>
    %cst_279 = arith.constant 1.000000e+00 : f32
    %480 = vector.broadcast %cst_279 : f32 to vector<8x128xf32>
    %481 = arith.addf %480, %479 : vector<8x128xf32>
    %482 = arith.divf %480, %481 : vector<8x128xf32>
    %483 = math.tanh %477 : vector<8x128xf32>
    %484 = vector.extract_strided_slice %482 {offsets = [0, 0], sizes = [8, 32], strides = [1, 1]} : vector<8x128xf32> to vector<8x32xf32>
    %485 = vector.extract_strided_slice %482 {offsets = [0, 32], sizes = [8, 32], strides = [1, 1]} : vector<8x128xf32> to vector<8x32xf32>
    %486 = vector.extract_strided_slice %483 {offsets = [0, 64], sizes = [8, 32], strides = [1, 1]} : vector<8x128xf32> to vector<8x32xf32>
    %487 = vector.extract_strided_slice %482 {offsets = [0, 96], sizes = [8, 32], strides = [1, 1]} : vector<8x128xf32> to vector<8x32xf32>
    %488 = arith.mulf %485, %473 : vector<8x32xf32>
    %489 = arith.mulf %484, %486 : vector<8x32xf32>
    %490 = arith.addf %488, %489 : vector<8x32xf32>
    %491 = math.tanh %490 : vector<8x32xf32>
    %492 = arith.mulf %487, %491 : vector<8x32xf32>
    %c0_280 = arith.constant 0 : index
    %c0_281 = arith.constant 0 : index
    %493 = vector.load %arg10[%c0_280, %c0_281] : memref<8x32xf32, #tpu.memory_space<vmem>>, vector<8x32xf32>
    tpu.vector_store %arg10[%c0_280, %c0_281], %490 {strides = array<i32>} : memref<8x32xf32, #tpu.memory_space<vmem>>, vector<8x32xf32>,
    %c0_282 = arith.constant 0 : index
    %c0_283 = arith.constant 0 : index
    %494 = vector.load %arg9[%c0_282, %c0_283] : memref<8x32xf32, #tpu.memory_space<vmem>>, vector<8x32xf32>
    tpu.vector_store %arg9[%c0_282, %c0_283], %492 {strides = array<i32>} : memref<8x32xf32, #tpu.memory_space<vmem>>, vector<8x32xf32>,
    %c18_284 = arith.constant 18 : index
    %c0_285 = arith.constant 0 : index
    %c0_286 = arith.constant 0 : index
    %495 = vector.load %arg6[%c18_284, %c0_285, %c0_286] : memref<32x8x32xf32, #tpu.memory_space<vmem>>, vector<1x8x32xf32>
    %496 = vector.shape_cast %495 : vector<1x8x32xf32> to vector<8x32xf32>
    %497 = vector.shape_cast %492 : vector<8x32xf32> to vector<1x8x32xf32>
    tpu.vector_store %arg6[%c18_284, %c0_285, %c0_286], %497 {strides = array<i32>} : memref<32x8x32xf32, #tpu.memory_space<vmem>>, vector<1x8x32xf32>,
    %c0_287 = arith.constant 0 : index
    %c0_288 = arith.constant 0 : index
    %498 = vector.load %arg9[%c0_287, %c0_288] : memref<8x32xf32, #tpu.memory_space<vmem>>, vector<8x32xf32>
    %c0_289 = arith.constant 0 : index
    %c0_290 = arith.constant 0 : index
    %499 = vector.load %arg10[%c0_289, %c0_290] : memref<8x32xf32, #tpu.memory_space<vmem>>, vector<8x32xf32>
    %c19 = arith.constant 19 : index
    %c0_291 = arith.constant 0 : index
    %c0_292 = arith.constant 0 : index
    %500 = vector.load %arg2[%c19, %c0_291, %c0_292] : memref<32x8x128xf32, #tpu.memory_space<vmem>>, vector<1x8x128xf32>
    %501 = vector.shape_cast %500 : vector<1x8x128xf32> to vector<8x128xf32>
    %cst_293 = arith.constant dense<0.000000e+00> : vector<8x128xf32>
    %502 = tpu.matmul %498, %3, %cst_293 {dimension_numbers = #tpu.dot_dimension_numbers<[1], [0], [0], [1], [0, 0, 1, 1], [], []>} : vector<8x32xf32>, vector<32x128xf32>, vector<8x128xf32> -> vector<8x128xf32>
    %503 = arith.addf %501, %502 : vector<8x128xf32>
    %504 = arith.negf %503 : vector<8x128xf32>
    %505 = math.exp %504 : vector<8x128xf32>
    %cst_294 = arith.constant 1.000000e+00 : f32
    %506 = vector.broadcast %cst_294 : f32 to vector<8x128xf32>
    %507 = arith.addf %506, %505 : vector<8x128xf32>
    %508 = arith.divf %506, %507 : vector<8x128xf32>
    %509 = math.tanh %503 : vector<8x128xf32>
    %510 = vector.extract_strided_slice %508 {offsets = [0, 0], sizes = [8, 32], strides = [1, 1]} : vector<8x128xf32> to vector<8x32xf32>
    %511 = vector.extract_strided_slice %508 {offsets = [0, 32], sizes = [8, 32], strides = [1, 1]} : vector<8x128xf32> to vector<8x32xf32>
    %512 = vector.extract_strided_slice %509 {offsets = [0, 64], sizes = [8, 32], strides = [1, 1]} : vector<8x128xf32> to vector<8x32xf32>
    %513 = vector.extract_strided_slice %508 {offsets = [0, 96], sizes = [8, 32], strides = [1, 1]} : vector<8x128xf32> to vector<8x32xf32>
    %514 = arith.mulf %511, %499 : vector<8x32xf32>
    %515 = arith.mulf %510, %512 : vector<8x32xf32>
    %516 = arith.addf %514, %515 : vector<8x32xf32>
    %517 = math.tanh %516 : vector<8x32xf32>
    %518 = arith.mulf %513, %517 : vector<8x32xf32>
    %c0_295 = arith.constant 0 : index
    %c0_296 = arith.constant 0 : index
    %519 = vector.load %arg10[%c0_295, %c0_296] : memref<8x32xf32, #tpu.memory_space<vmem>>, vector<8x32xf32>
    tpu.vector_store %arg10[%c0_295, %c0_296], %516 {strides = array<i32>} : memref<8x32xf32, #tpu.memory_space<vmem>>, vector<8x32xf32>,
    %c0_297 = arith.constant 0 : index
    %c0_298 = arith.constant 0 : index
    %520 = vector.load %arg9[%c0_297, %c0_298] : memref<8x32xf32, #tpu.memory_space<vmem>>, vector<8x32xf32>
    tpu.vector_store %arg9[%c0_297, %c0_298], %518 {strides = array<i32>} : memref<8x32xf32, #tpu.memory_space<vmem>>, vector<8x32xf32>,
    %c19_299 = arith.constant 19 : index
    %c0_300 = arith.constant 0 : index
    %c0_301 = arith.constant 0 : index
    %521 = vector.load %arg6[%c19_299, %c0_300, %c0_301] : memref<32x8x32xf32, #tpu.memory_space<vmem>>, vector<1x8x32xf32>
    %522 = vector.shape_cast %521 : vector<1x8x32xf32> to vector<8x32xf32>
    %523 = vector.shape_cast %518 : vector<8x32xf32> to vector<1x8x32xf32>
    tpu.vector_store %arg6[%c19_299, %c0_300, %c0_301], %523 {strides = array<i32>} : memref<32x8x32xf32, #tpu.memory_space<vmem>>, vector<1x8x32xf32>,
    %c0_302 = arith.constant 0 : index
    %c0_303 = arith.constant 0 : index
    %524 = vector.load %arg9[%c0_302, %c0_303] : memref<8x32xf32, #tpu.memory_space<vmem>>, vector<8x32xf32>
    %c0_304 = arith.constant 0 : index
    %c0_305 = arith.constant 0 : index
    %525 = vector.load %arg10[%c0_304, %c0_305] : memref<8x32xf32, #tpu.memory_space<vmem>>, vector<8x32xf32>
    %c20 = arith.constant 20 : index
    %c0_306 = arith.constant 0 : index
    %c0_307 = arith.constant 0 : index
    %526 = vector.load %arg2[%c20, %c0_306, %c0_307] : memref<32x8x128xf32, #tpu.memory_space<vmem>>, vector<1x8x128xf32>
    %527 = vector.shape_cast %526 : vector<1x8x128xf32> to vector<8x128xf32>
    %cst_308 = arith.constant dense<0.000000e+00> : vector<8x128xf32>
    %528 = tpu.matmul %524, %3, %cst_308 {dimension_numbers = #tpu.dot_dimension_numbers<[1], [0], [0], [1], [0, 0, 1, 1], [], []>} : vector<8x32xf32>, vector<32x128xf32>, vector<8x128xf32> -> vector<8x128xf32>
    %529 = arith.addf %527, %528 : vector<8x128xf32>
    %530 = arith.negf %529 : vector<8x128xf32>
    %531 = math.exp %530 : vector<8x128xf32>
    %cst_309 = arith.constant 1.000000e+00 : f32
    %532 = vector.broadcast %cst_309 : f32 to vector<8x128xf32>
    %533 = arith.addf %532, %531 : vector<8x128xf32>
    %534 = arith.divf %532, %533 : vector<8x128xf32>
    %535 = math.tanh %529 : vector<8x128xf32>
    %536 = vector.extract_strided_slice %534 {offsets = [0, 0], sizes = [8, 32], strides = [1, 1]} : vector<8x128xf32> to vector<8x32xf32>
    %537 = vector.extract_strided_slice %534 {offsets = [0, 32], sizes = [8, 32], strides = [1, 1]} : vector<8x128xf32> to vector<8x32xf32>
    %538 = vector.extract_strided_slice %535 {offsets = [0, 64], sizes = [8, 32], strides = [1, 1]} : vector<8x128xf32> to vector<8x32xf32>
    %539 = vector.extract_strided_slice %534 {offsets = [0, 96], sizes = [8, 32], strides = [1, 1]} : vector<8x128xf32> to vector<8x32xf32>
    %540 = arith.mulf %537, %525 : vector<8x32xf32>
    %541 = arith.mulf %536, %538 : vector<8x32xf32>
    %542 = arith.addf %540, %541 : vector<8x32xf32>
    %543 = math.tanh %542 : vector<8x32xf32>
    %544 = arith.mulf %539, %543 : vector<8x32xf32>
    %c0_310 = arith.constant 0 : index
    %c0_311 = arith.constant 0 : index
    %545 = vector.load %arg10[%c0_310, %c0_311] : memref<8x32xf32, #tpu.memory_space<vmem>>, vector<8x32xf32>
    tpu.vector_store %arg10[%c0_310, %c0_311], %542 {strides = array<i32>} : memref<8x32xf32, #tpu.memory_space<vmem>>, vector<8x32xf32>,
    %c0_312 = arith.constant 0 : index
    %c0_313 = arith.constant 0 : index
    %546 = vector.load %arg9[%c0_312, %c0_313] : memref<8x32xf32, #tpu.memory_space<vmem>>, vector<8x32xf32>
    tpu.vector_store %arg9[%c0_312, %c0_313], %544 {strides = array<i32>} : memref<8x32xf32, #tpu.memory_space<vmem>>, vector<8x32xf32>,
    %c20_314 = arith.constant 20 : index
    %c0_315 = arith.constant 0 : index
    %c0_316 = arith.constant 0 : index
    %547 = vector.load %arg6[%c20_314, %c0_315, %c0_316] : memref<32x8x32xf32, #tpu.memory_space<vmem>>, vector<1x8x32xf32>
    %548 = vector.shape_cast %547 : vector<1x8x32xf32> to vector<8x32xf32>
    %549 = vector.shape_cast %544 : vector<8x32xf32> to vector<1x8x32xf32>
    tpu.vector_store %arg6[%c20_314, %c0_315, %c0_316], %549 {strides = array<i32>} : memref<32x8x32xf32, #tpu.memory_space<vmem>>, vector<1x8x32xf32>,
    %c0_317 = arith.constant 0 : index
    %c0_318 = arith.constant 0 : index
    %550 = vector.load %arg9[%c0_317, %c0_318] : memref<8x32xf32, #tpu.memory_space<vmem>>, vector<8x32xf32>
    %c0_319 = arith.constant 0 : index
    %c0_320 = arith.constant 0 : index
    %551 = vector.load %arg10[%c0_319, %c0_320] : memref<8x32xf32, #tpu.memory_space<vmem>>, vector<8x32xf32>
    %c21 = arith.constant 21 : index
    %c0_321 = arith.constant 0 : index
    %c0_322 = arith.constant 0 : index
    %552 = vector.load %arg2[%c21, %c0_321, %c0_322] : memref<32x8x128xf32, #tpu.memory_space<vmem>>, vector<1x8x128xf32>
    %553 = vector.shape_cast %552 : vector<1x8x128xf32> to vector<8x128xf32>
    %cst_323 = arith.constant dense<0.000000e+00> : vector<8x128xf32>
    %554 = tpu.matmul %550, %3, %cst_323 {dimension_numbers = #tpu.dot_dimension_numbers<[1], [0], [0], [1], [0, 0, 1, 1], [], []>} : vector<8x32xf32>, vector<32x128xf32>, vector<8x128xf32> -> vector<8x128xf32>
    %555 = arith.addf %553, %554 : vector<8x128xf32>
    %556 = arith.negf %555 : vector<8x128xf32>
    %557 = math.exp %556 : vector<8x128xf32>
    %cst_324 = arith.constant 1.000000e+00 : f32
    %558 = vector.broadcast %cst_324 : f32 to vector<8x128xf32>
    %559 = arith.addf %558, %557 : vector<8x128xf32>
    %560 = arith.divf %558, %559 : vector<8x128xf32>
    %561 = math.tanh %555 : vector<8x128xf32>
    %562 = vector.extract_strided_slice %560 {offsets = [0, 0], sizes = [8, 32], strides = [1, 1]} : vector<8x128xf32> to vector<8x32xf32>
    %563 = vector.extract_strided_slice %560 {offsets = [0, 32], sizes = [8, 32], strides = [1, 1]} : vector<8x128xf32> to vector<8x32xf32>
    %564 = vector.extract_strided_slice %561 {offsets = [0, 64], sizes = [8, 32], strides = [1, 1]} : vector<8x128xf32> to vector<8x32xf32>
    %565 = vector.extract_strided_slice %560 {offsets = [0, 96], sizes = [8, 32], strides = [1, 1]} : vector<8x128xf32> to vector<8x32xf32>
    %566 = arith.mulf %563, %551 : vector<8x32xf32>
    %567 = arith.mulf %562, %564 : vector<8x32xf32>
    %568 = arith.addf %566, %567 : vector<8x32xf32>
    %569 = math.tanh %568 : vector<8x32xf32>
    %570 = arith.mulf %565, %569 : vector<8x32xf32>
    %c0_325 = arith.constant 0 : index
    %c0_326 = arith.constant 0 : index
    %571 = vector.load %arg10[%c0_325, %c0_326] : memref<8x32xf32, #tpu.memory_space<vmem>>, vector<8x32xf32>
    tpu.vector_store %arg10[%c0_325, %c0_326], %568 {strides = array<i32>} : memref<8x32xf32, #tpu.memory_space<vmem>>, vector<8x32xf32>,
    %c0_327 = arith.constant 0 : index
    %c0_328 = arith.constant 0 : index
    %572 = vector.load %arg9[%c0_327, %c0_328] : memref<8x32xf32, #tpu.memory_space<vmem>>, vector<8x32xf32>
    tpu.vector_store %arg9[%c0_327, %c0_328], %570 {strides = array<i32>} : memref<8x32xf32, #tpu.memory_space<vmem>>, vector<8x32xf32>,
    %c21_329 = arith.constant 21 : index
    %c0_330 = arith.constant 0 : index
    %c0_331 = arith.constant 0 : index
    %573 = vector.load %arg6[%c21_329, %c0_330, %c0_331] : memref<32x8x32xf32, #tpu.memory_space<vmem>>, vector<1x8x32xf32>
    %574 = vector.shape_cast %573 : vector<1x8x32xf32> to vector<8x32xf32>
    %575 = vector.shape_cast %570 : vector<8x32xf32> to vector<1x8x32xf32>
    tpu.vector_store %arg6[%c21_329, %c0_330, %c0_331], %575 {strides = array<i32>} : memref<32x8x32xf32, #tpu.memory_space<vmem>>, vector<1x8x32xf32>,
    %c0_332 = arith.constant 0 : index
    %c0_333 = arith.constant 0 : index
    %576 = vector.load %arg9[%c0_332, %c0_333] : memref<8x32xf32, #tpu.memory_space<vmem>>, vector<8x32xf32>
    %c0_334 = arith.constant 0 : index
    %c0_335 = arith.constant 0 : index
    %577 = vector.load %arg10[%c0_334, %c0_335] : memref<8x32xf32, #tpu.memory_space<vmem>>, vector<8x32xf32>
    %c22 = arith.constant 22 : index
    %c0_336 = arith.constant 0 : index
    %c0_337 = arith.constant 0 : index
    %578 = vector.load %arg2[%c22, %c0_336, %c0_337] : memref<32x8x128xf32, #tpu.memory_space<vmem>>, vector<1x8x128xf32>
    %579 = vector.shape_cast %578 : vector<1x8x128xf32> to vector<8x128xf32>
    %cst_338 = arith.constant dense<0.000000e+00> : vector<8x128xf32>
    %580 = tpu.matmul %576, %3, %cst_338 {dimension_numbers = #tpu.dot_dimension_numbers<[1], [0], [0], [1], [0, 0, 1, 1], [], []>} : vector<8x32xf32>, vector<32x128xf32>, vector<8x128xf32> -> vector<8x128xf32>
    %581 = arith.addf %579, %580 : vector<8x128xf32>
    %582 = arith.negf %581 : vector<8x128xf32>
    %583 = math.exp %582 : vector<8x128xf32>
    %cst_339 = arith.constant 1.000000e+00 : f32
    %584 = vector.broadcast %cst_339 : f32 to vector<8x128xf32>
    %585 = arith.addf %584, %583 : vector<8x128xf32>
    %586 = arith.divf %584, %585 : vector<8x128xf32>
    %587 = math.tanh %581 : vector<8x128xf32>
    %588 = vector.extract_strided_slice %586 {offsets = [0, 0], sizes = [8, 32], strides = [1, 1]} : vector<8x128xf32> to vector<8x32xf32>
    %589 = vector.extract_strided_slice %586 {offsets = [0, 32], sizes = [8, 32], strides = [1, 1]} : vector<8x128xf32> to vector<8x32xf32>
    %590 = vector.extract_strided_slice %587 {offsets = [0, 64], sizes = [8, 32], strides = [1, 1]} : vector<8x128xf32> to vector<8x32xf32>
    %591 = vector.extract_strided_slice %586 {offsets = [0, 96], sizes = [8, 32], strides = [1, 1]} : vector<8x128xf32> to vector<8x32xf32>
    %592 = arith.mulf %589, %577 : vector<8x32xf32>
    %593 = arith.mulf %588, %590 : vector<8x32xf32>
    %594 = arith.addf %592, %593 : vector<8x32xf32>
    %595 = math.tanh %594 : vector<8x32xf32>
    %596 = arith.mulf %591, %595 : vector<8x32xf32>
    %c0_340 = arith.constant 0 : index
    %c0_341 = arith.constant 0 : index
    %597 = vector.load %arg10[%c0_340, %c0_341] : memref<8x32xf32, #tpu.memory_space<vmem>>, vector<8x32xf32>
    tpu.vector_store %arg10[%c0_340, %c0_341], %594 {strides = array<i32>} : memref<8x32xf32, #tpu.memory_space<vmem>>, vector<8x32xf32>,
    %c0_342 = arith.constant 0 : index
    %c0_343 = arith.constant 0 : index
    %598 = vector.load %arg9[%c0_342, %c0_343] : memref<8x32xf32, #tpu.memory_space<vmem>>, vector<8x32xf32>
    tpu.vector_store %arg9[%c0_342, %c0_343], %596 {strides = array<i32>} : memref<8x32xf32, #tpu.memory_space<vmem>>, vector<8x32xf32>,
    %c22_344 = arith.constant 22 : index
    %c0_345 = arith.constant 0 : index
    %c0_346 = arith.constant 0 : index
    %599 = vector.load %arg6[%c22_344, %c0_345, %c0_346] : memref<32x8x32xf32, #tpu.memory_space<vmem>>, vector<1x8x32xf32>
    %600 = vector.shape_cast %599 : vector<1x8x32xf32> to vector<8x32xf32>
    %601 = vector.shape_cast %596 : vector<8x32xf32> to vector<1x8x32xf32>
    tpu.vector_store %arg6[%c22_344, %c0_345, %c0_346], %601 {strides = array<i32>} : memref<32x8x32xf32, #tpu.memory_space<vmem>>, vector<1x8x32xf32>,
    %c0_347 = arith.constant 0 : index
    %c0_348 = arith.constant 0 : index
    %602 = vector.load %arg9[%c0_347, %c0_348] : memref<8x32xf32, #tpu.memory_space<vmem>>, vector<8x32xf32>
    %c0_349 = arith.constant 0 : index
    %c0_350 = arith.constant 0 : index
    %603 = vector.load %arg10[%c0_349, %c0_350] : memref<8x32xf32, #tpu.memory_space<vmem>>, vector<8x32xf32>
    %c23 = arith.constant 23 : index
    %c0_351 = arith.constant 0 : index
    %c0_352 = arith.constant 0 : index
    %604 = vector.load %arg2[%c23, %c0_351, %c0_352] : memref<32x8x128xf32, #tpu.memory_space<vmem>>, vector<1x8x128xf32>
    %605 = vector.shape_cast %604 : vector<1x8x128xf32> to vector<8x128xf32>
    %cst_353 = arith.constant dense<0.000000e+00> : vector<8x128xf32>
    %606 = tpu.matmul %602, %3, %cst_353 {dimension_numbers = #tpu.dot_dimension_numbers<[1], [0], [0], [1], [0, 0, 1, 1], [], []>} : vector<8x32xf32>, vector<32x128xf32>, vector<8x128xf32> -> vector<8x128xf32>
    %607 = arith.addf %605, %606 : vector<8x128xf32>
    %608 = arith.negf %607 : vector<8x128xf32>
    %609 = math.exp %608 : vector<8x128xf32>
    %cst_354 = arith.constant 1.000000e+00 : f32
    %610 = vector.broadcast %cst_354 : f32 to vector<8x128xf32>
    %611 = arith.addf %610, %609 : vector<8x128xf32>
    %612 = arith.divf %610, %611 : vector<8x128xf32>
    %613 = math.tanh %607 : vector<8x128xf32>
    %614 = vector.extract_strided_slice %612 {offsets = [0, 0], sizes = [8, 32], strides = [1, 1]} : vector<8x128xf32> to vector<8x32xf32>
    %615 = vector.extract_strided_slice %612 {offsets = [0, 32], sizes = [8, 32], strides = [1, 1]} : vector<8x128xf32> to vector<8x32xf32>
    %616 = vector.extract_strided_slice %613 {offsets = [0, 64], sizes = [8, 32], strides = [1, 1]} : vector<8x128xf32> to vector<8x32xf32>
    %617 = vector.extract_strided_slice %612 {offsets = [0, 96], sizes = [8, 32], strides = [1, 1]} : vector<8x128xf32> to vector<8x32xf32>
    %618 = arith.mulf %615, %603 : vector<8x32xf32>
    %619 = arith.mulf %614, %616 : vector<8x32xf32>
    %620 = arith.addf %618, %619 : vector<8x32xf32>
    %621 = math.tanh %620 : vector<8x32xf32>
    %622 = arith.mulf %617, %621 : vector<8x32xf32>
    %c0_355 = arith.constant 0 : index
    %c0_356 = arith.constant 0 : index
    %623 = vector.load %arg10[%c0_355, %c0_356] : memref<8x32xf32, #tpu.memory_space<vmem>>, vector<8x32xf32>
    tpu.vector_store %arg10[%c0_355, %c0_356], %620 {strides = array<i32>} : memref<8x32xf32, #tpu.memory_space<vmem>>, vector<8x32xf32>,
    %c0_357 = arith.constant 0 : index
    %c0_358 = arith.constant 0 : index
    %624 = vector.load %arg9[%c0_357, %c0_358] : memref<8x32xf32, #tpu.memory_space<vmem>>, vector<8x32xf32>
    tpu.vector_store %arg9[%c0_357, %c0_358], %622 {strides = array<i32>} : memref<8x32xf32, #tpu.memory_space<vmem>>, vector<8x32xf32>,
    %c23_359 = arith.constant 23 : index
    %c0_360 = arith.constant 0 : index
    %c0_361 = arith.constant 0 : index
    %625 = vector.load %arg6[%c23_359, %c0_360, %c0_361] : memref<32x8x32xf32, #tpu.memory_space<vmem>>, vector<1x8x32xf32>
    %626 = vector.shape_cast %625 : vector<1x8x32xf32> to vector<8x32xf32>
    %627 = vector.shape_cast %622 : vector<8x32xf32> to vector<1x8x32xf32>
    tpu.vector_store %arg6[%c23_359, %c0_360, %c0_361], %627 {strides = array<i32>} : memref<32x8x32xf32, #tpu.memory_space<vmem>>, vector<1x8x32xf32>,
    %c0_362 = arith.constant 0 : index
    %c0_363 = arith.constant 0 : index
    %628 = vector.load %arg9[%c0_362, %c0_363] : memref<8x32xf32, #tpu.memory_space<vmem>>, vector<8x32xf32>
    %c0_364 = arith.constant 0 : index
    %c0_365 = arith.constant 0 : index
    %629 = vector.load %arg10[%c0_364, %c0_365] : memref<8x32xf32, #tpu.memory_space<vmem>>, vector<8x32xf32>
    %c24 = arith.constant 24 : index
    %c0_366 = arith.constant 0 : index
    %c0_367 = arith.constant 0 : index
    %630 = vector.load %arg2[%c24, %c0_366, %c0_367] : memref<32x8x128xf32, #tpu.memory_space<vmem>>, vector<1x8x128xf32>
    %631 = vector.shape_cast %630 : vector<1x8x128xf32> to vector<8x128xf32>
    %cst_368 = arith.constant dense<0.000000e+00> : vector<8x128xf32>
    %632 = tpu.matmul %628, %3, %cst_368 {dimension_numbers = #tpu.dot_dimension_numbers<[1], [0], [0], [1], [0, 0, 1, 1], [], []>} : vector<8x32xf32>, vector<32x128xf32>, vector<8x128xf32> -> vector<8x128xf32>
    %633 = arith.addf %631, %632 : vector<8x128xf32>
    %634 = arith.negf %633 : vector<8x128xf32>
    %635 = math.exp %634 : vector<8x128xf32>
    %cst_369 = arith.constant 1.000000e+00 : f32
    %636 = vector.broadcast %cst_369 : f32 to vector<8x128xf32>
    %637 = arith.addf %636, %635 : vector<8x128xf32>
    %638 = arith.divf %636, %637 : vector<8x128xf32>
    %639 = math.tanh %633 : vector<8x128xf32>
    %640 = vector.extract_strided_slice %638 {offsets = [0, 0], sizes = [8, 32], strides = [1, 1]} : vector<8x128xf32> to vector<8x32xf32>
    %641 = vector.extract_strided_slice %638 {offsets = [0, 32], sizes = [8, 32], strides = [1, 1]} : vector<8x128xf32> to vector<8x32xf32>
    %642 = vector.extract_strided_slice %639 {offsets = [0, 64], sizes = [8, 32], strides = [1, 1]} : vector<8x128xf32> to vector<8x32xf32>
    %643 = vector.extract_strided_slice %638 {offsets = [0, 96], sizes = [8, 32], strides = [1, 1]} : vector<8x128xf32> to vector<8x32xf32>
    %644 = arith.mulf %641, %629 : vector<8x32xf32>
    %645 = arith.mulf %640, %642 : vector<8x32xf32>
    %646 = arith.addf %644, %645 : vector<8x32xf32>
    %647 = math.tanh %646 : vector<8x32xf32>
    %648 = arith.mulf %643, %647 : vector<8x32xf32>
    %c0_370 = arith.constant 0 : index
    %c0_371 = arith.constant 0 : index
    %649 = vector.load %arg10[%c0_370, %c0_371] : memref<8x32xf32, #tpu.memory_space<vmem>>, vector<8x32xf32>
    tpu.vector_store %arg10[%c0_370, %c0_371], %646 {strides = array<i32>} : memref<8x32xf32, #tpu.memory_space<vmem>>, vector<8x32xf32>,
    %c0_372 = arith.constant 0 : index
    %c0_373 = arith.constant 0 : index
    %650 = vector.load %arg9[%c0_372, %c0_373] : memref<8x32xf32, #tpu.memory_space<vmem>>, vector<8x32xf32>
    tpu.vector_store %arg9[%c0_372, %c0_373], %648 {strides = array<i32>} : memref<8x32xf32, #tpu.memory_space<vmem>>, vector<8x32xf32>,
    %c24_374 = arith.constant 24 : index
    %c0_375 = arith.constant 0 : index
    %c0_376 = arith.constant 0 : index
    %651 = vector.load %arg6[%c24_374, %c0_375, %c0_376] : memref<32x8x32xf32, #tpu.memory_space<vmem>>, vector<1x8x32xf32>
    %652 = vector.shape_cast %651 : vector<1x8x32xf32> to vector<8x32xf32>
    %653 = vector.shape_cast %648 : vector<8x32xf32> to vector<1x8x32xf32>
    tpu.vector_store %arg6[%c24_374, %c0_375, %c0_376], %653 {strides = array<i32>} : memref<32x8x32xf32, #tpu.memory_space<vmem>>, vector<1x8x32xf32>,
    %c0_377 = arith.constant 0 : index
    %c0_378 = arith.constant 0 : index
    %654 = vector.load %arg9[%c0_377, %c0_378] : memref<8x32xf32, #tpu.memory_space<vmem>>, vector<8x32xf32>
    %c0_379 = arith.constant 0 : index
    %c0_380 = arith.constant 0 : index
    %655 = vector.load %arg10[%c0_379, %c0_380] : memref<8x32xf32, #tpu.memory_space<vmem>>, vector<8x32xf32>
    %c25 = arith.constant 25 : index
    %c0_381 = arith.constant 0 : index
    %c0_382 = arith.constant 0 : index
    %656 = vector.load %arg2[%c25, %c0_381, %c0_382] : memref<32x8x128xf32, #tpu.memory_space<vmem>>, vector<1x8x128xf32>
    %657 = vector.shape_cast %656 : vector<1x8x128xf32> to vector<8x128xf32>
    %cst_383 = arith.constant dense<0.000000e+00> : vector<8x128xf32>
    %658 = tpu.matmul %654, %3, %cst_383 {dimension_numbers = #tpu.dot_dimension_numbers<[1], [0], [0], [1], [0, 0, 1, 1], [], []>} : vector<8x32xf32>, vector<32x128xf32>, vector<8x128xf32> -> vector<8x128xf32>
    %659 = arith.addf %657, %658 : vector<8x128xf32>
    %660 = arith.negf %659 : vector<8x128xf32>
    %661 = math.exp %660 : vector<8x128xf32>
    %cst_384 = arith.constant 1.000000e+00 : f32
    %662 = vector.broadcast %cst_384 : f32 to vector<8x128xf32>
    %663 = arith.addf %662, %661 : vector<8x128xf32>
    %664 = arith.divf %662, %663 : vector<8x128xf32>
    %665 = math.tanh %659 : vector<8x128xf32>
    %666 = vector.extract_strided_slice %664 {offsets = [0, 0], sizes = [8, 32], strides = [1, 1]} : vector<8x128xf32> to vector<8x32xf32>
    %667 = vector.extract_strided_slice %664 {offsets = [0, 32], sizes = [8, 32], strides = [1, 1]} : vector<8x128xf32> to vector<8x32xf32>
    %668 = vector.extract_strided_slice %665 {offsets = [0, 64], sizes = [8, 32], strides = [1, 1]} : vector<8x128xf32> to vector<8x32xf32>
    %669 = vector.extract_strided_slice %664 {offsets = [0, 96], sizes = [8, 32], strides = [1, 1]} : vector<8x128xf32> to vector<8x32xf32>
    %670 = arith.mulf %667, %655 : vector<8x32xf32>
    %671 = arith.mulf %666, %668 : vector<8x32xf32>
    %672 = arith.addf %670, %671 : vector<8x32xf32>
    %673 = math.tanh %672 : vector<8x32xf32>
    %674 = arith.mulf %669, %673 : vector<8x32xf32>
    %c0_385 = arith.constant 0 : index
    %c0_386 = arith.constant 0 : index
    %675 = vector.load %arg10[%c0_385, %c0_386] : memref<8x32xf32, #tpu.memory_space<vmem>>, vector<8x32xf32>
    tpu.vector_store %arg10[%c0_385, %c0_386], %672 {strides = array<i32>} : memref<8x32xf32, #tpu.memory_space<vmem>>, vector<8x32xf32>,
    %c0_387 = arith.constant 0 : index
    %c0_388 = arith.constant 0 : index
    %676 = vector.load %arg9[%c0_387, %c0_388] : memref<8x32xf32, #tpu.memory_space<vmem>>, vector<8x32xf32>
    tpu.vector_store %arg9[%c0_387, %c0_388], %674 {strides = array<i32>} : memref<8x32xf32, #tpu.memory_space<vmem>>, vector<8x32xf32>,
    %c25_389 = arith.constant 25 : index
    %c0_390 = arith.constant 0 : index
    %c0_391 = arith.constant 0 : index
    %677 = vector.load %arg6[%c25_389, %c0_390, %c0_391] : memref<32x8x32xf32, #tpu.memory_space<vmem>>, vector<1x8x32xf32>
    %678 = vector.shape_cast %677 : vector<1x8x32xf32> to vector<8x32xf32>
    %679 = vector.shape_cast %674 : vector<8x32xf32> to vector<1x8x32xf32>
    tpu.vector_store %arg6[%c25_389, %c0_390, %c0_391], %679 {strides = array<i32>} : memref<32x8x32xf32, #tpu.memory_space<vmem>>, vector<1x8x32xf32>,
    %c0_392 = arith.constant 0 : index
    %c0_393 = arith.constant 0 : index
    %680 = vector.load %arg9[%c0_392, %c0_393] : memref<8x32xf32, #tpu.memory_space<vmem>>, vector<8x32xf32>
    %c0_394 = arith.constant 0 : index
    %c0_395 = arith.constant 0 : index
    %681 = vector.load %arg10[%c0_394, %c0_395] : memref<8x32xf32, #tpu.memory_space<vmem>>, vector<8x32xf32>
    %c26 = arith.constant 26 : index
    %c0_396 = arith.constant 0 : index
    %c0_397 = arith.constant 0 : index
    %682 = vector.load %arg2[%c26, %c0_396, %c0_397] : memref<32x8x128xf32, #tpu.memory_space<vmem>>, vector<1x8x128xf32>
    %683 = vector.shape_cast %682 : vector<1x8x128xf32> to vector<8x128xf32>
    %cst_398 = arith.constant dense<0.000000e+00> : vector<8x128xf32>
    %684 = tpu.matmul %680, %3, %cst_398 {dimension_numbers = #tpu.dot_dimension_numbers<[1], [0], [0], [1], [0, 0, 1, 1], [], []>} : vector<8x32xf32>, vector<32x128xf32>, vector<8x128xf32> -> vector<8x128xf32>
    %685 = arith.addf %683, %684 : vector<8x128xf32>
    %686 = arith.negf %685 : vector<8x128xf32>
    %687 = math.exp %686 : vector<8x128xf32>
    %cst_399 = arith.constant 1.000000e+00 : f32
    %688 = vector.broadcast %cst_399 : f32 to vector<8x128xf32>
    %689 = arith.addf %688, %687 : vector<8x128xf32>
    %690 = arith.divf %688, %689 : vector<8x128xf32>
    %691 = math.tanh %685 : vector<8x128xf32>
    %692 = vector.extract_strided_slice %690 {offsets = [0, 0], sizes = [8, 32], strides = [1, 1]} : vector<8x128xf32> to vector<8x32xf32>
    %693 = vector.extract_strided_slice %690 {offsets = [0, 32], sizes = [8, 32], strides = [1, 1]} : vector<8x128xf32> to vector<8x32xf32>
    %694 = vector.extract_strided_slice %691 {offsets = [0, 64], sizes = [8, 32], strides = [1, 1]} : vector<8x128xf32> to vector<8x32xf32>
    %695 = vector.extract_strided_slice %690 {offsets = [0, 96], sizes = [8, 32], strides = [1, 1]} : vector<8x128xf32> to vector<8x32xf32>
    %696 = arith.mulf %693, %681 : vector<8x32xf32>
    %697 = arith.mulf %692, %694 : vector<8x32xf32>
    %698 = arith.addf %696, %697 : vector<8x32xf32>
    %699 = math.tanh %698 : vector<8x32xf32>
    %700 = arith.mulf %695, %699 : vector<8x32xf32>
    %c0_400 = arith.constant 0 : index
    %c0_401 = arith.constant 0 : index
    %701 = vector.load %arg10[%c0_400, %c0_401] : memref<8x32xf32, #tpu.memory_space<vmem>>, vector<8x32xf32>
    tpu.vector_store %arg10[%c0_400, %c0_401], %698 {strides = array<i32>} : memref<8x32xf32, #tpu.memory_space<vmem>>, vector<8x32xf32>,
    %c0_402 = arith.constant 0 : index
    %c0_403 = arith.constant 0 : index
    %702 = vector.load %arg9[%c0_402, %c0_403] : memref<8x32xf32, #tpu.memory_space<vmem>>, vector<8x32xf32>
    tpu.vector_store %arg9[%c0_402, %c0_403], %700 {strides = array<i32>} : memref<8x32xf32, #tpu.memory_space<vmem>>, vector<8x32xf32>,
    %c26_404 = arith.constant 26 : index
    %c0_405 = arith.constant 0 : index
    %c0_406 = arith.constant 0 : index
    %703 = vector.load %arg6[%c26_404, %c0_405, %c0_406] : memref<32x8x32xf32, #tpu.memory_space<vmem>>, vector<1x8x32xf32>
    %704 = vector.shape_cast %703 : vector<1x8x32xf32> to vector<8x32xf32>
    %705 = vector.shape_cast %700 : vector<8x32xf32> to vector<1x8x32xf32>
    tpu.vector_store %arg6[%c26_404, %c0_405, %c0_406], %705 {strides = array<i32>} : memref<32x8x32xf32, #tpu.memory_space<vmem>>, vector<1x8x32xf32>,
    %c0_407 = arith.constant 0 : index
    %c0_408 = arith.constant 0 : index
    %706 = vector.load %arg9[%c0_407, %c0_408] : memref<8x32xf32, #tpu.memory_space<vmem>>, vector<8x32xf32>
    %c0_409 = arith.constant 0 : index
    %c0_410 = arith.constant 0 : index
    %707 = vector.load %arg10[%c0_409, %c0_410] : memref<8x32xf32, #tpu.memory_space<vmem>>, vector<8x32xf32>
    %c27 = arith.constant 27 : index
    %c0_411 = arith.constant 0 : index
    %c0_412 = arith.constant 0 : index
    %708 = vector.load %arg2[%c27, %c0_411, %c0_412] : memref<32x8x128xf32, #tpu.memory_space<vmem>>, vector<1x8x128xf32>
    %709 = vector.shape_cast %708 : vector<1x8x128xf32> to vector<8x128xf32>
    %cst_413 = arith.constant dense<0.000000e+00> : vector<8x128xf32>
    %710 = tpu.matmul %706, %3, %cst_413 {dimension_numbers = #tpu.dot_dimension_numbers<[1], [0], [0], [1], [0, 0, 1, 1], [], []>} : vector<8x32xf32>, vector<32x128xf32>, vector<8x128xf32> -> vector<8x128xf32>
    %711 = arith.addf %709, %710 : vector<8x128xf32>
    %712 = arith.negf %711 : vector<8x128xf32>
    %713 = math.exp %712 : vector<8x128xf32>
    %cst_414 = arith.constant 1.000000e+00 : f32
    %714 = vector.broadcast %cst_414 : f32 to vector<8x128xf32>
    %715 = arith.addf %714, %713 : vector<8x128xf32>
    %716 = arith.divf %714, %715 : vector<8x128xf32>
    %717 = math.tanh %711 : vector<8x128xf32>
    %718 = vector.extract_strided_slice %716 {offsets = [0, 0], sizes = [8, 32], strides = [1, 1]} : vector<8x128xf32> to vector<8x32xf32>
    %719 = vector.extract_strided_slice %716 {offsets = [0, 32], sizes = [8, 32], strides = [1, 1]} : vector<8x128xf32> to vector<8x32xf32>
    %720 = vector.extract_strided_slice %717 {offsets = [0, 64], sizes = [8, 32], strides = [1, 1]} : vector<8x128xf32> to vector<8x32xf32>
    %721 = vector.extract_strided_slice %716 {offsets = [0, 96], sizes = [8, 32], strides = [1, 1]} : vector<8x128xf32> to vector<8x32xf32>
    %722 = arith.mulf %719, %707 : vector<8x32xf32>
    %723 = arith.mulf %718, %720 : vector<8x32xf32>
    %724 = arith.addf %722, %723 : vector<8x32xf32>
    %725 = math.tanh %724 : vector<8x32xf32>
    %726 = arith.mulf %721, %725 : vector<8x32xf32>
    %c0_415 = arith.constant 0 : index
    %c0_416 = arith.constant 0 : index
    %727 = vector.load %arg10[%c0_415, %c0_416] : memref<8x32xf32, #tpu.memory_space<vmem>>, vector<8x32xf32>
    tpu.vector_store %arg10[%c0_415, %c0_416], %724 {strides = array<i32>} : memref<8x32xf32, #tpu.memory_space<vmem>>, vector<8x32xf32>,
    %c0_417 = arith.constant 0 : index
    %c0_418 = arith.constant 0 : index
    %728 = vector.load %arg9[%c0_417, %c0_418] : memref<8x32xf32, #tpu.memory_space<vmem>>, vector<8x32xf32>
    tpu.vector_store %arg9[%c0_417, %c0_418], %726 {strides = array<i32>} : memref<8x32xf32, #tpu.memory_space<vmem>>, vector<8x32xf32>,
    %c27_419 = arith.constant 27 : index
    %c0_420 = arith.constant 0 : index
    %c0_421 = arith.constant 0 : index
    %729 = vector.load %arg6[%c27_419, %c0_420, %c0_421] : memref<32x8x32xf32, #tpu.memory_space<vmem>>, vector<1x8x32xf32>
    %730 = vector.shape_cast %729 : vector<1x8x32xf32> to vector<8x32xf32>
    %731 = vector.shape_cast %726 : vector<8x32xf32> to vector<1x8x32xf32>
    tpu.vector_store %arg6[%c27_419, %c0_420, %c0_421], %731 {strides = array<i32>} : memref<32x8x32xf32, #tpu.memory_space<vmem>>, vector<1x8x32xf32>,
    %c0_422 = arith.constant 0 : index
    %c0_423 = arith.constant 0 : index
    %732 = vector.load %arg9[%c0_422, %c0_423] : memref<8x32xf32, #tpu.memory_space<vmem>>, vector<8x32xf32>
    %c0_424 = arith.constant 0 : index
    %c0_425 = arith.constant 0 : index
    %733 = vector.load %arg10[%c0_424, %c0_425] : memref<8x32xf32, #tpu.memory_space<vmem>>, vector<8x32xf32>
    %c28 = arith.constant 28 : index
    %c0_426 = arith.constant 0 : index
    %c0_427 = arith.constant 0 : index
    %734 = vector.load %arg2[%c28, %c0_426, %c0_427] : memref<32x8x128xf32, #tpu.memory_space<vmem>>, vector<1x8x128xf32>
    %735 = vector.shape_cast %734 : vector<1x8x128xf32> to vector<8x128xf32>
    %cst_428 = arith.constant dense<0.000000e+00> : vector<8x128xf32>
    %736 = tpu.matmul %732, %3, %cst_428 {dimension_numbers = #tpu.dot_dimension_numbers<[1], [0], [0], [1], [0, 0, 1, 1], [], []>} : vector<8x32xf32>, vector<32x128xf32>, vector<8x128xf32> -> vector<8x128xf32>
    %737 = arith.addf %735, %736 : vector<8x128xf32>
    %738 = arith.negf %737 : vector<8x128xf32>
    %739 = math.exp %738 : vector<8x128xf32>
    %cst_429 = arith.constant 1.000000e+00 : f32
    %740 = vector.broadcast %cst_429 : f32 to vector<8x128xf32>
    %741 = arith.addf %740, %739 : vector<8x128xf32>
    %742 = arith.divf %740, %741 : vector<8x128xf32>
    %743 = math.tanh %737 : vector<8x128xf32>
    %744 = vector.extract_strided_slice %742 {offsets = [0, 0], sizes = [8, 32], strides = [1, 1]} : vector<8x128xf32> to vector<8x32xf32>
    %745 = vector.extract_strided_slice %742 {offsets = [0, 32], sizes = [8, 32], strides = [1, 1]} : vector<8x128xf32> to vector<8x32xf32>
    %746 = vector.extract_strided_slice %743 {offsets = [0, 64], sizes = [8, 32], strides = [1, 1]} : vector<8x128xf32> to vector<8x32xf32>
    %747 = vector.extract_strided_slice %742 {offsets = [0, 96], sizes = [8, 32], strides = [1, 1]} : vector<8x128xf32> to vector<8x32xf32>
    %748 = arith.mulf %745, %733 : vector<8x32xf32>
    %749 = arith.mulf %744, %746 : vector<8x32xf32>
    %750 = arith.addf %748, %749 : vector<8x32xf32>
    %751 = math.tanh %750 : vector<8x32xf32>
    %752 = arith.mulf %747, %751 : vector<8x32xf32>
    %c0_430 = arith.constant 0 : index
    %c0_431 = arith.constant 0 : index
    %753 = vector.load %arg10[%c0_430, %c0_431] : memref<8x32xf32, #tpu.memory_space<vmem>>, vector<8x32xf32>
    tpu.vector_store %arg10[%c0_430, %c0_431], %750 {strides = array<i32>} : memref<8x32xf32, #tpu.memory_space<vmem>>, vector<8x32xf32>,
    %c0_432 = arith.constant 0 : index
    %c0_433 = arith.constant 0 : index
    %754 = vector.load %arg9[%c0_432, %c0_433] : memref<8x32xf32, #tpu.memory_space<vmem>>, vector<8x32xf32>
    tpu.vector_store %arg9[%c0_432, %c0_433], %752 {strides = array<i32>} : memref<8x32xf32, #tpu.memory_space<vmem>>, vector<8x32xf32>,
    %c28_434 = arith.constant 28 : index
    %c0_435 = arith.constant 0 : index
    %c0_436 = arith.constant 0 : index
    %755 = vector.load %arg6[%c28_434, %c0_435, %c0_436] : memref<32x8x32xf32, #tpu.memory_space<vmem>>, vector<1x8x32xf32>
    %756 = vector.shape_cast %755 : vector<1x8x32xf32> to vector<8x32xf32>
    %757 = vector.shape_cast %752 : vector<8x32xf32> to vector<1x8x32xf32>
    tpu.vector_store %arg6[%c28_434, %c0_435, %c0_436], %757 {strides = array<i32>} : memref<32x8x32xf32, #tpu.memory_space<vmem>>, vector<1x8x32xf32>,
    %c0_437 = arith.constant 0 : index
    %c0_438 = arith.constant 0 : index
    %758 = vector.load %arg9[%c0_437, %c0_438] : memref<8x32xf32, #tpu.memory_space<vmem>>, vector<8x32xf32>
    %c0_439 = arith.constant 0 : index
    %c0_440 = arith.constant 0 : index
    %759 = vector.load %arg10[%c0_439, %c0_440] : memref<8x32xf32, #tpu.memory_space<vmem>>, vector<8x32xf32>
    %c29 = arith.constant 29 : index
    %c0_441 = arith.constant 0 : index
    %c0_442 = arith.constant 0 : index
    %760 = vector.load %arg2[%c29, %c0_441, %c0_442] : memref<32x8x128xf32, #tpu.memory_space<vmem>>, vector<1x8x128xf32>
    %761 = vector.shape_cast %760 : vector<1x8x128xf32> to vector<8x128xf32>
    %cst_443 = arith.constant dense<0.000000e+00> : vector<8x128xf32>
    %762 = tpu.matmul %758, %3, %cst_443 {dimension_numbers = #tpu.dot_dimension_numbers<[1], [0], [0], [1], [0, 0, 1, 1], [], []>} : vector<8x32xf32>, vector<32x128xf32>, vector<8x128xf32> -> vector<8x128xf32>
    %763 = arith.addf %761, %762 : vector<8x128xf32>
    %764 = arith.negf %763 : vector<8x128xf32>
    %765 = math.exp %764 : vector<8x128xf32>
    %cst_444 = arith.constant 1.000000e+00 : f32
    %766 = vector.broadcast %cst_444 : f32 to vector<8x128xf32>
    %767 = arith.addf %766, %765 : vector<8x128xf32>
    %768 = arith.divf %766, %767 : vector<8x128xf32>
    %769 = math.tanh %763 : vector<8x128xf32>
    %770 = vector.extract_strided_slice %768 {offsets = [0, 0], sizes = [8, 32], strides = [1, 1]} : vector<8x128xf32> to vector<8x32xf32>
    %771 = vector.extract_strided_slice %768 {offsets = [0, 32], sizes = [8, 32], strides = [1, 1]} : vector<8x128xf32> to vector<8x32xf32>
    %772 = vector.extract_strided_slice %769 {offsets = [0, 64], sizes = [8, 32], strides = [1, 1]} : vector<8x128xf32> to vector<8x32xf32>
    %773 = vector.extract_strided_slice %768 {offsets = [0, 96], sizes = [8, 32], strides = [1, 1]} : vector<8x128xf32> to vector<8x32xf32>
    %774 = arith.mulf %771, %759 : vector<8x32xf32>
    %775 = arith.mulf %770, %772 : vector<8x32xf32>
    %776 = arith.addf %774, %775 : vector<8x32xf32>
    %777 = math.tanh %776 : vector<8x32xf32>
    %778 = arith.mulf %773, %777 : vector<8x32xf32>
    %c0_445 = arith.constant 0 : index
    %c0_446 = arith.constant 0 : index
    %779 = vector.load %arg10[%c0_445, %c0_446] : memref<8x32xf32, #tpu.memory_space<vmem>>, vector<8x32xf32>
    tpu.vector_store %arg10[%c0_445, %c0_446], %776 {strides = array<i32>} : memref<8x32xf32, #tpu.memory_space<vmem>>, vector<8x32xf32>,
    %c0_447 = arith.constant 0 : index
    %c0_448 = arith.constant 0 : index
    %780 = vector.load %arg9[%c0_447, %c0_448] : memref<8x32xf32, #tpu.memory_space<vmem>>, vector<8x32xf32>
    tpu.vector_store %arg9[%c0_447, %c0_448], %778 {strides = array<i32>} : memref<8x32xf32, #tpu.memory_space<vmem>>, vector<8x32xf32>,
    %c29_449 = arith.constant 29 : index
    %c0_450 = arith.constant 0 : index
    %c0_451 = arith.constant 0 : index
    %781 = vector.load %arg6[%c29_449, %c0_450, %c0_451] : memref<32x8x32xf32, #tpu.memory_space<vmem>>, vector<1x8x32xf32>
    %782 = vector.shape_cast %781 : vector<1x8x32xf32> to vector<8x32xf32>
    %783 = vector.shape_cast %778 : vector<8x32xf32> to vector<1x8x32xf32>
    tpu.vector_store %arg6[%c29_449, %c0_450, %c0_451], %783 {strides = array<i32>} : memref<32x8x32xf32, #tpu.memory_space<vmem>>, vector<1x8x32xf32>,
    %c0_452 = arith.constant 0 : index
    %c0_453 = arith.constant 0 : index
    %784 = vector.load %arg9[%c0_452, %c0_453] : memref<8x32xf32, #tpu.memory_space<vmem>>, vector<8x32xf32>
    %c0_454 = arith.constant 0 : index
    %c0_455 = arith.constant 0 : index
    %785 = vector.load %arg10[%c0_454, %c0_455] : memref<8x32xf32, #tpu.memory_space<vmem>>, vector<8x32xf32>
    %c30 = arith.constant 30 : index
    %c0_456 = arith.constant 0 : index
    %c0_457 = arith.constant 0 : index
    %786 = vector.load %arg2[%c30, %c0_456, %c0_457] : memref<32x8x128xf32, #tpu.memory_space<vmem>>, vector<1x8x128xf32>
    %787 = vector.shape_cast %786 : vector<1x8x128xf32> to vector<8x128xf32>
    %cst_458 = arith.constant dense<0.000000e+00> : vector<8x128xf32>
    %788 = tpu.matmul %784, %3, %cst_458 {dimension_numbers = #tpu.dot_dimension_numbers<[1], [0], [0], [1], [0, 0, 1, 1], [], []>} : vector<8x32xf32>, vector<32x128xf32>, vector<8x128xf32> -> vector<8x128xf32>
    %789 = arith.addf %787, %788 : vector<8x128xf32>
    %790 = arith.negf %789 : vector<8x128xf32>
    %791 = math.exp %790 : vector<8x128xf32>
    %cst_459 = arith.constant 1.000000e+00 : f32
    %792 = vector.broadcast %cst_459 : f32 to vector<8x128xf32>
    %793 = arith.addf %792, %791 : vector<8x128xf32>
    %794 = arith.divf %792, %793 : vector<8x128xf32>
    %795 = math.tanh %789 : vector<8x128xf32>
    %796 = vector.extract_strided_slice %794 {offsets = [0, 0], sizes = [8, 32], strides = [1, 1]} : vector<8x128xf32> to vector<8x32xf32>
    %797 = vector.extract_strided_slice %794 {offsets = [0, 32], sizes = [8, 32], strides = [1, 1]} : vector<8x128xf32> to vector<8x32xf32>
    %798 = vector.extract_strided_slice %795 {offsets = [0, 64], sizes = [8, 32], strides = [1, 1]} : vector<8x128xf32> to vector<8x32xf32>
    %799 = vector.extract_strided_slice %794 {offsets = [0, 96], sizes = [8, 32], strides = [1, 1]} : vector<8x128xf32> to vector<8x32xf32>
    %800 = arith.mulf %797, %785 : vector<8x32xf32>
    %801 = arith.mulf %796, %798 : vector<8x32xf32>
    %802 = arith.addf %800, %801 : vector<8x32xf32>
    %803 = math.tanh %802 : vector<8x32xf32>
    %804 = arith.mulf %799, %803 : vector<8x32xf32>
    %c0_460 = arith.constant 0 : index
    %c0_461 = arith.constant 0 : index
    %805 = vector.load %arg10[%c0_460, %c0_461] : memref<8x32xf32, #tpu.memory_space<vmem>>, vector<8x32xf32>
    tpu.vector_store %arg10[%c0_460, %c0_461], %802 {strides = array<i32>} : memref<8x32xf32, #tpu.memory_space<vmem>>, vector<8x32xf32>,
    %c0_462 = arith.constant 0 : index
    %c0_463 = arith.constant 0 : index
    %806 = vector.load %arg9[%c0_462, %c0_463] : memref<8x32xf32, #tpu.memory_space<vmem>>, vector<8x32xf32>
    tpu.vector_store %arg9[%c0_462, %c0_463], %804 {strides = array<i32>} : memref<8x32xf32, #tpu.memory_space<vmem>>, vector<8x32xf32>,
    %c30_464 = arith.constant 30 : index
    %c0_465 = arith.constant 0 : index
    %c0_466 = arith.constant 0 : index
    %807 = vector.load %arg6[%c30_464, %c0_465, %c0_466] : memref<32x8x32xf32, #tpu.memory_space<vmem>>, vector<1x8x32xf32>
    %808 = vector.shape_cast %807 : vector<1x8x32xf32> to vector<8x32xf32>
    %809 = vector.shape_cast %804 : vector<8x32xf32> to vector<1x8x32xf32>
    tpu.vector_store %arg6[%c30_464, %c0_465, %c0_466], %809 {strides = array<i32>} : memref<32x8x32xf32, #tpu.memory_space<vmem>>, vector<1x8x32xf32>,
    %c0_467 = arith.constant 0 : index
    %c0_468 = arith.constant 0 : index
    %810 = vector.load %arg9[%c0_467, %c0_468] : memref<8x32xf32, #tpu.memory_space<vmem>>, vector<8x32xf32>
    %c0_469 = arith.constant 0 : index
    %c0_470 = arith.constant 0 : index
    %811 = vector.load %arg10[%c0_469, %c0_470] : memref<8x32xf32, #tpu.memory_space<vmem>>, vector<8x32xf32>
    %c31 = arith.constant 31 : index
    %c0_471 = arith.constant 0 : index
    %c0_472 = arith.constant 0 : index
    %812 = vector.load %arg2[%c31, %c0_471, %c0_472] : memref<32x8x128xf32, #tpu.memory_space<vmem>>, vector<1x8x128xf32>
    %813 = vector.shape_cast %812 : vector<1x8x128xf32> to vector<8x128xf32>
    %cst_473 = arith.constant dense<0.000000e+00> : vector<8x128xf32>
    %814 = tpu.matmul %810, %3, %cst_473 {dimension_numbers = #tpu.dot_dimension_numbers<[1], [0], [0], [1], [0, 0, 1, 1], [], []>} : vector<8x32xf32>, vector<32x128xf32>, vector<8x128xf32> -> vector<8x128xf32>
    %815 = arith.addf %813, %814 : vector<8x128xf32>
    %816 = arith.negf %815 : vector<8x128xf32>
    %817 = math.exp %816 : vector<8x128xf32>
    %cst_474 = arith.constant 1.000000e+00 : f32
    %818 = vector.broadcast %cst_474 : f32 to vector<8x128xf32>
    %819 = arith.addf %818, %817 : vector<8x128xf32>
    %820 = arith.divf %818, %819 : vector<8x128xf32>
    %821 = math.tanh %815 : vector<8x128xf32>
    %822 = vector.extract_strided_slice %820 {offsets = [0, 0], sizes = [8, 32], strides = [1, 1]} : vector<8x128xf32> to vector<8x32xf32>
    %823 = vector.extract_strided_slice %820 {offsets = [0, 32], sizes = [8, 32], strides = [1, 1]} : vector<8x128xf32> to vector<8x32xf32>
    %824 = vector.extract_strided_slice %821 {offsets = [0, 64], sizes = [8, 32], strides = [1, 1]} : vector<8x128xf32> to vector<8x32xf32>
    %825 = vector.extract_strided_slice %820 {offsets = [0, 96], sizes = [8, 32], strides = [1, 1]} : vector<8x128xf32> to vector<8x32xf32>
    %826 = arith.mulf %823, %811 : vector<8x32xf32>
    %827 = arith.mulf %822, %824 : vector<8x32xf32>
    %828 = arith.addf %826, %827 : vector<8x32xf32>
    %829 = math.tanh %828 : vector<8x32xf32>
    %830 = arith.mulf %825, %829 : vector<8x32xf32>
    %c0_475 = arith.constant 0 : index
    %c0_476 = arith.constant 0 : index
    %831 = vector.load %arg10[%c0_475, %c0_476] : memref<8x32xf32, #tpu.memory_space<vmem>>, vector<8x32xf32>
    tpu.vector_store %arg10[%c0_475, %c0_476], %828 {strides = array<i32>} : memref<8x32xf32, #tpu.memory_space<vmem>>, vector<8x32xf32>,
    %c0_477 = arith.constant 0 : index
    %c0_478 = arith.constant 0 : index
    %832 = vector.load %arg9[%c0_477, %c0_478] : memref<8x32xf32, #tpu.memory_space<vmem>>, vector<8x32xf32>
    tpu.vector_store %arg9[%c0_477, %c0_478], %830 {strides = array<i32>} : memref<8x32xf32, #tpu.memory_space<vmem>>, vector<8x32xf32>,
    %c31_479 = arith.constant 31 : index
    %c0_480 = arith.constant 0 : index
    %c0_481 = arith.constant 0 : index
    %833 = vector.load %arg6[%c31_479, %c0_480, %c0_481] : memref<32x8x32xf32, #tpu.memory_space<vmem>>, vector<1x8x32xf32>
    %834 = vector.shape_cast %833 : vector<1x8x32xf32> to vector<8x32xf32>
    %835 = vector.shape_cast %830 : vector<8x32xf32> to vector<1x8x32xf32>
    tpu.vector_store %arg6[%c31_479, %c0_480, %c0_481], %835 {strides = array<i32>} : memref<32x8x32xf32, #tpu.memory_space<vmem>>, vector<1x8x32xf32>,
    %c0_i32_482 = arith.constant 0 : i32
    %836 = arith.cmpi eq, %arg1, %c0_i32_482 : i32
    %837 = arith.extui %836 : i1 to i32
    %c0_i32_483 = arith.constant 0 : i32
    %838 = arith.cmpi ne, %837, %c0_i32_483 : i32
    scf.if %838 {
      %c0_484 = arith.constant 0 : index
      %c0_485 = arith.constant 0 : index
      %839 = vector.load %arg9[%c0_484, %c0_485] : memref<8x32xf32, #tpu.memory_space<vmem>>, vector<8x32xf32>
      %c0_486 = arith.constant 0 : index
      %c0_487 = arith.constant 0 : index
      %840 = vector.load %arg7[%c0_486, %c0_487] : memref<8x32xf32, #tpu.memory_space<vmem>>, vector<8x32xf32>
      tpu.vector_store %arg7[%c0_486, %c0_487], %839 {strides = array<i32>} : memref<8x32xf32, #tpu.memory_space<vmem>>, vector<8x32xf32>,
      %c0_488 = arith.constant 0 : index
      %c0_489 = arith.constant 0 : index
      %841 = vector.load %arg10[%c0_488, %c0_489] : memref<8x32xf32, #tpu.memory_space<vmem>>, vector<8x32xf32>
      %c0_490 = arith.constant 0 : index
      %c0_491 = arith.constant 0 : index
      %842 = vector.load %arg8[%c0_490, %c0_491] : memref<8x32xf32, #tpu.memory_space<vmem>>, vector<8x32xf32>
      tpu.vector_store %arg8[%c0_490, %c0_491], %841 {strides = array<i32>} : memref<8x32xf32, #tpu.memory_space<vmem>>, vector<8x32xf32>,
    } else {
    }
    return
  }
  func.func @transform_0(%arg0: i32, %arg1: i32) -> (i32, i32, i32) {
    %c0_i32 = arith.constant 0 : i32
    %c0_i32_0 = arith.constant 0 : i32
    return %arg1, %arg0, %c0_i32 : i32, i32, i32
  }
  func.func @transform_1(%arg0: i32, %arg1: i32) -> (i32, i32) {
    %c0_i32 = arith.constant 0 : i32
    %c0_i32_0 = arith.constant 0 : i32
    return %arg0, %c0_i32 : i32, i32
  }
  func.func @transform_2(%arg0: i32, %arg1: i32) -> (i32, i32) {
    %c0_i32 = arith.constant 0 : i32
    %c0_i32_0 = arith.constant 0 : i32
    return %arg0, %c0_i32 : i32, i32
  }
  func.func @transform_3(%arg0: i32, %arg1: i32) -> (i32, i32) {
    %c0_i32 = arith.constant 0 : i32
    %c0_i32_0 = arith.constant 0 : i32
    %c0_i32_1 = arith.constant 0 : i32
    return %c0_i32, %c0_i32_0 : i32, i32
  }
  func.func @transform_4(%arg0: i32, %arg1: i32) -> (i32, i32, i32) {
    %c0_i32 = arith.constant 0 : i32
    %c0_i32_0 = arith.constant 0 : i32
    return %arg1, %arg0, %c0_i32 : i32, i32, i32
  }
  func.func @transform_5(%arg0: i32, %arg1: i32) -> (i32, i32) {
    %c0_i32 = arith.constant 0 : i32
    %c0_i32_0 = arith.constant 0 : i32
    return %arg0, %c0_i32 : i32, i32
  }
  func.func @transform_6(%arg0: i32, %arg1: i32) -> (i32, i32) {
    %c0_i32 = arith.constant 0 : i32
    %c0_i32_0 = arith.constant 0 : i32
    return %arg0, %c0_i32 : i32, i32
  }
}

module attributes {stable_mosaic.version = 11 : i64} {
  func.func @_dec_logsoftmax_kernel(%arg0: i32, %arg1: i32, %arg2: memref<256x32xf32, #tpu.memory_space<vmem>>, %arg3: memref<32x128xf32, #tpu.memory_space<vmem>>, %arg4: memref<1x128xf32, #tpu.memory_space<vmem>>, %arg5: memref<256x384xf32, #tpu.memory_space<vmem>>, %arg6: memref<256x1xf32, #tpu.memory_space<vmem>>, %arg7: memref<256x1xf32, #tpu.memory_space<vmem>>) attributes {dimension_semantics = [#tpu.dimension_semantics<parallel>, #tpu.dimension_semantics<arbitrary>], iteration_bounds = array<i64: 1, 3>, scalar_prefetch = 0 : i64, scratch_operands = 2 : i64, tpu.core_type = #tpu.core_type<tc>, window_params = [{transform_indices = @transform_0, window_bounds = array<i64: 256, 32>}, {transform_indices = @transform_1, window_bounds = array<i64: 32, 128>}, {transform_indices = @transform_2, window_bounds = array<i64: 1, 128>}, {transform_indices = @transform_3, window_bounds = array<i64: 256, 384>}]} {
    %c0_i32 = arith.constant 0 : i32
    %0 = arith.cmpi eq, %arg1, %c0_i32 : i32
    %1 = arith.extui %0 : i1 to i32
    %c0_i32_0 = arith.constant 0 : i32
    %2 = arith.cmpi ne, %1, %c0_i32_0 : i32
    scf.if %2 {
      %cst_18 = arith.constant 0xFF800000 : f32
      %32 = vector.broadcast %cst_18 : f32 to vector<256x1xf32>
      %c0_19 = arith.constant 0 : index
      %c0_20 = arith.constant 0 : index
      %33 = vector.load %arg6[%c0_19, %c0_20] : memref<256x1xf32, #tpu.memory_space<vmem>>, vector<256x1xf32>
      tpu.vector_store %arg6[%c0_19, %c0_20], %32 {strides = array<i32>} : memref<256x1xf32, #tpu.memory_space<vmem>>, vector<256x1xf32>,
      %cst_21 = arith.constant 0.000000e+00 : f32
      %34 = vector.broadcast %cst_21 : f32 to vector<256x1xf32>
      %c0_22 = arith.constant 0 : index
      %c0_23 = arith.constant 0 : index
      %35 = vector.load %arg7[%c0_22, %c0_23] : memref<256x1xf32, #tpu.memory_space<vmem>>, vector<256x1xf32>
      tpu.vector_store %arg7[%c0_22, %c0_23], %34 {strides = array<i32>} : memref<256x1xf32, #tpu.memory_space<vmem>>, vector<256x1xf32>,
    } else {
    }
    %c0 = arith.constant 0 : index
    %c0_1 = arith.constant 0 : index
    %3 = vector.load %arg2[%c0, %c0_1] : memref<256x32xf32, #tpu.memory_space<vmem>>, vector<256x32xf32>
    %c0_2 = arith.constant 0 : index
    %c0_3 = arith.constant 0 : index
    %4 = vector.load %arg3[%c0_2, %c0_3] : memref<32x128xf32, #tpu.memory_space<vmem>>, vector<32x128xf32>
    %cst = arith.constant dense<0.000000e+00> : vector<256x128xf32>
    %5 = tpu.matmul %3, %4, %cst {dimension_numbers = #tpu.dot_dimension_numbers<[1], [0], [0], [1], [0, 0, 1, 1], [], []>} : vector<256x32xf32>, vector<32x128xf32>, vector<256x128xf32> -> vector<256x128xf32>
    %c0_4 = arith.constant 0 : index
    %c0_5 = arith.constant 0 : index
    %6 = vector.load %arg4[%c0_4, %c0_5] : memref<1x128xf32, #tpu.memory_space<vmem>>, vector<1x128xf32>
    %7 = vector.broadcast %6 : vector<1x128xf32> to vector<256x128xf32>
    %8 = arith.addf %5, %7 : vector<256x128xf32>
    %c128_i32 = arith.constant 128 : i32
    %9 = arith.muli %arg1, %c128_i32 : i32
    %10 = tpu.assume_multiple %9, 128 : i32
    %c0_6 = arith.constant 0 : index
    %11 = arith.index_cast %10 : i32 to index
    %12 = vector.load %arg5[%c0_6, %11] : memref<256x384xf32, #tpu.memory_space<vmem>>, vector<256x128xf32>
    tpu.vector_store %arg5[%c0_6, %11], %8 {strides = array<i32>} : memref<256x384xf32, #tpu.memory_space<vmem>>, vector<256x128xf32>,
    %c0_7 = arith.constant 0 : index
    %c0_8 = arith.constant 0 : index
    %13 = vector.load %arg6[%c0_7, %c0_8] : memref<256x1xf32, #tpu.memory_space<vmem>>, vector<256x1xf32>
    %cst_9 = arith.constant dense<0xFF800000> : vector<256xf32>
    %14 = vector.multi_reduction <maximumf>, %8, %cst_9 [1] : vector<256x128xf32> to vector<256xf32>
    %15 = vector.shape_cast %14 : vector<256xf32> to vector<256x1xf32>
    %16 = arith.maximumf %13, %15 : vector<256x1xf32>
    %c0_10 = arith.constant 0 : index
    %c0_11 = arith.constant 0 : index
    %17 = vector.load %arg7[%c0_10, %c0_11] : memref<256x1xf32, #tpu.memory_space<vmem>>, vector<256x1xf32>
    %18 = arith.subf %13, %16 : vector<256x1xf32>
    %19 = math.exp %18 : vector<256x1xf32>
    %20 = arith.mulf %17, %19 : vector<256x1xf32>
    %21 = vector.broadcast %16 : vector<256x1xf32> to vector<256x128xf32>
    %22 = arith.subf %8, %21 : vector<256x128xf32>
    %23 = math.exp %22 : vector<256x128xf32>
    %cst_12 = arith.constant dense<0.000000e+00> : vector<256xf32>
    %24 = vector.multi_reduction <add>, %23, %cst_12 [1] : vector<256x128xf32> to vector<256xf32>
    %25 = vector.shape_cast %24 : vector<256xf32> to vector<256x1xf32>
    %26 = arith.addf %20, %25 : vector<256x1xf32>
    %c0_13 = arith.constant 0 : index
    %c0_14 = arith.constant 0 : index
    %27 = vector.load %arg7[%c0_13, %c0_14] : memref<256x1xf32, #tpu.memory_space<vmem>>, vector<256x1xf32>
    tpu.vector_store %arg7[%c0_13, %c0_14], %26 {strides = array<i32>} : memref<256x1xf32, #tpu.memory_space<vmem>>, vector<256x1xf32>,
    %c0_15 = arith.constant 0 : index
    %c0_16 = arith.constant 0 : index
    %28 = vector.load %arg6[%c0_15, %c0_16] : memref<256x1xf32, #tpu.memory_space<vmem>>, vector<256x1xf32>
    tpu.vector_store %arg6[%c0_15, %c0_16], %16 {strides = array<i32>} : memref<256x1xf32, #tpu.memory_space<vmem>>, vector<256x1xf32>,
    %c2_i32 = arith.constant 2 : i32
    %29 = arith.cmpi eq, %arg1, %c2_i32 : i32
    %30 = arith.extui %29 : i1 to i32
    %c0_i32_17 = arith.constant 0 : i32
    %31 = arith.cmpi ne, %30, %c0_i32_17 : i32
    scf.if %31 {
      %c0_18 = arith.constant 0 : index
      %c0_19 = arith.constant 0 : index
      %32 = vector.load %arg6[%c0_18, %c0_19] : memref<256x1xf32, #tpu.memory_space<vmem>>, vector<256x1xf32>
      %c0_20 = arith.constant 0 : index
      %c0_21 = arith.constant 0 : index
      %33 = vector.load %arg7[%c0_20, %c0_21] : memref<256x1xf32, #tpu.memory_space<vmem>>, vector<256x1xf32>
      %34 = math.log %33 : vector<256x1xf32>
      %35 = arith.addf %32, %34 : vector<256x1xf32>
      %c0_22 = arith.constant 0 : index
      %c0_23 = arith.constant 0 : index
      %36 = vector.load %arg5[%c0_22, %c0_23] : memref<256x384xf32, #tpu.memory_space<vmem>>, vector<256x384xf32>
      %37 = vector.broadcast %35 : vector<256x1xf32> to vector<256x384xf32>
      %38 = arith.subf %36, %37 : vector<256x384xf32>
      %c0_24 = arith.constant 0 : index
      %c0_25 = arith.constant 0 : index
      %39 = vector.load %arg5[%c0_24, %c0_25] : memref<256x384xf32, #tpu.memory_space<vmem>>, vector<256x384xf32>
      tpu.vector_store %arg5[%c0_24, %c0_25], %38 {strides = array<i32>} : memref<256x384xf32, #tpu.memory_space<vmem>>, vector<256x384xf32>,
    } else {
    }
    return
  }
  func.func @transform_0(%arg0: i32, %arg1: i32) -> (i32, i32) {
    %c0_i32 = arith.constant 0 : i32
    %c0_i32_0 = arith.constant 0 : i32
    return %arg0, %c0_i32 : i32, i32
  }
  func.func @transform_1(%arg0: i32, %arg1: i32) -> (i32, i32) {
    %c0_i32 = arith.constant 0 : i32
    %c0_i32_0 = arith.constant 0 : i32
    return %c0_i32, %arg1 : i32, i32
  }
  func.func @transform_2(%arg0: i32, %arg1: i32) -> (i32, i32) {
    %c0_i32 = arith.constant 0 : i32
    %c0_i32_0 = arith.constant 0 : i32
    return %c0_i32, %arg1 : i32, i32
  }
  func.func @transform_3(%arg0: i32, %arg1: i32) -> (i32, i32) {
    %c0_i32 = arith.constant 0 : i32
    %c0_i32_0 = arith.constant 0 : i32
    return %arg0, %c0_i32 : i32, i32
  }
}

</mosaic_0001>

<bundles_post_ra>
// kernel: my_rnn_model_forward.5
= control target key start
LH: loop header
LB: loop body
LE: loop exit
PB: predicated region body
PF: predicated region fallthrough
CT: control target
= control target key end

     0   :  { %vm54_vm0 = vcmask 261120   ;;  %s638_s1 = inlined_call_operand.vmem [shape: f32[32,128], index: 1, kind: input, shape index: {}]   ;;  %s639_s0 = inlined_call_operand.vmem [shape: f32[256,32], index: 0, kind: input, shape index: {}]   ;;  %s640_s2 = inlined_call_operand.vmem [shape: f32[1,128], index: 2, kind: input, shape index: {}]   ;;  %s641_s3 = inlined_call_operand.vmem [shape: f32[256,128], index: 3, kind: output, shape index: {}]  }
   0x1   :  { %v49_v0 = vld [vmem:[%s638_s1 + $0x18] sm:$0xff]  ;;  %v48_v1 = vld [vmem:[%s638_s1 + $0x10] sm:$0xff]  ;;  %v47_v2 = vld [vmem:[%s638_s1 + $0x8] sm:$0xff] }
   0x2   :  { %333 = vmatpush.msra.mxu2 %v49_v0  ;;  %334 = vmatpush.msra.mxu3 %v49_v0  ;;  %v46_v3 = vld [vmem:[%s638_s1] sm:$0xff]  ;;  %v31_v8 = vld [vmem:[%s639_s0 + $0x88] sm:$0xff]  ;;  %v32_v12 = vld [vmem:[%s639_s0 + $0x90] sm:$0xff] }
   0x3   :  { %163 = vmatpush.msra.mxu0 %v49_v0  ;;  %332 = vmatpush.msra.mxu1 %v49_v0  ;;  %v30_v4 = vld [vmem:[%s639_s0 + $0x80] sm:$0xff]  ;;  %v39_v9 = vld [vmem:[%s639_s0 + $0xc8] sm:$0xff]  ;;  %v40_v13 = vld [vmem:[%s639_s0 + $0xd0] sm:$0xff] }
   0x4   :  { %336 = vmatpush.msra.mxu2 %v48_v1  ;;  %337 = vmatpush.msra.mxu3 %v48_v1  ;;  %v38_v5 = vld [vmem:[%s639_s0 + $0xc0] sm:$0xff]  ;;  %v15_v10 = vld [vmem:[%s639_s0 + $0x8] sm:$0xff]  ;;  %v16_v14 = vld [vmem:[%s639_s0 + $0x10] sm:$0xff] }
   0x5   :  { %164 = vmatpush.msra.mxu0 %v48_v1  ;;  %335 = vmatpush.msra.mxu1 %v48_v1  ;;  %v14_v6 = vld [vmem:[%s639_s0] sm:$0xff]  ;;  %v23_v11 = vld [vmem:[%s639_s0 + $0x48] sm:$0xff]  ;;  %v24_v15 = vld [vmem:[%s639_s0 + $0x50] sm:$0xff] }
   0x6   :  { %339 = vmatpush.msra.mxu2 %v47_v2  ;;  %340 = vmatpush.msra.mxu3 %v47_v2  ;;  %v22_v7 = vld [vmem:[%s639_s0 + $0x40] sm:$0xff]  ;;  %v33_v16 = vld [vmem:[%s639_s0 + $0x98] sm:$0xff]  ;;  %v35_v24 = vld [vmem:[%s639_s0 + $0xa8] sm:$0xff] }
   0x7   :  { %165 = vmatpush.msra.mxu0 %v47_v2  ;;  %338 = vmatpush.msra.mxu1 %v47_v2  ;;  %v41_v17 = vld [vmem:[%s639_s0 + $0xd8] sm:$0xff]  ;;  %v34_v20 = vld [vmem:[%s639_s0 + $0xa0] sm:$0xff]  ;;  %v43_v25 = vld [vmem:[%s639_s0 + $0xe8] sm:$0xff] }
   0x8   :  { %342 = vmatpush.msra.mxu2 %v46_v3  ;;  %343 = vmatpush.msra.mxu3 %v46_v3  ;;  %v17_v18 = vld [vmem:[%s639_s0 + $0x18] sm:$0xff]  ;;  %v42_v21 = vld [vmem:[%s639_s0 + $0xe0] sm:$0xff]  ;;  %v19_v26 = vld [vmem:[%s639_s0 + $0x28] sm:$0xff] }
   0x9   :  { %316 = vmatmul.msk.f32.vlgmr.msra.gmra.mxu2 %vm54_vm0, %v30_v4  ;;  %324 = vmatmul.msk.f32.vlgmr.msra.gmra.mxu3 %vm54_vm0, %v38_v5  ;;  %v25_v19 = vld [vmem:[%s639_s0 + $0x58] sm:$0xff]  ;;  %v18_v22 = vld [vmem:[%s639_s0 + $0x20] sm:$0xff]  ;;  %v27_v27 = vld [vmem:[%s639_s0 + $0x68] sm:$0xff] }
   0xa   :  { %166 = vmatpush.msra.mxu0 %v46_v3  ;;  %341 = vmatpush.msra.mxu1 %v46_v3  ;;  %v26_v23 = vld [vmem:[%s639_s0 + $0x60] sm:$0xff]  ;;  %v36_v28 = vld [vmem:[%s639_s0 + $0xb0] sm:$0xff]  ;;  %v37_v32 = vld [vmem:[%s639_s0 + $0xb8] sm:$0xff] }
   0xb   :  { %300 = vmatmul.msk.f32.vlgmr.msra.gmra.mxu0 %vm54_vm0, %v14_v6  ;;  %308 = vmatmul.msk.f32.vlgmr.msra.gmra.mxu1 %vm54_vm0, %v22_v7  ;;  %v44_v29 = vld [vmem:[%s639_s0 + $0xf0] sm:$0xff]  ;;  %v45_v33 = vld [vmem:[%s639_s0 + $0xf8] sm:$0xff]  ;;  %v508_v36 = vld [vmem:[%s640_s2] ss:$0 sm:$0xff] }
   0xc   :  { %v20_v30 = vld [vmem:[%s639_s0 + $0x30] sm:$0xff]  ;;  %v21_v34 = vld [vmem:[%s639_s0 + $0x38] sm:$0xff] }
   0xd   :  { %v28_v31 = vld [vmem:[%s639_s0 + $0x70] sm:$0xff]  ;;  %v29_v35 = vld [vmem:[%s639_s0 + $0x78] sm:$0xff] }
  0x11   :  { %317 = vmatmul.msk.f32.gmra.mxu2 %vm54_vm0, %v31_v8  ;;  %325 = vmatmul.msk.f32.gmra.mxu3 %vm54_vm0, %v39_v9 }
  0x13   :  { %301 = vmatmul.msk.f32.gmra.mxu0 %vm54_vm0, %v15_v10  ;;  %309 = vmatmul.msk.f32.gmra.mxu1 %vm54_vm0, %v23_v11 }
  0x19   :  { %318 = vmatmul.msk.f32.gmra.mxu2 %vm54_vm0, %v32_v12  ;;  %326 = vmatmul.msk.f32.gmra.mxu3 %vm54_vm0, %v40_v13 }
  0x1b   :  { %302 = vmatmul.msk.f32.gmra.mxu0 %vm54_vm0, %v16_v14  ;;  %310 = vmatmul.msk.f32.gmra.mxu1 %vm54_vm0, %v24_v15 }
  0x21   :  { %319 = vmatmul.msk.f32.gmra.mxu2 %vm54_vm0, %v33_v16  ;;  %327 = vmatmul.msk.f32.gmra.mxu3 %vm54_vm0, %v41_v17 }
  0x23   :  { %303 = vmatmul.msk.f32.gmra.mxu0 %vm54_vm0, %v17_v18  ;;  %311 = vmatmul.msk.f32.gmra.mxu1 %vm54_vm0, %v25_v19 }
  0x29   :  { %320 = vmatmul.msk.f32.gmra.mxu2 %vm54_vm0, %v34_v20  ;;  %328 = vmatmul.msk.f32.gmra.mxu3 %vm54_vm0, %v42_v21 }
  0x2b   :  { %304 = vmatmul.msk.f32.gmra.mxu0 %vm54_vm0, %v18_v22  ;;  %312 = vmatmul.msk.f32.gmra.mxu1 %vm54_vm0, %v26_v23 }
  0x31   :  { %321 = vmatmul.msk.f32.gmra.mxu2 %vm54_vm0, %v35_v24  ;;  %329 = vmatmul.msk.f32.gmra.mxu3 %vm54_vm0, %v43_v25 }
  0x33   :  { %305 = vmatmul.msk.f32.gmra.mxu0 %vm54_vm0, %v19_v26  ;;  %313 = vmatmul.msk.f32.gmra.mxu1 %vm54_vm0, %v27_v27 }
  0x39   :  { %322 = vmatmul.msk.f32.gmra.mxu2 %vm54_vm0, %v36_v28  ;;  %330 = vmatmul.msk.f32.gmra.mxu3 %vm54_vm0, %v44_v29 }
  0x3b   :  { %306 = vmatmul.msk.f32.gmra.mxu0 %vm54_vm0, %v20_v30  ;;  %314 = vmatmul.msk.f32.gmra.mxu1 %vm54_vm0, %v28_v31 }
  0x41   :  { %323 = vmatmul.msk.f32.gmra.mxu2 %vm54_vm0, %v37_v32  ;;  %331 = vmatmul.msk.f32.gmra.mxu3 %vm54_vm0, %v45_v33 }
  0x43   :  { %307 = vmatmul.msk.f32.gmra.mxu0 %vm54_vm0, %v21_v34  ;;  %315 = vmatmul.msk.f32.gmra.mxu1 %vm54_vm0, %v29_v35 }
  0x88   :  { %v168_v37 = vpop.f32.mrf.mxu0  ;;  %v192_v38 = vpop.f32.mrf.mxu1 }
  0x89   :  { %v169_v39 = vadd.f32 %v508_v36, %v168_v37  ;;  %v193_v40 = vadd.f32 %v508_v36, %v192_v38 }
  0x8b   :  { %264 = vst [vmem:[%s641_s3] sm:$0xff] %v169_v39 }
  0x8c   :  { %272 = vst [vmem:[%s641_s3 + $0x40] sm:$0xff] %v193_v40  ;;  %v216_v41 = vpop.f32.mrf.mxu2  ;;  %v240_v42 = vpop.f32.mrf.mxu3 }
  0x8d   :  { %v217_v43 = vadd.f32 %v508_v36, %v216_v41  ;;  %v241_v44 = vadd.f32 %v508_v36, %v240_v42 }
  0x8f   :  { %280 = vst [vmem:[%s641_s3 + $0x80] sm:$0xff] %v217_v43 }
  0x90   :  { %288 = vst [vmem:[%s641_s3 + $0xc0] sm:$0xff] %v241_v44  ;;  %v171_v45 = vpop.f32.mrf.mxu0  ;;  %v195_v46 = vpop.f32.mrf.mxu1 }
  0x91   :  { %v172_v47 = vadd.f32 %v508_v36, %v171_v45  ;;  %v196_v48 = vadd.f32 %v508_v36, %v195_v46 }
  0x93   :  { %265 = vst [vmem:[%s641_s3 + $0x8] sm:$0xff] %v172_v47 }
  0x94   :  { %273 = vst [vmem:[%s641_s3 + $0x48] sm:$0xff] %v196_v48  ;;  %v219_v49 = vpop.f32.mrf.mxu2  ;;  %v243_v50 = vpop.f32.mrf.mxu3 }
  0x95   :  { %v220_v51 = vadd.f32 %v508_v36, %v219_v49  ;;  %v244_v52 = vadd.f32 %v508_v36, %v243_v50 }
  0x97   :  { %281 = vst [vmem:[%s641_s3 + $0x88] sm:$0xff] %v220_v51 }
  0x98   :  { %289 = vst [vmem:[%s641_s3 + $0xc8] sm:$0xff] %v244_v52  ;;  %v174_v53 = vpop.f32.mrf.mxu0  ;;  %v198_v54 = vpop.f32.mrf.mxu1 }
  0x99   :  { %v175_v55 = vadd.f32 %v508_v36, %v174_v53  ;;  %v199_v56 = vadd.f32 %v508_v36, %v198_v54 }
  0x9b   :  { %266 = vst [vmem:[%s641_s3 + $0x10] sm:$0xff] %v175_v55 }
  0x9c   :  { %274 = vst [vmem:[%s641_s3 + $0x50] sm:$0xff] %v199_v56  ;;  %v222_v57 = vpop.f32.mrf.mxu2  ;;  %v246_v58 = vpop.f32.mrf.mxu3 }
  0x9d   :  { %v223_v59 = vadd.f32 %v508_v36, %v222_v57  ;;  %v247_v60 = vadd.f32 %v508_v36, %v246_v58 }
  0x9f   :  { %282 = vst [vmem:[%s641_s3 + $0x90] sm:$0xff] %v223_v59 }
  0xa0   :  { %290 = vst [vmem:[%s641_s3 + $0xd0] sm:$0xff] %v247_v60  ;;  %v177_v61 = vpop.f32.mrf.mxu0  ;;  %v201_v62 = vpop.f32.mrf.mxu1 }
  0xa1   :  { %v178_v63 = vadd.f32 %v508_v36, %v177_v61  ;;  %v202_v0 = vadd.f32 %v508_v36, %v201_v62 }
  0xa3   :  { %267 = vst [vmem:[%s641_s3 + $0x18] sm:$0xff] %v178_v63 }
  0xa4   :  { %275 = vst [vmem:[%s641_s3 + $0x58] sm:$0xff] %v202_v0  ;;  %v225_v1 = vpop.f32.mrf.mxu2  ;;  %v249_v2 = vpop.f32.mrf.mxu3 }
  0xa5   :  { %v226_v3 = vadd.f32 %v508_v36, %v225_v1  ;;  %v250_v4 = vadd.f32 %v508_v36, %v249_v2 }
  0xa7   :  { %283 = vst [vmem:[%s641_s3 + $0x98] sm:$0xff] %v226_v3 }
  0xa8   :  { %291 = vst [vmem:[%s641_s3 + $0xd8] sm:$0xff] %v250_v4  ;;  %v180_v5 = vpop.f32.mrf.mxu0  ;;  %v204_v6 = vpop.f32.mrf.mxu1 }
  0xa9   :  { %v181_v7 = vadd.f32 %v508_v36, %v180_v5  ;;  %v205_v8 = vadd.f32 %v508_v36, %v204_v6 }
  0xab   :  { %268 = vst [vmem:[%s641_s3 + $0x20] sm:$0xff] %v181_v7 }
  0xac   :  { %276 = vst [vmem:[%s641_s3 + $0x60] sm:$0xff] %v205_v8  ;;  %v228_v9 = vpop.f32.mrf.mxu2  ;;  %v252_v10 = vpop.f32.mrf.mxu3 }
  0xad   :  { %v229_v11 = vadd.f32 %v508_v36, %v228_v9  ;;  %v253_v12 = vadd.f32 %v508_v36, %v252_v10 }
  0xaf   :  { %284 = vst [vmem:[%s641_s3 + $0xa0] sm:$0xff] %v229_v11 }
  0xb0   :  { %292 = vst [vmem:[%s641_s3 + $0xe0] sm:$0xff] %v253_v12  ;;  %v183_v13 = vpop.f32.mrf.mxu0  ;;  %v207_v14 = vpop.f32.mrf.mxu1 }
  0xb1   :  { %v184_v15 = vadd.f32 %v508_v36, %v183_v13  ;;  %v208_v16 = vadd.f32 %v508_v36, %v207_v14 }
  0xb3   :  { %269 = vst [vmem:[%s641_s3 + $0x28] sm:$0xff] %v184_v15 }
  0xb4   :  { %277 = vst [vmem:[%s641_s3 + $0x68] sm:$0xff] %v208_v16  ;;  %v231_v17 = vpop.f32.mrf.mxu2  ;;  %v255_v18 = vpop.f32.mrf.mxu3 }
  0xb5   :  { %v232_v19 = vadd.f32 %v508_v36, %v231_v17  ;;  %v256_v20 = vadd.f32 %v508_v36, %v255_v18 }
  0xb7   :  { %285 = vst [vmem:[%s641_s3 + $0xa8] sm:$0xff] %v232_v19 }
  0xb8   :  { %293 = vst [vmem:[%s641_s3 + $0xe8] sm:$0xff] %v256_v20  ;;  %v186_v21 = vpop.f32.mrf.mxu0  ;;  %v210_v22 = vpop.f32.mrf.mxu1 }
  0xb9   :  { %v187_v23 = vadd.f32 %v508_v36, %v186_v21  ;;  %v211_v24 = vadd.f32 %v508_v36, %v210_v22 }
  0xbb   :  { %270 = vst [vmem:[%s641_s3 + $0x30] sm:$0xff] %v187_v23 }
  0xbc   :  { %278 = vst [vmem:[%s641_s3 + $0x70] sm:$0xff] %v211_v24  ;;  %v234_v25 = vpop.f32.mrf.mxu2  ;;  %v258_v26 = vpop.f32.mrf.mxu3 }
  0xbd   :  { %v235_v27 = vadd.f32 %v508_v36, %v234_v25  ;;  %v259_v28 = vadd.f32 %v508_v36, %v258_v26 }
  0xbf   :  { %286 = vst [vmem:[%s641_s3 + $0xb0] sm:$0xff] %v235_v27 }
  0xc0   :  { %294 = vst [vmem:[%s641_s3 + $0xf0] sm:$0xff] %v259_v28  ;;  %v189_v29 = vpop.f32.mrf.mxu0  ;;  %v213_v30 = vpop.f32.mrf.mxu1 }
  0xc1   :  { %v190_v31 = vadd.f32 %v508_v36, %v189_v29  ;;  %v214_v32 = vadd.f32 %v508_v36, %v213_v30 }
  0xc3   :  { %271 = vst [vmem:[%s641_s3 + $0x38] sm:$0xff] %v190_v31 }
  0xc4   :  { %279 = vst [vmem:[%s641_s3 + $0x78] sm:$0xff] %v214_v32  ;;  %v237_v33 = vpop.f32.mrf.mxu2  ;;  %v261_v34 = vpop.f32.mrf.mxu3 }
  0xc5   :  { %v238_v35 = vadd.f32 %v508_v36, %v237_v33  ;;  %v262_v37 = vadd.f32 %v508_v36, %v261_v34 }
  0xc7   :  { %287 = vst [vmem:[%s641_s3 + $0xb8] sm:$0xff] %v238_v35 }
  0xc8   :  { %295 = vst [vmem:[%s641_s3 + $0xf8] sm:$0xff] %v262_v37 }

// kernel: my_rnn_model_forward.9
= control target key start
LH: loop header
LB: loop body
LE: loop exit
PB: predicated region body
PF: predicated region fallthrough
CT: control target
= control target key end

     0   :  { %8 = vsyncpa [#allocation6], 0  ;;  %s2439_s12 = smov 0   ;;  %s2441_s13 = smov 0   ;;  %s3396_s0 = inlined_call_operand.vmem [shape: f32[256,32], index: 0, kind: input, shape index: {}]   ;;  %s3397_s1 = inlined_call_operand.vmem [shape: f32[32,384], index: 1, kind: input, shape index: {}]   ;;  %s3398_s2 = inlined_call_operand.vmem [shape: f32[1,384], index: 2, kind: input, shape index: {}]   ;;  %s3399_s3 = inlined_call_operand.hbm [shape: f32[256,384], index: 3, kind: output, shape index: {}]  }
   0x1   :  { %s2443_s14 = smov 0   ;;  %s2445_s15 = smov 0  }
   0x2   :  { %s2447_s16 = smov 0  }
   0x3 LB: > { %s2028_s17 = sadd.s32 4294967295, %s2410_s16   ;;  %s23_s18 = sadd.s32 1, %s2406_s15  ;;  %s2410_s16 = sphi %s2447_s16, %s14_s16   ;;  %s2406_s15 = sphi %s2445_s15, %s3576_s15   ;;  %s2402_s14 = sphi %s2443_s14, %s3575_s14   ;;  %s2398_s13 = sphi %s2441_s13, %s3574_s13   ;;  %s2394_s12 = sphi %s2439_s12, %s3573_s12  }
   0x4   : > { %p24_p0 = scmp.ge.s32.totalorder %s23_s18, 3  ;;  %p66_p1 = scmp.ne.s32.totalorder %s2398_s13, %s2394_s12 }
   0x5   : > { %p67_p2 = scmp.eq.s32.totalorder %s2410_s16, 0  ;;  %s59_s20 = sadd.s32 1, %s2398_s13 }
   0x6   : > { %s3578_s18 = smov (%p24_p0, %s23_s18), 0  ;;  %p2031_p5 = scmp.ge.s32.totalorder %s2410_s16, 3 }
   0x7   : > { %p68_p3 = por %p67_p2, %p66_p1  ;;  %s56_s19 = ssub.s32 %s2406_s15, %s3578_s18 }
   0x8   : > { %p57_p4 = scmp.eq.s32.totalorder %s56_s19, 0  ;;  %153 = sbr.rel (%p2031_p5) target bundleno = 21 (0x15), region = 20 }
   0xa   : > { %s2475_s21 = scalar_select %p57_p4, %s2398_s13, %s59_s20  }
   0xd   : > { %156 = sbr.rel (!%p68_p3) target bundleno = 21 (0x15), region = 24  ;;  %s158_s22 = sand.u32 (%p68_p3), 1, %s2398_s13  }
   0xe   : > { %s2033_s23 = sshll.u32 (%p68_p3), %s2406_s15, 3  ;;  %s2032_s24 = sshll.u32 (%p68_p3), %s158_s22, 5 }
   0xf   : > { %s162_s27 = scalar_lea.vmem (%p68_p3), %s3397_s1, %s2033_s23  ;;  %s160_s28 = scalar_lea.vmem (%p68_p3), [#allocation4], %s2032_s24 }
  0x10   : > { %v197_v0 = vld [vmem:[%s162_s27] sm:$0xff] (%p68_p3)  ;;  %v199_v1 = vld [vmem:[%s162_s27 + $0x18] sm:$0xff] (%p68_p3)  ;;  %v201_v2 = vld [vmem:[%s162_s27 + $0x30] sm:$0xff] (%p68_p3) }
  0x11   : > { %198 = vst [vmem:[%s160_s28] sm:$0xff] (%p68_p3), %v197_v0  ;;  %v203_v3 = vld [vmem:[%s162_s27 + $0x48] sm:$0xff] (%p68_p3) }
  0x12   : > { %200 = vst [vmem:[%s160_s28 + $0x8] sm:$0xff] %v199_v1 }
  0x13   : > { %202 = vst [vmem:[%s160_s28 + $0x10] sm:$0xff] %v201_v2 }
  0x14   : > { %204 = vst [vmem:[%s160_s28 + $0x18] sm:$0xff] %v203_v3 }
  0x15 PF: > { %p2034_p6 = scmp.ge.s32.totalorder %s2410_s16, 1  ;;  %p215_p7 = scmp.lt.s32.totalorder %s2410_s16, 4 }
  0x17   : > { %p216_p8 = pnand %p2034_p6, %p215_p7 }
  0x19   : > { %219 = sbr.rel (%p216_p8) target bundleno = 920 (0x398), region = 66 }
  0x1e   : > { %s222_s29 = sand.u32 1, %s2394_s12   ;;  %p254_p9 = scmp.lt.s32.totalorder %s2402_s14, 2 }
  0x1f   : > { %s2035_s30 = sshll.u32 %s222_s29, 5  ;;  %p2036_p10 = scmp.ne.s32.totalorder %s2402_s14, 0 }
  0x20   : > { %s2488_s4 = scalar_select %p254_p9, %s2402_s14, 2 }
  0x21   : > { %s2494_s8 = scalar_lea.vmem [#allocation4], %s2035_s30  ;;  %261 = sbr.rel (%p2036_p10) target bundleno = 103 (0x67), region = 74 }
  0x22   : > { %s256_s7 = scalar_lea.vmem %s3398_s2, %s2488_s4 }
  0x26   : > { %vm262_vm0 = vcmask 7168   ;;  %v2412_v4 = vmov -inf   ;;  %v2413_v5 = vmov 0.0  }
  0x27   : > { %263 = vst.msk [vmem:[#allocation2] sm:$0xff] %vm262_vm0, %v2412_v4 }
  0x28   : > { %264 = vst.msk [vmem:[#allocation2 + $0x8] sm:$0xff] %vm262_vm0, %v2412_v4 }
  0x29   : > { %265 = vst.msk [vmem:[#allocation2 + $0x10] sm:$0xff] %vm262_vm0, %v2412_v4 }
  0x2a   : > { %266 = vst.msk [vmem:[#allocation2 + $0x18] sm:$0xff] %vm262_vm0, %v2412_v4 }
  0x2b   : > { %267 = vst.msk [vmem:[#allocation2 + $0x20] sm:$0xff] %vm262_vm0, %v2412_v4 }
  0x2c   : > { %268 = vst.msk [vmem:[#allocation2 + $0x28] sm:$0xff] %vm262_vm0, %v2412_v4 }
  0x2d   : > { %269 = vst.msk [vmem:[#allocation2 + $0x30] sm:$0xff] %vm262_vm0, %v2412_v4 }
  0x2e   : > { %270 = vst.msk [vmem:[#allocation2 + $0x38] sm:$0xff] %vm262_vm0, %v2412_v4 }
  0x2f   : > { %271 = vst.msk [vmem:[#allocation2 + $0x40] sm:$0xff] %vm262_vm0, %v2412_v4 }
  0x30   : > { %272 = vst.msk [vmem:[#allocation2 + $0x48] sm:$0xff] %vm262_vm0, %v2412_v4 }
  0x31   : > { %273 = vst.msk [vmem:[#allocation2 + $0x50] sm:$0xff] %vm262_vm0, %v2412_v4 }
  0x32   : > { %274 = vst.msk [vmem:[#allocation2 + $0x58] sm:$0xff] %vm262_vm0, %v2412_v4 }
  0x33   : > { %275 = vst.msk [vmem:[#allocation2 + $0x60] sm:$0xff] %vm262_vm0, %v2412_v4 }
  0x34   : > { %276 = vst.msk [vmem:[#allocation2 + $0x68] sm:$0xff] %vm262_vm0, %v2412_v4 }
  0x35   : > { %277 = vst.msk [vmem:[#allocation2 + $0x70] sm:$0xff] %vm262_vm0, %v2412_v4 }
  0x36   : > { %278 = vst.msk [vmem:[#allocation2 + $0x78] sm:$0xff] %vm262_vm0, %v2412_v4 }
  0x37   : > { %279 = vst.msk [vmem:[#allocation2 + $0x80] sm:$0xff] %vm262_vm0, %v2412_v4 }
  0x38   : > { %280 = vst.msk [vmem:[#allocation2 + $0x88] sm:$0xff] %vm262_vm0, %v2412_v4 }
  0x39   : > { %281 = vst.msk [vmem:[#allocation2 + $0x90] sm:$0xff] %vm262_vm0, %v2412_v4 }
  0x3a   : > { %282 = vst.msk [vmem:[#allocation2 + $0x98] sm:$0xff] %vm262_vm0, %v2412_v4 }
  0x3b   : > { %283 = vst.msk [vmem:[#allocation2 + $0xa0] sm:$0xff] %vm262_vm0, %v2412_v4 }
  0x3c   : > { %284 = vst.msk [vmem:[#allocation2 + $0xa8] sm:$0xff] %vm262_vm0, %v2412_v4 }
  0x3d   : > { %285 = vst.msk [vmem:[#allocation2 + $0xb0] sm:$0xff] %vm262_vm0, %v2412_v4 }
  0x3e   : > { %286 = vst.msk [vmem:[#allocation2 + $0xb8] sm:$0xff] %vm262_vm0, %v2412_v4 }
  0x3f   : > { %287 = vst.msk [vmem:[#allocation2 + $0xc0] sm:$0xff] %vm262_vm0, %v2412_v4 }
  0x40   : > { %288 = vst.msk [vmem:[#allocation2 + $0xc8] sm:$0xff] %vm262_vm0, %v2412_v4 }
  0x41   : > { %289 = vst.msk [vmem:[#allocation2 + $0xd0] sm:$0xff] %vm262_vm0, %v2412_v4 }
  0x42   : > { %290 = vst.msk [vmem:[#allocation2 + $0xd8] sm:$0xff] %vm262_vm0, %v2412_v4 }
  0x43   : > { %291 = vst.msk [vmem:[#allocation2 + $0xe0] sm:$0xff] %vm262_vm0, %v2412_v4 }
  0x44   : > { %292 = vst.msk [vmem:[#allocation2 + $0xe8] sm:$0xff] %vm262_vm0, %v2412_v4 }
  0x45   : > { %293 = vst.msk [vmem:[#allocation2 + $0xf0] sm:$0xff] %vm262_vm0, %v2412_v4 }
  0x46   : > { %294 = vst.msk [vmem:[#allocation2 + $0xf8] sm:$0xff] %vm262_vm0, %v2412_v4 }
  0x47   : > { %295 = vst.msk [vmem:[#allocation3] sm:$0xff] %vm262_vm0, %v2413_v5 }
  0x48   : > { %296 = vst.msk [vmem:[#allocation3 + $0x8] sm:$0xff] %vm262_vm0, %v2413_v5 }
  0x49   : > { %297 = vst.msk [vmem:[#allocation3 + $0x10] sm:$0xff] %vm262_vm0, %v2413_v5 }
  0x4a   : > { %298 = vst.msk [vmem:[#allocation3 + $0x18] sm:$0xff] %vm262_vm0, %v2413_v5 }
  0x4b   : > { %299 = vst.msk [vmem:[#allocation3 + $0x20] sm:$0xff] %vm262_vm0, %v2413_v5 }
  0x4c   : > { %300 = vst.msk [vmem:[#allocation3 + $0x28] sm:$0xff] %vm262_vm0, %v2413_v5 }
  0x4d   : > { %301 = vst.msk [vmem:[#allocation3 + $0x30] sm:$0xff] %vm262_vm0, %v2413_v5 }
  0x4e   : > { %302 = vst.msk [vmem:[#allocation3 + $0x38] sm:$0xff] %vm262_vm0, %v2413_v5 }
  0x4f   : > { %303 = vst.msk [vmem:[#allocation3 + $0x40] sm:$0xff] %vm262_vm0, %v2413_v5 }
  0x50   : > { %304 = vst.msk [vmem:[#allocation3 + $0x48] sm:$0xff] %vm262_vm0, %v2413_v5 }
  0x51   : > { %305 = vst.msk [vmem:[#allocation3 + $0x50] sm:$0xff] %vm262_vm0, %v2413_v5 }
  0x52   : > { %306 = vst.msk [vmem:[#allocation3 + $0x58] sm:$0xff] %vm262_vm0, %v2413_v5 }
  0x53   : > { %307 = vst.msk [vmem:[#allocation3 + $0x60] sm:$0xff] %vm262_vm0, %v2413_v5 }
  0x54   : > { %308 = vst.msk [vmem:[#allocation3 + $0x68] sm:$0xff] %vm262_vm0, %v2413_v5 }
  0x55   : > { %309 = vst.msk [vmem:[#allocation3 + $0x70] sm:$0xff] %vm262_vm0, %v2413_v5 }
  0x56   : > { %310 = vst.msk [vmem:[#allocation3 + $0x78] sm:$0xff] %vm262_vm0, %v2413_v5 }
  0x57   : > { %311 = vst.msk [vmem:[#allocation3 + $0x80] sm:$0xff] %vm262_vm0, %v2413_v5 }
  0x58   : > { %312 = vst.msk [vmem:[#allocation3 + $0x88] sm:$0xff] %vm262_vm0, %v2413_v5 }
  0x59   : > { %313 = vst.msk [vmem:[#allocation3 + $0x90] sm:$0xff] %vm262_vm0, %v2413_v5 }
  0x5a   : > { %314 = vst.msk [vmem:[#allocation3 + $0x98] sm:$0xff] %vm262_vm0, %v2413_v5 }
  0x5b   : > { %315 = vst.msk [vmem:[#allocation3 + $0xa0] sm:$0xff] %vm262_vm0, %v2413_v5 }
  0x5c   : > { %316 = vst.msk [vmem:[#allocation3 + $0xa8] sm:$0xff] %vm262_vm0, %v2413_v5 }
  0x5d   : > { %317 = vst.msk [vmem:[#allocation3 + $0xb0] sm:$0xff] %vm262_vm0, %v2413_v5 }
  0x5e   : > { %318 = vst.msk [vmem:[#allocation3 + $0xb8] sm:$0xff] %vm262_vm0, %v2413_v5 }
  0x5f   : > { %319 = vst.msk [vmem:[#allocation3 + $0xc0] sm:$0xff] %vm262_vm0, %v2413_v5 }
  0x60   : > { %320 = vst.msk [vmem:[#allocation3 + $0xc8] sm:$0xff] %vm262_vm0, %v2413_v5 }
  0x61   : > { %321 = vst.msk [vmem:[#allocation3 + $0xd0] sm:$0xff] %vm262_vm0, %v2413_v5 }
  0x62   : > { %322 = vst.msk [vmem:[#allocation3 + $0xd8] sm:$0xff] %vm262_vm0, %v2413_v5 }
  0x63   : > { %323 = vst.msk [vmem:[#allocation3 + $0xe0] sm:$0xff] %vm262_vm0, %v2413_v5 }
  0x64   : > { %324 = vst.msk [vmem:[#allocation3 + $0xe8] sm:$0xff] %vm262_vm0, %v2413_v5 }
  0x65   : > { %325 = vst.msk [vmem:[#allocation3 + $0xf0] sm:$0xff] %vm262_vm0, %v2413_v5 }
  0x66   : > { %326 = vst.msk [vmem:[#allocation3 + $0xf8] sm:$0xff] %vm262_vm0, %v2413_v5 }
  0x67 PF: > { %v362_v6 = vld [vmem:[%s2494_s8 + $0x18] sm:$0xff]  ;;  %v361_v7 = vld [vmem:[%s2494_s8 + $0x10] sm:$0xff]  ;;  %v360_v8 = vld [vmem:[%s2494_s8 + $0x8] sm:$0xff]  ;;  %vm367_vm1 = vcmask 261120   ;;  %s2069_s26 = sshll.u32 %s2402_s14, 7  ;;  %vm1254_vm2 = vcmask 7168  }
  0x68   : > { %476 = vmatpush.msra.mxu0 %v362_v6  ;;  %2076 = vmatpush.msra.mxu1 %v362_v6  ;;  %v359_v9 = vld [vmem:[%s2494_s8] sm:$0xff]  ;;  %v328_v14 = vld [vmem:[%s3396_s0 + $0x8] sm:$0xff]  ;;  %v329_v18 = vld [vmem:[%s3396_s0 + $0x10] sm:$0xff]  ;;  %s578_s27 = sshra.s32 %s2069_s26, 7  ;;  %p2071_p11 = scmp.ne.s32.totalorder %s2402_s14, 2 }
  0x69   : > { %2077 = vmatpush.msra.mxu2 %v362_v6  ;;  %2078 = vmatpush.msra.mxu3 %v362_v6  ;;  %v327_v10 = vld [vmem:[%s3396_s0] sm:$0xff]  ;;  %v336_v15 = vld [vmem:[%s3396_s0 + $0x48] sm:$0xff]  ;;  %v337_v19 = vld [vmem:[%s3396_s0 + $0x50] sm:$0xff]  ;;  %s2070_s30 = sshll.u32 %s578_s27, 3 }
  0x6a   : > { %477 = vmatpush.msra.mxu0 %v361_v7  ;;  %2079 = vmatpush.msra.mxu1 %v361_v7  ;;  %v335_v11 = vld [vmem:[%s3396_s0 + $0x40] sm:$0xff]  ;;  %v344_v16 = vld [vmem:[%s3396_s0 + $0x88] sm:$0xff]  ;;  %v353_v20 = vld [vmem:[%s3396_s0 + $0xd0] sm:$0xff]  ;;  %s2707_s5 = scalar_lea.vmem [#allocation5], %s2070_s30 }
  0x6b   : > { %2080 = vmatpush.msra.mxu2 %v361_v7  ;;  %2081 = vmatpush.msra.mxu3 %v361_v7  ;;  %v343_v12 = vld [vmem:[%s3396_s0 + $0x80] sm:$0xff]  ;;  %v352_v17 = vld [vmem:[%s3396_s0 + $0xc8] sm:$0xff]  ;;  %v345_v21 = vld [vmem:[%s3396_s0 + $0x90] sm:$0xff] }
  0x6c   : > { %478 = vmatpush.msra.mxu0 %v360_v8  ;;  %2082 = vmatpush.msra.mxu1 %v360_v8  ;;  %v351_v13 = vld [vmem:[%s3396_s0 + $0xc0] sm:$0xff]  ;;  %v330_v22 = vld [vmem:[%s3396_s0 + $0x18] sm:$0xff]  ;;  %v332_v30 = vld [vmem:[%s3396_s0 + $0x28] sm:$0xff] }
  0x6d   : > { %2083 = vmatpush.msra.mxu2 %v360_v8  ;;  %2084 = vmatpush.msra.mxu3 %v360_v8  ;;  %v338_v23 = vld [vmem:[%s3396_s0 + $0x58] sm:$0xff]  ;;  %v331_v26 = vld [vmem:[%s3396_s0 + $0x20] sm:$0xff]  ;;  %v340_v31 = vld [vmem:[%s3396_s0 + $0x68] sm:$0xff] }
  0x6e   : > { %479 = vmatpush.msra.mxu0 %v359_v9  ;;  %2085 = vmatpush.msra.mxu1 %v359_v9  ;;  %v346_v24 = vld [vmem:[%s3396_s0 + $0x98] sm:$0xff]  ;;  %v339_v27 = vld [vmem:[%s3396_s0 + $0x60] sm:$0xff]  ;;  %v348_v32 = vld [vmem:[%s3396_s0 + $0xa8] sm:$0xff] }
  0x6f   : > { %2086 = vmatpush.msra.mxu2 %v359_v9  ;;  %2087 = vmatpush.msra.mxu3 %v359_v9  ;;  %v354_v25 = vld [vmem:[%s3396_s0 + $0xd8] sm:$0xff]  ;;  %v347_v28 = vld [vmem:[%s3396_s0 + $0xa0] sm:$0xff]  ;;  %v356_v33 = vld [vmem:[%s3396_s0 + $0xe8] sm:$0xff] }
  0x70   : > { %2037 = vmatmul.msk.f32.vlgmr.msra.gmra.mxu0 %vm367_vm1, %v327_v10  ;;  %2045 = vmatmul.msk.f32.vlgmr.msra.gmra.mxu1 %vm367_vm1, %v335_v11  ;;  %v355_v29 = vld [vmem:[%s3396_s0 + $0xe0] sm:$0xff]  ;;  %v341_v34 = vld [vmem:[%s3396_s0 + $0x70] sm:$0xff]  ;;  %v334_v38 = vld [vmem:[%s3396_s0 + $0x38] sm:$0xff] }
  0x71   : > { %2053 = vmatmul.msk.f32.vlgmr.msra.gmra.mxu2 %vm367_vm1, %v343_v12  ;;  %2061 = vmatmul.msk.f32.vlgmr.msra.gmra.mxu3 %vm367_vm1, %v351_v13  ;;  %v333_v35 = vld [vmem:[%s3396_s0 + $0x30] sm:$0xff]  ;;  %v342_v39 = vld [vmem:[%s3396_s0 + $0x78] sm:$0xff]  ;;  %v2699_v42 = vld [vmem:[%s256_s7] ss:$0 sm:$0xff] }
  0x72   : > { %v349_v36 = vld [vmem:[%s3396_s0 + $0xb0] sm:$0xff]  ;;  %v350_v40 = vld [vmem:[%s3396_s0 + $0xb8] sm:$0xff] }
  0x73   : > { %v357_v37 = vld [vmem:[%s3396_s0 + $0xf0] sm:$0xff]  ;;  %v358_v41 = vld [vmem:[%s3396_s0 + $0xf8] sm:$0xff] }
  0x78   : > { %2038 = vmatmul.msk.f32.gmra.mxu0 %vm367_vm1, %v328_v14  ;;  %2046 = vmatmul.msk.f32.gmra.mxu1 %vm367_vm1, %v336_v15 }
  0x79   : > { %2054 = vmatmul.msk.f32.gmra.mxu2 %vm367_vm1, %v344_v16  ;;  %2062 = vmatmul.msk.f32.gmra.mxu3 %vm367_vm1, %v352_v17 }
  0x80   : > { %2039 = vmatmul.msk.f32.gmra.mxu0 %vm367_vm1, %v329_v18  ;;  %2047 = vmatmul.msk.f32.gmra.mxu1 %vm367_vm1, %v337_v19 }
  0x81   : > { %2063 = vmatmul.msk.f32.gmra.mxu3 %vm367_vm1, %v353_v20  ;;  %2055 = vmatmul.msk.f32.gmra.mxu2 %vm367_vm1, %v345_v21 }
  0x88   : > { %2040 = vmatmul.msk.f32.gmra.mxu0 %vm367_vm1, %v330_v22  ;;  %2048 = vmatmul.msk.f32.gmra.mxu1 %vm367_vm1, %v338_v23 }
  0x89   : > { %2056 = vmatmul.msk.f32.gmra.mxu2 %vm367_vm1, %v346_v24  ;;  %2064 = vmatmul.msk.f32.gmra.mxu3 %vm367_vm1, %v354_v25 }
  0x90   : > { %2041 = vmatmul.msk.f32.gmra.mxu0 %vm367_vm1, %v331_v26  ;;  %2049 = vmatmul.msk.f32.gmra.mxu1 %vm367_vm1, %v339_v27 }
  0x91   : > { %2057 = vmatmul.msk.f32.gmra.mxu2 %vm367_vm1, %v347_v28  ;;  %2065 = vmatmul.msk.f32.gmra.mxu3 %vm367_vm1, %v355_v29 }
  0x98   : > { %2042 = vmatmul.msk.f32.gmra.mxu0 %vm367_vm1, %v332_v30  ;;  %2050 = vmatmul.msk.f32.gmra.mxu1 %vm367_vm1, %v340_v31 }
  0x99   : > { %2058 = vmatmul.msk.f32.gmra.mxu2 %vm367_vm1, %v348_v32  ;;  %2066 = vmatmul.msk.f32.gmra.mxu3 %vm367_vm1, %v356_v33 }
  0xa0   : > { %2051 = vmatmul.msk.f32.gmra.mxu1 %vm367_vm1, %v341_v34  ;;  %2043 = vmatmul.msk.f32.gmra.mxu0 %vm367_vm1, %v333_v35 }
  0xa1   : > { %2059 = vmatmul.msk.f32.gmra.mxu2 %vm367_vm1, %v349_v36  ;;  %2067 = vmatmul.msk.f32.gmra.mxu3 %vm367_vm1, %v357_v37 }
  0xa8   : > { %2044 = vmatmul.msk.f32.gmra.mxu0 %vm367_vm1, %v334_v38  ;;  %2052 = vmatmul.msk.f32.gmra.mxu1 %vm367_vm1, %v342_v39 }
  0xa9   : > { %2060 = vmatmul.msk.f32.gmra.mxu2 %vm367_vm1, %v350_v40  ;;  %2068 = vmatmul.msk.f32.gmra.mxu3 %vm367_vm1, %v358_v41 }
  0xed   : > { %v481_v43 = vpop.f32.mrf.mxu0  ;;  %v505_v44 = vpop.f32.mrf.mxu1 }
  0xee   : > { %v2702_v45 = vadd.f32 %v2699_v42, %v481_v43  ;;  %v2705_v46 = vadd.f32 %v2699_v42, %v505_v44  ;;  %v2895_v44 = vld [vmem:[#allocation2 + $0x40] sm:$0xff] }
  0xf0   : > { %582 = vst [vmem:[%s2707_s5] sm:$0xff] %v2702_v45  ;;  %662 = vmax.xlane.f32.xlu2 %v2705_v46  ;;  %646 = vmax.xlane.f32.xlu0 %v2702_v45 }
  0xf1   : > { %590 = vst [vmem:[%s2707_s5 + $0xc0] sm:$0xff] %v2705_v46 }
  0xf4   : > { %v529_v47 = vpop.f32.mrf.mxu2  ;;  %v553_v48 = vpop.f32.mrf.mxu3 }
  0xf5   : > { %v2716_v49 = vadd.f32 %v2699_v42, %v529_v47  ;;  %v2719_v50 = vadd.f32 %v2699_v42, %v553_v48  ;;  %v484_v51 = vpop.f32.mrf.mxu0  ;;  %v508_v52 = vpop.f32.mrf.mxu1  ;;  %v2897_v47 = vld [vmem:[#allocation2] sm:$0xff] }
  0xf6   : > { %v2722_v53 = vadd.f32 %v2699_v42, %v484_v51  ;;  %v2725_v54 = vadd.f32 %v2699_v42, %v508_v52 }
  0xf7   : > { %598 = vst [vmem:[%s2707_s5 + $0x180] sm:$0xff] %v2716_v49  ;;  %678 = vmax.xlane.f32.xlu1 %v2716_v49 }
  0xf8   : > { %606 = vst [vmem:[%s2707_s5 + $0x240] sm:$0xff] %v2719_v50  ;;  %694 = vmax.xlane.f32.xlu0 %v2719_v50 }
  0xf9   : > { %583 = vst [vmem:[%s2707_s5 + $0x18] sm:$0xff] %v2722_v53 }
  0xfa   : > { %591 = vst [vmem:[%s2707_s5 + $0xd8] sm:$0xff] %v2725_v54 }
  0xfc   : > { %v532_v55 = vpop.f32.mrf.mxu2  ;;  %v556_v56 = vpop.f32.mrf.mxu3 }
  0xfd   : > { %v2738_v57 = vadd.f32 %v2699_v42, %v532_v55  ;;  %v2741_v58 = vadd.f32 %v2699_v42, %v556_v56  ;;  %v487_v59 = vpop.f32.mrf.mxu0  ;;  %v511_v60 = vpop.f32.mrf.mxu1  ;;  %v3028_v56 = vld [vmem:[#allocation2 + $0xd8] sm:$0xff] }
  0xfe   : > { %v2744_v61 = vadd.f32 %v2699_v42, %v487_v59  ;;  %v2747_v62 = vadd.f32 %v2699_v42, %v511_v60  ;;  %v2915_v60 = vld [vmem:[#allocation2 + $0x80] sm:$0xff]  ;;  %3458 = vst [vmem:[#allocation19_spill] sm:$0xff] %v3028_v56 }
  0xff   : > { %599 = vst [vmem:[%s2707_s5 + $0x198] sm:$0xff] %v2738_v57  ;;  %696 = vmax.xlane.f32.xlu1 %v2741_v58  ;;  %680 = vmax.xlane.f32.xlu2 %v2738_v57 }
 0x100   : > { %607 = vst [vmem:[%s2707_s5 + $0x258] sm:$0xff] %v2741_v58  ;;  %648 = vmax.xlane.f32.xlu0 %v2722_v53 }
 0x101   : > { %584 = vst [vmem:[%s2707_s5 + $0x30] sm:$0xff] %v2744_v61 }
 0x102   : > { %592 = vst [vmem:[%s2707_s5 + $0xf0] sm:$0xff] %v2747_v62 }
 0x104   : > { %v559_v63 = vpop.f32.mrf.mxu3  ;;  %v535_v0 = vpop.f32.mrf.mxu2 }
 0x105   : > { %v2761_v1 = vadd.f32 %v2699_v42, %v559_v63  ;;  %v490_v2 = vpop.f32.mrf.mxu0  ;;  %v514_v3 = vpop.f32.mrf.mxu1  ;;  %v2777_v6 = vadd.f32 %v2699_v42, %v535_v0  ;;  %v2917_v63 = vld [vmem:[#allocation2 + $0xc0] sm:$0xff] }
 0x106   : > { %v2764_v4 = vadd.f32 %v2699_v42, %v490_v2  ;;  %v2771_v5 = vadd.f32 %v2699_v42, %v514_v3 }
 0x107   : > { %608 = vst [vmem:[%s2707_s5 + $0x270] sm:$0xff] %v2761_v1  ;;  %698 = vmax.xlane.f32.xlu2 %v2761_v1  ;;  %650 = vmax.xlane.f32.xlu1 %v2744_v61 }
 0x108   : > { %664 = vmax.xlane.f32.xlu0 %v2725_v54  ;;  %585 = vst [vmem:[%s2707_s5 + $0x48] sm:$0xff] %v2764_v4 }
 0x109   : > { %593 = vst [vmem:[%s2707_s5 + $0x108] sm:$0xff] %v2771_v5 }
 0x10a   : > { %600 = vst [vmem:[%s2707_s5 + $0x1b0] sm:$0xff] %v2777_v6 }
 0x10c   : > { %v538_v7 = vpop.f32.mrf.mxu2  ;;  %v562_v8 = vpop.f32.mrf.mxu3 }
 0x10d   : > { %v493_v9 = vpop.f32.mrf.mxu0  ;;  %v2784_v10 = vadd.f32 %v2699_v42, %v538_v7  ;;  %v2787_v11 = vadd.f32 %v2699_v42, %v562_v8  ;;  %v517_v12 = vpop.f32.mrf.mxu1 }
 0x10e   : > { %v2790_v13 = vadd.f32 %v2699_v42, %v493_v9  ;;  %v2793_v14 = vadd.f32 %v2699_v42, %v517_v12  ;;  %v2935_v12 = vld [vmem:[#allocation2 + $0xc8] sm:$0xff] }
 0x10f   : > { %668 = vmax.xlane.f32.xlu2 %v2771_v5  ;;  %666 = vmax.xlane.f32.xlu1 %v2747_v62  ;;  %601 = vst [vmem:[%s2707_s5 + $0x1c8] sm:$0xff] %v2784_v10 }
 0x110   : > { %682 = vmax.xlane.f32.xlu0 %v2777_v6  ;;  %586 = vst [vmem:[%s2707_s5 + $0x60] sm:$0xff] %v2790_v13 }
 0x111   : > { %609 = vst [vmem:[%s2707_s5 + $0x288] sm:$0xff] %v2787_v11 }
 0x112   : > { %594 = vst [vmem:[%s2707_s5 + $0x120] sm:$0xff] %v2793_v14 }
 0x114   : > { %v541_v15 = vpop.f32.mrf.mxu2  ;;  %v565_v16 = vpop.f32.mrf.mxu3 }
 0x115   : > { %v2807_v17 = vadd.f32 %v2699_v42, %v541_v15  ;;  %v496_v18 = vpop.f32.mrf.mxu0  ;;  %v2810_v19 = vadd.f32 %v2699_v42, %v565_v16  ;;  %v520_v20 = vpop.f32.mrf.mxu1  ;;  %v2937_v15 = vld [vmem:[#allocation2 + $0x88] sm:$0xff] }
 0x116   : > { %v2813_v21 = vadd.f32 %v2699_v42, %v496_v18  ;;  %v2816_v22 = vadd.f32 %v2699_v42, %v520_v20  ;;  %v2939_v16 = vld [vmem:[#allocation2 + $0x8] sm:$0xff] }
 0x117   : > { %654 = vmax.xlane.f32.xlu2 %v2790_v13  ;;  %652 = vmax.xlane.f32.xlu1 %v2764_v4  ;;  %602 = vst [vmem:[%s2707_s5 + $0x1e0] sm:$0xff] %v2807_v17 }
 0x118   : > { %700 = vmax.xlane.f32.xlu0 %v2787_v11  ;;  %587 = vst [vmem:[%s2707_s5 + $0x78] sm:$0xff] %v2813_v21 }
 0x119   : > { %610 = vst [vmem:[%s2707_s5 + $0x2a0] sm:$0xff] %v2810_v19 }
 0x11a   : > { %595 = vst [vmem:[%s2707_s5 + $0x138] sm:$0xff] %v2816_v22 }
 0x11c   : > { %v544_v23 = vpop.f32.mrf.mxu2  ;;  %v568_v24 = vpop.f32.mrf.mxu3 }
 0x11d   : > { %v2830_v25 = vadd.f32 %v2699_v42, %v544_v23  ;;  %v523_v26 = vpop.f32.mrf.mxu1  ;;  %v499_v27 = vpop.f32.mrf.mxu0  ;;  %v2833_v28 = vadd.f32 %v2699_v42, %v568_v24 }
 0x11e   : > { %v2836_v29 = vadd.f32 %v2699_v42, %v499_v27  ;;  %v2843_v30 = vadd.f32 %v2699_v42, %v523_v26 }
 0x11f   : > { %686 = vmax.xlane.f32.xlu2 %v2807_v17  ;;  %684 = vmax.xlane.f32.xlu1 %v2784_v10  ;;  %603 = vst [vmem:[%s2707_s5 + $0x1f8] sm:$0xff] %v2830_v25 }
 0x120   : > { %611 = vst [vmem:[%s2707_s5 + $0x2b8] sm:$0xff] %v2833_v28  ;;  %670 = vmax.xlane.f32.xlu0 %v2793_v14 }
 0x121   : > { %596 = vst [vmem:[%s2707_s5 + $0x150] sm:$0xff] %v2843_v30 }
 0x122   : > { %588 = vst [vmem:[%s2707_s5 + $0x90] sm:$0xff] %v2836_v29 }
 0x124   : > { %v547_v31 = vpop.f32.mrf.mxu2  ;;  %v571_v32 = vpop.f32.mrf.mxu3 }
 0x125   : > { %v2853_v33 = vadd.f32 %v2699_v42, %v547_v31  ;;  %v502_v34 = vpop.f32.mrf.mxu0  ;;  %v2856_v35 = vadd.f32 %v2699_v42, %v571_v32  ;;  %v526_v36 = vpop.f32.mrf.mxu1 }
 0x126   : > { %v2859_v37 = vadd.f32 %v2699_v42, %v502_v34  ;;  %v2869_v38 = vadd.f32 %v2699_v42, %v526_v36  ;;  %v2964_v36 = vld [vmem:[#allocation2 + $0xd0] sm:$0xff] }
 0x127   : > { %656 = vmax.xlane.f32.xlu2 %v2813_v21  ;;  %702 = vmax.xlane.f32.xlu1 %v2810_v19  ;;  %604 = vst [vmem:[%s2707_s5 + $0x210] sm:$0xff] %v2853_v33 }
 0x128   : > { %688 = vmax.xlane.f32.xlu0 %v2830_v25  ;;  %589 = vst [vmem:[%s2707_s5 + $0xa8] sm:$0xff] %v2859_v37 }
 0x129   : > { %612 = vst [vmem:[%s2707_s5 + $0x2d0] sm:$0xff] %v2856_v35 }
 0x12a   : > { %597 = vst [vmem:[%s2707_s5 + $0x168] sm:$0xff] %v2869_v38 }
 0x12b   : > { %3447 = vst [vmem:[#allocation8_spill] sm:$0xff] %v2964_v36 }
 0x12c   : > { %v550_v39 = vpop.f32.mrf.mxu2  ;;  %v574_v40 = vpop.f32.mrf.mxu3 }
 0x12d   : > { %v2876_v41 = vadd.f32 %v2699_v42, %v550_v39  ;;  %v2879_v43 = vadd.f32 %v2699_v42, %v574_v40  ;;  %v2414_v42 = vmov 0   ;;  %v2966_v39 = vld [vmem:[#allocation2 + $0x10] sm:$0xff]  ;;  %v2968_v40 = vld [vmem:[#allocation2 + $0x48] sm:$0xff] }
 0x12e   : > { %2142 = vset.pattern.permute.xlu0 %v2414_v42  ;;  %2141 = vset.pattern.permute.xlu2 %v2414_v42  ;;  %3448 = vst [vmem:[#allocation9_spill] sm:$0xff] %v2966_v39 }
 0x12f   : > { %704 = vmax.xlane.f32.xlu2 %v2833_v28  ;;  %672 = vmax.xlane.f32.xlu1 %v2816_v22  ;;  %605 = vst [vmem:[%s2707_s5 + $0x228] sm:$0xff] %v2876_v41 }
 0x130   : > { %658 = vmax.xlane.f32.xlu0 %v2836_v29  ;;  %613 = vst [vmem:[%s2707_s5 + $0x2e8] sm:$0xff] %v2879_v43  ;;  %2143 = vset.pattern.permute.xlu1 %v2414_v42 }
 0x137   : > { %674 = vmax.xlane.f32.xlu2 %v2843_v30  ;;  %690 = vmax.xlane.f32.xlu1 %v2853_v33 }
 0x138   : > { %706 = vmax.xlane.f32.xlu0 %v2856_v35 }
 0x13f   : > { %692 = vmax.xlane.f32.xlu2 %v2876_v41  ;;  %660 = vmax.xlane.f32.xlu1 %v2859_v37 }
 0x140   : > { %676 = vmax.xlane.f32.xlu0 %v2869_v38 }
 0x147   : > { %708 = vmax.xlane.f32.xlu1 %v2879_v43 }
 0x163   : > { %v663_v48 = vpop.xlane.xlu2 %662  ;;  %v647_v51 = vpop.xlane.xlu0 %646 }
 0x164   : > { %v2900_v52 = vmax.f32 %v2895_v44, %v663_v48  ;;  %v2903_v55 = vmax.f32 %v2897_v47, %v647_v51 }
 0x166   : > { %1295 = vst.msk [vmem:[#allocation2 + $0x40] sm:$0xff] %vm1254_vm2, %v2900_v52  ;;  %944 = vperm.xlu0 %2142, %v2900_v52   ;;  %904 = vperm.xlu2 %2141, %v2903_v55  }
 0x167   : > { %1287 = vst.msk [vmem:[#allocation2] sm:$0xff] %vm1254_vm2, %v2903_v55 }
 0x16a   : > { %v679_v0 = vpop.xlane.xlu1 %678 }
 0x16b   : > { %v2920_v2 = vmax.f32 %v2915_v60, %v679_v0  ;;  %v695_v3 = vpop.xlane.xlu0 %694 }
 0x16c   : > { %v2923_v7 = vmax.f32 %v2917_v63, %v695_v3 }
 0x16d   : > { %1303 = vst.msk [vmem:[#allocation2 + $0x80] sm:$0xff] %vm1254_vm2, %v2920_v2  ;;  %984 = vperm.xlu1 %2143, %v2920_v2  }
 0x16e   : > { %1311 = vst.msk [vmem:[#allocation2 + $0xc0] sm:$0xff] %vm1254_vm2, %v2923_v7  ;;  %1024 = vperm.xlu2 %2141, %v2923_v7  }
 0x172   : > { %v697_v18 = vpop.xlane.xlu1 %696  ;;  %v681_v20 = vpop.xlane.xlu2 %680 }
 0x173   : > { %v2942_v23 = vmax.f32 %v2935_v12, %v697_v18  ;;  %v2945_v24 = vmax.f32 %v2937_v15, %v681_v20  ;;  %v649_v26 = vpop.xlane.xlu0 %648  ;;  %v2998_v20 = vld [vmem:[#allocation2 + $0x90] sm:$0xff] }
 0x174   : > { %v2948_v27 = vmax.f32 %v2939_v16, %v649_v26  ;;  %3452 = vst [vmem:[#allocation13_spill] sm:$0xff] %v2998_v20 }
 0x175   : > { %1312 = vst.msk [vmem:[#allocation2 + $0xc8] sm:$0xff] %vm1254_vm2, %v2942_v23  ;;  %1029 = vperm.xlu1 %2143, %v2942_v23  }
 0x176   : > { %1304 = vst.msk [vmem:[#allocation2 + $0x88] sm:$0xff] %vm1254_vm2, %v2945_v24  ;;  %909 = vperm.xlu0 %2142, %v2948_v27  }
 0x177   : > { %1288 = vst.msk [vmem:[#allocation2 + $0x8] sm:$0xff] %vm1254_vm2, %v2948_v27 }
 0x17a   : > { %v699_v42 = vpop.xlane.xlu2 %698  ;;  %v651_v48 = vpop.xlane.xlu1 %650 }
 0x17b   : > { %v2971_v51 = vmax.f32 %v2964_v36, %v699_v42  ;;  %v2974_v0 = vmax.f32 %v2966_v39, %v651_v48  ;;  %v665_v3 = vpop.xlane.xlu0 %664  ;;  %v2994_v48 = vld [vmem:[#allocation2 + $0x58] sm:$0xff] }
 0x17c   : > { %v2977_v18 = vmax.f32 %v2968_v40, %v665_v3  ;;  %3451 = vst [vmem:[#allocation12_spill] sm:$0xff] %v2994_v48  ;;  %v2996_v3 = vld [vmem:[#allocation2 + $0x50] sm:$0xff] }
 0x17d   : > { %3449 = vst [vmem:[#allocation10_spill] sm:$0xff] %v2971_v51  ;;  %914 = vperm.xlu1 %2143, %v2974_v0  }
 0x17e   : > { %3450 = vst [vmem:[#allocation11_spill] sm:$0xff] %v2974_v0  ;;  %989 = vperm.xlu0 %2142, %v2945_v24   ;;  %949 = vperm.xlu2 %2141, %v2977_v18  }
 0x17f   : > { %1313 = vst.msk [vmem:[#allocation2 + $0xd0] sm:$0xff] %vm1254_vm2, %v2971_v51 }
 0x180   : > { %1289 = vst.msk [vmem:[#allocation2 + $0x10] sm:$0xff] %vm1254_vm2, %v2974_v0 }
 0x181   : > { %1296 = vst.msk [vmem:[#allocation2 + $0x48] sm:$0xff] %vm1254_vm2, %v2977_v18 }
 0x182   : > { %v669_v26 = vpop.xlane.xlu2 %668  ;;  %v667_v32 = vpop.xlane.xlu1 %666 }
 0x183   : > { %v3001_v34 = vmax.f32 %v2994_v48, %v669_v26  ;;  %v3004_v42 = vmax.f32 %v2996_v3, %v667_v32  ;;  %v683_v31 = vpop.xlane.xlu0 %682  ;;  %v3026_v26 = vld [vmem:[#allocation2 + $0x18] sm:$0xff] }
 0x184   : > { %v3007_v9 = vmax.f32 %v2998_v20, %v683_v31  ;;  %v3024_v31 = vld [vmem:[#allocation2 + $0x20] sm:$0xff]  ;;  %3457 = vst [vmem:[#allocation18_spill] sm:$0xff] %v3026_v26 }
 0x185   : > { %3453 = vst [vmem:[#allocation14_spill] sm:$0xff] %v3001_v34  ;;  %954 = vperm.xlu1 %2143, %v3004_v42  }
 0x186   : > { %3454 = vst [vmem:[#allocation15_spill] sm:$0xff] %v3004_v42  ;;  %1034 = vperm.xlu0 %2142, %v2971_v51   ;;  %994 = vperm.xlu2 %2141, %v3007_v9  }
 0x187   : > { %3455 = vst [vmem:[#allocation16_spill] sm:$0xff] %v3007_v9 }
 0x188   : > { %1298 = vst.msk [vmem:[#allocation2 + $0x58] sm:$0xff] %vm1254_vm2, %v3001_v34 }
 0x189   : > { %1297 = vst.msk [vmem:[#allocation2 + $0x50] sm:$0xff] %vm1254_vm2, %v3004_v42 }
 0x18a   : > { %1305 = vst.msk [vmem:[#allocation2 + $0x90] sm:$0xff] %vm1254_vm2, %v3007_v9  ;;  %v655_v8 = vpop.xlane.xlu2 %654  ;;  %v653_v59 = vpop.xlane.xlu1 %652  ;;  %v3057_v9 = vld [vmem:[#allocation2 + $0x60] sm:$0xff] }
 0x18b   : > { %3456 = vst [vmem:[#allocation17_spill] sm:$0xff] %v3024_v31  ;;  %v3031_v48 = vmax.f32 %v3024_v31, %v655_v8  ;;  %v3034_v32 = vmax.f32 %v3026_v26, %v653_v59  ;;  %v701_v51 = vpop.xlane.xlu0 %700  ;;  %v3053_v8 = vld [vmem:[#allocation2 + $0xa0] sm:$0xff] }
 0x18c   : > { %v3037_v36 = vmax.f32 %v3028_v56, %v701_v51  ;;  %3462 = vst [vmem:[#allocation23_spill] sm:$0xff] %v3053_v8  ;;  %v3055_v51 = vld [vmem:[#allocation2 + $0x98] sm:$0xff]  ;;  %v3087_v56 = vld [vmem:[#allocation2 + $0xa8] sm:$0xff] }
 0x18d   : > { %3459 = vst [vmem:[#allocation20_spill] sm:$0xff] %v3031_v48 }
 0x18e   : > { %3460 = vst [vmem:[#allocation21_spill] sm:$0xff] %v3034_v32  ;;  %959 = vperm.xlu0 %2142, %v3001_v34   ;;  %919 = vperm.xlu2 %2141, %v3034_v32  }
 0x18f   : > { %3461 = vst [vmem:[#allocation22_spill] sm:$0xff] %v3037_v36 }
 0x190   : > { %1291 = vst.msk [vmem:[#allocation2 + $0x20] sm:$0xff] %vm1254_vm2, %v3031_v48 }
 0x191   : > { %1290 = vst.msk [vmem:[#allocation2 + $0x18] sm:$0xff] %vm1254_vm2, %v3034_v32 }
 0x192   : > { %1314 = vst.msk [vmem:[#allocation2 + $0xd8] sm:$0xff] %vm1254_vm2, %v3037_v36  ;;  %v687_v20 = vpop.xlane.xlu2 %686  ;;  %v685_v31 = vpop.xlane.xlu1 %684 }
 0x193   : > { %3463 = vst [vmem:[#allocation24_spill] sm:$0xff] %v3055_v51  ;;  %v3060_v26 = vmax.f32 %v3053_v8, %v687_v20  ;;  %v3063_v34 = vmax.f32 %v3055_v51, %v685_v31  ;;  %v671_v32 = vpop.xlane.xlu0 %670  ;;  %v3085_v31 = vld [vmem:[#allocation2 + $0xe0] sm:$0xff] }
 0x194   : > { %3464 = vst [vmem:[#allocation25_spill] sm:$0xff] %v3057_v9  ;;  %v3066_v59 = vmax.f32 %v3057_v9, %v671_v32  ;;  %v3083_v32 = vld [vmem:[#allocation2 + $0x28] sm:$0xff]  ;;  %v3116_v9 = vld [vmem:[#allocation2 + $0x30] sm:$0xff] }
 0x195   : > { %3465 = vst [vmem:[#allocation26_spill] sm:$0xff] %v3060_v26  ;;  %999 = vperm.xlu1 %2143, %v3063_v34  }
 0x196   : > { %3466 = vst [vmem:[#allocation27_spill] sm:$0xff] %v3063_v34  ;;  %1004 = vperm.xlu0 %2142, %v3060_v26   ;;  %1039 = vperm.xlu2 %2141, %v3037_v36  }
 0x197   : > { %3467 = vst [vmem:[#allocation28_spill] sm:$0xff] %v3066_v59 }
 0x198   : > { %1307 = vst.msk [vmem:[#allocation2 + $0xa0] sm:$0xff] %vm1254_vm2, %v3060_v26 }
 0x199   : > { %1306 = vst.msk [vmem:[#allocation2 + $0x98] sm:$0xff] %vm1254_vm2, %v3063_v34 }
 0x19a   : > { %1299 = vst.msk [vmem:[#allocation2 + $0x60] sm:$0xff] %vm1254_vm2, %v3066_v59  ;;  %v657_v0 = vpop.xlane.xlu2 %656  ;;  %v703_v8 = vpop.xlane.xlu1 %702 }
 0x19b   : > { %3468 = vst [vmem:[#allocation29_spill] sm:$0xff] %v3083_v32  ;;  %v3090_v34 = vmax.f32 %v3083_v32, %v657_v0  ;;  %v3093_v26 = vmax.f32 %v3085_v31, %v703_v8  ;;  %v689_v36 = vpop.xlane.xlu0 %688  ;;  %v3112_v0 = vld [vmem:[#allocation2 + $0xe8] sm:$0xff] }
 0x19c   : > { %3469 = vst [vmem:[#allocation30_spill] sm:$0xff] %v3085_v31  ;;  %v3096_v20 = vmax.f32 %v3087_v56, %v689_v36  ;;  %v3114_v8 = vld [vmem:[#allocation2 + $0x68] sm:$0xff] }
 0x19d   : > { %3470 = vst [vmem:[#allocation31_spill] sm:$0xff] %v3087_v56  ;;  %1044 = vperm.xlu1 %2143, %v3093_v26   ;;  %v3144_v56 = vld [vmem:[#allocation2 + $0xb0] sm:$0xff] }
 0x19e   : > { %3471 = vst [vmem:[#allocation32_spill] sm:$0xff] %v3090_v34  ;;  %924 = vperm.xlu2 %2141, %v3031_v48  }
 0x19f   : > { %3472 = vst [vmem:[#allocation33_spill] sm:$0xff] %v3093_v26 }
 0x1a0   : > { %3473 = vst [vmem:[#allocation34_spill] sm:$0xff] %v3096_v20 }
 0x1a1   : > { %1292 = vst.msk [vmem:[#allocation2 + $0x28] sm:$0xff] %vm1254_vm2, %v3090_v34 }
 0x1a2   : > { %1315 = vst.msk [vmem:[#allocation2 + $0xe0] sm:$0xff] %vm1254_vm2, %v3093_v26  ;;  %v705_v51 = vpop.xlane.xlu2 %704  ;;  %v673_v32 = vpop.xlane.xlu1 %672 }
 0x1a3   : > { %1308 = vst.msk [vmem:[#allocation2 + $0xa8] sm:$0xff] %vm1254_vm2, %v3096_v20  ;;  %v3119_v31 = vmax.f32 %v3112_v0, %v705_v51  ;;  %v3122_v26 = vmax.f32 %v3114_v8, %v673_v32  ;;  %v659_v48 = vpop.xlane.xlu0 %658  ;;  %v3142_v32 = vld [vmem:[#allocation2 + $0x70] sm:$0xff] }
 0x1a4   : > { %3474 = vst [vmem:[#allocation35_spill] sm:$0xff] %v3112_v0  ;;  %v3125_v36 = vmax.f32 %v3116_v9, %v659_v48  ;;  %v3146_v0 = vld [vmem:[#allocation2 + $0xf0] sm:$0xff] }
 0x1a5   : > { %3475 = vst [vmem:[#allocation36_spill] sm:$0xff] %v3114_v8  ;;  %929 = vperm.xlu1 %2143, %v3090_v34   ;;  %1049 = vperm.xlu0 %2142, %v3119_v31  }
 0x1a6   : > { %3476 = vst [vmem:[#allocation37_spill] sm:$0xff] %v3116_v9  ;;  %964 = vperm.xlu2 %2141, %v3066_v59   ;;  %v3174_v9 = vld [vmem:[#allocation2 + $0x38] sm:$0xff] }
 0x1a7   : > { %3477 = vst [vmem:[#allocation38_spill] sm:$0xff] %v3119_v31 }
 0x1a8   : > { %3478 = vst [vmem:[#allocation39_spill] sm:$0xff] %v3122_v26 }
 0x1a9   : > { %3479 = vst [vmem:[#allocation40_spill] sm:$0xff] %v3125_v36 }
 0x1aa   : > { %1316 = vst.msk [vmem:[#allocation2 + $0xe8] sm:$0xff] %vm1254_vm2, %v3119_v31  ;;  %v675_v31 = vpop.xlane.xlu2 %674  ;;  %v691_v34 = vpop.xlane.xlu1 %690 }
 0x1ab   : > { %1300 = vst.msk [vmem:[#allocation2 + $0x68] sm:$0xff] %vm1254_vm2, %v3122_v26  ;;  %v3149_v51 = vmax.f32 %v3142_v32, %v675_v31  ;;  %v3152_v8 = vmax.f32 %v3144_v56, %v691_v34  ;;  %v707_v59 = vpop.xlane.xlu0 %706 }
 0x1ac   : > { %1293 = vst.msk [vmem:[#allocation2 + $0x30] sm:$0xff] %vm1254_vm2, %v3125_v36  ;;  %v3155_v48 = vmax.f32 %v3146_v0, %v707_v59  ;;  %v3172_v59 = vld [vmem:[#allocation2 + $0xb8] sm:$0xff] }
 0x1ad   : > { %3480 = vst [vmem:[#allocation41_spill] sm:$0xff] %v3142_v32  ;;  %969 = vperm.xlu1 %2143, %v3122_v26   ;;  %974 = vperm.xlu0 %2142, %v3149_v51   ;;  %v3176_v32 = vld [vmem:[#allocation2 + $0x78] sm:$0xff] }
 0x1ae   : > { %3481 = vst [vmem:[#allocation42_spill] sm:$0xff] %v3144_v56  ;;  %1009 = vperm.xlu2 %2141, %v3096_v20  }
 0x1af   : > { %3482 = vst [vmem:[#allocation43_spill] sm:$0xff] %v3146_v0 }
 0x1b0   : > { %3483 = vst [vmem:[#allocation44_spill] sm:$0xff] %v3149_v51 }
 0x1b1   : > { %3484 = vst [vmem:[#allocation45_spill] sm:$0xff] %v3152_v8 }
 0x1b2   : > { %3485 = vst [vmem:[#allocation46_spill] sm:$0xff] %v3155_v48  ;;  %v661_v26 = vpop.xlane.xlu1 %660 }
 0x1b3   : > { %1301 = vst.msk [vmem:[#allocation2 + $0x70] sm:$0xff] %vm1254_vm2, %v3149_v51  ;;  %v693_v51 = vpop.xlane.xlu2 %692  ;;  %v3182_v56 = vmax.f32 %v3174_v9, %v661_v26  ;;  %v677_v20 = vpop.xlane.xlu0 %676 }
 0x1b4   : > { %1309 = vst.msk [vmem:[#allocation2 + $0xb0] sm:$0xff] %vm1254_vm2, %v3152_v8  ;;  %v3179_v31 = vmax.f32 %v3172_v59, %v693_v51  ;;  %v3185_v34 = vmax.f32 %v3176_v32, %v677_v20  ;;  %v3202_v20 = vld [vmem:[#allocation2 + $0xf8] sm:$0xff] }
 0x1b5   : > { %1317 = vst.msk [vmem:[#allocation2 + $0xf0] sm:$0xff] %vm1254_vm2, %v3155_v48  ;;  %1014 = vperm.xlu1 %2143, %v3152_v8  }
 0x1b6   : > { %3486 = vst [vmem:[#allocation47_spill] sm:$0xff] %v3172_v59  ;;  %1019 = vperm.xlu0 %2142, %v3179_v31   ;;  %934 = vperm.xlu2 %2141, %v3125_v36  }
 0x1b7   : > { %3487 = vst [vmem:[#allocation48_spill] sm:$0xff] %v3174_v9 }
 0x1b8   : > { %3488 = vst [vmem:[#allocation49_spill] sm:$0xff] %v3176_v32 }
 0x1b9   : > { %3489 = vst [vmem:[#allocation50_spill] sm:$0xff] %v3179_v31 }
 0x1ba   : > { %3490 = vst [vmem:[#allocation51_spill] sm:$0xff] %v3182_v56  ;;  %v709_v0 = vpop.xlane.xlu1 %708 }
 0x1bb   : > { %3491 = vst [vmem:[#allocation52_spill] sm:$0xff] %v3185_v34  ;;  %v3205_v59 = vmax.f32 %v3202_v20, %v709_v0 }
 0x1bc   : > { %1310 = vst.msk [vmem:[#allocation2 + $0xb8] sm:$0xff] %vm1254_vm2, %v3179_v31 }
 0x1bd   : > { %1294 = vst.msk [vmem:[#allocation2 + $0x38] sm:$0xff] %vm1254_vm2, %v3182_v56  ;;  %939 = vperm.xlu1 %2143, %v3182_v56  }
 0x1be   : > { %1302 = vst.msk [vmem:[#allocation2 + $0x78] sm:$0xff] %vm1254_vm2, %v3185_v34  ;;  %1054 = vperm.xlu2 %2141, %v3155_v48  }
 0x1bf   : > { %3492 = vst [vmem:[#allocation53_spill] sm:$0xff] %v3202_v20 }
 0x1c0   : > { %3493 = vst [vmem:[#allocation54_spill] sm:$0xff] %v3205_v59  ;;  %v905_v26 = vpop.permute.xlu2 %904 }
 0x1c1   : > { %1318 = vst.msk [vmem:[#allocation2 + $0xf8] sm:$0xff] %vm1254_vm2, %v3205_v59  ;;  %v1062_v9 = vsub.f32 %v2702_v45, %v905_v26 }
 0x1c3   : > { %v1094_v0 = vmul.f32 1.442695, %v1062_v9 }
 0x1c5   : > { %1059 = vperm.xlu1 %2143, %v3205_v59   ;;  %2145 = vpow2.f32 %v1094_v0 }
 0x1c6   : > { %979 = vperm.xlu2 %2141, %v3185_v34  }
 0x1c8   : > { %v1025_v32 = vpop.permute.xlu2 %1024 }
 0x1c9   : > { %v1086_v51 = vsub.f32 %v2719_v50, %v1025_v32 }
 0x1cb   : > { %v2146_v8 = vpop.eup %2145  ;;  %v1142_v42 = vmul.f32 1.442695, %v1086_v51 }
 0x1d8   : > { %v950_v31 = vpop.permute.xlu2 %949  ;;  %v945_v56 = vpop.permute.xlu0 %944 }
 0x1d9   : > { %v1070_v36 = vsub.f32 %v2705_v46, %v945_v56 }
 0x1db   : > { %v1110_v34 = vmul.f32 1.442695, %v1070_v36 }
 0x1df   : > { %v985_v20 = vpop.permute.xlu1 %984 }
 0x1e0   : > { %1158 = vadd.xlane.f32.xlu0 %v2146_v8  ;;  %v1078_v48 = vsub.f32 %v2716_v49, %v985_v20  ;;  %v995_v59 = vpop.permute.xlu2 %994 }
 0x1e2   : > { %v1126_v39 = vmul.f32 1.442695, %v1078_v48 }
 0x1e4   : > { %2147 = vpow2.f32 %v1126_v39  ;;  %v1071_v39 = vsub.f32 %v2725_v54, %v950_v31 }
 0x1e5   : > { %2149 = vpow2.f32 %v1142_v42 }
 0x1e6   : > { %2151 = vpow2.f32 %v1110_v34 }
 0x1e7   : > { %v1030_v45 = vpop.permute.xlu1 %1029 }
 0x1e8   : > { %v1087_v9 = vsub.f32 %v2741_v58, %v1030_v45  ;;  %v920_v26 = vpop.permute.xlu2 %919  ;;  %v910_v0 = vpop.permute.xlu0 %909 }
 0x1e9   : > { %v1063_v50 = vsub.f32 %v2722_v53, %v910_v0  ;;  %v1112_v53 = vmul.f32 1.442695, %v1071_v39  ;;  %v1080_v0 = vsub.f32 %v2777_v6, %v995_v59 }
 0x1ea   : > { %v2148_v32 = vpop.eup %2147  ;;  %v1144_v8 = vmul.f32 1.442695, %v1087_v9 }
 0x1eb   : > { %1190 = vadd.xlane.f32.xlu0 %v2148_v32  ;;  %v1096_v46 = vmul.f32 1.442695, %v1063_v50  ;;  %v2150_v49 = vpop.eup %2149 }
 0x1ec   : > { %2153 = vpow2.f32 %v1144_v8  ;;  %v2152_v56 = vpop.eup %2151 }
 0x1ed   : > { %2155 = vpow2.f32 %v1096_v46  ;;  %v1130_v46 = vmul.f32 1.442695, %v1080_v0 }
 0x1ef   : > { %v915_v48 = vpop.permute.xlu1 %914  ;;  %1174 = vadd.xlane.f32.xlu1 %v2152_v56  ;;  %1206 = vadd.xlane.f32.xlu2 %v2150_v49  ;;  %v1065_v56 = vsub.f32 %v2764_v4, %v920_v26 }
 0x1f0   : > { %v1040_v42 = vpop.permute.xlu2 %1039  ;;  %v990_v36 = vpop.permute.xlu0 %989  ;;  %v1064_v45 = vsub.f32 %v2744_v61, %v915_v48 }
 0x1f1   : > { %v1079_v58 = vsub.f32 %v2738_v57, %v990_v36  ;;  %v1100_v36 = vmul.f32 1.442695, %v1065_v56 }
 0x1f2   : > { %v2154_v34 = vpop.eup %2153  ;;  %v1098_v32 = vmul.f32 1.442695, %v1064_v45 }
 0x1f3   : > { %v1128_v51 = vmul.f32 1.442695, %v1079_v58  ;;  %1208 = vadd.xlane.f32.xlu0 %v2154_v34  ;;  %v2156_v20 = vpop.eup %2155 }
 0x1f5   : > { %2157 = vpow2.f32 %v1128_v51 }
 0x1f6   : > { %2159 = vpow2.f32 %v1112_v53 }
 0x1f7   : > { %v955_v9 = vpop.permute.xlu1 %954  ;;  %1160 = vadd.xlane.f32.xlu2 %v2156_v20 }
 0x1f8   : > { %v1072_v54 = vsub.f32 %v2747_v62, %v955_v9  ;;  %v925_v31 = vpop.permute.xlu2 %924  ;;  %v1035_v50 = vpop.permute.xlu0 %1034 }
 0x1f9   : > { %v1088_v61 = vsub.f32 %v2761_v1, %v1035_v50  ;;  %v1089_v1 = vsub.f32 %v2787_v11, %v1040_v42 }
 0x1fa   : > { %v1114_v8 = vmul.f32 1.442695, %v1072_v54  ;;  %v1066_v54 = vsub.f32 %v2790_v13, %v925_v31 }
 0x1fb   : > { %v2158_v57 = vpop.eup %2157  ;;  %v1146_v62 = vmul.f32 1.442695, %v1088_v61  ;;  %v1148_v0 = vmul.f32 1.442695, %v1089_v1 }
 0x1fc   : > { %2161 = vpow2.f32 %v1114_v8  ;;  %1192 = vadd.xlane.f32.xlu1 %v2158_v57  ;;  %v2160_v49 = vpop.eup %2159  ;;  %v1102_v11 = vmul.f32 1.442695, %v1066_v54 }
 0x1fd   : > { %2163 = vpow2.f32 %v1098_v32 }
 0x1fe   : > { %2165 = vpow2.f32 %v1130_v46 }
 0x1ff   : > { %1176 = vadd.xlane.f32.xlu2 %v2160_v49  ;;  %2167 = vpow2.f32 %v1146_v62 }
 0x200   : > { %v965_v48 = vpop.permute.xlu2 %964  ;;  %v960_v6 = vpop.permute.xlu0 %959  ;;  %2169 = vpow2.f32 %v1100_v36 }
 0x201   : > { %v1073_v34 = vsub.f32 %v2771_v5, %v960_v6 }
 0x202   : > { %v2162_v59 = vpop.eup %2161 }
 0x203   : > { %1178 = vadd.xlane.f32.xlu0 %v2162_v59  ;;  %v2164_v39 = vpop.eup %2163  ;;  %v1116_v26 = vmul.f32 1.442695, %v1073_v34 }
 0x204   : > { %1162 = vadd.xlane.f32.xlu1 %v2164_v39  ;;  %v2166_v58 = vpop.eup %2165 }
 0x205   : > { %v2168_v9 = vpop.eup %2167 }
 0x206   : > { %v2170_v50 = vpop.eup %2169 }
 0x207   : > { %v1000_v51 = vpop.permute.xlu1 %999  ;;  %1194 = vadd.xlane.f32.xlu2 %v2166_v58 }
 0x208   : > { %v1081_v53 = vsub.f32 %v2784_v10, %v1000_v51  ;;  %v1010_v4 = vpop.permute.xlu2 %1009  ;;  %v1005_v45 = vpop.permute.xlu0 %1004  ;;  %v1074_v10 = vsub.f32 %v2793_v14, %v965_v48 }
 0x209   : > { %v1082_v5 = vsub.f32 %v2807_v17, %v1005_v45  ;;  %v1083_v56 = vsub.f32 %v2830_v25, %v1010_v4 }
 0x20a   : > { %v1132_v20 = vmul.f32 1.442695, %v1081_v53  ;;  %v1118_v49 = vmul.f32 1.442695, %v1074_v10 }
 0x20b   : > { %v1134_v57 = vmul.f32 1.442695, %v1082_v5  ;;  %v1136_v36 = vmul.f32 1.442695, %v1083_v56 }
 0x20c   : > { %2171 = vpow2.f32 %v1132_v20  ;;  %1210 = vadd.xlane.f32.xlu1 %v2168_v9 }
 0x20d   : > { %2173 = vpow2.f32 %v1116_v26 }
 0x20e   : > { %2175 = vpow2.f32 %v1148_v0 }
 0x20f   : > { %v1045_v32 = vpop.permute.xlu1 %1044  ;;  %1164 = vadd.xlane.f32.xlu2 %v2170_v50  ;;  %2177 = vpow2.f32 %v1102_v11 }
 0x210   : > { %v935_v42 = vpop.permute.xlu2 %934  ;;  %v1090_v13 = vsub.f32 %v2810_v19, %v1045_v32  ;;  %2179 = vpow2.f32 %v1134_v57 }
 0x211   : > { %2181 = vpow2.f32 %v1118_v49  ;;  %v1068_v51 = vsub.f32 %v2836_v29, %v935_v42 }
 0x212   : > { %v2172_v8 = vpop.eup %2171  ;;  %v1150_v6 = vmul.f32 1.442695, %v1090_v13 }
 0x213   : > { %1196 = vadd.xlane.f32.xlu0 %v2172_v8  ;;  %v2174_v46 = vpop.eup %2173  ;;  %v1106_v20 = vmul.f32 1.442695, %v1068_v51 }
 0x214   : > { %1180 = vadd.xlane.f32.xlu1 %v2174_v46  ;;  %v2176_v31 = vpop.eup %2175  ;;  %2183 = vpow2.f32 %v1150_v6 }
 0x215   : > { %v2178_v48 = vpop.eup %2177 }
 0x216   : > { %v2180_v39 = vpop.eup %2179 }
 0x217   : > { %v930_v61 = vpop.permute.xlu1 %929  ;;  %v1050_v17 = vpop.permute.xlu0 %1049  ;;  %1212 = vadd.xlane.f32.xlu2 %v2176_v31 }
 0x218   : > { %v1067_v14 = vsub.f32 %v2813_v21, %v930_v61  ;;  %v1055_v62 = vpop.permute.xlu2 %1054  ;;  %v2182_v19 = vpop.eup %2181  ;;  %v1091_v8 = vsub.f32 %v2833_v28, %v1050_v17 }
 0x21a   : > { %v1104_v59 = vmul.f32 1.442695, %v1067_v14  ;;  %v2184_v1 = vpop.eup %2183  ;;  %v1152_v46 = vmul.f32 1.442695, %v1091_v8 }
 0x21b   : > { %1166 = vadd.xlane.f32.xlu0 %v2178_v48  ;;  %v3494_v48 = vsub.f32 %v2897_v47, %v2903_v55  ;;  %v3498_v55 = vsub.f32 %v2935_v12, %v2942_v23 }
 0x21c   : > { %1198 = vadd.xlane.f32.xlu1 %v2180_v39  ;;  %2185 = vpow2.f32 %v1104_v59  ;;  %v742_v39 = vld [vmem:[#allocation3] sm:$0xff] }
 0x21d   : > { %2187 = vpow2.f32 %v1136_v36  ;;  %v806_v59 = vmul.f32 1.442695, %v3494_v48 }
 0x21f   : > { %v970_v58 = vpop.permute.xlu1 %969  ;;  %v975_v34 = vpop.permute.xlu0 %974  ;;  %1182 = vadd.xlane.f32.xlu2 %v2182_v19 }
 0x220   : > { %v1075_v25 = vsub.f32 %v2816_v22, %v970_v58  ;;  %v1076_v21 = vsub.f32 %v2843_v30, %v975_v34  ;;  %v980_v45 = vpop.permute.xlu2 %979  ;;  %v3496_v34 = vsub.f32 %v2895_v44, %v2900_v52  ;;  %v3499_v44 = vsub.f32 %v2939_v16, %v2948_v27  ;;  %v767_v27 = vld [vmem:[#allocation3 + $0xc8] sm:$0xff] }
 0x221   : > { %v1077_v29 = vsub.f32 %v2869_v38, %v980_v45  ;;  %v1092_v38 = vsub.f32 %v2856_v35, %v1055_v62 }
 0x222   : > { %v1120_v53 = vmul.f32 1.442695, %v1075_v25  ;;  %v1122_v4 = vmul.f32 1.442695, %v1076_v21  ;;  %v2186_v26 = vpop.eup %2185  ;;  %v822_v51 = vmul.f32 1.442695, %v3496_v34  ;;  %v3497_v21 = vsub.f32 %v2917_v63, %v2923_v7 }
 0x223   : > { %1214 = vadd.xlane.f32.xlu0 %v2184_v1  ;;  %v2188_v9 = vpop.eup %2187  ;;  %v1124_v10 = vmul.f32 1.442695, %v1077_v29  ;;  %v1154_v31 = vmul.f32 1.442695, %v1092_v38  ;;  %v758_v1 = vld [vmem:[#allocation3 + $0x80] sm:$0xff] }
 0x224   : > { %2189 = vpow2.f32 %v1120_v53  ;;  %1168 = vadd.xlane.f32.xlu1 %v2186_v26  ;;  %v854_v47 = vmul.f32 1.442695, %v3497_v21  ;;  %v808_v52 = vmul.f32 1.442695, %v3499_v44  ;;  %v750_v7 = vld [vmem:[#allocation3 + $0x40] sm:$0xff]  ;;  %v3514_v21 = vld [vmem:[#allocation21_spill] sm:$0xff] }
 0x225   : > { %2191 = vpow2.f32 %v1122_v4 }
 0x226   : > { %2193 = vpow2.f32 %v1106_v20  ;;  %v766_v20 = vld [vmem:[#allocation3 + $0xc0] sm:$0xff] }
 0x227   : > { %v1015_v0 = vpop.permute.xlu1 %1014  ;;  %1200 = vadd.xlane.f32.xlu2 %v2188_v9 }
 0x228   : > { %v1020_v54 = vpop.permute.xlu0 %1019  ;;  %v1084_v22 = vsub.f32 %v2853_v33, %v1015_v0  ;;  %v3500_v0 = vsub.f32 %v2937_v15, %v2945_v24  ;;  %v3502_v24 = vld [vmem:[#allocation15_spill] sm:$0xff] }
 0x229   : > { %v1085_v30 = vsub.f32 %v2876_v41, %v1020_v54  ;;  %v3503_v8 = vsub.f32 %v2996_v3, %v3502_v24  ;;  %v3525_v24 = vld [vmem:[#allocation17_spill] sm:$0xff] }
 0x22a   : > { %v2190_v50 = vpop.eup %2189  ;;  %v1138_v5 = vmul.f32 1.442695, %v1084_v22  ;;  %v840_v54 = vmul.f32 1.442695, %v3500_v0  ;;  %v3520_v0 = vld [vmem:[#allocation14_spill] sm:$0xff] }
 0x22b   : > { %v1140_v32 = vmul.f32 1.442695, %v1085_v30  ;;  %1184 = vadd.xlane.f32.xlu0 %v2190_v50  ;;  %v2192_v11 = vpop.eup %2191  ;;  %v3501_v50 = vsub.f32 %v2968_v40, %v2977_v18  ;;  %v3504_v40 = vld [vmem:[#allocation9_spill] sm:$0xff]  ;;  %v3505_v18 = vld [vmem:[#allocation11_spill] sm:$0xff] }
 0x22c   : > { %2195 = vpow2.f32 %v1138_v5  ;;  %1186 = vadd.xlane.f32.xlu1 %v2192_v11  ;;  %v2194_v42 = vpop.eup %2193 }
 0x22d   : > { %2197 = vpow2.f32 %v1140_v32  ;;  %v824_v5 = vmul.f32 1.442695, %v3501_v50  ;;  %v3523_v50 = vld [vmem:[#allocation22_spill] sm:$0xff] }
 0x22e   : > { %2199 = vpow2.f32 %v1124_v10 }
 0x22f   : > { %v940_v57 = vpop.permute.xlu1 %939  ;;  %1170 = vadd.xlane.f32.xlu2 %v2194_v42  ;;  %v743_v42 = vld [vmem:[#allocation3 + $0x8] sm:$0xff] }
 0x230   : > { %v1069_v33 = vsub.f32 %v2859_v37, %v940_v57  ;;  %v826_v57 = vmul.f32 1.442695, %v3503_v8  ;;  %v3526_v8 = vld [vmem:[#allocation20_spill] sm:$0xff] }
 0x232   : > { %v2196_v41 = vpop.eup %2195  ;;  %v1108_v49 = vmul.f32 1.442695, %v1069_v33  ;;  %v3506_v33 = vsub.f32 %v3504_v40, %v3505_v18 }
 0x233   : > { %1202 = vadd.xlane.f32.xlu0 %v2196_v41  ;;  %v2198_v13 = vpop.eup %2197 }
 0x234   : > { %2201 = vpow2.f32 %v1108_v49  ;;  %1204 = vadd.xlane.f32.xlu1 %v2198_v13  ;;  %v2200_v61 = vpop.eup %2199  ;;  %v810_v41 = vmul.f32 1.442695, %v3506_v33 }
 0x235   : > { %2203 = vpow2.f32 %v1152_v46 }
 0x236   : > { %2205 = vpow2.f32 %v1154_v31  ;;  %v3507_v31 = vld [vmem:[#allocation13_spill] sm:$0xff] }
 0x237   : > { %v1060_v56 = vpop.permute.xlu1 %1059  ;;  %1188 = vadd.xlane.f32.xlu2 %v2200_v61  ;;  %v3508_v61 = vld [vmem:[#allocation16_spill] sm:$0xff] }
 0x238   : > { %v1093_v28 = vsub.f32 %v2879_v43, %v1060_v56  ;;  %v3495_v43 = vsub.f32 %v2915_v60, %v2920_v2  ;;  %v856_v60 = vmul.f32 1.442695, %v3498_v55  ;;  %v3509_v56 = vsub.f32 %v3507_v31, %v3508_v61 }
 0x23a   : > { %v2202_v17 = vpop.eup %2201  ;;  %v1156_v35 = vmul.f32 1.442695, %v1093_v28  ;;  %v838_v36 = vmul.f32 1.442695, %v3495_v43  ;;  %v842_v28 = vmul.f32 1.442695, %v3509_v56 }
 0x23b   : > { %1172 = vadd.xlane.f32.xlu0 %v2202_v17  ;;  %v2204_v6 = vpop.eup %2203  ;;  %v759_v17 = vld [vmem:[#allocation3 + $0x88] sm:$0xff]  ;;  %v761_v56 = vld [vmem:[#allocation3 + $0x98] sm:$0xff] }
 0x23c   : > { %2207 = vpow2.f32 %v1156_v35  ;;  %1216 = vadd.xlane.f32.xlu1 %v2204_v6  ;;  %v2206_v37 = vpop.eup %2205  ;;  %v751_v35 = vld [vmem:[#allocation3 + $0x48] sm:$0xff] }
 0x23d   : > { %2209 = vpow2.f32 %v806_v59 }
 0x23e   : > { %2211 = vpow2.f32 %v838_v36 }
 0x23f   : > { %1218 = vadd.xlane.f32.xlu2 %v2206_v37  ;;  %2213 = vpow2.f32 %v822_v51 }
 0x240   : > { %2215 = vpow2.f32 %v854_v47 }
 0x241   : > { %2217 = vpow2.f32 %v856_v60  ;;  %v744_v60 = vld [vmem:[#allocation3 + $0x10] sm:$0xff] }
 0x242   : > { %v2208_v14 = vpop.eup %2207  ;;  %2219 = vpow2.f32 %v808_v52  ;;  %v760_v52 = vld [vmem:[#allocation3 + $0x90] sm:$0xff] }
 0x243   : > { %1220 = vadd.xlane.f32.xlu0 %v2208_v14  ;;  %v2210_v62 = vpop.eup %2209  ;;  %2221 = vpow2.f32 %v840_v54 }
 0x244   : > { %v870_v19 = vmul.f32 %v2210_v62, %v742_v39  ;;  %v2212_v2 = vpop.eup %2211  ;;  %2223 = vpow2.f32 %v824_v5  ;;  %v3510_v62 = vld [vmem:[#allocation8_spill] sm:$0xff]  ;;  %v3511_v39 = vld [vmem:[#allocation10_spill] sm:$0xff] }
 0x245   : > { %v2214_v53 = vpop.eup %2213  ;;  %v886_v4 = vmul.f32 %v2212_v2, %v758_v1  ;;  %2225 = vpow2.f32 %v826_v57  ;;  %v3512_v43 = vsub.f32 %v3510_v62, %v3511_v39  ;;  %v3527_v57 = vsub.f32 %v3525_v24, %v3526_v8  ;;  %v769_v39 = vld [vmem:[#allocation3 + $0xd8] sm:$0xff] }
 0x246   : > { %v2216_v26 = vpop.eup %2215  ;;  %v878_v9 = vmul.f32 %v2214_v53, %v750_v7  ;;  %2227 = vpow2.f32 %v810_v41 }
 0x247   : > { %v894_v12 = vmul.f32 %v2216_v26, %v766_v20  ;;  %v2218_v23 = vpop.eup %2217  ;;  %2229 = vpow2.f32 %v842_v28  ;;  %v858_v36 = vmul.f32 1.442695, %v3512_v43  ;;  %v3516_v26 = vld [vmem:[#allocation24_spill] sm:$0xff] }
 0x248   : > { %v895_v32 = vmul.f32 %v2218_v23, %v767_v27  ;;  %v2220_v11 = vpop.eup %2219  ;;  %v3519_v23 = vld [vmem:[#allocation12_spill] sm:$0xff] }
 0x249   : > { %v871_v38 = vmul.f32 %v2220_v11, %v743_v42  ;;  %v2222_v13 = vpop.eup %2221  ;;  %2231 = vpow2.f32 %v858_v36  ;;  %v3521_v54 = vsub.f32 %v3519_v23, %v3520_v0  ;;  %v768_v11 = vld [vmem:[#allocation3 + $0xd0] sm:$0xff]  ;;  %v745_v42 = vld [vmem:[#allocation3 + $0x18] sm:$0xff] }
 0x24a   : > { %v2224_v3 = vpop.eup %2223  ;;  %v887_v6 = vmul.f32 %v2222_v13, %v759_v17 }
 0x24b   : > { %v879_v48 = vmul.f32 %v2224_v3, %v751_v35  ;;  %v2226_v59 = vpop.eup %2225  ;;  %v3531_v3 = vld [vmem:[#allocation25_spill] sm:$0xff]  ;;  %v3532_v35 = vld [vmem:[#allocation28_spill] sm:$0xff] }
 0x24c   : > { %v2228_v51 = vpop.eup %2227 }
 0x24d   : > { %v2230_v1 = vpop.eup %2229 }
 0x253   : > { %v1159_v58 = vpop.xlane.xlu0 %1158 }
 0x254   : > { %v1222_v25 = vadd.f32 %v1159_v58, %v870_v19  ;;  %v752_v58 = vld [vmem:[#allocation3 + $0x50] sm:$0xff] }
 0x255   : > { %v880_v2 = vmul.f32 %v2226_v59, %v752_v58  ;;  %v3535_v58 = vld [vmem:[#allocation33_spill] sm:$0xff] }
 0x256   : > { %1255 = vst.msk [vmem:[#allocation3] sm:$0xff] %vm1254_vm2, %v1222_v25  ;;  %v3513_v25 = vld [vmem:[#allocation18_spill] sm:$0xff] }
 0x257   : > { %v3515_v47 = vsub.f32 %v3513_v25, %v3514_v21 }
 0x259   : > { %v812_v55 = vmul.f32 1.442695, %v3515_v47 }
 0x25b   : > { %2233 = vpow2.f32 %v812_v55 }
 0x25e   : > { %v1191_v63 = vpop.xlane.xlu0 %1190 }
 0x25f   : > { %v1238_v45 = vadd.f32 %v1191_v63, %v886_v4  ;;  %v872_v4 = vmul.f32 %v2228_v51, %v744_v60  ;;  %v3517_v63 = vld [vmem:[#allocation27_spill] sm:$0xff]  ;;  %v3537_v60 = vld [vmem:[#allocation29_spill] sm:$0xff] }
 0x260   : > { %v3518_v7 = vsub.f32 %v3516_v26, %v3517_v63  ;;  %v3540_v63 = vld [vmem:[#allocation31_spill] sm:$0xff] }
 0x261   : > { %1271 = vst.msk [vmem:[#allocation3 + $0x80] sm:$0xff] %vm1254_vm2, %v1238_v45 }
 0x262   : > { %v1175_v29 = vpop.xlane.xlu1 %1174  ;;  %v1207_v16 = vpop.xlane.xlu2 %1206  ;;  %v844_v20 = vmul.f32 1.442695, %v3518_v7  ;;  %v3541_v7 = vld [vmem:[#allocation34_spill] sm:$0xff] }
 0x263   : > { %v1230_v22 = vadd.f32 %v1175_v29, %v878_v9  ;;  %v1246_v30 = vadd.f32 %v1207_v16, %v894_v12  ;;  %v888_v12 = vmul.f32 %v2230_v1, %v760_v52  ;;  %v828_v29 = vmul.f32 1.442695, %v3521_v54  ;;  %v754_v54 = vld [vmem:[#allocation3 + $0x60] sm:$0xff] }
 0x264   : > { %2235 = vpow2.f32 %v844_v20  ;;  %v3542_v20 = vsub.f32 %v3540_v63, %v3541_v7  ;;  %v3561_v7 = vld [vmem:[#allocation48_spill] sm:$0xff] }
 0x265   : > { %1263 = vst.msk [vmem:[#allocation3 + $0x40] sm:$0xff] %vm1254_vm2, %v1230_v22  ;;  %v2232_v22 = vpop.eup %2231  ;;  %2237 = vpow2.f32 %v828_v29 }
 0x266   : > { %1279 = vst.msk [vmem:[#allocation3 + $0xc0] sm:$0xff] %vm1254_vm2, %v1246_v30  ;;  %v1209_v10 = vpop.xlane.xlu0 %1208  ;;  %v3522_v30 = vld [vmem:[#allocation19_spill] sm:$0xff] }
 0x267   : > { %v1247_v15 = vadd.f32 %v1209_v10, %v895_v32  ;;  %v3524_v5 = vsub.f32 %v3522_v30, %v3523_v50  ;;  %v2234_v10 = vpop.eup %2233 }
 0x268   : > { %v873_v33 = vmul.f32 %v2234_v10, %v745_v42  ;;  %v3546_v42 = vld [vmem:[#allocation41_spill] sm:$0xff] }
 0x269   : > { %1280 = vst.msk [vmem:[#allocation3 + $0xc8] sm:$0xff] %vm1254_vm2, %v1247_v15  ;;  %v860_v32 = vmul.f32 1.442695, %v3524_v5  ;;  %v896_v15 = vmul.f32 %v2232_v22, %v768_v11  ;;  %v3544_v22 = vld [vmem:[#allocation39_spill] sm:$0xff] }
 0x26a   : > { %v1161_v46 = vpop.xlane.xlu2 %1160  ;;  %v2236_v41 = vpop.eup %2235 }
 0x26b   : > { %v1223_v49 = vadd.f32 %v1161_v46, %v871_v38  ;;  %v814_v38 = vmul.f32 1.442695, %v3527_v57  ;;  %2239 = vpow2.f32 %v860_v32  ;;  %v3528_v46 = vld [vmem:[#allocation23_spill] sm:$0xff]  ;;  %v2238_v17 = vpop.eup %2237 }
 0x26d   : > { %1256 = vst.msk [vmem:[#allocation3 + $0x8] sm:$0xff] %vm1254_vm2, %v1223_v49  ;;  %v3529_v49 = vld [vmem:[#allocation26_spill] sm:$0xff]  ;;  %2241 = vpow2.f32 %v814_v38  ;;  %v770_v38 = vld [vmem:[#allocation3 + $0xe0] sm:$0xff] }
 0x26e   : > { %v3530_v13 = vsub.f32 %v3528_v46, %v3529_v49 }
 0x26f   : > { %v1193_v37 = vpop.xlane.xlu1 %1192 }
 0x270   : > { %v1239_v14 = vadd.f32 %v1193_v37, %v887_v6  ;;  %v846_v31 = vmul.f32 1.442695, %v3530_v13  ;;  %v3533_v6 = vsub.f32 %v3531_v3, %v3532_v35  ;;  %v747_v13 = vld [vmem:[#allocation3 + $0x28] sm:$0xff]  ;;  %v3552_v35 = vld [vmem:[#allocation42_spill] sm:$0xff] }
 0x271   : > { %v2240_v59 = vpop.eup %2239 }
 0x272   : > { %v1177_v19 = vpop.xlane.xlu2 %1176  ;;  %1272 = vst.msk [vmem:[#allocation3 + $0x88] sm:$0xff] %vm1254_vm2, %v1239_v14  ;;  %v830_v37 = vmul.f32 1.442695, %v3533_v6  ;;  %v753_v14 = vld [vmem:[#allocation3 + $0x58] sm:$0xff]  ;;  %2243 = vpow2.f32 %v846_v31  ;;  %v897_v47 = vmul.f32 %v2240_v59, %v769_v39  ;;  %v3553_v6 = vld [vmem:[#allocation45_spill] sm:$0xff] }
 0x273   : > { %v1231_v34 = vadd.f32 %v1177_v19, %v879_v48  ;;  %v889_v48 = vmul.f32 %v2236_v41, %v761_v56  ;;  %v881_v36 = vmul.f32 %v2238_v17, %v753_v14  ;;  %v3534_v19 = vld [vmem:[#allocation30_spill] sm:$0xff]  ;;  %v2242_v55 = vpop.eup %2241  ;;  %v3550_v41 = vld [vmem:[#allocation40_spill] sm:$0xff] }
 0x274   : > { %2245 = vpow2.f32 %v830_v37  ;;  %v3554_v37 = vsub.f32 %v3552_v35, %v3553_v6 }
 0x275   : > { %1264 = vst.msk [vmem:[#allocation3 + $0x48] sm:$0xff] %vm1254_vm2, %v1231_v34  ;;  %v3536_v34 = vsub.f32 %v3534_v19, %v3535_v58 }
 0x276   : > { %v1179_v44 = vpop.xlane.xlu0 %1178  ;;  %v850_v14 = vmul.f32 1.442695, %v3554_v37  ;;  %v771_v37 = vld [vmem:[#allocation3 + $0xe8] sm:$0xff] }
 0x277   : > { %v1232_v53 = vadd.f32 %v1179_v44, %v880_v2  ;;  %v1163_v45 = vpop.xlane.xlu1 %1162  ;;  %v862_v51 = vmul.f32 1.442695, %v3536_v34  ;;  %v3538_v2 = vld [vmem:[#allocation32_spill] sm:$0xff] }
 0x278   : > { %v1224_v9 = vadd.f32 %v1163_v45, %v872_v4  ;;  %v3539_v1 = vsub.f32 %v3537_v60, %v3538_v2  ;;  %v2244_v26 = vpop.eup %2243  ;;  %v848_v45 = vmul.f32 1.442695, %v3542_v20  ;;  %v3562_v20 = vld [vmem:[#allocation51_spill] sm:$0xff] }
 0x279   : > { %1265 = vst.msk [vmem:[#allocation3 + $0x50] sm:$0xff] %vm1254_vm2, %v1232_v53  ;;  %v746_v53 = vld [vmem:[#allocation3 + $0x20] sm:$0xff]  ;;  %2247 = vpow2.f32 %v862_v51  ;;  %v755_v51 = vld [vmem:[#allocation3 + $0x68] sm:$0xff] }
 0x27a   : > { %v1195_v16 = vpop.xlane.xlu2 %1194  ;;  %1257 = vst.msk [vmem:[#allocation3 + $0x10] sm:$0xff] %vm1254_vm2, %v1224_v9  ;;  %v816_v44 = vmul.f32 1.442695, %v3539_v1  ;;  %v762_v9 = vld [vmem:[#allocation3 + $0xa0] sm:$0xff]  ;;  %v2246_v23 = vpop.eup %2245  ;;  %v756_v1 = vld [vmem:[#allocation3 + $0x70] sm:$0xff] }
 0x27b   : > { %v1240_v27 = vadd.f32 %v1195_v16, %v888_v12  ;;  %v874_v12 = vmul.f32 %v2242_v55, %v746_v53  ;;  %v890_v16 = vmul.f32 %v2244_v26, %v762_v9  ;;  %v882_v11 = vmul.f32 %v2246_v23, %v754_v54  ;;  %v3559_v55 = vld [vmem:[#allocation52_spill] sm:$0xff] }
 0x27c   : > { %2249 = vpow2.f32 %v816_v44 }
 0x27d   : > { %1273 = vst.msk [vmem:[#allocation3 + $0x90] sm:$0xff] %vm1254_vm2, %v1240_v27  ;;  %v3543_v27 = vld [vmem:[#allocation36_spill] sm:$0xff]  ;;  %2251 = vpow2.f32 %v848_v45  ;;  %v3563_v45 = vsub.f32 %v3561_v7, %v3562_v20 }
 0x27e   : > { %v3545_v30 = vsub.f32 %v3543_v27, %v3544_v22 }
 0x27f   : > { %v1211_v40 = vpop.xlane.xlu1 %1210  ;;  %v2248_v10 = vpop.eup %2247  ;;  %v820_v9 = vmul.f32 1.442695, %v3563_v45 }
 0x280   : > { %v1248_v18 = vadd.f32 %v1211_v40, %v896_v15  ;;  %v832_v50 = vmul.f32 1.442695, %v3545_v30  ;;  %v3547_v15 = vld [vmem:[#allocation44_spill] sm:$0xff]  ;;  %v898_v31 = vmul.f32 %v2248_v10, %v770_v38  ;;  %v3568_v10 = vld [vmem:[#allocation46_spill] sm:$0xff] }
 0x281   : > { %v3548_v24 = vsub.f32 %v3546_v42, %v3547_v15 }
 0x282   : > { %v1165_v61 = vpop.xlane.xlu2 %1164  ;;  %1281 = vst.msk [vmem:[#allocation3 + $0xd0] sm:$0xff] %vm1254_vm2, %v1248_v18  ;;  %v2250_v18 = vpop.eup %2249  ;;  %2253 = vpow2.f32 %v832_v50  ;;  %v764_v50 = vld [vmem:[#allocation3 + $0xb0] sm:$0xff] }
 0x283   : > { %v1225_v28 = vadd.f32 %v1165_v61, %v873_v33  ;;  %v834_v8 = vmul.f32 1.442695, %v3548_v24  ;;  %v3549_v33 = vld [vmem:[#allocation37_spill] sm:$0xff]  ;;  %v2252_v61 = vpop.eup %2251  ;;  %v875_v3 = vmul.f32 %v2250_v18, %v747_v13  ;;  %v765_v24 = vld [vmem:[#allocation3 + $0xb8] sm:$0xff] }
 0x284   : > { %v3551_v46 = vsub.f32 %v3549_v33, %v3550_v41  ;;  %v3570_v41 = vld [vmem:[#allocation53_spill] sm:$0xff] }
 0x285   : > { %1258 = vst.msk [vmem:[#allocation3 + $0x18] sm:$0xff] %vm1254_vm2, %v1225_v28  ;;  %2255 = vpow2.f32 %v834_v8  ;;  %v763_v28 = vld [vmem:[#allocation3 + $0xa8] sm:$0xff] }
 0x286   : > { %v1197_v62 = vpop.xlane.xlu0 %1196  ;;  %v818_v49 = vmul.f32 1.442695, %v3551_v46  ;;  %v3571_v46 = vld [vmem:[#allocation54_spill] sm:$0xff] }
 0x287   : > { %v1241_v43 = vadd.f32 %v1197_v62, %v889_v48  ;;  %v1181_v25 = vpop.xlane.xlu1 %1180  ;;  %v891_v62 = vmul.f32 %v2252_v61, %v763_v28 }
 0x288   : > { %v1233_v21 = vadd.f32 %v1181_v25, %v881_v36  ;;  %2257 = vpow2.f32 %v818_v49  ;;  %v2254_v39 = vpop.eup %2253  ;;  %v3556_v36 = vld [vmem:[#allocation50_spill] sm:$0xff]  ;;  %v3572_v49 = vsub.f32 %v3570_v41, %v3571_v46 }
 0x289   : > { %1274 = vst.msk [vmem:[#allocation3 + $0x98] sm:$0xff] %vm1254_vm2, %v1241_v43  ;;  %v3555_v43 = vld [vmem:[#allocation47_spill] sm:$0xff]  ;;  %2259 = vpow2.f32 %v850_v14  ;;  %v883_v44 = vmul.f32 %v2254_v39, %v755_v51 }
 0x28a   : > { %v1213_v52 = vpop.xlane.xlu2 %1212  ;;  %1266 = vst.msk [vmem:[#allocation3 + $0x58] sm:$0xff] %vm1254_vm2, %v1233_v21  ;;  %v3557_v19 = vsub.f32 %v3555_v43, %v3556_v36  ;;  %v868_v13 = vmul.f32 1.442695, %v3572_v49 }
 0x28b   : > { %v1249_v4 = vadd.f32 %v1213_v52, %v897_v47  ;;  %v2256_v21 = vpop.eup %2255  ;;  %v3558_v47 = vld [vmem:[#allocation49_spill] sm:$0xff] }
 0x28c   : > { %v852_v58 = vmul.f32 1.442695, %v3557_v19  ;;  %v3560_v60 = vsub.f32 %v3558_v47, %v3559_v55  ;;  %v884_v63 = vmul.f32 %v2256_v21, %v756_v1 }
 0x28d   : > { %1282 = vst.msk [vmem:[#allocation3 + $0xd8] sm:$0xff] %vm1254_vm2, %v1249_v4  ;;  %v748_v4 = vld [vmem:[#allocation3 + $0x30] sm:$0xff] }
 0x28e   : > { %v1167_v0 = vpop.xlane.xlu0 %1166  ;;  %v836_v2 = vmul.f32 1.442695, %v3560_v60  ;;  %v2258_v52 = vpop.eup %2257  ;;  %2261 = vpow2.f32 %v852_v58 }
 0x28f   : > { %v1226_v29 = vadd.f32 %v1167_v0, %v874_v12  ;;  %v1199_v5 = vpop.xlane.xlu1 %1198  ;;  %v876_v0 = vmul.f32 %v2258_v52, %v748_v4  ;;  %v2260_v54 = vpop.eup %2259 }
 0x290   : > { %v1242_v32 = vadd.f32 %v1199_v5, %v890_v16  ;;  %2263 = vpow2.f32 %v836_v2  ;;  %v3565_v16 = vld [vmem:[#allocation38_spill] sm:$0xff]  ;;  %v892_v8 = vmul.f32 %v2260_v54, %v764_v50 }
 0x291   : > { %1259 = vst.msk [vmem:[#allocation3 + $0x20] sm:$0xff] %vm1254_vm2, %v1226_v29  ;;  %v3564_v29 = vld [vmem:[#allocation35_spill] sm:$0xff]  ;;  %2265 = vpow2.f32 %v820_v9 }
 0x292   : > { %v1183_v57 = vpop.xlane.xlu2 %1182  ;;  %1275 = vst.msk [vmem:[#allocation3 + $0xa0] sm:$0xff] %vm1254_vm2, %v1242_v32  ;;  %v3566_v27 = vsub.f32 %v3564_v29, %v3565_v16 }
 0x293   : > { %v1234_v40 = vadd.f32 %v1183_v57, %v882_v11  ;;  %v3567_v11 = vld [vmem:[#allocation43_spill] sm:$0xff] }
 0x294   : > { %v864_v22 = vmul.f32 1.442695, %v3566_v27  ;;  %v2262_v32 = vpop.eup %2261  ;;  %v3569_v42 = vsub.f32 %v3567_v11, %v3568_v10 }
 0x295   : > { %1267 = vst.msk [vmem:[#allocation3 + $0x60] sm:$0xff] %vm1254_vm2, %v1234_v40  ;;  %v757_v40 = vld [vmem:[#allocation3 + $0x78] sm:$0xff]  ;;  %v893_v33 = vmul.f32 %v2262_v32, %v765_v24 }
 0x296   : > { %v1215_v56 = vpop.xlane.xlu0 %1214  ;;  %v866_v15 = vmul.f32 1.442695, %v3569_v42  ;;  %v2264_v57 = vpop.eup %2263  ;;  %2267 = vpow2.f32 %v864_v22 }
 0x297   : > { %v1250_v17 = vadd.f32 %v1215_v56, %v898_v31  ;;  %v1169_v48 = vpop.xlane.xlu1 %1168  ;;  %v885_v56 = vmul.f32 %v2264_v57, %v757_v40  ;;  %v2266_v28 = vpop.eup %2265 }
 0x298   : > { %v1227_v59 = vadd.f32 %v1169_v48, %v875_v3  ;;  %2269 = vpow2.f32 %v866_v15  ;;  %v749_v3 = vld [vmem:[#allocation3 + $0x38] sm:$0xff] }
 0x299   : > { %1283 = vst.msk [vmem:[#allocation3 + $0xe0] sm:$0xff] %vm1254_vm2, %v1250_v17  ;;  %2271 = vpow2.f32 %v868_v13  ;;  %v877_v14 = vmul.f32 %v2266_v28, %v749_v3 }
 0x29a   : > { %v1201_v34 = vpop.xlane.xlu2 %1200  ;;  %1260 = vst.msk [vmem:[#allocation3 + $0x28] sm:$0xff] %vm1254_vm2, %v1227_v59 }
 0x29b   : > { %v1243_v25 = vadd.f32 %v1201_v34, %v891_v62  ;;  %v772_v62 = vld [vmem:[#allocation3 + $0xf0] sm:$0xff] }
 0x29c   : > { %v2268_v6 = vpop.eup %2267 }
 0x29d   : > { %1276 = vst.msk [vmem:[#allocation3 + $0xa8] sm:$0xff] %vm1254_vm2, %v1243_v25  ;;  %v899_v43 = vmul.f32 %v2268_v6, %v771_v37  ;;  %v773_v25 = vld [vmem:[#allocation3 + $0xf8] sm:$0xff] }
 0x29e   : > { %v1185_v53 = vpop.xlane.xlu0 %1184  ;;  %v2270_v48 = vpop.eup %2269 }
 0x29f   : > { %v1235_v26 = vadd.f32 %v1185_v53, %v883_v44  ;;  %v1187_v12 = vpop.xlane.xlu1 %1186  ;;  %v900_v58 = vmul.f32 %v2270_v48, %v772_v62  ;;  %v2272_v34 = vpop.eup %2271 }
 0x2a0   : > { %v1236_v23 = vadd.f32 %v1187_v12, %v884_v63  ;;  %v901_v47 = vmul.f32 %v2272_v34, %v773_v25 }
 0x2a1   : > { %1268 = vst.msk [vmem:[#allocation3 + $0x68] sm:$0xff] %vm1254_vm2, %v1235_v26 }
 0x2a2   : > { %v1171_v30 = vpop.xlane.xlu2 %1170  ;;  %1269 = vst.msk [vmem:[#allocation3 + $0x70] sm:$0xff] %vm1254_vm2, %v1236_v23 }
 0x2a3   : > { %v1228_v5 = vadd.f32 %v1171_v30, %v876_v0 }
 0x2a5   : > { %1261 = vst.msk [vmem:[#allocation3 + $0x30] sm:$0xff] %vm1254_vm2, %v1228_v5 }
 0x2a6   : > { %v1203_v38 = vpop.xlane.xlu0 %1202 }
 0x2a7   : > { %v1244_v18 = vadd.f32 %v1203_v38, %v892_v8  ;;  %v1205_v31 = vpop.xlane.xlu1 %1204 }
 0x2a8   : > { %v1245_v61 = vadd.f32 %v1205_v31, %v893_v33 }
 0x2a9   : > { %1277 = vst.msk [vmem:[#allocation3 + $0xb0] sm:$0xff] %vm1254_vm2, %v1244_v18 }
 0x2aa   : > { %v1189_v17 = vpop.xlane.xlu2 %1188  ;;  %1278 = vst.msk [vmem:[#allocation3 + $0xb8] sm:$0xff] %vm1254_vm2, %v1245_v61 }
 0x2ab   : > { %v1237_v35 = vadd.f32 %v1189_v17, %v885_v56 }
 0x2ad   : > { %1270 = vst.msk [vmem:[#allocation3 + $0x78] sm:$0xff] %vm1254_vm2, %v1237_v35 }
 0x2ae   : > { %v1173_v59 = vpop.xlane.xlu0 %1172 }
 0x2af   : > { %v1229_v39 = vadd.f32 %v1173_v59, %v877_v14  ;;  %v1217_v36 = vpop.xlane.xlu1 %1216 }
 0x2b0   : > { %v1251_v19 = vadd.f32 %v1217_v36, %v899_v43 }
 0x2b1   : > { %1262 = vst.msk [vmem:[#allocation3 + $0x38] sm:$0xff] %vm1254_vm2, %v1229_v39 }
 0x2b2   : > { %v1219_v51 = vpop.xlane.xlu2 %1218  ;;  %1284 = vst.msk [vmem:[#allocation3 + $0xe8] sm:$0xff] %vm1254_vm2, %v1251_v19 }
 0x2b3   : > { %v1252_v21 = vadd.f32 %v1219_v51, %v900_v58 }
 0x2b5   : > { %1285 = vst.msk [vmem:[#allocation3 + $0xf0] sm:$0xff] %vm1254_vm2, %v1252_v21  ;;  %1322 = sbr.rel (%p2071_p11) target bundleno = 914 (0x392), region = 78 }
 0x2b6   : > { %v1221_v55 = vpop.xlane.xlu0 %1220 }
 0x2b7   : > { %v1253_v60 = vadd.f32 %v1221_v55, %v901_v47 }
 0x2b9   : > { %1286 = vst.msk [vmem:[#allocation3 + $0xf8] sm:$0xff] %vm1254_vm2, %v1253_v60 }
 0x2ba   : > { %v1359_v2 = vld [vmem:[#allocation3 + $0x20] sm:$0xff]  ;;  %v2415_v1 = vmov 0   ;;  %v1357_v44 = vld [vmem:[#allocation3 + $0x10] sm:$0xff]  ;;  %v1360_v53 = vld [vmem:[#allocation3 + $0x28] sm:$0xff] }
 0x2bb   : > { %2275 = vset.pattern.permute.xlu2 %v2415_v1  ;;  %2274 = vset.pattern.permute.xlu1 %v2415_v1  ;;  %2276 = vlog2.f32 %v1359_v2  ;;  %v1355_v52 = vld [vmem:[#allocation3] sm:$0xff]  ;;  %v1358_v4 = vld [vmem:[#allocation3 + $0x18] sm:$0xff]  ;;  %v1356_v26 = vld [vmem:[#allocation3 + $0x8] sm:$0xff] }
 0x2bc   : > { %2273 = vset.pattern.permute.xlu0 %v2415_v1  ;;  %2278 = vlog2.f32 %v1357_v44  ;;  %v1327_v7 = vld [vmem:[#allocation2 + $0x20] sm:$0xff]  ;;  %v1325_v9 = vld [vmem:[#allocation2 + $0x10] sm:$0xff]  ;;  %v1362_v29 = vld [vmem:[#allocation3 + $0x38] sm:$0xff] }
 0x2bd   : > { %2280 = vlog2.f32 %v1355_v52  ;;  %v1363_v12 = vld [vmem:[#allocation3 + $0x40] sm:$0xff]  ;;  %v1361_v30 = vld [vmem:[#allocation3 + $0x30] sm:$0xff]  ;;  %v1328_v42 = vld [vmem:[#allocation2 + $0x28] sm:$0xff] }
 0x2be   : > { %2282 = vlog2.f32 %v1360_v53  ;;  %v1323_v54 = vld [vmem:[#allocation2] sm:$0xff]  ;;  %v1326_v24 = vld [vmem:[#allocation2 + $0x18] sm:$0xff]  ;;  %v1324_v57 = vld [vmem:[#allocation2 + $0x8] sm:$0xff] }
 0x2bf   : > { %2284 = vlog2.f32 %v1358_v4  ;;  %v1366_v40 = vld [vmem:[#allocation3 + $0x58] sm:$0xff]  ;;  %v1365_v41 = vld [vmem:[#allocation3 + $0x50] sm:$0xff]  ;;  %v1364_v13 = vld [vmem:[#allocation3 + $0x48] sm:$0xff] }
 0x2c0   : > { %2286 = vlog2.f32 %v1356_v26  ;;  %v1331_v56 = vld [vmem:[#allocation2 + $0x40] sm:$0xff]  ;;  %v1330_v17 = vld [vmem:[#allocation2 + $0x38] sm:$0xff]  ;;  %v1329_v35 = vld [vmem:[#allocation2 + $0x30] sm:$0xff] }
 0x2c1   : > { %v2277_v63 = vpop.eup %2276  ;;  %2288 = vlog2.f32 %v1363_v12  ;;  %v1369_v37 = vld [vmem:[#allocation3 + $0x70] sm:$0xff]  ;;  %v1368_v59 = vld [vmem:[#allocation3 + $0x68] sm:$0xff]  ;;  %v1367_v43 = vld [vmem:[#allocation3 + $0x60] sm:$0xff] }
 0x2c2   : > { %v2279_v20 = vpop.eup %2278  ;;  %v1396_v45 = vmul.f32 0.6931472, %v2277_v63  ;;  %2290 = vlog2.f32 %v1362_v29  ;;  %v1334_v58 = vld [vmem:[#allocation2 + $0x58] sm:$0xff]  ;;  %v1333_v51 = vld [vmem:[#allocation2 + $0x50] sm:$0xff]  ;;  %v1332_v21 = vld [vmem:[#allocation2 + $0x48] sm:$0xff] }
 0x2c3   : > { %v2281_v23 = vpop.eup %2280  ;;  %v1392_v0 = vmul.f32 0.6931472, %v2279_v20  ;;  %2292 = vlog2.f32 %v1361_v30  ;;  %v1372_v55 = vld [vmem:[#allocation3 + $0x88] sm:$0xff]  ;;  %v1371_v1 = vld [vmem:[#allocation3 + $0x80] sm:$0xff]  ;;  %v1370_v53 = vld [vmem:[#allocation3 + $0x78] sm:$0xff] }
 0x2c4   : > { %v2283_v16 = vpop.eup %2282  ;;  %v1455_v27 = vadd.f32 %v1396_v45, %v1327_v7  ;;  %v1388_v22 = vmul.f32 0.6931472, %v2281_v23  ;;  %2294 = vlog2.f32 %v1366_v40  ;;  %v1337_v63 = vld [vmem:[#allocation2 + $0x70] sm:$0xff]  ;;  %v1336_v20 = vld [vmem:[#allocation2 + $0x68] sm:$0xff]  ;;  %v1375_v23 = vld [vmem:[#allocation3 + $0xa0] sm:$0xff] }
 0x2c5   : > { %v2285_v50 = vpop.eup %2284  ;;  %v1453_v5 = vadd.f32 %v1392_v0, %v1325_v9  ;;  %v1398_v10 = vmul.f32 0.6931472, %v2283_v16  ;;  %2296 = vlog2.f32 %v1365_v41  ;;  %v1335_v9 = vld [vmem:[#allocation2 + $0x60] sm:$0xff]  ;;  %v1374_v29 = vld [vmem:[#allocation3 + $0x98] sm:$0xff] }
 0x2c6   : > { %v2287_v32 = vpop.eup %2286  ;;  %1601 = vperm.xlu2 %2275, %v1455_v27   ;;  %v1451_v11 = vadd.f32 %v1388_v22, %v1323_v54  ;;  %v1394_v15 = vmul.f32 0.6931472, %v2285_v50  ;;  %2298 = vlog2.f32 %v1364_v13  ;;  %v1373_v22 = vld [vmem:[#allocation3 + $0x90] sm:$0xff] }
 0x2c7   : > { %1591 = vperm.xlu1 %2274, %v1453_v5   ;;  %v1390_v8 = vmul.f32 0.6931472, %v2287_v32  ;;  %v1456_v38 = vadd.f32 %v1398_v10, %v1328_v42  ;;  %v2289_v18 = vpop.eup %2288  ;;  %2300 = vlog2.f32 %v1369_v37  ;;  %v1340_v5 = vld [vmem:[#allocation2 + $0x88] sm:$0xff]  ;;  %v1338_v42 = vld [vmem:[#allocation2 + $0x78] sm:$0xff] }
 0x2c8   : > { %1581 = vperm.xlu0 %2273, %v1451_v11   ;;  %v1454_v33 = vadd.f32 %v1394_v15, %v1326_v24  ;;  %v2291_v46 = vpop.eup %2290  ;;  %v1404_v61 = vmul.f32 0.6931472, %v2289_v18  ;;  %2302 = vlog2.f32 %v1368_v59  ;;  %v1339_v11 = vld [vmem:[#allocation2 + $0x80] sm:$0xff]  ;;  %v1378_v24 = vld [vmem:[#allocation3 + $0xb8] sm:$0xff] }
 0x2c9   : > { %v1452_v49 = vadd.f32 %v1390_v8, %v1324_v57  ;;  %v2293_v31 = vpop.eup %2292  ;;  %v1402_v28 = vmul.f32 0.6931472, %v2291_v46  ;;  %2304 = vlog2.f32 %v1367_v43 }
 0x2ca   : > { %v1400_v3 = vmul.f32 0.6931472, %v2293_v31  ;;  %v1459_v6 = vadd.f32 %v1404_v61, %v1331_v56  ;;  %v2295_v14 = vpop.eup %2294  ;;  %2306 = vlog2.f32 %v1372_v55  ;;  %v1342_v31 = vld [vmem:[#allocation2 + $0x98] sm:$0xff]  ;;  %v1341_v56 = vld [vmem:[#allocation2 + $0x90] sm:$0xff] }
 0x2cb   : > { %v1458_v48 = vadd.f32 %v1402_v28, %v1330_v17  ;;  %v2297_v62 = vpop.eup %2296  ;;  %v1410_v19 = vmul.f32 0.6931472, %v2295_v14  ;;  %2308 = vlog2.f32 %v1371_v1  ;;  %v1381_v17 = vld [vmem:[#allocation3 + $0xd0] sm:$0xff] }
 0x2cc   : > { %v1457_v39 = vadd.f32 %v1400_v3, %v1329_v35  ;;  %v2299_v36 = vpop.eup %2298  ;;  %v1408_v34 = vmul.f32 0.6931472, %v2297_v62  ;;  %2310 = vlog2.f32 %v1370_v53 }
 0x2cd   : > { %v1406_v25 = vmul.f32 0.6931472, %v2299_v36  ;;  %v1462_v47 = vadd.f32 %v1410_v19, %v1334_v58  ;;  %v2301_v60 = vpop.eup %2300  ;;  %2312 = vlog2.f32 %v1375_v23  ;;  %v1345_v36 = vld [vmem:[#allocation2 + $0xb0] sm:$0xff]  ;;  %v1344_v58 = vld [vmem:[#allocation2 + $0xa8] sm:$0xff] }
 0x2ce   : > { %1606 = vperm.xlu2 %2275, %v1456_v38   ;;  %v1461_v2 = vadd.f32 %v1408_v34, %v1333_v51  ;;  %v2303_v44 = vpop.eup %2302  ;;  %v1416_v26 = vmul.f32 0.6931472, %v2301_v60  ;;  %2314 = vlog2.f32 %v1374_v29  ;;  %v1377_v38 = vld [vmem:[#allocation3 + $0xb0] sm:$0xff]  ;;  %v1384_v51 = vld [vmem:[#allocation3 + $0xe8] sm:$0xff] }
 0x2cf   : > { %1596 = vperm.xlu1 %2274, %v1454_v33   ;;  %v1460_v52 = vadd.f32 %v1406_v25, %v1332_v21  ;;  %v2305_v4 = vpop.eup %2304  ;;  %v1414_v7 = vmul.f32 0.6931472, %v2303_v44  ;;  %2316 = vlog2.f32 %v1373_v22  ;;  %v1376_v33 = vld [vmem:[#allocation3 + $0xa8] sm:$0xff]  ;;  %v1351_v22 = vld [vmem:[#allocation2 + $0xe0] sm:$0xff] }
 0x2d0   : > { %1586 = vperm.xlu0 %2273, %v1452_v49   ;;  %v1412_v45 = vmul.f32 0.6931472, %v2305_v4  ;;  %v1465_v12 = vadd.f32 %v1416_v26, %v1337_v63  ;;  %v2307_v0 = vpop.eup %2306  ;;  %2318 = vlog2.f32 %v1378_v24  ;;  %v1343_v49 = vld [vmem:[#allocation2 + $0xa0] sm:$0xff]  ;;  %v1348_v4 = vld [vmem:[#allocation2 + $0xc8] sm:$0xff]  ;;  %v1354_v24 = vld [vmem:[#allocation2 + $0xf8] sm:$0xff] }
 0x2d1   : > { %v1464_v54 = vadd.f32 %v1414_v7, %v1336_v20  ;;  %v2309_v16 = vpop.eup %2308  ;;  %v1422_v50 = vmul.f32 0.6931472, %v2307_v0  ;;  %2320 = vlog2.f32 %v1377_v38  ;;  %v1347_v63 = vld [vmem:[#allocation2 + $0xc0] sm:$0xff]  ;;  %v1385_v0 = vld [vmem:[#allocation3 + $0xf0] sm:$0xff] }
 0x2d2   : > { %v1463_v27 = vadd.f32 %v1412_v45, %v1335_v9  ;;  %v2311_v30 = vpop.eup %2310  ;;  %v1420_v32 = vmul.f32 0.6931472, %v2309_v16  ;;  %2322 = vlog2.f32 %v1376_v33  ;;  %v1386_v9 = vld [vmem:[#allocation3 + $0xf8] sm:$0xff]  ;;  %v1352_v16 = vld [vmem:[#allocation2 + $0xe8] sm:$0xff] }
 0x2d3   : > { %v1418_v10 = vmul.f32 0.6931472, %v2311_v30  ;;  %v1468_v15 = vadd.f32 %v1422_v50, %v1340_v5  ;;  %v2313_v8 = vpop.eup %2312  ;;  %2324 = vlog2.f32 %v1381_v17  ;;  %v1350_v50 = vld [vmem:[#allocation2 + $0xd8] sm:$0xff]  ;;  %v1496_v33 = vld [vmem:[#allocation5 + $0x68] sm:$0xff] }
 0x2d4   : > { %v1467_v57 = vadd.f32 %v1420_v32, %v1339_v11  ;;  %v2315_v40 = vpop.eup %2314  ;;  %v1428_v46 = vmul.f32 0.6931472, %v2313_v8 }
 0x2d5   : > { %v1466_v18 = vadd.f32 %v1418_v10, %v1338_v42  ;;  %v2317_v41 = vpop.eup %2316  ;;  %v1426_v13 = vmul.f32 0.6931472, %v2315_v40 }
 0x2d6   : > { %1621 = vperm.xlu2 %2275, %v1459_v6   ;;  %v1424_v61 = vmul.f32 0.6931472, %v2317_v41  ;;  %v1471_v28 = vadd.f32 %v1428_v46, %v1343_v49  ;;  %v2319_v3 = vpop.eup %2318  ;;  %v1380_v6 = vld [vmem:[#allocation3 + $0xc8] sm:$0xff]  ;;  %v1497_v41 = vld [vmem:[#allocation5 + $0x70] sm:$0xff] }
 0x2d7   : > { %1616 = vperm.xlu1 %2274, %v1458_v48   ;;  %v1470_v35 = vadd.f32 %v1426_v13, %v1342_v31  ;;  %v2321_v37 = vpop.eup %2320  ;;  %v1379_v48 = vld [vmem:[#allocation3 + $0xc0] sm:$0xff]  ;;  %v1434_v62 = vmul.f32 0.6931472, %v2319_v3  ;;  %2326 = vlog2.f32 %v1380_v6 }
 0x2d8   : > { %1611 = vperm.xlu0 %2273, %v1457_v39   ;;  %v1469_v14 = vadd.f32 %v1424_v61, %v1341_v56  ;;  %v2323_v59 = vpop.eup %2322  ;;  %v1346_v39 = vld [vmem:[#allocation2 + $0xb8] sm:$0xff]  ;;  %v1432_v43 = vmul.f32 0.6931472, %v2321_v37  ;;  %2328 = vlog2.f32 %v1379_v48  ;;  %v1499_v56 = vld [vmem:[#allocation5 + $0x80] sm:$0xff]  ;;  %v1509_v48 = vld [vmem:[#allocation5 + $0xd0] sm:$0xff] }
 0x2d9   : > { %v1430_v19 = vmul.f32 0.6931472, %v2323_v59  ;;  %v1474_v34 = vadd.f32 %v1434_v62, %v1346_v39  ;;  %v2325_v25 = vpop.eup %2324  ;;  %2330 = vlog2.f32 %v1384_v51  ;;  %v1498_v61 = vld [vmem:[#allocation5 + $0x78] sm:$0xff]  ;;  %v1507_v37 = vld [vmem:[#allocation5 + $0xc0] sm:$0xff] }
 0x2da   : > { %v1473_v21 = vadd.f32 %v1432_v43, %v1345_v36  ;;  %v1440_v44 = vmul.f32 0.6931472, %v2325_v25  ;;  %v1516_v36 = vld [vmem:[#allocation5 + $0x108] sm:$0xff]  ;;  %v1490_v25 = vld [vmem:[#allocation5 + $0x38] sm:$0xff] }
 0x2db   : > { %v1472_v60 = vadd.f32 %v1430_v19, %v1344_v58  ;;  %v1517_v19 = vld [vmem:[#allocation5 + $0x110] sm:$0xff]  ;;  %v1518_v58 = vld [vmem:[#allocation5 + $0x118] sm:$0xff] }
 0x2dd   : > { %v2327_v55 = vpop.eup %2326 }
 0x2de   : > { %1636 = vperm.xlu2 %2275, %v1462_v47   ;;  %v1383_v47 = vld [vmem:[#allocation3 + $0xe0] sm:$0xff]  ;;  %v2329_v1 = vpop.eup %2328  ;;  %v1438_v53 = vmul.f32 0.6931472, %v2327_v55 }
 0x2df   : > { %1631 = vperm.xlu1 %2274, %v1461_v2   ;;  %v1382_v2 = vld [vmem:[#allocation3 + $0xd8] sm:$0xff]  ;;  %2332 = vlog2.f32 %v1383_v47  ;;  %v1436_v26 = vmul.f32 0.6931472, %v2329_v1  ;;  %v2331_v20 = vpop.eup %2330 }
 0x2e0   : > { %1626 = vperm.xlu0 %2273, %v1460_v52   ;;  %v1349_v52 = vld [vmem:[#allocation2 + $0xd0] sm:$0xff]  ;;  %2334 = vlog2.f32 %v1382_v2  ;;  %v1476_v45 = vadd.f32 %v1438_v53, %v1348_v4  ;;  %v1446_v29 = vmul.f32 0.6931472, %v2331_v20  ;;  %v1484_v4 = vld [vmem:[#allocation5 + $0x8] sm:$0xff] }
 0x2e1   : > { %v1477_v7 = vadd.f32 %v1440_v44, %v1349_v52  ;;  %v1475_v23 = vadd.f32 %v1436_v26, %v1347_v63  ;;  %2336 = vlog2.f32 %v1386_v9  ;;  %v1483_v44 = vld [vmem:[#allocation5] sm:$0xff]  ;;  %v1485_v63 = vld [vmem:[#allocation5 + $0x10] sm:$0xff]  ;;  %v1526_v9 = vld [vmem:[#allocation5 + $0x158] sm:$0xff] }
 0x2e2   : > { %2338 = vlog2.f32 %v1385_v0  ;;  %v1480_v5 = vadd.f32 %v1446_v29, %v1352_v16 }
 0x2e6   : > { %1651 = vperm.xlu2 %2275, %v1465_v12   ;;  %v2333_v12 = vpop.eup %2332 }
 0x2e7   : > { %1646 = vperm.xlu1 %2274, %v1464_v54   ;;  %v2335_v54 = vpop.eup %2334 }
 0x2e8   : > { %1641 = vperm.xlu0 %2273, %v1463_v27   ;;  %v1444_v27 = vmul.f32 0.6931472, %v2333_v12  ;;  %v1442_v30 = vmul.f32 0.6931472, %v2335_v54  ;;  %v2337_v11 = vpop.eup %2336  ;;  %v1492_v54 = vld [vmem:[#allocation5 + $0x48] sm:$0xff] }
 0x2e9   : > { %v2339_v42 = vpop.eup %2338 }
 0x2ea   : > { %v1479_v32 = vadd.f32 %v1444_v27, %v1351_v22  ;;  %v1478_v10 = vadd.f32 %v1442_v30, %v1350_v50  ;;  %v1448_v8 = vmul.f32 0.6931472, %v2339_v42  ;;  %v1493_v27 = vld [vmem:[#allocation5 + $0x50] sm:$0xff]  ;;  %v1494_v50 = vld [vmem:[#allocation5 + $0x58] sm:$0xff]  ;;  %v1487_v42 = vld [vmem:[#allocation5 + $0x20] sm:$0xff] }
 0x2ee   : > { %1666 = vperm.xlu2 %2275, %v1468_v15   ;;  %v1450_v15 = vmul.f32 0.6931472, %v2337_v11  ;;  %v1486_v11 = vld [vmem:[#allocation5 + $0x18] sm:$0xff] }
 0x2ef   : > { %1661 = vperm.xlu1 %2274, %v1467_v57   ;;  %v1353_v57 = vld [vmem:[#allocation2 + $0xf0] sm:$0xff] }
 0x2f0   : > { %1656 = vperm.xlu0 %2273, %v1466_v18   ;;  %v1482_v38 = vadd.f32 %v1450_v15, %v1354_v24  ;;  %v1481_v40 = vadd.f32 %v1448_v8, %v1353_v57  ;;  %v1495_v18 = vld [vmem:[#allocation5 + $0x60] sm:$0xff]  ;;  %v1488_v24 = vld [vmem:[#allocation5 + $0x28] sm:$0xff]  ;;  %v1534_v57 = vld [vmem:[#allocation5 + $0x198] sm:$0xff] }
 0x2f6   : > { %1681 = vperm.xlu2 %2275, %v1471_v28   ;;  %v1500_v28 = vld [vmem:[#allocation5 + $0x88] sm:$0xff] }
 0x2f7   : > { %1676 = vperm.xlu1 %2274, %v1470_v35  }
 0x2f8   : > { %1671 = vperm.xlu0 %2273, %v1469_v14   ;;  %v1508_v14 = vld [vmem:[#allocation5 + $0xc8] sm:$0xff] }
 0x2fe   : > { %1696 = vperm.xlu2 %2275, %v1474_v34   ;;  %v1489_v34 = vld [vmem:[#allocation5 + $0x30] sm:$0xff] }
 0x2ff   : > { %1691 = vperm.xlu1 %2274, %v1473_v21  }
 0x300   : > { %1686 = vperm.xlu0 %2273, %v1472_v60   ;;  %v1491_v60 = vld [vmem:[#allocation5 + $0x40] sm:$0xff] }
 0x306   : > { %1711 = vperm.xlu2 %2275, %v1477_v7  }
 0x307   : > { %1706 = vperm.xlu1 %2274, %v1476_v45   ;;  %v1525_v45 = vld [vmem:[#allocation5 + $0x150] sm:$0xff] }
 0x308   : > { %1701 = vperm.xlu0 %2273, %v1475_v23   ;;  %v1527_v23 = vld [vmem:[#allocation5 + $0x160] sm:$0xff] }
 0x30e   : > { %1726 = vperm.xlu2 %2275, %v1480_v5  }
 0x30f   : > { %1721 = vperm.xlu1 %2274, %v1479_v32  }
 0x310   : > { %1716 = vperm.xlu0 %2273, %v1478_v10  }
 0x317   : > { %1736 = vperm.xlu1 %2274, %v1482_v38  }
 0x318   : > { %1731 = vperm.xlu0 %2273, %v1481_v40   ;;  %v1535_v40 = vld [vmem:[#allocation5 + $0x1a0] sm:$0xff] }
 0x320   : > { %v1602_v46 = vpop.permute.xlu2 %1601 }
 0x321   : > { %v1751_v49 = vsub.f32 %v1495_v18, %v1602_v46  ;;  %v1752_v13 = vsub.f32 %v1496_v33, %v1602_v46  ;;  %v1753_v31 = vsub.f32 %v1497_v41, %v1602_v46  ;;  %v1536_v33 = vld [vmem:[#allocation5 + $0x1a8] sm:$0xff] }
 0x323   : > { %1847 = vst [vmem:[#allocation5 + $0x60] sm:$0xff] %v1751_v49  ;;  %v1504_v49 = vld [vmem:[#allocation5 + $0xa8] sm:$0xff] }
 0x324   : > { %1848 = vst [vmem:[#allocation5 + $0x68] sm:$0xff] %v1752_v13 }
 0x325   : > { %1849 = vst [vmem:[#allocation5 + $0x70] sm:$0xff] %v1753_v31 }
 0x328   : > { %v1607_v17 = vpop.permute.xlu2 %1606 }
 0x329   : > { %v1754_v3 = vsub.f32 %v1498_v61, %v1607_v17  ;;  %v1755_v35 = vsub.f32 %v1499_v56, %v1607_v17  ;;  %v1756_v6 = vsub.f32 %v1500_v28, %v1607_v17  ;;  %v1505_v61 = vld [vmem:[#allocation5 + $0xb0] sm:$0xff]  ;;  %v1506_v17 = vld [vmem:[#allocation5 + $0xb8] sm:$0xff] }
 0x32b   : > { %1850 = vst [vmem:[#allocation5 + $0x78] sm:$0xff] %v1754_v3 }
 0x32c   : > { %1851 = vst [vmem:[#allocation5 + $0x80] sm:$0xff] %v1755_v35  ;;  %v1501_v35 = vld [vmem:[#allocation5 + $0x90] sm:$0xff] }
 0x32d   : > { %1852 = vst [vmem:[#allocation5 + $0x88] sm:$0xff] %v1756_v6 }
 0x330   : > { %v1622_v59 = vpop.permute.xlu2 %1621 }
 0x331   : > { %v1763_v62 = vsub.f32 %v1507_v37, %v1622_v59  ;;  %v1764_v39 = vsub.f32 %v1508_v14, %v1622_v59  ;;  %v1765_v43 = vsub.f32 %v1509_v48, %v1622_v59  ;;  %v1502_v37 = vld [vmem:[#allocation5 + $0x98] sm:$0xff]  ;;  %v1503_v48 = vld [vmem:[#allocation5 + $0xa0] sm:$0xff] }
 0x333   : > { %1859 = vst [vmem:[#allocation5 + $0xc0] sm:$0xff] %v1763_v62  ;;  %v1543_v62 = vld [vmem:[#allocation5 + $0x1e0] sm:$0xff] }
 0x334   : > { %1860 = vst [vmem:[#allocation5 + $0xc8] sm:$0xff] %v1764_v39 }
 0x335   : > { %1861 = vst [vmem:[#allocation5 + $0xd0] sm:$0xff] %v1765_v43  ;;  %v1544_v43 = vld [vmem:[#allocation5 + $0x1e8] sm:$0xff] }
 0x338   : > { %v1637_v51 = vpop.permute.xlu2 %1636 }
 0x339   : > { %v1772_v21 = vsub.f32 %v1516_v36, %v1637_v51  ;;  %v1773_v47 = vsub.f32 %v1517_v19, %v1637_v51  ;;  %v1774_v55 = vsub.f32 %v1518_v58, %v1637_v51  ;;  %v1592_v2 = vpop.permute.xlu1 %1591  ;;  %v1545_v58 = vld [vmem:[#allocation5 + $0x1f0] sm:$0xff] }
 0x33a   : > { %v1745_v1 = vsub.f32 %v1489_v34, %v1592_v2  ;;  %v1582_v52 = vpop.permute.xlu0 %1581  ;;  %v1746_v53 = vsub.f32 %v1490_v25, %v1592_v2  ;;  %v1747_v26 = vsub.f32 %v1491_v60, %v1592_v2  ;;  %v1513_v25 = vld [vmem:[#allocation5 + $0xf0] sm:$0xff]  ;;  %v1515_v2 = vld [vmem:[#allocation5 + $0x100] sm:$0xff] }
 0x33b   : > { %1868 = vst [vmem:[#allocation5 + $0x108] sm:$0xff] %v1772_v21  ;;  %v1739_v7 = vsub.f32 %v1483_v44, %v1582_v52  ;;  %v1740_v20 = vsub.f32 %v1484_v4, %v1582_v52  ;;  %v1741_v12 = vsub.f32 %v1485_v63, %v1582_v52  ;;  %v1510_v44 = vld [vmem:[#allocation5 + $0xd8] sm:$0xff] }
 0x33c   : > { %1869 = vst [vmem:[#allocation5 + $0x110] sm:$0xff] %v1773_v47 }
 0x33d   : > { %1870 = vst [vmem:[#allocation5 + $0x118] sm:$0xff] %v1774_v55  ;;  %v1514_v55 = vld [vmem:[#allocation5 + $0xf8] sm:$0xff] }
 0x33e   : > { %1841 = vst [vmem:[#allocation5 + $0x30] sm:$0xff] %v1745_v1 }
 0x33f   : > { %1842 = vst [vmem:[#allocation5 + $0x38] sm:$0xff] %v1746_v53  ;;  %v1511_v53 = vld [vmem:[#allocation5 + $0xe0] sm:$0xff] }
 0x340   : > { %1843 = vst [vmem:[#allocation5 + $0x40] sm:$0xff] %v1747_v26  ;;  %v1652_v0 = vpop.permute.xlu2 %1651  ;;  %v1512_v26 = vld [vmem:[#allocation5 + $0xe8] sm:$0xff] }
 0x341   : > { %1835 = vst [vmem:[#allocation5] sm:$0xff] %v1739_v7  ;;  %v1781_v29 = vsub.f32 %v1525_v45, %v1652_v0  ;;  %v1782_v16 = vsub.f32 %v1526_v9, %v1652_v0  ;;  %v1597_v22 = vpop.permute.xlu1 %1596  ;;  %v1783_v30 = vsub.f32 %v1527_v23, %v1652_v0  ;;  %v1552_v7 = vld [vmem:[#allocation5 + $0x228] sm:$0xff]  ;;  %v1553_v9 = vld [vmem:[#allocation5 + $0x230] sm:$0xff]  ;;  %v1554_v0 = vld [vmem:[#allocation5 + $0x238] sm:$0xff] }
 0x342   : > { %1836 = vst [vmem:[#allocation5 + $0x8] sm:$0xff] %v1740_v20  ;;  %v1587_v5 = vpop.permute.xlu0 %1586  ;;  %v1748_v32 = vsub.f32 %v1492_v54, %v1597_v22  ;;  %v1749_v10 = vsub.f32 %v1493_v27, %v1597_v22  ;;  %v1750_v15 = vsub.f32 %v1494_v50, %v1597_v22  ;;  %v1523_v22 = vld [vmem:[#allocation5 + $0x140] sm:$0xff]  ;;  %v1524_v50 = vld [vmem:[#allocation5 + $0x148] sm:$0xff] }
 0x343   : > { %1837 = vst [vmem:[#allocation5 + $0x10] sm:$0xff] %v1741_v12  ;;  %v1742_v8 = vsub.f32 %v1486_v11, %v1587_v5  ;;  %v1743_v38 = vsub.f32 %v1487_v42, %v1587_v5  ;;  %v1744_v18 = vsub.f32 %v1488_v24, %v1587_v5 }
 0x344   : > { %1877 = vst [vmem:[#allocation5 + $0x150] sm:$0xff] %v1781_v29 }
 0x345   : > { %1878 = vst [vmem:[#allocation5 + $0x158] sm:$0xff] %v1782_v16  ;;  %v1522_v16 = vld [vmem:[#allocation5 + $0x138] sm:$0xff] }
 0x346   : > { %1879 = vst [vmem:[#allocation5 + $0x160] sm:$0xff] %v1783_v30 }
 0x347   : > { %1844 = vst [vmem:[#allocation5 + $0x48] sm:$0xff] %v1748_v32  ;;  %v1519_v32 = vld [vmem:[#allocation5 + $0x120] sm:$0xff] }
 0x348   : > { %1845 = vst [vmem:[#allocation5 + $0x50] sm:$0xff] %v1749_v10  ;;  %v1667_v41 = vpop.permute.xlu2 %1666  ;;  %v1520_v10 = vld [vmem:[#allocation5 + $0x128] sm:$0xff] }
 0x349   : > { %1846 = vst [vmem:[#allocation5 + $0x58] sm:$0xff] %v1750_v15  ;;  %v1790_v46 = vsub.f32 %v1534_v57, %v1667_v41  ;;  %v1617_v13 = vpop.permute.xlu1 %1616  ;;  %v1791_v31 = vsub.f32 %v1535_v40, %v1667_v41  ;;  %v1792_v28 = vsub.f32 %v1536_v33, %v1667_v41  ;;  %v1521_v15 = vld [vmem:[#allocation5 + $0x130] sm:$0xff] }
 0x34a   : > { %1838 = vst [vmem:[#allocation5 + $0x18] sm:$0xff] %v1742_v8  ;;  %v1612_v56 = vpop.permute.xlu0 %1611  ;;  %v1760_v3 = vsub.f32 %v1504_v49, %v1617_v13  ;;  %v1761_v6 = vsub.f32 %v1505_v61, %v1617_v13  ;;  %v1762_v14 = vsub.f32 %v1506_v17, %v1617_v13  ;;  %v1561_v57 = vld [vmem:[#allocation5 + $0x270] sm:$0xff]  ;;  %v1531_v13 = vld [vmem:[#allocation5 + $0x180] sm:$0xff]  ;;  %v1532_v61 = vld [vmem:[#allocation5 + $0x188] sm:$0xff] }
 0x34b   : > { %1839 = vst [vmem:[#allocation5 + $0x20] sm:$0xff] %v1743_v38  ;;  %v1757_v59 = vsub.f32 %v1501_v35, %v1612_v56  ;;  %v1758_v39 = vsub.f32 %v1502_v37, %v1612_v56  ;;  %v1759_v19 = vsub.f32 %v1503_v48, %v1612_v56 }
 0x34c   : > { %1840 = vst [vmem:[#allocation5 + $0x28] sm:$0xff] %v1744_v18  ;;  %v1562_v18 = vld [vmem:[#allocation5 + $0x278] sm:$0xff] }
 0x34d   : > { %1886 = vst [vmem:[#allocation5 + $0x198] sm:$0xff] %v1790_v46  ;;  %v1563_v46 = vld [vmem:[#allocation5 + $0x280] sm:$0xff] }
 0x34e   : > { %1887 = vst [vmem:[#allocation5 + $0x1a0] sm:$0xff] %v1791_v31 }
 0x34f   : > { %1888 = vst [vmem:[#allocation5 + $0x1a8] sm:$0xff] %v1792_v28  ;;  %v1533_v28 = vld [vmem:[#allocation5 + $0x190] sm:$0xff] }
 0x350   : > { %1856 = vst [vmem:[#allocation5 + $0xa8] sm:$0xff] %v1760_v3  ;;  %v1682_v36 = vpop.permute.xlu2 %1681  ;;  %v1528_v3 = vld [vmem:[#allocation5 + $0x168] sm:$0xff] }
 0x351   : > { %1857 = vst [vmem:[#allocation5 + $0xb0] sm:$0xff] %v1761_v6  ;;  %v1632_v34 = vpop.permute.xlu1 %1631  ;;  %v1799_v51 = vsub.f32 %v1543_v62, %v1682_v36  ;;  %v1800_v47 = vsub.f32 %v1544_v43, %v1682_v36  ;;  %v1801_v60 = vsub.f32 %v1545_v58, %v1682_v36  ;;  %v1529_v6 = vld [vmem:[#allocation5 + $0x170] sm:$0xff]  ;;  %v1570_v62 = vld [vmem:[#allocation5 + $0x2b8] sm:$0xff] }
 0x352   : > { %1858 = vst [vmem:[#allocation5 + $0xb8] sm:$0xff] %v1762_v14  ;;  %v1627_v21 = vpop.permute.xlu0 %1626  ;;  %v1769_v1 = vsub.f32 %v1513_v25, %v1632_v34  ;;  %v1770_v52 = vsub.f32 %v1514_v55, %v1632_v34  ;;  %v1771_v4 = vsub.f32 %v1515_v2, %v1632_v34  ;;  %v1530_v14 = vld [vmem:[#allocation5 + $0x178] sm:$0xff]  ;;  %v1572_v34 = vld [vmem:[#allocation5 + $0x2c8] sm:$0xff] }
 0x353   : > { %1853 = vst [vmem:[#allocation5 + $0x90] sm:$0xff] %v1757_v59  ;;  %v1766_v63 = vsub.f32 %v1510_v44, %v1627_v21  ;;  %v1767_v45 = vsub.f32 %v1511_v53, %v1627_v21  ;;  %v1768_v23 = vsub.f32 %v1512_v26, %v1627_v21  ;;  %v1540_v25 = vld [vmem:[#allocation5 + $0x1c8] sm:$0xff]  ;;  %v1539_v26 = vld [vmem:[#allocation5 + $0x1c0] sm:$0xff] }
 0x354   : > { %1854 = vst [vmem:[#allocation5 + $0x98] sm:$0xff] %v1758_v39 }
 0x355   : > { %1855 = vst [vmem:[#allocation5 + $0xa0] sm:$0xff] %v1759_v19  ;;  %v1571_v19 = vld [vmem:[#allocation5 + $0x2c0] sm:$0xff] }
 0x356   : > { %1895 = vst [vmem:[#allocation5 + $0x1e0] sm:$0xff] %v1799_v51 }
 0x357   : > { %1896 = vst [vmem:[#allocation5 + $0x1e8] sm:$0xff] %v1800_v47  ;;  %v1541_v47 = vld [vmem:[#allocation5 + $0x1d0] sm:$0xff] }
 0x358   : > { %1897 = vst [vmem:[#allocation5 + $0x1f0] sm:$0xff] %v1801_v60  ;;  %v1697_v20 = vpop.permute.xlu2 %1696  ;;  %v1542_v60 = vld [vmem:[#allocation5 + $0x1d8] sm:$0xff] }
 0x359   : > { %1865 = vst [vmem:[#allocation5 + $0xf0] sm:$0xff] %v1769_v1  ;;  %v1647_v12 = vpop.permute.xlu1 %1646  ;;  %v1808_v29 = vsub.f32 %v1552_v7, %v1697_v20  ;;  %v1809_v27 = vsub.f32 %v1553_v9, %v1697_v20  ;;  %v1810_v30 = vsub.f32 %v1554_v0, %v1697_v20  ;;  %v1537_v1 = vld [vmem:[#allocation5 + $0x1b0] sm:$0xff]  ;;  %v1550_v9 = vld [vmem:[#allocation5 + $0x218] sm:$0xff] }
 0x35a   : > { %1866 = vst [vmem:[#allocation5 + $0xf8] sm:$0xff] %v1770_v52  ;;  %v1642_v54 = vpop.permute.xlu0 %1641  ;;  %v1778_v5 = vsub.f32 %v1522_v16, %v1647_v12  ;;  %v1779_v11 = vsub.f32 %v1523_v22, %v1647_v12  ;;  %v1780_v42 = vsub.f32 %v1524_v50, %v1647_v12  ;;  %v1538_v52 = vld [vmem:[#allocation5 + $0x1b8] sm:$0xff]  ;;  %v1549_v20 = vld [vmem:[#allocation5 + $0x210] sm:$0xff]  ;;  %v1547_v16 = vld [vmem:[#allocation5 + $0x200] sm:$0xff] }
 0x35b   : > { %1867 = vst [vmem:[#allocation5 + $0x100] sm:$0xff] %v1771_v4  ;;  %v1775_v8 = vsub.f32 %v1519_v32, %v1642_v54  ;;  %v1776_v40 = vsub.f32 %v1520_v10, %v1642_v54  ;;  %v1777_v41 = vsub.f32 %v1521_v15, %v1642_v54  ;;  %v1546_v54 = vld [vmem:[#allocation5 + $0x1f8] sm:$0xff]  ;;  %v1548_v22 = vld [vmem:[#allocation5 + $0x208] sm:$0xff] }
 0x35c   : > { %1862 = vst [vmem:[#allocation5 + $0xd8] sm:$0xff] %v1766_v63  ;;  %v1558_v50 = vld [vmem:[#allocation5 + $0x258] sm:$0xff]  ;;  %v1560_v15 = vld [vmem:[#allocation5 + $0x268] sm:$0xff] }
 0x35d   : > { %1863 = vst [vmem:[#allocation5 + $0xe0] sm:$0xff] %v1767_v45 }
 0x35e   : > { %1864 = vst [vmem:[#allocation5 + $0xe8] sm:$0xff] %v1768_v23  ;;  %v1551_v23 = vld [vmem:[#allocation5 + $0x220] sm:$0xff] }
 0x35f   : > { %1904 = vst [vmem:[#allocation5 + $0x228] sm:$0xff] %v1808_v29 }
 0x360   : > { %1905 = vst [vmem:[#allocation5 + $0x230] sm:$0xff] %v1809_v27  ;;  %v1712_v24 = vpop.permute.xlu2 %1711 }
 0x361   : > { %1906 = vst [vmem:[#allocation5 + $0x238] sm:$0xff] %v1810_v30  ;;  %v1662_v38 = vpop.permute.xlu1 %1661  ;;  %v1817_v49 = vsub.f32 %v1561_v57, %v1712_v24  ;;  %v1818_v31 = vsub.f32 %v1562_v18, %v1712_v24  ;;  %v1819_v56 = vsub.f32 %v1563_v46, %v1712_v24  ;;  %v1557_v18 = vld [vmem:[#allocation5 + $0x250] sm:$0xff] }
 0x362   : > { %1874 = vst [vmem:[#allocation5 + $0x138] sm:$0xff] %v1778_v5  ;;  %v1657_v33 = vpop.permute.xlu0 %1656  ;;  %v1787_v17 = vsub.f32 %v1531_v13, %v1662_v38  ;;  %v1788_v35 = vsub.f32 %v1532_v61, %v1662_v38  ;;  %v1789_v37 = vsub.f32 %v1533_v28, %v1662_v38  ;;  %v1556_v38 = vld [vmem:[#allocation5 + $0x248] sm:$0xff] }
 0x363   : > { %1875 = vst [vmem:[#allocation5 + $0x140] sm:$0xff] %v1779_v11  ;;  %v1784_v59 = vsub.f32 %v1528_v3, %v1657_v33  ;;  %v1785_v36 = vsub.f32 %v1529_v6, %v1657_v33  ;;  %v1786_v58 = vsub.f32 %v1530_v14, %v1657_v33  ;;  %v1559_v11 = vld [vmem:[#allocation5 + $0x260] sm:$0xff]  ;;  %v1564_v28 = vld [vmem:[#allocation5 + $0x288] sm:$0xff] }
 0x364   : > { %1876 = vst [vmem:[#allocation5 + $0x148] sm:$0xff] %v1780_v42 }
 0x365   : > { %1871 = vst [vmem:[#allocation5 + $0x120] sm:$0xff] %v1775_v8  ;;  %v1555_v8 = vld [vmem:[#allocation5 + $0x240] sm:$0xff] }
 0x366   : > { %1872 = vst [vmem:[#allocation5 + $0x128] sm:$0xff] %v1776_v40 }
 0x367   : > { %1873 = vst [vmem:[#allocation5 + $0x130] sm:$0xff] %v1777_v41  ;;  %v1567_v41 = vld [vmem:[#allocation5 + $0x2a0] sm:$0xff] }
 0x368   : > { %1913 = vst [vmem:[#allocation5 + $0x270] sm:$0xff] %v1817_v49  ;;  %v1727_v39 = vpop.permute.xlu2 %1726  ;;  %v1568_v49 = vld [vmem:[#allocation5 + $0x2a8] sm:$0xff] }
 0x369   : > { %1914 = vst [vmem:[#allocation5 + $0x278] sm:$0xff] %v1818_v31  ;;  %v1677_v48 = vpop.permute.xlu1 %1676  ;;  %v1826_v51 = vsub.f32 %v1570_v62, %v1727_v39  ;;  %v1827_v21 = vsub.f32 %v1571_v19, %v1727_v39  ;;  %v1828_v55 = vsub.f32 %v1572_v34, %v1727_v39  ;;  %v1569_v31 = vld [vmem:[#allocation5 + $0x2b0] sm:$0xff]  ;;  %v1576_v62 = vld [vmem:[#allocation5 + $0x2e8] sm:$0xff] }
 0x36a   : > { %1915 = vst [vmem:[#allocation5 + $0x280] sm:$0xff] %v1819_v56  ;;  %v1672_v43 = vpop.permute.xlu0 %1671  ;;  %v1796_v2 = vsub.f32 %v1540_v25, %v1677_v48  ;;  %v1797_v44 = vsub.f32 %v1541_v47, %v1677_v48  ;;  %v1798_v4 = vsub.f32 %v1542_v60, %v1677_v48  ;;  %v1577_v39 = vld [vmem:[#allocation5 + $0x2f0] sm:$0xff] }
 0x36b   : > { %1883 = vst [vmem:[#allocation5 + $0x180] sm:$0xff] %v1787_v17  ;;  %v1793_v7 = vsub.f32 %v1537_v1, %v1672_v43  ;;  %v1794_v45 = vsub.f32 %v1538_v52, %v1672_v43  ;;  %v1795_v12 = vsub.f32 %v1539_v26, %v1672_v43  ;;  %v1578_v43 = vld [vmem:[#allocation5 + $0x2f8] sm:$0xff] }
 0x36c   : > { %1884 = vst [vmem:[#allocation5 + $0x188] sm:$0xff] %v1788_v35  ;;  %v1565_v35 = vld [vmem:[#allocation5 + $0x290] sm:$0xff] }
 0x36d   : > { %1885 = vst [vmem:[#allocation5 + $0x190] sm:$0xff] %v1789_v37  ;;  %v1566_v37 = vld [vmem:[#allocation5 + $0x298] sm:$0xff] }
 0x36e   : > { %1880 = vst [vmem:[#allocation5 + $0x168] sm:$0xff] %v1784_v59 }
 0x36f   : > { %1881 = vst [vmem:[#allocation5 + $0x170] sm:$0xff] %v1785_v36  ;;  %v1573_v36 = vld [vmem:[#allocation5 + $0x2d0] sm:$0xff] }
 0x370   : > { %1882 = vst [vmem:[#allocation5 + $0x178] sm:$0xff] %v1786_v58  ;;  %v1574_v58 = vld [vmem:[#allocation5 + $0x2d8] sm:$0xff] }
 0x371   : > { %1922 = vst [vmem:[#allocation5 + $0x2b8] sm:$0xff] %v1826_v51  ;;  %v1692_v53 = vpop.permute.xlu1 %1691 }
 0x372   : > { %1923 = vst [vmem:[#allocation5 + $0x2c0] sm:$0xff] %v1827_v21  ;;  %v1687_v63 = vpop.permute.xlu0 %1686  ;;  %v1805_v0 = vsub.f32 %v1549_v20, %v1692_v53  ;;  %v1806_v29 = vsub.f32 %v1550_v9, %v1692_v53  ;;  %v1807_v27 = vsub.f32 %v1551_v23, %v1692_v53  ;;  %v1575_v21 = vld [vmem:[#allocation5 + $0x2e0] sm:$0xff] }
 0x373   : > { %1924 = vst [vmem:[#allocation5 + $0x2c8] sm:$0xff] %v1828_v55  ;;  %v1802_v30 = vsub.f32 %v1546_v54, %v1687_v63  ;;  %v1803_v32 = vsub.f32 %v1547_v16, %v1687_v63  ;;  %v1804_v42 = vsub.f32 %v1548_v22, %v1687_v63 }
 0x374   : > { %1892 = vst [vmem:[#allocation5 + $0x1c8] sm:$0xff] %v1796_v2 }
 0x375   : > { %1893 = vst [vmem:[#allocation5 + $0x1d0] sm:$0xff] %v1797_v44 }
 0x376   : > { %1894 = vst [vmem:[#allocation5 + $0x1d8] sm:$0xff] %v1798_v4 }
 0x377   : > { %1889 = vst [vmem:[#allocation5 + $0x1b0] sm:$0xff] %v1793_v7 }
 0x378   : > { %1890 = vst [vmem:[#allocation5 + $0x1b8] sm:$0xff] %v1794_v45 }
 0x379   : > { %1891 = vst [vmem:[#allocation5 + $0x1c0] sm:$0xff] %v1795_v12  ;;  %v1707_v5 = vpop.permute.xlu1 %1706 }
 0x37a   : > { %1901 = vst [vmem:[#allocation5 + $0x210] sm:$0xff] %v1805_v0  ;;  %v1702_v10 = vpop.permute.xlu0 %1701  ;;  %v1814_v24 = vsub.f32 %v1558_v50, %v1707_v5  ;;  %v1815_v57 = vsub.f32 %v1559_v11, %v1707_v5  ;;  %v1816_v40 = vsub.f32 %v1560_v15, %v1707_v5 }
 0x37b   : > { %1902 = vst [vmem:[#allocation5 + $0x218] sm:$0xff] %v1806_v29  ;;  %v1811_v33 = vsub.f32 %v1555_v8, %v1702_v10  ;;  %v1812_v46 = vsub.f32 %v1556_v38, %v1702_v10  ;;  %v1813_v13 = vsub.f32 %v1557_v18, %v1702_v10 }
 0x37c   : > { %1903 = vst [vmem:[#allocation5 + $0x220] sm:$0xff] %v1807_v27 }
 0x37d   : > { %1898 = vst [vmem:[#allocation5 + $0x1f8] sm:$0xff] %v1802_v30 }
 0x37e   : > { %1899 = vst [vmem:[#allocation5 + $0x200] sm:$0xff] %v1803_v32 }
 0x37f   : > { %1900 = vst [vmem:[#allocation5 + $0x208] sm:$0xff] %v1804_v42 }
 0x380   : > { %1910 = vst [vmem:[#allocation5 + $0x258] sm:$0xff] %v1814_v24 }
 0x381   : > { %1911 = vst [vmem:[#allocation5 + $0x260] sm:$0xff] %v1815_v57  ;;  %v1722_v61 = vpop.permute.xlu1 %1721 }
 0x382   : > { %1912 = vst [vmem:[#allocation5 + $0x268] sm:$0xff] %v1816_v40  ;;  %v1823_v56 = vsub.f32 %v1567_v41, %v1722_v61  ;;  %v1717_v17 = vpop.permute.xlu0 %1716  ;;  %v1824_v3 = vsub.f32 %v1568_v49, %v1722_v61  ;;  %v1825_v6 = vsub.f32 %v1569_v31, %v1722_v61 }
 0x383   : > { %1907 = vst [vmem:[#allocation5 + $0x240] sm:$0xff] %v1811_v33  ;;  %v1820_v14 = vsub.f32 %v1564_v28, %v1717_v17  ;;  %v1821_v48 = vsub.f32 %v1565_v35, %v1717_v17  ;;  %v1822_v59 = vsub.f32 %v1566_v37, %v1717_v17 }
 0x384   : > { %1908 = vst [vmem:[#allocation5 + $0x248] sm:$0xff] %v1812_v46 }
 0x385   : > { %1909 = vst [vmem:[#allocation5 + $0x250] sm:$0xff] %v1813_v13 }
 0x386   : > { %1919 = vst [vmem:[#allocation5 + $0x2a0] sm:$0xff] %v1823_v56 }
 0x387   : > { %1920 = vst [vmem:[#allocation5 + $0x2a8] sm:$0xff] %v1824_v3 }
 0x388   : > { %1921 = vst [vmem:[#allocation5 + $0x2b0] sm:$0xff] %v1825_v6 }
 0x389   : > { %1916 = vst [vmem:[#allocation5 + $0x288] sm:$0xff] %v1820_v14  ;;  %v1737_v19 = vpop.permute.xlu1 %1736 }
 0x38a   : > { %1917 = vst [vmem:[#allocation5 + $0x290] sm:$0xff] %v1821_v48  ;;  %v1832_v34 = vsub.f32 %v1576_v62, %v1737_v19  ;;  %v1833_v51 = vsub.f32 %v1577_v39, %v1737_v19  ;;  %v1834_v25 = vsub.f32 %v1578_v43, %v1737_v19  ;;  %v1732_v47 = vpop.permute.xlu0 %1731 }
 0x38b   : > { %1918 = vst [vmem:[#allocation5 + $0x298] sm:$0xff] %v1822_v59  ;;  %v1829_v55 = vsub.f32 %v1573_v36, %v1732_v47  ;;  %v1830_v60 = vsub.f32 %v1574_v58, %v1732_v47  ;;  %v1831_v2 = vsub.f32 %v1575_v21, %v1732_v47 }
 0x38c   : > { %1928 = vst [vmem:[#allocation5 + $0x2e8] sm:$0xff] %v1832_v34 }
 0x38d   : > { %1929 = vst [vmem:[#allocation5 + $0x2f0] sm:$0xff] %v1833_v51 }
 0x38e   : > { %1930 = vst [vmem:[#allocation5 + $0x2f8] sm:$0xff] %v1834_v25 }
 0x38f   : > { %1925 = vst [vmem:[#allocation5 + $0x2d0] sm:$0xff] %v1829_v55 }
 0x390   : > { %1926 = vst [vmem:[#allocation5 + $0x2d8] sm:$0xff] %v1830_v60 }
 0x391   : > { %1927 = vst [vmem:[#allocation5 + $0x2e0] sm:$0xff] %v1831_v2 }
 0x392 PF: > { %p2092_p12 = scmp.eq.s32.totalorder %s2028_s17, 2  ;;  %s1942_s7 = sshll.u32 %s3399_s3, 4  ;;  %s1943_s7 = int_to_ptr.hbm [resolvable:$true] %s1942_s7 }
 0x393   : > { %s2416_s6 = smov [#allocation5]   ;;  %s2417_s9 = smov 384  }
 0x394   : > { %s1940_s8 = sshll.u32 %s2416_s6, 4  ;;  %s2418_s10 = smov 24   ;;  %s1941_s8 = int_to_ptr.vmem [resolvable:$true] %s1940_s8 }
 0x395   : > { %2089 = dma.vmem_to_hbm [thread:$0]  (%p2092_p12), %s1941_s8, 12288, %s1943_s7, [#allocation6], %s2417_s9, %s2417_s9, %s2418_s10  }
 0x396   : > { %2389 = dma.done.wait (%p2092_p12), [#allocation6], 12288  }
 0x397   : > { %2391 = vsyncadd (%p2092_p12), [#allocation6], 4294955008 }
 0x398 PF: > { %s14_s16 = sadd.s32 1, %s2410_s16   ;;  %s3573_s12 = smov %s2398_s13 }
 0x399   : > { %p11_p13 = scmp.ge.s32.totalorder %s14_s16, 5   ;;  %s3574_s13 = smov %s2475_s21 }
 0x39a   : > { %s3575_s14 = smov %s2406_s15  ;;  %s3576_s15 = smov %s3578_s18 }
 0x39b   :  { %13 = sbr.rel (!%p11_p13) target bundleno = 3 (0x3), region = 118 }
 0x3a0   :  { %1959 = vsyncpa [#allocation6], 1 }
 0x3a1   :  { %1961 = vsyncpa [#allocation6 + $0x1], 1 }

// kernel: my_rnn_model_forward.6
= control target key start
LH: loop header
LB: loop body
LE: loop exit
PB: predicated region body
PF: predicated region fallthrough
CT: control target
= control target key end

     0   :  { %vm25_vm0 = vcmask 261120   ;;  %s3036_s10 = smov 64   ;;  %s3037_s11 = smov 32   ;;  %s3790_s3 = inlined_call_operand.vmem [shape: f32[32,128], index: 3, kind: input, shape index: {}]   ;;  %s3791_s1 = inlined_call_operand.vmem [shape: f32[8,32], index: 1, kind: input, shape index: {}]   ;;  %s3792_s2 = inlined_call_operand.vmem [shape: f32[8,32], index: 2, kind: input, shape index: {}]   ;;  %s3793_s0 = inlined_call_operand.vmem [shape: f32[32,8,128], index: 0, kind: input, shape index: {}]   ;;  %s3794_s4 = inlined_call_operand.vmem [shape: f32[32,8,32], index: 4, kind: output, shape index: {0}]   ;;  %s3795_s6 = inlined_call_operand.vmem [shape: f32[8,32], index: 6, kind: output, shape index: {2}]   ;;  %s3796_s5 = inlined_call_operand.vmem [shape: f32[8,32], index: 5, kind: output, shape index: {1}]  }
   0x1   :  { %v3077_v0 = vld [vmem:[%s3790_s3 + $0x18] sm:$0xff]  ;;  %v3082_v1 = vld [vmem:[%s3790_s3 + $0x10] sm:$0xff]  ;;  %v24_v2 = vld [vmem:[%s3791_s1] sm:$0xff] }
   0x2   :  { %52 = vmatpush.msra.mxu0 %v3077_v0  ;;  %132 = vmatpush.msra.mxu1 %v3077_v0  ;;  %v3092_v3 = vld [vmem:[%s3790_s3 + $0x8] sm:$0xff]  ;;  %26 = vst.msk [vmem:[#allocation2] sm:$0xff] %vm25_vm0, %v24_v2  ;;  %v3102_v4 = vld [vmem:[%s3790_s3] sm:$0xff] }
   0x3   :  { %213 = vmatpush.msra.mxu2 %v3077_v0  ;;  %294 = vmatpush.msra.mxu3 %v3077_v0  ;;  %v27_v6 = vld [vmem:[%s3792_s2] sm:$0xff]  ;;  %s3038_s2 = smov 96   ;;  %v2645_v38 = vld [vmem:[%s3793_s0 + $0x8] sm:$0xff] }
   0x4   :  { %53 = vmatpush.msra.mxu0 %v3082_v1  ;;  %133 = vmatpush.msra.mxu1 %v3082_v1  ;;  %28 = vst.msk [vmem:[#allocation3] sm:$0xff] %vm25_vm0, %v27_v6  ;;  %v35_v7 = vld [vmem:[%s3793_s0] sm:$0xff] }
   0x5   :  { %214 = vmatpush.msra.mxu2 %v3082_v1  ;;  %295 = vmatpush.msra.mxu3 %v3082_v1 }
   0x6   :  { %54 = vmatpush.msra.mxu0 %v3092_v3  ;;  %134 = vmatpush.msra.mxu1 %v3092_v3 }
   0x7   :  { %215 = vmatpush.msra.mxu2 %v3092_v3  ;;  %296 = vmatpush.msra.mxu3 %v3092_v3 }
   0x8   :  { %55 = vmatpush.msra.mxu0 %v3102_v4  ;;  %135 = vmatpush.msra.mxu1 %v3102_v4 }
   0x9   :  { %216 = vmatpush.msra.mxu2 %v3102_v4  ;;  %297 = vmatpush.msra.mxu3 %v3102_v4  ;;  %v33_v5 = vld [vmem:[#allocation2] sm:$0xff] }
   0xa   :  { %375 = vmatpush.msrb.mxu0 %v3077_v0  ;;  %456 = vmatpush.msrb.mxu1 %v3077_v0 }
   0xb   :  { %2643 = vmatmul.msk.f32.vlgmr.msra.gmra.mxu0 %vm25_vm0, %v33_v5  ;;  %537 = vmatpush.msrb.mxu2 %v3077_v0  ;;  %v34_v11 = vld [vmem:[#allocation3] sm:$0xff] }
   0xc   :  { %376 = vmatpush.msrb.mxu0 %v3082_v1  ;;  %457 = vmatpush.msrb.mxu1 %v3082_v1 }
   0xd   :  { %538 = vmatpush.msrb.mxu2 %v3082_v1  ;;  %618 = vmatpush.msrb.mxu3 %v3077_v0 }
   0xe   :  { %377 = vmatpush.msrb.mxu0 %v3092_v3  ;;  %458 = vmatpush.msrb.mxu1 %v3092_v3 }
   0xf   :  { %539 = vmatpush.msrb.mxu2 %v3092_v3  ;;  %619 = vmatpush.msrb.mxu3 %v3082_v1 }
  0x10   :  { %378 = vmatpush.msrb.mxu0 %v3102_v4  ;;  %459 = vmatpush.msrb.mxu1 %v3102_v4 }
  0x11   :  { %540 = vmatpush.msrb.mxu2 %v3102_v4  ;;  %620 = vmatpush.msrb.mxu3 %v3092_v3 }
  0x12   :  { %699 = vmatpush.msra.mxu0 %v3077_v0 }
  0x13   :  { %621 = vmatpush.msrb.mxu3 %v3102_v4 }
  0x14   :  { %700 = vmatpush.msra.mxu0 %v3082_v1 }
  0x16   :  { %701 = vmatpush.msra.mxu0 %v3092_v3 }
  0x18   :  { %702 = vmatpush.msra.mxu0 %v3102_v4 }
  0x88   :  { %v57_v8 = vpop.f32.mrf.mxu0 }
  0x89   :  { %v60_v9 = vadd.f32 %v57_v8, %v35_v7  ;;  %v2649_v8 = vld [vmem:[%s3793_s0 + $0x10] sm:$0xff] }
  0x8b   :  { %2772 = vtanh.f32 %v60_v9  ;;  %v2644_v12 = vmul.f32 -1.442695, %v60_v9 }
  0x8d   :  { %2774 = vpow2.f32 %v2644_v12 }
  0x91   :  { %v2773_v10 = vpop.eup %2772 }
  0x92   :  { %87 = vrot.lane.b32.xlu0 %v2773_v10, %s3036_s10 }
  0x93   :  { %v2775_v13 = vpop.eup %2774 }
  0x94   :  { %v64_v14 = vadd.f32 1.0, %v2775_v13 }
  0x96   :  { %2776 = vrcp.f32 %v64_v14  ;;  %v76_v20 = vand.u32 2147483648, %v64_v14  ;;  %vm70_vm2 = vweird.f32 %v64_v14  ;;  %v74_v21 = vand.u32 2147483647, %v64_v14 }
  0x98   :  { %v77_v23 = vor.u32 1.1754944e-38, %v76_v20  ;;  %vm75_vm4 = vcmp.eq.f32.partialorder %v74_v21, 8.507059e+37 }
  0x9a   :  { %82 = vrot.lane.b32.xlu0 %v34_v11, %s3037_s11 }
  0x9c   :  { %v2777_v15 = vpop.eup %2776 }
  0x9d   :  { %v66_v16 = vmul.f32 %v2777_v15, %v64_v14  ;;  %vm71_vm1 = vweird.f32 %v2777_v15 }
  0x9e   :  { %vm72_vm3 = vmor %vm70_vm2, %vm71_vm1 }
  0x9f   :  { %v67_v17 = vsub.f32 1.0, %v66_v16 }
  0xa1   :  { %v68_v18 = vmul.f32 %v2777_v15, %v67_v17 }
  0xa3   :  { %v69_v19 = vadd.f32 %v2777_v15, %v68_v18 }
  0xa5   :  { %v73_v22 = vsel %vm72_vm3, %v2777_v15, %v69_v19 }
  0xa6   :  { %v78_v25 = vsel %vm75_vm4, %v77_v23, %v73_v22 }
 0x104   :  { %v88_v24 = vpop.permute.xlu0 %87 }
 0x105   :  { %v90_v26 = vmul.f32 %v88_v24, %v78_v25 }
 0x107   :  { %92 = vrot.lane.b32.xlu1 %v90_v26, %s3037_s11 }
 0x10c   :  { %v83_v27 = vpop.permute.xlu0 %82 }
 0x10d   :  { %v85_v28 = vmul.f32 %v83_v27, %v78_v25 }
 0x179   :  { %v93_v29 = vpop.permute.xlu1 %92 }
 0x17a   :  { %v95_v30 = vadd.f32 %v93_v29, %v85_v28 }
 0x17c   :  { %2778 = vtanh.f32 %v95_v30 }
 0x182   :  { %v2779_v31 = vpop.eup %2778 }
 0x183   :  { %98 = vrot.lane.b32.xlu1 %v2779_v31, %s3036_s10 }
 0x1f5   :  { %v99_v32 = vpop.permute.xlu1 %98 }
 0x1f6   :  { %v101_v33 = vmul.f32 %v99_v32, %v78_v25 }
 0x1f8   :  { %108 = vrot.lane.b32.xlu2 %v101_v33, %s3037_s11 }
 0x200   :  { %103 = vrot.lane.b32.xlu2 %v95_v30, %s3038_s2 }
 0x252   :  { %v109_v34 = vpop.permute.xlu2 %108 }
 0x253   :  { %111 = vst.msk [vmem:[#allocation2] sm:$0xff] %vm25_vm0, %v109_v34 }
 0x254   :  { %112 = vst.msk [vmem:[%s3794_s4] sm:$0xff] %vm25_vm0, %v109_v34 }
 0x25a   :  { %v104_v35 = vpop.permute.xlu2 %103  ;;  %v113_v36 = vld [vmem:[#allocation2] sm:$0xff] }
 0x25b   :  { %106 = vst.msk [vmem:[#allocation3] sm:$0xff] %vm25_vm0, %v104_v35  ;;  %2646 = vmatmul.msk.f32.vlgmr.msra.gmra.mxu1 %vm25_vm0, %v113_v36 }
 0x25c   :  { %780 = vmatpush.msra.mxu1 %v3077_v0 }
 0x25e   :  { %781 = vmatpush.msra.mxu1 %v3082_v1 }
 0x260   :  { %782 = vmatpush.msra.mxu1 %v3092_v3 }
 0x262   :  { %v114_v37 = vld [vmem:[#allocation3] sm:$0xff]  ;;  %783 = vmatpush.msra.mxu1 %v3102_v4 }
 0x263   :  { %162 = vrot.lane.b32.xlu1 %v114_v37, %s3037_s11 }
 0x2d5   :  { %v163_v57 = vpop.permute.xlu1 %162 }
 0x2d8   :  { %v137_v39 = vpop.f32.mrf.mxu1 }
 0x2d9   :  { %v140_v40 = vadd.f32 %v2645_v38, %v137_v39  ;;  %v2653_v38 = vld [vmem:[%s3793_s0 + $0x18] sm:$0xff] }
 0x2db   :  { %2780 = vtanh.f32 %v140_v40  ;;  %v2647_v42 = vmul.f32 -1.442695, %v140_v40 }
 0x2dd   :  { %2782 = vpow2.f32 %v2647_v42 }
 0x2e1   :  { %v2781_v41 = vpop.eup %2780 }
 0x2e2   :  { %167 = vrot.lane.b32.xlu0 %v2781_v41, %s3036_s10 }
 0x2e3   :  { %v2783_v43 = vpop.eup %2782 }
 0x2e4   :  { %v144_v44 = vadd.f32 1.0, %v2783_v43 }
 0x2e6   :  { %2784 = vrcp.f32 %v144_v44  ;;  %v156_v50 = vand.u32 2147483648, %v144_v44  ;;  %vm150_vm6 = vweird.f32 %v144_v44  ;;  %v154_v51 = vand.u32 2147483647, %v144_v44 }
 0x2e8   :  { %v157_v53 = vor.u32 1.1754944e-38, %v156_v50  ;;  %vm155_vm8 = vcmp.eq.f32.partialorder %v154_v51, 8.507059e+37 }
 0x2ec   :  { %v2785_v45 = vpop.eup %2784 }
 0x2ed   :  { %v146_v46 = vmul.f32 %v2785_v45, %v144_v44  ;;  %vm151_vm5 = vweird.f32 %v2785_v45 }
 0x2ee   :  { %vm152_vm7 = vmor %vm150_vm6, %vm151_vm5 }
 0x2ef   :  { %v147_v47 = vsub.f32 1.0, %v146_v46 }
 0x2f1   :  { %v148_v48 = vmul.f32 %v2785_v45, %v147_v47 }
 0x2f3   :  { %v149_v49 = vadd.f32 %v2785_v45, %v148_v48 }
 0x2f5   :  { %v153_v52 = vsel %vm152_vm7, %v2785_v45, %v149_v49 }
 0x2f6   :  { %v158_v55 = vsel %vm155_vm8, %v157_v53, %v153_v52 }
 0x2f7   :  { %v165_v58 = vmul.f32 %v163_v57, %v158_v55 }
 0x354   :  { %v168_v54 = vpop.permute.xlu0 %167 }
 0x355   :  { %v170_v56 = vmul.f32 %v168_v54, %v158_v55 }
 0x357   :  { %172 = vrot.lane.b32.xlu2 %v170_v56, %s3037_s11 }
 0x3b1   :  { %v173_v59 = vpop.permute.xlu2 %172 }
 0x3b2   :  { %v175_v60 = vadd.f32 %v173_v59, %v165_v58 }
 0x3b4   :  { %2786 = vtanh.f32 %v175_v60  ;;  %183 = vrot.lane.b32.xlu2 %v175_v60, %s3038_s2 }
 0x3ba   :  { %v2787_v61 = vpop.eup %2786 }
 0x3bb   :  { %178 = vrot.lane.b32.xlu0 %v2787_v61, %s3036_s10 }
 0x40e   :  { %v184_v62 = vpop.permute.xlu2 %183 }
 0x40f   :  { %186 = vst.msk [vmem:[#allocation3] sm:$0xff] %vm25_vm0, %v184_v62 }
 0x416   :  { %v195_v5 = vld [vmem:[#allocation3] sm:$0xff] }
 0x42d   :  { %v179_v63 = vpop.permute.xlu0 %178 }
 0x42e   :  { %v181_v2 = vmul.f32 %v179_v63, %v158_v55 }
 0x430   :  { %188 = vrot.lane.b32.xlu1 %v181_v2, %s3037_s11 }
 0x438   :  { %243 = vrot.lane.b32.xlu1 %v195_v5, %s3037_s11 }
 0x4a2   :  { %v189_v6 = vpop.permute.xlu1 %188 }
 0x4a3   :  { %191 = vst.msk [vmem:[#allocation2] sm:$0xff] %vm25_vm0, %v189_v6 }
 0x4a4   :  { %2648 = vst.msk [vmem:[%s3794_s4 + $0x8] sm:$0xff] %vm25_vm0, %v189_v6 }
 0x4aa   :  { %v194_v7 = vld [vmem:[#allocation2] sm:$0xff]  ;;  %v244_v27 = vpop.permute.xlu1 %243 }
 0x4ab   :  { %2650 = vmatmul.msk.f32.vlgmr.msra.gmra.mxu2 %vm25_vm0, %v194_v7 }
 0x4ac   :  { %861 = vmatpush.msra.mxu2 %v3077_v0 }
 0x4ae   :  { %862 = vmatpush.msra.mxu2 %v3082_v1 }
 0x4b0   :  { %863 = vmatpush.msra.mxu2 %v3092_v3 }
 0x4b2   :  { %864 = vmatpush.msra.mxu2 %v3102_v4 }
 0x52e   :  { %v218_v9 = vpop.f32.mrf.mxu2 }
 0x52f   :  { %v221_v10 = vadd.f32 %v2649_v8, %v218_v9  ;;  %v2657_v8 = vld [vmem:[%s3793_s0 + $0x20] sm:$0xff] }
 0x531   :  { %2788 = vtanh.f32 %v221_v10  ;;  %v2651_v12 = vmul.f32 -1.442695, %v221_v10 }
 0x533   :  { %2790 = vpow2.f32 %v2651_v12 }
 0x537   :  { %v2789_v11 = vpop.eup %2788 }
 0x538   :  { %248 = vrot.lane.b32.xlu0 %v2789_v11, %s3036_s10 }
 0x539   :  { %v2791_v13 = vpop.eup %2790 }
 0x53a   :  { %v225_v14 = vadd.f32 1.0, %v2791_v13 }
 0x53c   :  { %2792 = vrcp.f32 %v225_v14  ;;  %v237_v20 = vand.u32 2147483648, %v225_v14  ;;  %vm231_vm10 = vweird.f32 %v225_v14  ;;  %v235_v21 = vand.u32 2147483647, %v225_v14 }
 0x53e   :  { %v238_v23 = vor.u32 1.1754944e-38, %v237_v20  ;;  %vm236_vm12 = vcmp.eq.f32.partialorder %v235_v21, 8.507059e+37 }
 0x542   :  { %v2793_v15 = vpop.eup %2792 }
 0x543   :  { %v227_v16 = vmul.f32 %v2793_v15, %v225_v14  ;;  %vm232_vm9 = vweird.f32 %v2793_v15 }
 0x544   :  { %vm233_vm11 = vmor %vm231_vm10, %vm232_vm9 }
 0x545   :  { %v228_v17 = vsub.f32 1.0, %v227_v16 }
 0x547   :  { %v229_v18 = vmul.f32 %v2793_v15, %v228_v17 }
 0x549   :  { %v230_v19 = vadd.f32 %v2793_v15, %v229_v18 }
 0x54b   :  { %v234_v22 = vsel %vm233_vm11, %v2793_v15, %v230_v19 }
 0x54c   :  { %v239_v25 = vsel %vm236_vm12, %v238_v23, %v234_v22 }
 0x54d   :  { %v246_v28 = vmul.f32 %v244_v27, %v239_v25 }
 0x5aa   :  { %v249_v24 = vpop.permute.xlu0 %248 }
 0x5ab   :  { %v251_v26 = vmul.f32 %v249_v24, %v239_v25 }
 0x5ad   :  { %253 = vrot.lane.b32.xlu2 %v251_v26, %s3037_s11 }
 0x607   :  { %v254_v29 = vpop.permute.xlu2 %253 }
 0x608   :  { %v256_v30 = vadd.f32 %v254_v29, %v246_v28 }
 0x60a   :  { %2794 = vtanh.f32 %v256_v30  ;;  %264 = vrot.lane.b32.xlu2 %v256_v30, %s3038_s2 }
 0x610   :  { %v2795_v31 = vpop.eup %2794 }
 0x611   :  { %259 = vrot.lane.b32.xlu0 %v2795_v31, %s3036_s10 }
 0x664   :  { %v265_v32 = vpop.permute.xlu2 %264 }
 0x665   :  { %267 = vst.msk [vmem:[#allocation3] sm:$0xff] %vm25_vm0, %v265_v32 }
 0x66c   :  { %v276_v35 = vld [vmem:[#allocation3] sm:$0xff] }
 0x683   :  { %v260_v33 = vpop.permute.xlu0 %259 }
 0x684   :  { %v262_v34 = vmul.f32 %v260_v33, %v239_v25 }
 0x686   :  { %269 = vrot.lane.b32.xlu1 %v262_v34, %s3037_s11 }
 0x68e   :  { %324 = vrot.lane.b32.xlu1 %v276_v35, %s3037_s11 }
 0x6f8   :  { %v270_v36 = vpop.permute.xlu1 %269 }
 0x6f9   :  { %272 = vst.msk [vmem:[#allocation2] sm:$0xff] %vm25_vm0, %v270_v36 }
 0x6fa   :  { %2652 = vst.msk [vmem:[%s3794_s4 + $0x10] sm:$0xff] %vm25_vm0, %v270_v36 }
 0x700   :  { %v275_v37 = vld [vmem:[#allocation2] sm:$0xff]  ;;  %v325_v57 = vpop.permute.xlu1 %324 }
 0x701   :  { %2654 = vmatmul.msk.f32.vlgmr.msra.gmra.mxu3 %vm25_vm0, %v275_v37 }
 0x702   :  { %942 = vmatpush.msra.mxu3 %v3077_v0 }
 0x704   :  { %943 = vmatpush.msra.mxu3 %v3082_v1 }
 0x706   :  { %944 = vmatpush.msra.mxu3 %v3092_v3 }
 0x708   :  { %945 = vmatpush.msra.mxu3 %v3102_v4 }
 0x784   :  { %v299_v39 = vpop.f32.mrf.mxu3 }
 0x785   :  { %v302_v40 = vadd.f32 %v2653_v38, %v299_v39  ;;  %v2661_v38 = vld [vmem:[%s3793_s0 + $0x28] sm:$0xff] }
 0x787   :  { %2796 = vtanh.f32 %v302_v40  ;;  %v2655_v42 = vmul.f32 -1.442695, %v302_v40 }
 0x789   :  { %2798 = vpow2.f32 %v2655_v42 }
 0x78d   :  { %v2797_v41 = vpop.eup %2796 }
 0x78e   :  { %329 = vrot.lane.b32.xlu0 %v2797_v41, %s3036_s10 }
 0x78f   :  { %v2799_v43 = vpop.eup %2798 }
 0x790   :  { %v306_v44 = vadd.f32 1.0, %v2799_v43 }
 0x792   :  { %2800 = vrcp.f32 %v306_v44  ;;  %v318_v50 = vand.u32 2147483648, %v306_v44  ;;  %vm312_vm14 = vweird.f32 %v306_v44  ;;  %v316_v51 = vand.u32 2147483647, %v306_v44 }
 0x794   :  { %v319_v53 = vor.u32 1.1754944e-38, %v318_v50  ;;  %vm317_vm1 = vcmp.eq.f32.partialorder %v316_v51, 8.507059e+37 }
 0x798   :  { %v2801_v45 = vpop.eup %2800 }
 0x799   :  { %v308_v46 = vmul.f32 %v2801_v45, %v306_v44  ;;  %vm313_vm13 = vweird.f32 %v2801_v45 }
 0x79a   :  { %vm314_vm15 = vmor %vm312_vm14, %vm313_vm13 }
 0x79b   :  { %v309_v47 = vsub.f32 1.0, %v308_v46 }
 0x79d   :  { %v310_v48 = vmul.f32 %v2801_v45, %v309_v47 }
 0x79f   :  { %v311_v49 = vadd.f32 %v2801_v45, %v310_v48 }
 0x7a1   :  { %v315_v52 = vsel %vm314_vm15, %v2801_v45, %v311_v49 }
 0x7a2   :  { %v320_v55 = vsel %vm317_vm1, %v319_v53, %v315_v52 }
 0x7a3   :  { %v327_v58 = vmul.f32 %v325_v57, %v320_v55 }
 0x800   :  { %v330_v54 = vpop.permute.xlu0 %329 }
 0x801   :  { %v332_v56 = vmul.f32 %v330_v54, %v320_v55 }
 0x803   :  { %334 = vrot.lane.b32.xlu2 %v332_v56, %s3037_s11 }
 0x85d   :  { %v335_v59 = vpop.permute.xlu2 %334 }
 0x85e   :  { %v337_v60 = vadd.f32 %v335_v59, %v327_v58 }
 0x860   :  { %2802 = vtanh.f32 %v337_v60  ;;  %345 = vrot.lane.b32.xlu2 %v337_v60, %s3038_s2 }
 0x866   :  { %v2803_v61 = vpop.eup %2802 }
 0x867   :  { %340 = vrot.lane.b32.xlu0 %v2803_v61, %s3036_s10 }
 0x8ba   :  { %v346_v62 = vpop.permute.xlu2 %345 }
 0x8bb   :  { %348 = vst.msk [vmem:[#allocation3] sm:$0xff] %vm25_vm0, %v346_v62 }
 0x8c2   :  { %v357_v5 = vld [vmem:[#allocation3] sm:$0xff] }
 0x8d9   :  { %v341_v63 = vpop.permute.xlu0 %340 }
 0x8da   :  { %v343_v2 = vmul.f32 %v341_v63, %v320_v55 }
 0x8dc   :  { %350 = vrot.lane.b32.xlu1 %v343_v2, %s3037_s11 }
 0x8e4   :  { %405 = vrot.lane.b32.xlu1 %v357_v5, %s3037_s11 }
 0x94e   :  { %v351_v6 = vpop.permute.xlu1 %350 }
 0x94f   :  { %353 = vst.msk [vmem:[#allocation2] sm:$0xff] %vm25_vm0, %v351_v6 }
 0x950   :  { %2656 = vst.msk [vmem:[%s3794_s4 + $0x18] sm:$0xff] %vm25_vm0, %v351_v6 }
 0x956   :  { %v356_v7 = vld [vmem:[#allocation2] sm:$0xff]  ;;  %v406_v27 = vpop.permute.xlu1 %405 }
 0x957   :  { %2658 = vmatmul.msk.f32.vlgmr.msrb.gmra.mxu0 %vm25_vm0, %v356_v7 }
 0x958   :  { %1023 = vmatpush.msrb.mxu0 %v3077_v0 }
 0x95a   :  { %1024 = vmatpush.msrb.mxu0 %v3082_v1 }
 0x95c   :  { %1025 = vmatpush.msrb.mxu0 %v3092_v3 }
 0x95e   :  { %1026 = vmatpush.msrb.mxu0 %v3102_v4 }
 0x9d4   :  { %v380_v9 = vpop.f32.mrf.mxu0 }
 0x9d5   :  { %v383_v10 = vadd.f32 %v2657_v8, %v380_v9  ;;  %v2665_v8 = vld [vmem:[%s3793_s0 + $0x30] sm:$0xff] }
 0x9d7   :  { %2804 = vtanh.f32 %v383_v10  ;;  %v2659_v12 = vmul.f32 -1.442695, %v383_v10 }
 0x9d9   :  { %2806 = vpow2.f32 %v2659_v12 }
 0x9dd   :  { %v2805_v11 = vpop.eup %2804 }
 0x9de   :  { %410 = vrot.lane.b32.xlu0 %v2805_v11, %s3036_s10 }
 0x9df   :  { %v2807_v13 = vpop.eup %2806 }
 0x9e0   :  { %v387_v14 = vadd.f32 1.0, %v2807_v13 }
 0x9e2   :  { %2808 = vrcp.f32 %v387_v14  ;;  %v399_v20 = vand.u32 2147483648, %v387_v14  ;;  %vm393_vm3 = vweird.f32 %v387_v14  ;;  %v397_v21 = vand.u32 2147483647, %v387_v14 }
 0x9e4   :  { %v400_v23 = vor.u32 1.1754944e-38, %v399_v20  ;;  %vm398_vm5 = vcmp.eq.f32.partialorder %v397_v21, 8.507059e+37 }
 0x9e8   :  { %v2809_v15 = vpop.eup %2808 }
 0x9e9   :  { %v389_v16 = vmul.f32 %v2809_v15, %v387_v14  ;;  %vm394_vm2 = vweird.f32 %v2809_v15 }
 0x9ea   :  { %vm395_vm4 = vmor %vm393_vm3, %vm394_vm2 }
 0x9eb   :  { %v390_v17 = vsub.f32 1.0, %v389_v16 }
 0x9ed   :  { %v391_v18 = vmul.f32 %v2809_v15, %v390_v17 }
 0x9ef   :  { %v392_v19 = vadd.f32 %v2809_v15, %v391_v18 }
 0x9f1   :  { %v396_v22 = vsel %vm395_vm4, %v2809_v15, %v392_v19 }
 0x9f2   :  { %v401_v25 = vsel %vm398_vm5, %v400_v23, %v396_v22 }
 0x9f3   :  { %v408_v28 = vmul.f32 %v406_v27, %v401_v25 }
 0xa50   :  { %v411_v24 = vpop.permute.xlu0 %410 }
 0xa51   :  { %v413_v26 = vmul.f32 %v411_v24, %v401_v25 }
 0xa53   :  { %415 = vrot.lane.b32.xlu2 %v413_v26, %s3037_s11 }
 0xaad   :  { %v416_v29 = vpop.permute.xlu2 %415 }
 0xaae   :  { %v418_v30 = vadd.f32 %v416_v29, %v408_v28 }
 0xab0   :  { %2810 = vtanh.f32 %v418_v30  ;;  %426 = vrot.lane.b32.xlu2 %v418_v30, %s3038_s2 }
 0xab6   :  { %v2811_v31 = vpop.eup %2810 }
 0xab7   :  { %421 = vrot.lane.b32.xlu0 %v2811_v31, %s3036_s10 }
 0xb0a   :  { %v427_v32 = vpop.permute.xlu2 %426 }
 0xb0b   :  { %429 = vst.msk [vmem:[#allocation3] sm:$0xff] %vm25_vm0, %v427_v32 }
 0xb12   :  { %v438_v35 = vld [vmem:[#allocation3] sm:$0xff] }
 0xb29   :  { %v422_v33 = vpop.permute.xlu0 %421 }
 0xb2a   :  { %v424_v34 = vmul.f32 %v422_v33, %v401_v25 }
 0xb2c   :  { %431 = vrot.lane.b32.xlu1 %v424_v34, %s3037_s11 }
 0xb34   :  { %486 = vrot.lane.b32.xlu1 %v438_v35, %s3037_s11 }
 0xb9e   :  { %v432_v36 = vpop.permute.xlu1 %431 }
 0xb9f   :  { %434 = vst.msk [vmem:[#allocation2] sm:$0xff] %vm25_vm0, %v432_v36 }
 0xba0   :  { %2660 = vst.msk [vmem:[%s3794_s4 + $0x20] sm:$0xff] %vm25_vm0, %v432_v36 }
 0xba6   :  { %v437_v37 = vld [vmem:[#allocation2] sm:$0xff]  ;;  %v487_v57 = vpop.permute.xlu1 %486 }
 0xba7   :  { %2662 = vmatmul.msk.f32.vlgmr.msrb.gmra.mxu1 %vm25_vm0, %v437_v37 }
 0xba8   :  { %1104 = vmatpush.msrb.mxu1 %v3077_v0 }
 0xbaa   :  { %1105 = vmatpush.msrb.mxu1 %v3082_v1 }
 0xbac   :  { %1106 = vmatpush.msrb.mxu1 %v3092_v3 }
 0xbae   :  { %1107 = vmatpush.msrb.mxu1 %v3102_v4 }
 0xc24   :  { %v461_v39 = vpop.f32.mrf.mxu1 }
 0xc25   :  { %v464_v40 = vadd.f32 %v2661_v38, %v461_v39  ;;  %v2669_v38 = vld [vmem:[%s3793_s0 + $0x38] sm:$0xff] }
 0xc27   :  { %2812 = vtanh.f32 %v464_v40  ;;  %v2663_v42 = vmul.f32 -1.442695, %v464_v40 }
 0xc29   :  { %2814 = vpow2.f32 %v2663_v42 }
 0xc2d   :  { %v2813_v41 = vpop.eup %2812 }
 0xc2e   :  { %491 = vrot.lane.b32.xlu0 %v2813_v41, %s3036_s10 }
 0xc2f   :  { %v2815_v43 = vpop.eup %2814 }
 0xc30   :  { %v468_v44 = vadd.f32 1.0, %v2815_v43 }
 0xc32   :  { %2816 = vrcp.f32 %v468_v44  ;;  %v480_v50 = vand.u32 2147483648, %v468_v44  ;;  %vm474_vm7 = vweird.f32 %v468_v44  ;;  %v478_v51 = vand.u32 2147483647, %v468_v44 }
 0xc34   :  { %v481_v53 = vor.u32 1.1754944e-38, %v480_v50  ;;  %vm479_vm9 = vcmp.eq.f32.partialorder %v478_v51, 8.507059e+37 }
 0xc38   :  { %v2817_v45 = vpop.eup %2816 }
 0xc39   :  { %v470_v46 = vmul.f32 %v2817_v45, %v468_v44  ;;  %vm475_vm6 = vweird.f32 %v2817_v45 }
 0xc3a   :  { %vm476_vm8 = vmor %vm474_vm7, %vm475_vm6 }
 0xc3b   :  { %v471_v47 = vsub.f32 1.0, %v470_v46 }
 0xc3d   :  { %v472_v48 = vmul.f32 %v2817_v45, %v471_v47 }
 0xc3f   :  { %v473_v49 = vadd.f32 %v2817_v45, %v472_v48 }
 0xc41   :  { %v477_v52 = vsel %vm476_vm8, %v2817_v45, %v473_v49 }
 0xc42   :  { %v482_v55 = vsel %vm479_vm9, %v481_v53, %v477_v52 }
 0xc43   :  { %v489_v58 = vmul.f32 %v487_v57, %v482_v55 }
 0xca0   :  { %v492_v54 = vpop.permute.xlu0 %491 }
 0xca1   :  { %v494_v56 = vmul.f32 %v492_v54, %v482_v55 }
 0xca3   :  { %496 = vrot.lane.b32.xlu2 %v494_v56, %s3037_s11 }
 0xcfd   :  { %v497_v59 = vpop.permute.xlu2 %496 }
 0xcfe   :  { %v499_v60 = vadd.f32 %v497_v59, %v489_v58 }
 0xd00   :  { %2818 = vtanh.f32 %v499_v60  ;;  %507 = vrot.lane.b32.xlu2 %v499_v60, %s3038_s2 }
 0xd06   :  { %v2819_v61 = vpop.eup %2818 }
 0xd07   :  { %502 = vrot.lane.b32.xlu0 %v2819_v61, %s3036_s10 }
 0xd5a   :  { %v508_v62 = vpop.permute.xlu2 %507 }
 0xd5b   :  { %510 = vst.msk [vmem:[#allocation3] sm:$0xff] %vm25_vm0, %v508_v62 }
 0xd62   :  { %v519_v5 = vld [vmem:[#allocation3] sm:$0xff] }
 0xd79   :  { %v503_v63 = vpop.permute.xlu0 %502 }
 0xd7a   :  { %v505_v2 = vmul.f32 %v503_v63, %v482_v55 }
 0xd7c   :  { %512 = vrot.lane.b32.xlu1 %v505_v2, %s3037_s11 }
 0xd84   :  { %567 = vrot.lane.b32.xlu1 %v519_v5, %s3037_s11 }
 0xdee   :  { %v513_v6 = vpop.permute.xlu1 %512 }
 0xdef   :  { %515 = vst.msk [vmem:[#allocation2] sm:$0xff] %vm25_vm0, %v513_v6 }
 0xdf0   :  { %2664 = vst.msk [vmem:[%s3794_s4 + $0x28] sm:$0xff] %vm25_vm0, %v513_v6 }
 0xdf6   :  { %v518_v7 = vld [vmem:[#allocation2] sm:$0xff]  ;;  %v568_v27 = vpop.permute.xlu1 %567 }
 0xdf7   :  { %2666 = vmatmul.msk.f32.vlgmr.msrb.gmra.mxu2 %vm25_vm0, %v518_v7 }
 0xdf8   :  { %1185 = vmatpush.msrb.mxu2 %v3077_v0 }
 0xdfa   :  { %1186 = vmatpush.msrb.mxu2 %v3082_v1 }
 0xdfc   :  { %1187 = vmatpush.msrb.mxu2 %v3092_v3 }
 0xdfe   :  { %1188 = vmatpush.msrb.mxu2 %v3102_v4 }
 0xe7a   :  { %v542_v9 = vpop.f32.mrf.mxu2 }
 0xe7b   :  { %v545_v10 = vadd.f32 %v2665_v8, %v542_v9  ;;  %v2673_v8 = vld [vmem:[%s3793_s0 + $0x40] sm:$0xff] }
 0xe7d   :  { %2820 = vtanh.f32 %v545_v10  ;;  %v2667_v12 = vmul.f32 -1.442695, %v545_v10 }
 0xe7f   :  { %2822 = vpow2.f32 %v2667_v12 }
 0xe83   :  { %v2821_v11 = vpop.eup %2820 }
 0xe84   :  { %572 = vrot.lane.b32.xlu0 %v2821_v11, %s3036_s10 }
 0xe85   :  { %v2823_v13 = vpop.eup %2822 }
 0xe86   :  { %v549_v14 = vadd.f32 1.0, %v2823_v13 }
 0xe88   :  { %2824 = vrcp.f32 %v549_v14  ;;  %v561_v20 = vand.u32 2147483648, %v549_v14  ;;  %vm555_vm11 = vweird.f32 %v549_v14  ;;  %v559_v21 = vand.u32 2147483647, %v549_v14 }
 0xe8a   :  { %v562_v23 = vor.u32 1.1754944e-38, %v561_v20  ;;  %vm560_vm13 = vcmp.eq.f32.partialorder %v559_v21, 8.507059e+37 }
 0xe8e   :  { %v2825_v15 = vpop.eup %2824 }
 0xe8f   :  { %v551_v16 = vmul.f32 %v2825_v15, %v549_v14  ;;  %vm556_vm10 = vweird.f32 %v2825_v15 }
 0xe90   :  { %vm557_vm12 = vmor %vm555_vm11, %vm556_vm10 }
 0xe91   :  { %v552_v17 = vsub.f32 1.0, %v551_v16 }
 0xe93   :  { %v553_v18 = vmul.f32 %v2825_v15, %v552_v17 }
 0xe95   :  { %v554_v19 = vadd.f32 %v2825_v15, %v553_v18 }
 0xe97   :  { %v558_v22 = vsel %vm557_vm12, %v2825_v15, %v554_v19 }
 0xe98   :  { %v563_v25 = vsel %vm560_vm13, %v562_v23, %v558_v22 }
 0xe99   :  { %v570_v28 = vmul.f32 %v568_v27, %v563_v25 }
 0xef6   :  { %v573_v24 = vpop.permute.xlu0 %572 }
 0xef7   :  { %v575_v26 = vmul.f32 %v573_v24, %v563_v25 }
 0xef9   :  { %577 = vrot.lane.b32.xlu2 %v575_v26, %s3037_s11 }
 0xf53   :  { %v578_v29 = vpop.permute.xlu2 %577 }
 0xf54   :  { %v580_v30 = vadd.f32 %v578_v29, %v570_v28 }
 0xf56   :  { %2826 = vtanh.f32 %v580_v30  ;;  %588 = vrot.lane.b32.xlu2 %v580_v30, %s3038_s2 }
 0xf5c   :  { %v2827_v31 = vpop.eup %2826 }
 0xf5d   :  { %583 = vrot.lane.b32.xlu0 %v2827_v31, %s3036_s10 }
 0xfb0   :  { %v589_v32 = vpop.permute.xlu2 %588 }
 0xfb1   :  { %591 = vst.msk [vmem:[#allocation3] sm:$0xff] %vm25_vm0, %v589_v32 }
 0xfb8   :  { %v600_v35 = vld [vmem:[#allocation3] sm:$0xff] }
 0xfcf   :  { %v584_v33 = vpop.permute.xlu0 %583 }
 0xfd0   :  { %v586_v34 = vmul.f32 %v584_v33, %v563_v25 }
 0xfd2   :  { %593 = vrot.lane.b32.xlu1 %v586_v34, %s3037_s11 }
 0xfda   :  { %648 = vrot.lane.b32.xlu1 %v600_v35, %s3037_s11  ;;  %v3319_v35 = vld [vmem:[%s3790_s3 + $0x18] sm:$0xff] }
0x1044   :  { %v594_v36 = vpop.permute.xlu1 %593 }
0x1045   :  { %596 = vst.msk [vmem:[#allocation2] sm:$0xff] %vm25_vm0, %v594_v36 }
0x1046   :  { %2668 = vst.msk [vmem:[%s3794_s4 + $0x30] sm:$0xff] %vm25_vm0, %v594_v36  ;;  %v3325_v36 = vld [vmem:[%s3790_s3 + $0x10] sm:$0xff] }
0x104c   :  { %v599_v37 = vld [vmem:[#allocation2] sm:$0xff]  ;;  %v649_v57 = vpop.permute.xlu1 %648 }
0x104d   :  { %2670 = vmatmul.msk.f32.vlgmr.msrb.gmra.mxu3 %vm25_vm0, %v599_v37  ;;  %v3331_v37 = vld [vmem:[%s3790_s3 + $0x8] sm:$0xff] }
0x104e   :  { %1266 = vmatpush.msrb.mxu3 %v3077_v0 }
0x1050   :  { %1267 = vmatpush.msrb.mxu3 %v3082_v1 }
0x1052   :  { %1268 = vmatpush.msrb.mxu3 %v3092_v3 }
0x1054   :  { %1269 = vmatpush.msrb.mxu3 %v3102_v4 }
0x10d0   :  { %v623_v39 = vpop.f32.mrf.mxu3 }
0x10d1   :  { %v626_v40 = vadd.f32 %v2669_v38, %v623_v39  ;;  %v2677_v38 = vld [vmem:[%s3793_s0 + $0x48] sm:$0xff] }
0x10d3   :  { %2828 = vtanh.f32 %v626_v40  ;;  %v2671_v42 = vmul.f32 -1.442695, %v626_v40 }
0x10d5   :  { %2830 = vpow2.f32 %v2671_v42 }
0x10d9   :  { %v2829_v41 = vpop.eup %2828 }
0x10da   :  { %653 = vrot.lane.b32.xlu0 %v2829_v41, %s3036_s10 }
0x10db   :  { %v2831_v43 = vpop.eup %2830 }
0x10dc   :  { %v630_v44 = vadd.f32 1.0, %v2831_v43 }
0x10de   :  { %2832 = vrcp.f32 %v630_v44  ;;  %v642_v50 = vand.u32 2147483648, %v630_v44  ;;  %vm636_vm15 = vweird.f32 %v630_v44  ;;  %v640_v51 = vand.u32 2147483647, %v630_v44 }
0x10e0   :  { %v643_v53 = vor.u32 1.1754944e-38, %v642_v50  ;;  %vm641_vm2 = vcmp.eq.f32.partialorder %v640_v51, 8.507059e+37 }
0x10e4   :  { %v2833_v45 = vpop.eup %2832 }
0x10e5   :  { %v632_v46 = vmul.f32 %v2833_v45, %v630_v44  ;;  %vm637_vm14 = vweird.f32 %v2833_v45 }
0x10e6   :  { %vm638_vm1 = vmor %vm636_vm15, %vm637_vm14 }
0x10e7   :  { %v633_v47 = vsub.f32 1.0, %v632_v46 }
0x10e9   :  { %v634_v48 = vmul.f32 %v2833_v45, %v633_v47 }
0x10eb   :  { %v635_v49 = vadd.f32 %v2833_v45, %v634_v48 }
0x10ed   :  { %v639_v52 = vsel %vm638_vm1, %v2833_v45, %v635_v49 }
0x10ee   :  { %v644_v55 = vsel %vm641_vm2, %v643_v53, %v639_v52 }
0x10ef   :  { %v651_v58 = vmul.f32 %v649_v57, %v644_v55 }
0x114c   :  { %v654_v54 = vpop.permute.xlu0 %653 }
0x114d   :  { %v656_v56 = vmul.f32 %v654_v54, %v644_v55 }
0x114f   :  { %658 = vrot.lane.b32.xlu2 %v656_v56, %s3037_s11 }
0x11a9   :  { %v659_v59 = vpop.permute.xlu2 %658 }
0x11aa   :  { %v661_v60 = vadd.f32 %v659_v59, %v651_v58 }
0x11ac   :  { %2834 = vtanh.f32 %v661_v60  ;;  %669 = vrot.lane.b32.xlu2 %v661_v60, %s3038_s2 }
0x11b2   :  { %v2835_v61 = vpop.eup %2834 }
0x11b3   :  { %664 = vrot.lane.b32.xlu0 %v2835_v61, %s3036_s10 }
0x1206   :  { %v670_v62 = vpop.permute.xlu2 %669 }
0x1207   :  { %672 = vst.msk [vmem:[#allocation3] sm:$0xff] %vm25_vm0, %v670_v62 }
0x120e   :  { %v681_v5 = vld [vmem:[#allocation3] sm:$0xff] }
0x1225   :  { %v665_v63 = vpop.permute.xlu0 %664 }
0x1226   :  { %v667_v2 = vmul.f32 %v665_v63, %v644_v55 }
0x1228   :  { %674 = vrot.lane.b32.xlu1 %v667_v2, %s3037_s11 }
0x1230   :  { %729 = vrot.lane.b32.xlu1 %v681_v5, %s3037_s11 }
0x129a   :  { %v675_v6 = vpop.permute.xlu1 %674 }
0x129b   :  { %677 = vst.msk [vmem:[#allocation2] sm:$0xff] %vm25_vm0, %v675_v6 }
0x129c   :  { %2672 = vst.msk [vmem:[%s3794_s4 + $0x38] sm:$0xff] %vm25_vm0, %v675_v6 }
0x12a2   :  { %v680_v7 = vld [vmem:[#allocation2] sm:$0xff]  ;;  %v730_v24 = vpop.permute.xlu1 %729 }
0x12a3   :  { %2674 = vmatmul.msk.f32.vlgmr.msra.gmra.mxu0 %vm25_vm0, %v680_v7  ;;  %v3357_v7 = vld [vmem:[%s3790_s3] sm:$0xff] }
0x12a4   :  { %1347 = vmatpush.msra.mxu0 %v3077_v0 }
0x12a6   :  { %1348 = vmatpush.msra.mxu0 %v3082_v1 }
0x12a8   :  { %1349 = vmatpush.msra.mxu0 %v3092_v3 }
0x12aa   :  { %1350 = vmatpush.msra.mxu0 %v3102_v4 }
0x1320   :  { %v704_v9 = vpop.f32.mrf.mxu0 }
0x1321   :  { %v707_v10 = vadd.f32 %v2673_v8, %v704_v9  ;;  %v2681_v8 = vld [vmem:[%s3793_s0 + $0x50] sm:$0xff] }
0x1323   :  { %2836 = vtanh.f32 %v707_v10  ;;  %v2675_v12 = vmul.f32 -1.442695, %v707_v10 }
0x1325   :  { %2838 = vpow2.f32 %v2675_v12 }
0x1329   :  { %v2837_v11 = vpop.eup %2836 }
0x132a   :  { %734 = vrot.lane.b32.xlu0 %v2837_v11, %s3036_s10 }
0x132b   :  { %v2839_v13 = vpop.eup %2838 }
0x132c   :  { %v711_v0 = vadd.f32 1.0, %v2839_v13 }
0x132e   :  { %2840 = vrcp.f32 %v711_v0  ;;  %v723_v17 = vand.u32 2147483648, %v711_v0  ;;  %vm717_vm4 = vweird.f32 %v711_v0  ;;  %v721_v18 = vand.u32 2147483647, %v711_v0 }
0x1330   :  { %v724_v20 = vor.u32 1.1754944e-38, %v723_v17  ;;  %vm722_vm6 = vcmp.eq.f32.partialorder %v721_v18, 8.507059e+37 }
0x1334   :  { %v2841_v1 = vpop.eup %2840 }
0x1335   :  { %v713_v14 = vmul.f32 %v2841_v1, %v711_v0  ;;  %vm718_vm3 = vweird.f32 %v2841_v1 }
0x1336   :  { %vm719_vm5 = vmor %vm717_vm4, %vm718_vm3 }
0x1337   :  { %v714_v3 = vsub.f32 1.0, %v713_v14 }
0x1339   :  { %v715_v15 = vmul.f32 %v2841_v1, %v714_v3 }
0x133b   :  { %v716_v16 = vadd.f32 %v2841_v1, %v715_v15 }
0x133d   :  { %v720_v19 = vsel %vm719_vm5, %v2841_v1, %v716_v16 }
0x133e   :  { %v725_v22 = vsel %vm722_vm6, %v724_v20, %v720_v19 }
0x133f   :  { %v732_v25 = vmul.f32 %v730_v24, %v725_v22 }
0x139c   :  { %v735_v21 = vpop.permute.xlu0 %734 }
0x139d   :  { %v737_v23 = vmul.f32 %v735_v21, %v725_v22 }
0x139f   :  { %739 = vrot.lane.b32.xlu2 %v737_v23, %s3037_s11 }
0x13f9   :  { %v740_v26 = vpop.permute.xlu2 %739 }
0x13fa   :  { %v742_v27 = vadd.f32 %v740_v26, %v732_v25 }
0x13fc   :  { %2842 = vtanh.f32 %v742_v27  ;;  %750 = vrot.lane.b32.xlu2 %v742_v27, %s3038_s2 }
0x1402   :  { %v2843_v28 = vpop.eup %2842 }
0x1403   :  { %745 = vrot.lane.b32.xlu0 %v2843_v28, %s3036_s10 }
0x1456   :  { %v751_v29 = vpop.permute.xlu2 %750 }
0x1457   :  { %753 = vst.msk [vmem:[#allocation3] sm:$0xff] %vm25_vm0, %v751_v29 }
0x145e   :  { %v762_v32 = vld [vmem:[#allocation3] sm:$0xff] }
0x1475   :  { %v746_v30 = vpop.permute.xlu0 %745 }
0x1476   :  { %v748_v31 = vmul.f32 %v746_v30, %v725_v22 }
0x1478   :  { %755 = vrot.lane.b32.xlu1 %v748_v31, %s3037_s11 }
0x1480   :  { %810 = vrot.lane.b32.xlu1 %v762_v32, %s3037_s11 }
0x14ea   :  { %v756_v33 = vpop.permute.xlu1 %755 }
0x14eb   :  { %758 = vst.msk [vmem:[#allocation2] sm:$0xff] %vm25_vm0, %v756_v33 }
0x14ec   :  { %2676 = vst.msk [vmem:[%s3794_s4 + $0x40] sm:$0xff] %vm25_vm0, %v756_v33 }
0x14f2   :  { %v761_v34 = vld [vmem:[#allocation2] sm:$0xff]  ;;  %v811_v56 = vpop.permute.xlu1 %810 }
0x14f3   :  { %2678 = vmatmul.msk.f32.vlgmr.msra.gmra.mxu1 %vm25_vm0, %v761_v34 }
0x14f4   :  { %1428 = vmatpush.msra.mxu1 %v3319_v35 }
0x14f6   :  { %1429 = vmatpush.msra.mxu1 %v3325_v36 }
0x14f8   :  { %1430 = vmatpush.msra.mxu1 %v3331_v37 }
0x14fa   :  { %1431 = vmatpush.msra.mxu1 %v3102_v4 }
0x1570   :  { %v785_v39 = vpop.f32.mrf.mxu1 }
0x1571   :  { %v788_v40 = vadd.f32 %v2677_v38, %v785_v39  ;;  %v2685_v38 = vld [vmem:[%s3793_s0 + $0x58] sm:$0xff] }
0x1573   :  { %2844 = vtanh.f32 %v788_v40  ;;  %v2679_v42 = vmul.f32 -1.442695, %v788_v40 }
0x1575   :  { %2846 = vpow2.f32 %v2679_v42 }
0x1579   :  { %v2845_v41 = vpop.eup %2844 }
0x157a   :  { %815 = vrot.lane.b32.xlu0 %v2845_v41, %s3036_s10 }
0x157b   :  { %v2847_v43 = vpop.eup %2846 }
0x157c   :  { %v792_v44 = vadd.f32 1.0, %v2847_v43 }
0x157e   :  { %2848 = vrcp.f32 %v792_v44  ;;  %v804_v49 = vand.u32 2147483648, %v792_v44  ;;  %vm798_vm8 = vweird.f32 %v792_v44  ;;  %v802_v50 = vand.u32 2147483647, %v792_v44 }
0x1580   :  { %v805_v52 = vor.u32 1.1754944e-38, %v804_v49  ;;  %vm803_vm10 = vcmp.eq.f32.partialorder %v802_v50, 8.507059e+37 }
0x1584   :  { %v2849_v45 = vpop.eup %2848 }
0x1585   :  { %v794_v46 = vmul.f32 %v2849_v45, %v792_v44  ;;  %vm799_vm7 = vweird.f32 %v2849_v45 }
0x1586   :  { %vm800_vm9 = vmor %vm798_vm8, %vm799_vm7 }
0x1587   :  { %v795_v47 = vsub.f32 1.0, %v794_v46 }
0x1589   :  { %v796_v48 = vmul.f32 %v2849_v45, %v795_v47 }
0x158b   :  { %v797_v4 = vadd.f32 %v2849_v45, %v796_v48 }
0x158d   :  { %v801_v51 = vsel %vm800_vm9, %v2849_v45, %v797_v4 }
0x158e   :  { %v806_v54 = vsel %vm803_vm10, %v805_v52, %v801_v51 }
0x158f   :  { %v813_v57 = vmul.f32 %v811_v56, %v806_v54 }
0x15ec   :  { %v816_v53 = vpop.permute.xlu0 %815 }
0x15ed   :  { %v818_v55 = vmul.f32 %v816_v53, %v806_v54 }
0x15ef   :  { %820 = vrot.lane.b32.xlu2 %v818_v55, %s3037_s11 }
0x1649   :  { %v821_v58 = vpop.permute.xlu2 %820 }
0x164a   :  { %v823_v59 = vadd.f32 %v821_v58, %v813_v57 }
0x164c   :  { %2850 = vtanh.f32 %v823_v59  ;;  %831 = vrot.lane.b32.xlu2 %v823_v59, %s3038_s2 }
0x1652   :  { %v2851_v60 = vpop.eup %2850 }
0x1653   :  { %826 = vrot.lane.b32.xlu0 %v2851_v60, %s3036_s10 }
0x16a6   :  { %v832_v61 = vpop.permute.xlu2 %831 }
0x16a7   :  { %834 = vst.msk [vmem:[#allocation3] sm:$0xff] %vm25_vm0, %v832_v61 }
0x16ae   :  { %v843_v2 = vld [vmem:[#allocation3] sm:$0xff] }
0x16c5   :  { %v827_v62 = vpop.permute.xlu0 %826 }
0x16c6   :  { %v829_v63 = vmul.f32 %v827_v62, %v806_v54 }
0x16c8   :  { %836 = vrot.lane.b32.xlu1 %v829_v63, %s3037_s11 }
0x16d0   :  { %891 = vrot.lane.b32.xlu1 %v843_v2, %s3037_s11 }
0x173a   :  { %v837_v5 = vpop.permute.xlu1 %836 }
0x173b   :  { %839 = vst.msk [vmem:[#allocation2] sm:$0xff] %vm25_vm0, %v837_v5 }
0x173c   :  { %2680 = vst.msk [vmem:[%s3794_s4 + $0x48] sm:$0xff] %vm25_vm0, %v837_v5 }
0x1742   :  { %v842_v6 = vld [vmem:[#allocation2] sm:$0xff]  ;;  %v892_v24 = vpop.permute.xlu1 %891 }
0x1743   :  { %2682 = vmatmul.msk.f32.vlgmr.msra.gmra.mxu2 %vm25_vm0, %v842_v6 }
0x1744   :  { %1509 = vmatpush.msra.mxu2 %v3319_v35 }
0x1746   :  { %1510 = vmatpush.msra.mxu2 %v3325_v36 }
0x1748   :  { %1511 = vmatpush.msra.mxu2 %v3331_v37 }
0x174a   :  { %1512 = vmatpush.msra.mxu2 %v3357_v7 }
0x17c6   :  { %v866_v9 = vpop.f32.mrf.mxu2 }
0x17c7   :  { %v869_v10 = vadd.f32 %v2681_v8, %v866_v9  ;;  %v2689_v8 = vld [vmem:[%s3793_s0 + $0x60] sm:$0xff] }
0x17c9   :  { %2852 = vtanh.f32 %v869_v10  ;;  %v2683_v12 = vmul.f32 -1.442695, %v869_v10 }
0x17cb   :  { %2854 = vpow2.f32 %v2683_v12 }
0x17cf   :  { %v2853_v11 = vpop.eup %2852 }
0x17d0   :  { %896 = vrot.lane.b32.xlu0 %v2853_v11, %s3036_s10 }
0x17d1   :  { %v2855_v13 = vpop.eup %2854 }
0x17d2   :  { %v873_v0 = vadd.f32 1.0, %v2855_v13 }
0x17d4   :  { %2856 = vrcp.f32 %v873_v0  ;;  %v885_v17 = vand.u32 2147483648, %v873_v0  ;;  %vm879_vm12 = vweird.f32 %v873_v0  ;;  %v883_v18 = vand.u32 2147483647, %v873_v0 }
0x17d6   :  { %v886_v20 = vor.u32 1.1754944e-38, %v885_v17  ;;  %vm884_vm14 = vcmp.eq.f32.partialorder %v883_v18, 8.507059e+37 }
0x17da   :  { %v2857_v1 = vpop.eup %2856 }
0x17db   :  { %v875_v14 = vmul.f32 %v2857_v1, %v873_v0  ;;  %vm880_vm11 = vweird.f32 %v2857_v1 }
0x17dc   :  { %vm881_vm13 = vmor %vm879_vm12, %vm880_vm11 }
0x17dd   :  { %v876_v3 = vsub.f32 1.0, %v875_v14 }
0x17df   :  { %v877_v15 = vmul.f32 %v2857_v1, %v876_v3 }
0x17e1   :  { %v878_v16 = vadd.f32 %v2857_v1, %v877_v15 }
0x17e3   :  { %v882_v19 = vsel %vm881_vm13, %v2857_v1, %v878_v16 }
0x17e4   :  { %v887_v22 = vsel %vm884_vm14, %v886_v20, %v882_v19 }
0x17e5   :  { %v894_v25 = vmul.f32 %v892_v24, %v887_v22 }
0x1842   :  { %v897_v21 = vpop.permute.xlu0 %896 }
0x1843   :  { %v899_v23 = vmul.f32 %v897_v21, %v887_v22 }
0x1845   :  { %901 = vrot.lane.b32.xlu2 %v899_v23, %s3037_s11 }
0x189f   :  { %v902_v26 = vpop.permute.xlu2 %901 }
0x18a0   :  { %v904_v27 = vadd.f32 %v902_v26, %v894_v25 }
0x18a2   :  { %2858 = vtanh.f32 %v904_v27  ;;  %912 = vrot.lane.b32.xlu2 %v904_v27, %s3038_s2 }
0x18a8   :  { %v2859_v28 = vpop.eup %2858 }
0x18a9   :  { %907 = vrot.lane.b32.xlu0 %v2859_v28, %s3036_s10 }
0x18fc   :  { %v913_v29 = vpop.permute.xlu2 %912 }
0x18fd   :  { %915 = vst.msk [vmem:[#allocation3] sm:$0xff] %vm25_vm0, %v913_v29 }
0x1904   :  { %v924_v32 = vld [vmem:[#allocation3] sm:$0xff] }
0x191b   :  { %v908_v30 = vpop.permute.xlu0 %907 }
0x191c   :  { %v910_v31 = vmul.f32 %v908_v30, %v887_v22 }
0x191e   :  { %917 = vrot.lane.b32.xlu1 %v910_v31, %s3037_s11 }
0x1926   :  { %972 = vrot.lane.b32.xlu1 %v924_v32, %s3037_s11 }
0x1990   :  { %v918_v33 = vpop.permute.xlu1 %917 }
0x1991   :  { %920 = vst.msk [vmem:[#allocation2] sm:$0xff] %vm25_vm0, %v918_v33 }
0x1992   :  { %2684 = vst.msk [vmem:[%s3794_s4 + $0x50] sm:$0xff] %vm25_vm0, %v918_v33 }
0x1998   :  { %v923_v34 = vld [vmem:[#allocation2] sm:$0xff]  ;;  %v973_v56 = vpop.permute.xlu1 %972 }
0x1999   :  { %2686 = vmatmul.msk.f32.vlgmr.msra.gmra.mxu3 %vm25_vm0, %v923_v34 }
0x199a   :  { %1590 = vmatpush.msra.mxu3 %v3319_v35 }
0x199c   :  { %1591 = vmatpush.msra.mxu3 %v3325_v36 }
0x199e   :  { %1592 = vmatpush.msra.mxu3 %v3331_v37 }
0x19a0   :  { %1593 = vmatpush.msra.mxu3 %v3357_v7 }
0x1a1c   :  { %v947_v39 = vpop.f32.mrf.mxu3 }
0x1a1d   :  { %v950_v40 = vadd.f32 %v2685_v38, %v947_v39  ;;  %v2693_v38 = vld [vmem:[%s3793_s0 + $0x68] sm:$0xff] }
0x1a1f   :  { %2860 = vtanh.f32 %v950_v40  ;;  %v2687_v42 = vmul.f32 -1.442695, %v950_v40 }
0x1a21   :  { %2862 = vpow2.f32 %v2687_v42 }
0x1a25   :  { %v2861_v41 = vpop.eup %2860 }
0x1a26   :  { %977 = vrot.lane.b32.xlu0 %v2861_v41, %s3036_s10 }
0x1a27   :  { %v2863_v43 = vpop.eup %2862 }
0x1a28   :  { %v954_v44 = vadd.f32 1.0, %v2863_v43 }
0x1a2a   :  { %2864 = vrcp.f32 %v954_v44  ;;  %v966_v49 = vand.u32 2147483648, %v954_v44  ;;  %vm960_vm1 = vweird.f32 %v954_v44  ;;  %v964_v50 = vand.u32 2147483647, %v954_v44 }
0x1a2c   :  { %v967_v52 = vor.u32 1.1754944e-38, %v966_v49  ;;  %vm965_vm3 = vcmp.eq.f32.partialorder %v964_v50, 8.507059e+37 }
0x1a30   :  { %v2865_v45 = vpop.eup %2864 }
0x1a31   :  { %v956_v46 = vmul.f32 %v2865_v45, %v954_v44  ;;  %vm961_vm15 = vweird.f32 %v2865_v45 }
0x1a32   :  { %vm962_vm2 = vmor %vm960_vm1, %vm961_vm15 }
0x1a33   :  { %v957_v47 = vsub.f32 1.0, %v956_v46 }
0x1a35   :  { %v958_v48 = vmul.f32 %v2865_v45, %v957_v47 }
0x1a37   :  { %v959_v4 = vadd.f32 %v2865_v45, %v958_v48 }
0x1a39   :  { %v963_v51 = vsel %vm962_vm2, %v2865_v45, %v959_v4 }
0x1a3a   :  { %v968_v54 = vsel %vm965_vm3, %v967_v52, %v963_v51 }
0x1a3b   :  { %v975_v57 = vmul.f32 %v973_v56, %v968_v54 }
0x1a98   :  { %v978_v53 = vpop.permute.xlu0 %977 }
0x1a99   :  { %v980_v55 = vmul.f32 %v978_v53, %v968_v54 }
0x1a9b   :  { %982 = vrot.lane.b32.xlu2 %v980_v55, %s3037_s11 }
0x1af5   :  { %v983_v58 = vpop.permute.xlu2 %982 }
0x1af6   :  { %v985_v59 = vadd.f32 %v983_v58, %v975_v57 }
0x1af8   :  { %2866 = vtanh.f32 %v985_v59  ;;  %993 = vrot.lane.b32.xlu2 %v985_v59, %s3038_s2 }
0x1afe   :  { %v2867_v60 = vpop.eup %2866 }
0x1aff   :  { %988 = vrot.lane.b32.xlu0 %v2867_v60, %s3036_s10 }
0x1b52   :  { %v994_v61 = vpop.permute.xlu2 %993 }
0x1b53   :  { %996 = vst.msk [vmem:[#allocation3] sm:$0xff] %vm25_vm0, %v994_v61 }
0x1b5a   :  { %v1005_v2 = vld [vmem:[#allocation3] sm:$0xff] }
0x1b71   :  { %v989_v62 = vpop.permute.xlu0 %988 }
0x1b72   :  { %v991_v63 = vmul.f32 %v989_v62, %v968_v54 }
0x1b74   :  { %998 = vrot.lane.b32.xlu1 %v991_v63, %s3037_s11 }
0x1b7c   :  { %1053 = vrot.lane.b32.xlu1 %v1005_v2, %s3037_s11 }
0x1be6   :  { %v999_v5 = vpop.permute.xlu1 %998 }
0x1be7   :  { %1001 = vst.msk [vmem:[#allocation2] sm:$0xff] %vm25_vm0, %v999_v5 }
0x1be8   :  { %2688 = vst.msk [vmem:[%s3794_s4 + $0x58] sm:$0xff] %vm25_vm0, %v999_v5 }
0x1bee   :  { %v1004_v6 = vld [vmem:[#allocation2] sm:$0xff]  ;;  %v1054_v24 = vpop.permute.xlu1 %1053 }
0x1bef   :  { %2690 = vmatmul.msk.f32.vlgmr.msrb.gmra.mxu0 %vm25_vm0, %v1004_v6 }
0x1bf0   :  { %1671 = vmatpush.msrb.mxu0 %v3319_v35 }
0x1bf2   :  { %1672 = vmatpush.msrb.mxu0 %v3325_v36 }
0x1bf4   :  { %1673 = vmatpush.msrb.mxu0 %v3331_v37 }
0x1bf6   :  { %1674 = vmatpush.msrb.mxu0 %v3357_v7 }
0x1c6c   :  { %v1028_v9 = vpop.f32.mrf.mxu0 }
0x1c6d   :  { %v1031_v10 = vadd.f32 %v2689_v8, %v1028_v9  ;;  %v2697_v8 = vld [vmem:[%s3793_s0 + $0x70] sm:$0xff] }
0x1c6f   :  { %2868 = vtanh.f32 %v1031_v10  ;;  %v2691_v12 = vmul.f32 -1.442695, %v1031_v10 }
0x1c71   :  { %2870 = vpow2.f32 %v2691_v12 }
0x1c75   :  { %v2869_v11 = vpop.eup %2868 }
0x1c76   :  { %1058 = vrot.lane.b32.xlu0 %v2869_v11, %s3036_s10 }
0x1c77   :  { %v2871_v13 = vpop.eup %2870 }
0x1c78   :  { %v1035_v0 = vadd.f32 1.0, %v2871_v13 }
0x1c7a   :  { %2872 = vrcp.f32 %v1035_v0  ;;  %v1047_v17 = vand.u32 2147483648, %v1035_v0  ;;  %vm1041_vm5 = vweird.f32 %v1035_v0  ;;  %v1045_v18 = vand.u32 2147483647, %v1035_v0 }
0x1c7c   :  { %v1048_v20 = vor.u32 1.1754944e-38, %v1047_v17  ;;  %vm1046_vm7 = vcmp.eq.f32.partialorder %v1045_v18, 8.507059e+37 }
0x1c80   :  { %v2873_v1 = vpop.eup %2872 }
0x1c81   :  { %v1037_v14 = vmul.f32 %v2873_v1, %v1035_v0  ;;  %vm1042_vm4 = vweird.f32 %v2873_v1 }
0x1c82   :  { %vm1043_vm6 = vmor %vm1041_vm5, %vm1042_vm4 }
0x1c83   :  { %v1038_v3 = vsub.f32 1.0, %v1037_v14 }
0x1c85   :  { %v1039_v15 = vmul.f32 %v2873_v1, %v1038_v3 }
0x1c87   :  { %v1040_v16 = vadd.f32 %v2873_v1, %v1039_v15 }
0x1c89   :  { %v1044_v19 = vsel %vm1043_vm6, %v2873_v1, %v1040_v16 }
0x1c8a   :  { %v1049_v22 = vsel %vm1046_vm7, %v1048_v20, %v1044_v19 }
0x1c8b   :  { %v1056_v25 = vmul.f32 %v1054_v24, %v1049_v22 }
0x1ce8   :  { %v1059_v21 = vpop.permute.xlu0 %1058 }
0x1ce9   :  { %v1061_v23 = vmul.f32 %v1059_v21, %v1049_v22 }
0x1ceb   :  { %1063 = vrot.lane.b32.xlu2 %v1061_v23, %s3037_s11 }
0x1d45   :  { %v1064_v26 = vpop.permute.xlu2 %1063 }
0x1d46   :  { %v1066_v27 = vadd.f32 %v1064_v26, %v1056_v25 }
0x1d48   :  { %2874 = vtanh.f32 %v1066_v27  ;;  %1074 = vrot.lane.b32.xlu2 %v1066_v27, %s3038_s2 }
0x1d4e   :  { %v2875_v28 = vpop.eup %2874 }
0x1d4f   :  { %1069 = vrot.lane.b32.xlu0 %v2875_v28, %s3036_s10 }
0x1da2   :  { %v1075_v29 = vpop.permute.xlu2 %1074 }
0x1da3   :  { %1077 = vst.msk [vmem:[#allocation3] sm:$0xff] %vm25_vm0, %v1075_v29 }
0x1daa   :  { %v1086_v32 = vld [vmem:[#allocation3] sm:$0xff] }
0x1dc1   :  { %v1070_v30 = vpop.permute.xlu0 %1069 }
0x1dc2   :  { %v1072_v31 = vmul.f32 %v1070_v30, %v1049_v22 }
0x1dc4   :  { %1079 = vrot.lane.b32.xlu1 %v1072_v31, %s3037_s11 }
0x1dcc   :  { %1134 = vrot.lane.b32.xlu1 %v1086_v32, %s3037_s11 }
0x1e36   :  { %v1080_v33 = vpop.permute.xlu1 %1079 }
0x1e37   :  { %1082 = vst.msk [vmem:[#allocation2] sm:$0xff] %vm25_vm0, %v1080_v33 }
0x1e38   :  { %2692 = vst.msk [vmem:[%s3794_s4 + $0x60] sm:$0xff] %vm25_vm0, %v1080_v33 }
0x1e3e   :  { %v1085_v34 = vld [vmem:[#allocation2] sm:$0xff]  ;;  %v1135_v56 = vpop.permute.xlu1 %1134 }
0x1e3f   :  { %2694 = vmatmul.msk.f32.vlgmr.msrb.gmra.mxu1 %vm25_vm0, %v1085_v34 }
0x1e40   :  { %1752 = vmatpush.msrb.mxu1 %v3319_v35 }
0x1e42   :  { %1753 = vmatpush.msrb.mxu1 %v3325_v36 }
0x1e44   :  { %1754 = vmatpush.msrb.mxu1 %v3331_v37 }
0x1e46   :  { %1755 = vmatpush.msrb.mxu1 %v3357_v7 }
0x1ebc   :  { %v1109_v39 = vpop.f32.mrf.mxu1 }
0x1ebd   :  { %v1112_v40 = vadd.f32 %v2693_v38, %v1109_v39  ;;  %v2701_v38 = vld [vmem:[%s3793_s0 + $0x78] sm:$0xff] }
0x1ebf   :  { %2876 = vtanh.f32 %v1112_v40  ;;  %v2695_v42 = vmul.f32 -1.442695, %v1112_v40 }
0x1ec1   :  { %2878 = vpow2.f32 %v2695_v42 }
0x1ec5   :  { %v2877_v41 = vpop.eup %2876 }
0x1ec6   :  { %1139 = vrot.lane.b32.xlu0 %v2877_v41, %s3036_s10 }
0x1ec7   :  { %v2879_v43 = vpop.eup %2878 }
0x1ec8   :  { %v1116_v44 = vadd.f32 1.0, %v2879_v43 }
0x1eca   :  { %2880 = vrcp.f32 %v1116_v44  ;;  %v1128_v49 = vand.u32 2147483648, %v1116_v44  ;;  %vm1122_vm9 = vweird.f32 %v1116_v44  ;;  %v1126_v50 = vand.u32 2147483647, %v1116_v44 }
0x1ecc   :  { %v1129_v52 = vor.u32 1.1754944e-38, %v1128_v49  ;;  %vm1127_vm11 = vcmp.eq.f32.partialorder %v1126_v50, 8.507059e+37 }
0x1ed0   :  { %v2881_v45 = vpop.eup %2880 }
0x1ed1   :  { %v1118_v46 = vmul.f32 %v2881_v45, %v1116_v44  ;;  %vm1123_vm8 = vweird.f32 %v2881_v45 }
0x1ed2   :  { %vm1124_vm10 = vmor %vm1122_vm9, %vm1123_vm8 }
0x1ed3   :  { %v1119_v47 = vsub.f32 1.0, %v1118_v46 }
0x1ed5   :  { %v1120_v48 = vmul.f32 %v2881_v45, %v1119_v47 }
0x1ed7   :  { %v1121_v4 = vadd.f32 %v2881_v45, %v1120_v48 }
0x1ed9   :  { %v1125_v51 = vsel %vm1124_vm10, %v2881_v45, %v1121_v4 }
0x1eda   :  { %v1130_v54 = vsel %vm1127_vm11, %v1129_v52, %v1125_v51 }
0x1edb   :  { %v1137_v57 = vmul.f32 %v1135_v56, %v1130_v54 }
0x1f38   :  { %v1140_v53 = vpop.permute.xlu0 %1139 }
0x1f39   :  { %v1142_v55 = vmul.f32 %v1140_v53, %v1130_v54 }
0x1f3b   :  { %1144 = vrot.lane.b32.xlu2 %v1142_v55, %s3037_s11 }
0x1f95   :  { %v1145_v58 = vpop.permute.xlu2 %1144 }
0x1f96   :  { %v1147_v59 = vadd.f32 %v1145_v58, %v1137_v57 }
0x1f98   :  { %2882 = vtanh.f32 %v1147_v59  ;;  %1155 = vrot.lane.b32.xlu2 %v1147_v59, %s3038_s2 }
0x1f9e   :  { %v2883_v60 = vpop.eup %2882 }
0x1f9f   :  { %1150 = vrot.lane.b32.xlu0 %v2883_v60, %s3036_s10 }
0x1ff2   :  { %v1156_v61 = vpop.permute.xlu2 %1155 }
0x1ff3   :  { %1158 = vst.msk [vmem:[#allocation3] sm:$0xff] %vm25_vm0, %v1156_v61 }
0x1ffa   :  { %v1167_v2 = vld [vmem:[#allocation3] sm:$0xff] }
0x2011   :  { %v1151_v62 = vpop.permute.xlu0 %1150 }
0x2012   :  { %v1153_v63 = vmul.f32 %v1151_v62, %v1130_v54 }
0x2014   :  { %1160 = vrot.lane.b32.xlu1 %v1153_v63, %s3037_s11 }
0x201c   :  { %1215 = vrot.lane.b32.xlu1 %v1167_v2, %s3037_s11 }
0x2086   :  { %v1161_v5 = vpop.permute.xlu1 %1160 }
0x2087   :  { %1163 = vst.msk [vmem:[#allocation2] sm:$0xff] %vm25_vm0, %v1161_v5 }
0x2088   :  { %2696 = vst.msk [vmem:[%s3794_s4 + $0x68] sm:$0xff] %vm25_vm0, %v1161_v5 }
0x208e   :  { %v1166_v6 = vld [vmem:[#allocation2] sm:$0xff]  ;;  %v1216_v24 = vpop.permute.xlu1 %1215 }
0x208f   :  { %2698 = vmatmul.msk.f32.vlgmr.msrb.gmra.mxu2 %vm25_vm0, %v1166_v6 }
0x2090   :  { %1833 = vmatpush.msrb.mxu2 %v3319_v35 }
0x2092   :  { %1834 = vmatpush.msrb.mxu2 %v3325_v36 }
0x2094   :  { %1835 = vmatpush.msrb.mxu2 %v3331_v37 }
0x2096   :  { %1836 = vmatpush.msrb.mxu2 %v3357_v7 }
0x2112   :  { %v1190_v9 = vpop.f32.mrf.mxu2 }
0x2113   :  { %v1193_v10 = vadd.f32 %v2697_v8, %v1190_v9  ;;  %v2705_v8 = vld [vmem:[%s3793_s0 + $0x80] sm:$0xff] }
0x2115   :  { %2884 = vtanh.f32 %v1193_v10  ;;  %v2699_v12 = vmul.f32 -1.442695, %v1193_v10 }
0x2117   :  { %2886 = vpow2.f32 %v2699_v12 }
0x211b   :  { %v2885_v11 = vpop.eup %2884 }
0x211c   :  { %1220 = vrot.lane.b32.xlu0 %v2885_v11, %s3036_s10 }
0x211d   :  { %v2887_v13 = vpop.eup %2886 }
0x211e   :  { %v1197_v0 = vadd.f32 1.0, %v2887_v13 }
0x2120   :  { %2888 = vrcp.f32 %v1197_v0  ;;  %v1209_v17 = vand.u32 2147483648, %v1197_v0  ;;  %vm1203_vm13 = vweird.f32 %v1197_v0  ;;  %v1207_v18 = vand.u32 2147483647, %v1197_v0 }
0x2122   :  { %v1210_v20 = vor.u32 1.1754944e-38, %v1209_v17  ;;  %vm1208_vm15 = vcmp.eq.f32.partialorder %v1207_v18, 8.507059e+37 }
0x2126   :  { %v2889_v1 = vpop.eup %2888 }
0x2127   :  { %v1199_v14 = vmul.f32 %v2889_v1, %v1197_v0  ;;  %vm1204_vm12 = vweird.f32 %v2889_v1 }
0x2128   :  { %vm1205_vm14 = vmor %vm1203_vm13, %vm1204_vm12 }
0x2129   :  { %v1200_v3 = vsub.f32 1.0, %v1199_v14 }
0x212b   :  { %v1201_v15 = vmul.f32 %v2889_v1, %v1200_v3 }
0x212d   :  { %v1202_v16 = vadd.f32 %v2889_v1, %v1201_v15 }
0x212f   :  { %v1206_v19 = vsel %vm1205_vm14, %v2889_v1, %v1202_v16 }
0x2130   :  { %v1211_v22 = vsel %vm1208_vm15, %v1210_v20, %v1206_v19 }
0x2131   :  { %v1218_v25 = vmul.f32 %v1216_v24, %v1211_v22 }
0x218e   :  { %v1221_v21 = vpop.permute.xlu0 %1220 }
0x218f   :  { %v1223_v23 = vmul.f32 %v1221_v21, %v1211_v22 }
0x2191   :  { %1225 = vrot.lane.b32.xlu2 %v1223_v23, %s3037_s11 }
0x21eb   :  { %v1226_v26 = vpop.permute.xlu2 %1225 }
0x21ec   :  { %v1228_v27 = vadd.f32 %v1226_v26, %v1218_v25 }
0x21ee   :  { %2890 = vtanh.f32 %v1228_v27  ;;  %1236 = vrot.lane.b32.xlu2 %v1228_v27, %s3038_s2 }
0x21f4   :  { %v2891_v28 = vpop.eup %2890 }
0x21f5   :  { %1231 = vrot.lane.b32.xlu0 %v2891_v28, %s3036_s10 }
0x2248   :  { %v1237_v29 = vpop.permute.xlu2 %1236 }
0x2249   :  { %1239 = vst.msk [vmem:[#allocation3] sm:$0xff] %vm25_vm0, %v1237_v29 }
0x2250   :  { %v1248_v32 = vld [vmem:[#allocation3] sm:$0xff] }
0x2267   :  { %v1232_v30 = vpop.permute.xlu0 %1231 }
0x2268   :  { %v1234_v31 = vmul.f32 %v1232_v30, %v1211_v22 }
0x226a   :  { %1241 = vrot.lane.b32.xlu1 %v1234_v31, %s3037_s11 }
0x2272   :  { %1296 = vrot.lane.b32.xlu1 %v1248_v32, %s3037_s11 }
0x22dc   :  { %v1242_v33 = vpop.permute.xlu1 %1241 }
0x22dd   :  { %1244 = vst.msk [vmem:[#allocation2] sm:$0xff] %vm25_vm0, %v1242_v33 }
0x22de   :  { %2700 = vst.msk [vmem:[%s3794_s4 + $0x70] sm:$0xff] %vm25_vm0, %v1242_v33 }
0x22e4   :  { %v1247_v34 = vld [vmem:[#allocation2] sm:$0xff]  ;;  %v1297_v56 = vpop.permute.xlu1 %1296 }
0x22e5   :  { %2702 = vmatmul.msk.f32.vlgmr.msrb.gmra.mxu3 %vm25_vm0, %v1247_v34 }
0x22e6   :  { %1914 = vmatpush.msrb.mxu3 %v3319_v35 }
0x22e8   :  { %1915 = vmatpush.msrb.mxu3 %v3325_v36 }
0x22ea   :  { %1916 = vmatpush.msrb.mxu3 %v3331_v37 }
0x22ec   :  { %1917 = vmatpush.msrb.mxu3 %v3357_v7 }
0x2368   :  { %v1271_v39 = vpop.f32.mrf.mxu3 }
0x2369   :  { %v1274_v40 = vadd.f32 %v2701_v38, %v1271_v39  ;;  %v2709_v38 = vld [vmem:[%s3793_s0 + $0x88] sm:$0xff] }
0x236b   :  { %2892 = vtanh.f32 %v1274_v40  ;;  %v2703_v42 = vmul.f32 -1.442695, %v1274_v40 }
0x236d   :  { %2894 = vpow2.f32 %v2703_v42 }
0x2371   :  { %v2893_v41 = vpop.eup %2892 }
0x2372   :  { %1301 = vrot.lane.b32.xlu0 %v2893_v41, %s3036_s10 }
0x2373   :  { %v2895_v43 = vpop.eup %2894 }
0x2374   :  { %v1278_v44 = vadd.f32 1.0, %v2895_v43 }
0x2376   :  { %2896 = vrcp.f32 %v1278_v44  ;;  %v1290_v49 = vand.u32 2147483648, %v1278_v44  ;;  %vm1284_vm2 = vweird.f32 %v1278_v44  ;;  %v1288_v50 = vand.u32 2147483647, %v1278_v44 }
0x2378   :  { %v1291_v52 = vor.u32 1.1754944e-38, %v1290_v49  ;;  %vm1289_vm4 = vcmp.eq.f32.partialorder %v1288_v50, 8.507059e+37 }
0x237c   :  { %v2897_v45 = vpop.eup %2896 }
0x237d   :  { %v1280_v46 = vmul.f32 %v2897_v45, %v1278_v44  ;;  %vm1285_vm1 = vweird.f32 %v2897_v45 }
0x237e   :  { %vm1286_vm3 = vmor %vm1284_vm2, %vm1285_vm1 }
0x237f   :  { %v1281_v47 = vsub.f32 1.0, %v1280_v46 }
0x2381   :  { %v1282_v48 = vmul.f32 %v2897_v45, %v1281_v47 }
0x2383   :  { %v1283_v4 = vadd.f32 %v2897_v45, %v1282_v48 }
0x2385   :  { %v1287_v51 = vsel %vm1286_vm3, %v2897_v45, %v1283_v4 }
0x2386   :  { %v1292_v54 = vsel %vm1289_vm4, %v1291_v52, %v1287_v51 }
0x2387   :  { %v1299_v57 = vmul.f32 %v1297_v56, %v1292_v54 }
0x23e4   :  { %v1302_v53 = vpop.permute.xlu0 %1301 }
0x23e5   :  { %v1304_v55 = vmul.f32 %v1302_v53, %v1292_v54 }
0x23e7   :  { %1306 = vrot.lane.b32.xlu2 %v1304_v55, %s3037_s11 }
0x2441   :  { %v1307_v58 = vpop.permute.xlu2 %1306 }
0x2442   :  { %v1309_v59 = vadd.f32 %v1307_v58, %v1299_v57 }
0x2444   :  { %2898 = vtanh.f32 %v1309_v59  ;;  %1317 = vrot.lane.b32.xlu2 %v1309_v59, %s3038_s2 }
0x244a   :  { %v2899_v60 = vpop.eup %2898 }
0x244b   :  { %1312 = vrot.lane.b32.xlu0 %v2899_v60, %s3036_s10 }
0x249e   :  { %v1318_v61 = vpop.permute.xlu2 %1317 }
0x249f   :  { %1320 = vst.msk [vmem:[#allocation3] sm:$0xff] %vm25_vm0, %v1318_v61 }
0x24a6   :  { %v1329_v2 = vld [vmem:[#allocation3] sm:$0xff] }
0x24bd   :  { %v1313_v62 = vpop.permute.xlu0 %1312 }
0x24be   :  { %v1315_v63 = vmul.f32 %v1313_v62, %v1292_v54 }
0x24c0   :  { %1322 = vrot.lane.b32.xlu1 %v1315_v63, %s3037_s11 }
0x24c8   :  { %1377 = vrot.lane.b32.xlu1 %v1329_v2, %s3037_s11 }
0x2532   :  { %v1323_v5 = vpop.permute.xlu1 %1322 }
0x2533   :  { %1325 = vst.msk [vmem:[#allocation2] sm:$0xff] %vm25_vm0, %v1323_v5 }
0x2534   :  { %2704 = vst.msk [vmem:[%s3794_s4 + $0x78] sm:$0xff] %vm25_vm0, %v1323_v5 }
0x253a   :  { %v1328_v6 = vld [vmem:[#allocation2] sm:$0xff]  ;;  %v1378_v24 = vpop.permute.xlu1 %1377 }
0x253b   :  { %2706 = vmatmul.msk.f32.vlgmr.msra.gmra.mxu0 %vm25_vm0, %v1328_v6 }
0x253c   :  { %1995 = vmatpush.msra.mxu0 %v3319_v35 }
0x253e   :  { %1996 = vmatpush.msra.mxu0 %v3325_v36 }
0x2540   :  { %1997 = vmatpush.msra.mxu0 %v3331_v37 }
0x2542   :  { %1998 = vmatpush.msra.mxu0 %v3357_v7 }
0x25b8   :  { %v1352_v9 = vpop.f32.mrf.mxu0 }
0x25b9   :  { %v1355_v10 = vadd.f32 %v2705_v8, %v1352_v9  ;;  %v2713_v8 = vld [vmem:[%s3793_s0 + $0x90] sm:$0xff] }
0x25bb   :  { %2900 = vtanh.f32 %v1355_v10  ;;  %v2707_v12 = vmul.f32 -1.442695, %v1355_v10 }
0x25bd   :  { %2902 = vpow2.f32 %v2707_v12 }
0x25c1   :  { %v2901_v11 = vpop.eup %2900 }
0x25c2   :  { %1382 = vrot.lane.b32.xlu0 %v2901_v11, %s3036_s10 }
0x25c3   :  { %v2903_v13 = vpop.eup %2902 }
0x25c4   :  { %v1359_v0 = vadd.f32 1.0, %v2903_v13 }
0x25c6   :  { %2904 = vrcp.f32 %v1359_v0  ;;  %v1371_v17 = vand.u32 2147483648, %v1359_v0  ;;  %vm1365_vm6 = vweird.f32 %v1359_v0  ;;  %v1369_v18 = vand.u32 2147483647, %v1359_v0 }
0x25c8   :  { %v1372_v20 = vor.u32 1.1754944e-38, %v1371_v17  ;;  %vm1370_vm8 = vcmp.eq.f32.partialorder %v1369_v18, 8.507059e+37 }
0x25cc   :  { %v2905_v1 = vpop.eup %2904 }
0x25cd   :  { %v1361_v14 = vmul.f32 %v2905_v1, %v1359_v0  ;;  %vm1366_vm5 = vweird.f32 %v2905_v1 }
0x25ce   :  { %vm1367_vm7 = vmor %vm1365_vm6, %vm1366_vm5 }
0x25cf   :  { %v1362_v3 = vsub.f32 1.0, %v1361_v14 }
0x25d1   :  { %v1363_v15 = vmul.f32 %v2905_v1, %v1362_v3 }
0x25d3   :  { %v1364_v16 = vadd.f32 %v2905_v1, %v1363_v15 }
0x25d5   :  { %v1368_v19 = vsel %vm1367_vm7, %v2905_v1, %v1364_v16 }
0x25d6   :  { %v1373_v22 = vsel %vm1370_vm8, %v1372_v20, %v1368_v19 }
0x25d7   :  { %v1380_v25 = vmul.f32 %v1378_v24, %v1373_v22 }
0x2634   :  { %v1383_v21 = vpop.permute.xlu0 %1382 }
0x2635   :  { %v1385_v23 = vmul.f32 %v1383_v21, %v1373_v22 }
0x2637   :  { %1387 = vrot.lane.b32.xlu2 %v1385_v23, %s3037_s11 }
0x2691   :  { %v1388_v26 = vpop.permute.xlu2 %1387 }
0x2692   :  { %v1390_v27 = vadd.f32 %v1388_v26, %v1380_v25 }
0x2694   :  { %2906 = vtanh.f32 %v1390_v27  ;;  %1398 = vrot.lane.b32.xlu2 %v1390_v27, %s3038_s2 }
0x269a   :  { %v2907_v28 = vpop.eup %2906 }
0x269b   :  { %1393 = vrot.lane.b32.xlu0 %v2907_v28, %s3036_s10 }
0x26ee   :  { %v1399_v29 = vpop.permute.xlu2 %1398 }
0x26ef   :  { %1401 = vst.msk [vmem:[#allocation3] sm:$0xff] %vm25_vm0, %v1399_v29 }
0x26f6   :  { %v1410_v32 = vld [vmem:[#allocation3] sm:$0xff] }
0x270d   :  { %v1394_v30 = vpop.permute.xlu0 %1393 }
0x270e   :  { %v1396_v31 = vmul.f32 %v1394_v30, %v1373_v22 }
0x2710   :  { %1403 = vrot.lane.b32.xlu1 %v1396_v31, %s3037_s11 }
0x2718   :  { %1458 = vrot.lane.b32.xlu1 %v1410_v32, %s3037_s11  ;;  %v3539_v32 = vld [vmem:[%s3790_s3 + $0x18] sm:$0xff] }
0x2782   :  { %v1404_v33 = vpop.permute.xlu1 %1403 }
0x2783   :  { %1406 = vst.msk [vmem:[#allocation2] sm:$0xff] %vm25_vm0, %v1404_v33 }
0x2784   :  { %2708 = vst.msk [vmem:[%s3794_s4 + $0x80] sm:$0xff] %vm25_vm0, %v1404_v33  ;;  %v3545_v33 = vld [vmem:[%s3790_s3 + $0x10] sm:$0xff] }
0x278a   :  { %v1409_v34 = vld [vmem:[#allocation2] sm:$0xff]  ;;  %v1459_v56 = vpop.permute.xlu1 %1458 }
0x278b   :  { %2710 = vmatmul.msk.f32.vlgmr.msra.gmra.mxu1 %vm25_vm0, %v1409_v34  ;;  %v3551_v34 = vld [vmem:[%s3790_s3 + $0x8] sm:$0xff] }
0x278c   :  { %2076 = vmatpush.msra.mxu1 %v3319_v35 }
0x278e   :  { %2077 = vmatpush.msra.mxu1 %v3325_v36 }
0x2790   :  { %2078 = vmatpush.msra.mxu1 %v3331_v37 }
0x2792   :  { %2079 = vmatpush.msra.mxu1 %v3357_v7 }
0x2808   :  { %v1433_v39 = vpop.f32.mrf.mxu1 }
0x2809   :  { %v1436_v40 = vadd.f32 %v2709_v38, %v1433_v39  ;;  %v2717_v38 = vld [vmem:[%s3793_s0 + $0x98] sm:$0xff] }
0x280b   :  { %2908 = vtanh.f32 %v1436_v40  ;;  %v2711_v42 = vmul.f32 -1.442695, %v1436_v40 }
0x280d   :  { %2910 = vpow2.f32 %v2711_v42 }
0x2811   :  { %v2909_v41 = vpop.eup %2908 }
0x2812   :  { %1463 = vrot.lane.b32.xlu0 %v2909_v41, %s3036_s10 }
0x2813   :  { %v2911_v43 = vpop.eup %2910 }
0x2814   :  { %v1440_v44 = vadd.f32 1.0, %v2911_v43 }
0x2816   :  { %2912 = vrcp.f32 %v1440_v44  ;;  %v1452_v49 = vand.u32 2147483648, %v1440_v44  ;;  %vm1446_vm10 = vweird.f32 %v1440_v44  ;;  %v1450_v50 = vand.u32 2147483647, %v1440_v44 }
0x2818   :  { %v1453_v52 = vor.u32 1.1754944e-38, %v1452_v49  ;;  %vm1451_vm12 = vcmp.eq.f32.partialorder %v1450_v50, 8.507059e+37 }
0x281c   :  { %v2913_v45 = vpop.eup %2912 }
0x281d   :  { %v1442_v46 = vmul.f32 %v2913_v45, %v1440_v44  ;;  %vm1447_vm9 = vweird.f32 %v2913_v45 }
0x281e   :  { %vm1448_vm11 = vmor %vm1446_vm10, %vm1447_vm9 }
0x281f   :  { %v1443_v47 = vsub.f32 1.0, %v1442_v46 }
0x2821   :  { %v1444_v48 = vmul.f32 %v2913_v45, %v1443_v47 }
0x2823   :  { %v1445_v4 = vadd.f32 %v2913_v45, %v1444_v48 }
0x2825   :  { %v1449_v51 = vsel %vm1448_vm11, %v2913_v45, %v1445_v4 }
0x2826   :  { %v1454_v54 = vsel %vm1451_vm12, %v1453_v52, %v1449_v51 }
0x2827   :  { %v1461_v57 = vmul.f32 %v1459_v56, %v1454_v54 }
0x2884   :  { %v1464_v53 = vpop.permute.xlu0 %1463 }
0x2885   :  { %v1466_v55 = vmul.f32 %v1464_v53, %v1454_v54 }
0x2887   :  { %1468 = vrot.lane.b32.xlu2 %v1466_v55, %s3037_s11 }
0x28e1   :  { %v1469_v58 = vpop.permute.xlu2 %1468 }
0x28e2   :  { %v1471_v59 = vadd.f32 %v1469_v58, %v1461_v57 }
0x28e4   :  { %2914 = vtanh.f32 %v1471_v59  ;;  %1479 = vrot.lane.b32.xlu2 %v1471_v59, %s3038_s2 }
0x28ea   :  { %v2915_v60 = vpop.eup %2914 }
0x28eb   :  { %1474 = vrot.lane.b32.xlu0 %v2915_v60, %s3036_s10 }
0x293e   :  { %v1480_v61 = vpop.permute.xlu2 %1479 }
0x293f   :  { %1482 = vst.msk [vmem:[#allocation3] sm:$0xff] %vm25_vm0, %v1480_v61 }
0x2946   :  { %v1491_v2 = vld [vmem:[#allocation3] sm:$0xff] }
0x295d   :  { %v1475_v62 = vpop.permute.xlu0 %1474 }
0x295e   :  { %v1477_v63 = vmul.f32 %v1475_v62, %v1454_v54 }
0x2960   :  { %1484 = vrot.lane.b32.xlu1 %v1477_v63, %s3037_s11 }
0x2968   :  { %1539 = vrot.lane.b32.xlu1 %v1491_v2, %s3037_s11 }
0x29d2   :  { %v1485_v5 = vpop.permute.xlu1 %1484 }
0x29d3   :  { %1487 = vst.msk [vmem:[#allocation2] sm:$0xff] %vm25_vm0, %v1485_v5 }
0x29d4   :  { %2712 = vst.msk [vmem:[%s3794_s4 + $0x88] sm:$0xff] %vm25_vm0, %v1485_v5 }
0x29da   :  { %v1490_v6 = vld [vmem:[#allocation2] sm:$0xff]  ;;  %v1540_v21 = vpop.permute.xlu1 %1539 }
0x29db   :  { %2714 = vmatmul.msk.f32.vlgmr.msra.gmra.mxu2 %vm25_vm0, %v1490_v6  ;;  %v3577_v6 = vld [vmem:[%s3790_s3] sm:$0xff] }
0x29dc   :  { %2157 = vmatpush.msra.mxu2 %v3319_v35 }
0x29de   :  { %2158 = vmatpush.msra.mxu2 %v3325_v36 }
0x29e0   :  { %2159 = vmatpush.msra.mxu2 %v3331_v37 }
0x29e2   :  { %2160 = vmatpush.msra.mxu2 %v3357_v7 }
0x2a5e   :  { %v1514_v9 = vpop.f32.mrf.mxu2 }
0x2a5f   :  { %v1517_v10 = vadd.f32 %v2713_v8, %v1514_v9  ;;  %v2721_v8 = vld [vmem:[%s3793_s0 + $0xa0] sm:$0xff] }
0x2a61   :  { %2916 = vtanh.f32 %v1517_v10  ;;  %v2715_v12 = vmul.f32 -1.442695, %v1517_v10 }
0x2a63   :  { %2918 = vpow2.f32 %v2715_v12 }
0x2a67   :  { %v2917_v11 = vpop.eup %2916 }
0x2a68   :  { %1544 = vrot.lane.b32.xlu0 %v2917_v11, %s3036_s10 }
0x2a69   :  { %v2919_v13 = vpop.eup %2918 }
0x2a6a   :  { %v1521_v35 = vadd.f32 1.0, %v2919_v13 }
0x2a6c   :  { %2920 = vrcp.f32 %v1521_v35  ;;  %v1533_v3 = vand.u32 2147483648, %v1521_v35  ;;  %vm1527_vm14 = vweird.f32 %v1521_v35  ;;  %v1531_v15 = vand.u32 2147483647, %v1521_v35 }
0x2a6e   :  { %v1534_v17 = vor.u32 1.1754944e-38, %v1533_v3  ;;  %vm1532_vm1 = vcmp.eq.f32.partialorder %v1531_v15, 8.507059e+37 }
0x2a72   :  { %v2921_v36 = vpop.eup %2920 }
0x2a73   :  { %v1523_v0 = vmul.f32 %v2921_v36, %v1521_v35  ;;  %vm1528_vm13 = vweird.f32 %v2921_v36 }
0x2a74   :  { %vm1529_vm15 = vmor %vm1527_vm14, %vm1528_vm13 }
0x2a75   :  { %v1524_v37 = vsub.f32 1.0, %v1523_v0 }
0x2a77   :  { %v1525_v1 = vmul.f32 %v2921_v36, %v1524_v37 }
0x2a79   :  { %v1526_v14 = vadd.f32 %v2921_v36, %v1525_v1 }
0x2a7b   :  { %v1530_v16 = vsel %vm1529_vm15, %v2921_v36, %v1526_v14 }
0x2a7c   :  { %v1535_v19 = vsel %vm1532_vm1, %v1534_v17, %v1530_v16 }
0x2a7d   :  { %v1542_v22 = vmul.f32 %v1540_v21, %v1535_v19 }
0x2ada   :  { %v1545_v18 = vpop.permute.xlu0 %1544 }
0x2adb   :  { %v1547_v20 = vmul.f32 %v1545_v18, %v1535_v19 }
0x2add   :  { %1549 = vrot.lane.b32.xlu2 %v1547_v20, %s3037_s11 }
0x2b37   :  { %v1550_v23 = vpop.permute.xlu2 %1549 }
0x2b38   :  { %v1552_v24 = vadd.f32 %v1550_v23, %v1542_v22 }
0x2b3a   :  { %2922 = vtanh.f32 %v1552_v24  ;;  %1560 = vrot.lane.b32.xlu2 %v1552_v24, %s3038_s2 }
0x2b40   :  { %v2923_v25 = vpop.eup %2922 }
0x2b41   :  { %1555 = vrot.lane.b32.xlu0 %v2923_v25, %s3036_s10 }
0x2b94   :  { %v1561_v26 = vpop.permute.xlu2 %1560 }
0x2b95   :  { %1563 = vst.msk [vmem:[#allocation3] sm:$0xff] %vm25_vm0, %v1561_v26 }
0x2b9c   :  { %v1572_v29 = vld [vmem:[#allocation3] sm:$0xff] }
0x2bb3   :  { %v1556_v27 = vpop.permute.xlu0 %1555 }
0x2bb4   :  { %v1558_v28 = vmul.f32 %v1556_v27, %v1535_v19 }
0x2bb6   :  { %1565 = vrot.lane.b32.xlu1 %v1558_v28, %s3037_s11 }
0x2bbe   :  { %1620 = vrot.lane.b32.xlu1 %v1572_v29, %s3037_s11 }
0x2c28   :  { %v1566_v30 = vpop.permute.xlu1 %1565 }
0x2c29   :  { %1568 = vst.msk [vmem:[#allocation2] sm:$0xff] %vm25_vm0, %v1566_v30 }
0x2c2a   :  { %2716 = vst.msk [vmem:[%s3794_s4 + $0x90] sm:$0xff] %vm25_vm0, %v1566_v30 }
0x2c30   :  { %v1571_v31 = vld [vmem:[#allocation2] sm:$0xff]  ;;  %v1621_v55 = vpop.permute.xlu1 %1620 }
0x2c31   :  { %2718 = vmatmul.msk.f32.vlgmr.msra.gmra.mxu3 %vm25_vm0, %v1571_v31 }
0x2c32   :  { %2238 = vmatpush.msra.mxu3 %v3539_v32 }
0x2c34   :  { %2239 = vmatpush.msra.mxu3 %v3545_v33 }
0x2c36   :  { %2240 = vmatpush.msra.mxu3 %v3551_v34 }
0x2c38   :  { %2241 = vmatpush.msra.mxu3 %v3357_v7 }
0x2cb4   :  { %v1595_v39 = vpop.f32.mrf.mxu3 }
0x2cb5   :  { %v1598_v40 = vadd.f32 %v2717_v38, %v1595_v39  ;;  %v2725_v38 = vld [vmem:[%s3793_s0 + $0xa8] sm:$0xff] }
0x2cb7   :  { %2924 = vtanh.f32 %v1598_v40  ;;  %v2719_v42 = vmul.f32 -1.442695, %v1598_v40 }
0x2cb9   :  { %2926 = vpow2.f32 %v2719_v42 }
0x2cbd   :  { %v2925_v41 = vpop.eup %2924 }
0x2cbe   :  { %1625 = vrot.lane.b32.xlu0 %v2925_v41, %s3036_s10 }
0x2cbf   :  { %v2927_v43 = vpop.eup %2926 }
0x2cc0   :  { %v1602_v44 = vadd.f32 1.0, %v2927_v43 }
0x2cc2   :  { %2928 = vrcp.f32 %v1602_v44  ;;  %v1614_v4 = vand.u32 2147483648, %v1602_v44  ;;  %vm1608_vm3 = vweird.f32 %v1602_v44  ;;  %v1612_v49 = vand.u32 2147483647, %v1602_v44 }
0x2cc4   :  { %v1615_v51 = vor.u32 1.1754944e-38, %v1614_v4  ;;  %vm1613_vm5 = vcmp.eq.f32.partialorder %v1612_v49, 8.507059e+37 }
0x2cc8   :  { %v2929_v45 = vpop.eup %2928 }
0x2cc9   :  { %v1604_v46 = vmul.f32 %v2929_v45, %v1602_v44  ;;  %vm1609_vm2 = vweird.f32 %v2929_v45 }
0x2cca   :  { %vm1610_vm4 = vmor %vm1608_vm3, %vm1609_vm2 }
0x2ccb   :  { %v1605_v47 = vsub.f32 1.0, %v1604_v46 }
0x2ccd   :  { %v1606_v48 = vmul.f32 %v2929_v45, %v1605_v47 }
0x2ccf   :  { %v1607_v7 = vadd.f32 %v2929_v45, %v1606_v48 }
0x2cd1   :  { %v1611_v50 = vsel %vm1610_vm4, %v2929_v45, %v1607_v7 }
0x2cd2   :  { %v1616_v53 = vsel %vm1613_vm5, %v1615_v51, %v1611_v50 }
0x2cd3   :  { %v1623_v56 = vmul.f32 %v1621_v55, %v1616_v53 }
0x2d30   :  { %v1626_v52 = vpop.permute.xlu0 %1625 }
0x2d31   :  { %v1628_v54 = vmul.f32 %v1626_v52, %v1616_v53 }
0x2d33   :  { %1630 = vrot.lane.b32.xlu2 %v1628_v54, %s3037_s11 }
0x2d8d   :  { %v1631_v57 = vpop.permute.xlu2 %1630 }
0x2d8e   :  { %v1633_v58 = vadd.f32 %v1631_v57, %v1623_v56 }
0x2d90   :  { %2930 = vtanh.f32 %v1633_v58  ;;  %1641 = vrot.lane.b32.xlu2 %v1633_v58, %s3038_s2 }
0x2d96   :  { %v2931_v59 = vpop.eup %2930 }
0x2d97   :  { %1636 = vrot.lane.b32.xlu0 %v2931_v59, %s3036_s10 }
0x2dea   :  { %v1642_v60 = vpop.permute.xlu2 %1641 }
0x2deb   :  { %1644 = vst.msk [vmem:[#allocation3] sm:$0xff] %vm25_vm0, %v1642_v60 }
0x2df2   :  { %v1653_v63 = vld [vmem:[#allocation3] sm:$0xff] }
0x2e09   :  { %v1637_v61 = vpop.permute.xlu0 %1636 }
0x2e0a   :  { %v1639_v62 = vmul.f32 %v1637_v61, %v1616_v53 }
0x2e0c   :  { %1646 = vrot.lane.b32.xlu1 %v1639_v62, %s3037_s11 }
0x2e14   :  { %1701 = vrot.lane.b32.xlu1 %v1653_v63, %s3037_s11 }
0x2e7e   :  { %v1647_v2 = vpop.permute.xlu1 %1646 }
0x2e7f   :  { %1649 = vst.msk [vmem:[#allocation2] sm:$0xff] %vm25_vm0, %v1647_v2 }
0x2e80   :  { %2720 = vst.msk [vmem:[%s3794_s4 + $0x98] sm:$0xff] %vm25_vm0, %v1647_v2 }
0x2e86   :  { %v1652_v5 = vld [vmem:[#allocation2] sm:$0xff]  ;;  %v1702_v21 = vpop.permute.xlu1 %1701 }
0x2e87   :  { %2722 = vmatmul.msk.f32.vlgmr.msrb.gmra.mxu0 %vm25_vm0, %v1652_v5 }
0x2e88   :  { %2319 = vmatpush.msrb.mxu0 %v3539_v32 }
0x2e8a   :  { %2320 = vmatpush.msrb.mxu0 %v3545_v33 }
0x2e8c   :  { %2321 = vmatpush.msrb.mxu0 %v3551_v34 }
0x2e8e   :  { %2322 = vmatpush.msrb.mxu0 %v3577_v6 }
0x2f04   :  { %v1676_v9 = vpop.f32.mrf.mxu0 }
0x2f05   :  { %v1679_v10 = vadd.f32 %v2721_v8, %v1676_v9  ;;  %v2729_v8 = vld [vmem:[%s3793_s0 + $0xb0] sm:$0xff] }
0x2f07   :  { %2932 = vtanh.f32 %v1679_v10  ;;  %v2723_v12 = vmul.f32 -1.442695, %v1679_v10 }
0x2f09   :  { %2934 = vpow2.f32 %v2723_v12 }
0x2f0d   :  { %v2933_v11 = vpop.eup %2932 }
0x2f0e   :  { %1706 = vrot.lane.b32.xlu0 %v2933_v11, %s3036_s10 }
0x2f0f   :  { %v2935_v13 = vpop.eup %2934 }
0x2f10   :  { %v1683_v35 = vadd.f32 1.0, %v2935_v13 }
0x2f12   :  { %2936 = vrcp.f32 %v1683_v35  ;;  %v1695_v3 = vand.u32 2147483648, %v1683_v35  ;;  %vm1689_vm7 = vweird.f32 %v1683_v35  ;;  %v1693_v15 = vand.u32 2147483647, %v1683_v35 }
0x2f14   :  { %v1696_v17 = vor.u32 1.1754944e-38, %v1695_v3  ;;  %vm1694_vm9 = vcmp.eq.f32.partialorder %v1693_v15, 8.507059e+37 }
0x2f18   :  { %v2937_v36 = vpop.eup %2936 }
0x2f19   :  { %v1685_v0 = vmul.f32 %v2937_v36, %v1683_v35  ;;  %vm1690_vm6 = vweird.f32 %v2937_v36 }
0x2f1a   :  { %vm1691_vm8 = vmor %vm1689_vm7, %vm1690_vm6 }
0x2f1b   :  { %v1686_v37 = vsub.f32 1.0, %v1685_v0 }
0x2f1d   :  { %v1687_v1 = vmul.f32 %v2937_v36, %v1686_v37 }
0x2f1f   :  { %v1688_v14 = vadd.f32 %v2937_v36, %v1687_v1 }
0x2f21   :  { %v1692_v16 = vsel %vm1691_vm8, %v2937_v36, %v1688_v14 }
0x2f22   :  { %v1697_v19 = vsel %vm1694_vm9, %v1696_v17, %v1692_v16 }
0x2f23   :  { %v1704_v22 = vmul.f32 %v1702_v21, %v1697_v19 }
0x2f80   :  { %v1707_v18 = vpop.permute.xlu0 %1706 }
0x2f81   :  { %v1709_v20 = vmul.f32 %v1707_v18, %v1697_v19 }
0x2f83   :  { %1711 = vrot.lane.b32.xlu2 %v1709_v20, %s3037_s11 }
0x2fdd   :  { %v1712_v23 = vpop.permute.xlu2 %1711 }
0x2fde   :  { %v1714_v24 = vadd.f32 %v1712_v23, %v1704_v22 }
0x2fe0   :  { %2938 = vtanh.f32 %v1714_v24  ;;  %1722 = vrot.lane.b32.xlu2 %v1714_v24, %s3038_s2 }
0x2fe6   :  { %v2939_v25 = vpop.eup %2938 }
0x2fe7   :  { %1717 = vrot.lane.b32.xlu0 %v2939_v25, %s3036_s10 }
0x303a   :  { %v1723_v26 = vpop.permute.xlu2 %1722 }
0x303b   :  { %1725 = vst.msk [vmem:[#allocation3] sm:$0xff] %vm25_vm0, %v1723_v26 }
0x3042   :  { %v1734_v29 = vld [vmem:[#allocation3] sm:$0xff] }
0x3059   :  { %v1718_v27 = vpop.permute.xlu0 %1717 }
0x305a   :  { %v1720_v28 = vmul.f32 %v1718_v27, %v1697_v19 }
0x305c   :  { %1727 = vrot.lane.b32.xlu1 %v1720_v28, %s3037_s11 }
0x3064   :  { %1782 = vrot.lane.b32.xlu1 %v1734_v29, %s3037_s11 }
0x30ce   :  { %v1728_v30 = vpop.permute.xlu1 %1727 }
0x30cf   :  { %1730 = vst.msk [vmem:[#allocation2] sm:$0xff] %vm25_vm0, %v1728_v30 }
0x30d0   :  { %2724 = vst.msk [vmem:[%s3794_s4 + $0xa0] sm:$0xff] %vm25_vm0, %v1728_v30 }
0x30d6   :  { %v1733_v31 = vld [vmem:[#allocation2] sm:$0xff]  ;;  %v1783_v55 = vpop.permute.xlu1 %1782 }
0x30d7   :  { %2726 = vmatmul.msk.f32.vlgmr.msrb.gmra.mxu1 %vm25_vm0, %v1733_v31 }
0x30d8   :  { %2400 = vmatpush.msrb.mxu1 %v3539_v32 }
0x30da   :  { %2401 = vmatpush.msrb.mxu1 %v3545_v33 }
0x30dc   :  { %2402 = vmatpush.msrb.mxu1 %v3551_v34 }
0x30de   :  { %2403 = vmatpush.msrb.mxu1 %v3577_v6 }
0x3154   :  { %v1757_v39 = vpop.f32.mrf.mxu1 }
0x3155   :  { %v1760_v40 = vadd.f32 %v2725_v38, %v1757_v39  ;;  %v2733_v38 = vld [vmem:[%s3793_s0 + $0xb8] sm:$0xff] }
0x3157   :  { %2940 = vtanh.f32 %v1760_v40  ;;  %v2727_v42 = vmul.f32 -1.442695, %v1760_v40 }
0x3159   :  { %2942 = vpow2.f32 %v2727_v42 }
0x315d   :  { %v2941_v41 = vpop.eup %2940 }
0x315e   :  { %1787 = vrot.lane.b32.xlu0 %v2941_v41, %s3036_s10 }
0x315f   :  { %v2943_v43 = vpop.eup %2942 }
0x3160   :  { %v1764_v44 = vadd.f32 1.0, %v2943_v43 }
0x3162   :  { %2944 = vrcp.f32 %v1764_v44  ;;  %v1776_v4 = vand.u32 2147483648, %v1764_v44  ;;  %vm1770_vm11 = vweird.f32 %v1764_v44  ;;  %v1774_v49 = vand.u32 2147483647, %v1764_v44 }
0x3164   :  { %v1777_v51 = vor.u32 1.1754944e-38, %v1776_v4  ;;  %vm1775_vm13 = vcmp.eq.f32.partialorder %v1774_v49, 8.507059e+37 }
0x3168   :  { %v2945_v45 = vpop.eup %2944 }
0x3169   :  { %v1766_v46 = vmul.f32 %v2945_v45, %v1764_v44  ;;  %vm1771_vm10 = vweird.f32 %v2945_v45 }
0x316a   :  { %vm1772_vm12 = vmor %vm1770_vm11, %vm1771_vm10 }
0x316b   :  { %v1767_v47 = vsub.f32 1.0, %v1766_v46 }
0x316d   :  { %v1768_v48 = vmul.f32 %v2945_v45, %v1767_v47 }
0x316f   :  { %v1769_v7 = vadd.f32 %v2945_v45, %v1768_v48 }
0x3171   :  { %v1773_v50 = vsel %vm1772_vm12, %v2945_v45, %v1769_v7 }
0x3172   :  { %v1778_v53 = vsel %vm1775_vm13, %v1777_v51, %v1773_v50 }
0x3173   :  { %v1785_v56 = vmul.f32 %v1783_v55, %v1778_v53 }
0x31d0   :  { %v1788_v52 = vpop.permute.xlu0 %1787 }
0x31d1   :  { %v1790_v54 = vmul.f32 %v1788_v52, %v1778_v53 }
0x31d3   :  { %1792 = vrot.lane.b32.xlu2 %v1790_v54, %s3037_s11 }
0x322d   :  { %v1793_v57 = vpop.permute.xlu2 %1792 }
0x322e   :  { %v1795_v58 = vadd.f32 %v1793_v57, %v1785_v56 }
0x3230   :  { %2946 = vtanh.f32 %v1795_v58  ;;  %1803 = vrot.lane.b32.xlu2 %v1795_v58, %s3038_s2 }
0x3236   :  { %v2947_v59 = vpop.eup %2946 }
0x3237   :  { %1798 = vrot.lane.b32.xlu0 %v2947_v59, %s3036_s10 }
0x328a   :  { %v1804_v60 = vpop.permute.xlu2 %1803 }
0x328b   :  { %1806 = vst.msk [vmem:[#allocation3] sm:$0xff] %vm25_vm0, %v1804_v60 }
0x3292   :  { %v1815_v63 = vld [vmem:[#allocation3] sm:$0xff] }
0x32a9   :  { %v1799_v61 = vpop.permute.xlu0 %1798 }
0x32aa   :  { %v1801_v62 = vmul.f32 %v1799_v61, %v1778_v53 }
0x32ac   :  { %1808 = vrot.lane.b32.xlu1 %v1801_v62, %s3037_s11  ;;  %v2737_v62 = vld [vmem:[%s3793_s0 + $0xc0] sm:$0xff] }
0x32b4   :  { %1863 = vrot.lane.b32.xlu1 %v1815_v63, %s3037_s11 }
0x331e   :  { %v1809_v2 = vpop.permute.xlu1 %1808 }
0x331f   :  { %1811 = vst.msk [vmem:[#allocation2] sm:$0xff] %vm25_vm0, %v1809_v2 }
0x3320   :  { %2728 = vst.msk [vmem:[%s3794_s4 + $0xa8] sm:$0xff] %vm25_vm0, %v1809_v2 }
0x3326   :  { %v1814_v5 = vld [vmem:[#allocation2] sm:$0xff]  ;;  %v1864_v21 = vpop.permute.xlu1 %1863 }
0x3327   :  { %2730 = vmatmul.msk.f32.vlgmr.msrb.gmra.mxu2 %vm25_vm0, %v1814_v5 }
0x3328   :  { %2481 = vmatpush.msrb.mxu2 %v3539_v32 }
0x332a   :  { %2482 = vmatpush.msrb.mxu2 %v3545_v33 }
0x332c   :  { %2483 = vmatpush.msrb.mxu2 %v3551_v34 }
0x332e   :  { %2484 = vmatpush.msrb.mxu2 %v3577_v6 }
0x33aa   :  { %v1838_v9 = vpop.f32.mrf.mxu2 }
0x33ab   :  { %v1841_v10 = vadd.f32 %v2729_v8, %v1838_v9 }
0x33ad   :  { %2948 = vtanh.f32 %v1841_v10  ;;  %v2731_v12 = vmul.f32 -1.442695, %v1841_v10 }
0x33af   :  { %2950 = vpow2.f32 %v2731_v12 }
0x33b3   :  { %v2949_v11 = vpop.eup %2948 }
0x33b4   :  { %1868 = vrot.lane.b32.xlu0 %v2949_v11, %s3036_s10 }
0x33b5   :  { %v2951_v13 = vpop.eup %2950 }
0x33b6   :  { %v1845_v35 = vadd.f32 1.0, %v2951_v13 }
0x33b8   :  { %2952 = vrcp.f32 %v1845_v35  ;;  %v1857_v3 = vand.u32 2147483648, %v1845_v35  ;;  %vm1851_vm15 = vweird.f32 %v1845_v35  ;;  %v1855_v15 = vand.u32 2147483647, %v1845_v35 }
0x33ba   :  { %v1858_v17 = vor.u32 1.1754944e-38, %v1857_v3  ;;  %vm1856_vm2 = vcmp.eq.f32.partialorder %v1855_v15, 8.507059e+37 }
0x33be   :  { %v2953_v36 = vpop.eup %2952 }
0x33bf   :  { %v1847_v0 = vmul.f32 %v2953_v36, %v1845_v35  ;;  %vm1852_vm14 = vweird.f32 %v2953_v36 }
0x33c0   :  { %vm1853_vm1 = vmor %vm1851_vm15, %vm1852_vm14 }
0x33c1   :  { %v1848_v37 = vsub.f32 1.0, %v1847_v0 }
0x33c3   :  { %v1849_v1 = vmul.f32 %v2953_v36, %v1848_v37 }
0x33c5   :  { %v1850_v14 = vadd.f32 %v2953_v36, %v1849_v1 }
0x33c7   :  { %v1854_v16 = vsel %vm1853_vm1, %v2953_v36, %v1850_v14 }
0x33c8   :  { %v1859_v19 = vsel %vm1856_vm2, %v1858_v17, %v1854_v16 }
0x33c9   :  { %v1866_v22 = vmul.f32 %v1864_v21, %v1859_v19 }
0x3426   :  { %v1869_v18 = vpop.permute.xlu0 %1868 }
0x3427   :  { %v1871_v20 = vmul.f32 %v1869_v18, %v1859_v19 }
0x3429   :  { %1873 = vrot.lane.b32.xlu2 %v1871_v20, %s3037_s11 }
0x3483   :  { %v1874_v23 = vpop.permute.xlu2 %1873 }
0x3484   :  { %v1876_v24 = vadd.f32 %v1874_v23, %v1866_v22 }
0x3486   :  { %2954 = vtanh.f32 %v1876_v24  ;;  %1884 = vrot.lane.b32.xlu2 %v1876_v24, %s3038_s2 }
0x348c   :  { %v2955_v25 = vpop.eup %2954 }
0x348d   :  { %1879 = vrot.lane.b32.xlu0 %v2955_v25, %s3036_s10 }
0x34e0   :  { %v1885_v26 = vpop.permute.xlu2 %1884 }
0x34e1   :  { %1887 = vst.msk [vmem:[#allocation3] sm:$0xff] %vm25_vm0, %v1885_v26 }
0x34e8   :  { %v1896_v29 = vld [vmem:[#allocation3] sm:$0xff] }
0x34ff   :  { %v1880_v27 = vpop.permute.xlu0 %1879 }
0x3500   :  { %v1882_v28 = vmul.f32 %v1880_v27, %v1859_v19 }
0x3502   :  { %1889 = vrot.lane.b32.xlu1 %v1882_v28, %s3037_s11  ;;  %v2741_v28 = vld [vmem:[%s3793_s0 + $0xc8] sm:$0xff] }
0x350a   :  { %1944 = vrot.lane.b32.xlu1 %v1896_v29, %s3037_s11 }
0x3574   :  { %v1890_v30 = vpop.permute.xlu1 %1889 }
0x3575   :  { %1892 = vst.msk [vmem:[#allocation2] sm:$0xff] %vm25_vm0, %v1890_v30 }
0x3576   :  { %2732 = vst.msk [vmem:[%s3794_s4 + $0xb0] sm:$0xff] %vm25_vm0, %v1890_v30 }
0x357c   :  { %v1895_v31 = vld [vmem:[#allocation2] sm:$0xff]  ;;  %v1945_v51 = vpop.permute.xlu1 %1944 }
0x357d   :  { %2734 = vmatmul.msk.f32.vlgmr.msrb.gmra.mxu3 %vm25_vm0, %v1895_v31 }
0x357e   :  { %2562 = vmatpush.msrb.mxu3 %v3539_v32 }
0x3580   :  { %2563 = vmatpush.msrb.mxu3 %v3545_v33 }
0x3582   :  { %2564 = vmatpush.msrb.mxu3 %v3551_v34 }
0x3584   :  { %2565 = vmatpush.msrb.mxu3 %v3577_v6 }
0x3600   :  { %v1919_v39 = vpop.f32.mrf.mxu3 }
0x3601   :  { %v1922_v40 = vadd.f32 %v2733_v38, %v1919_v39 }
0x3603   :  { %2956 = vtanh.f32 %v1922_v40  ;;  %v2735_v42 = vmul.f32 -1.442695, %v1922_v40 }
0x3605   :  { %2958 = vpow2.f32 %v2735_v42 }
0x3609   :  { %v2957_v41 = vpop.eup %2956 }
0x360a   :  { %1949 = vrot.lane.b32.xlu0 %v2957_v41, %s3036_s10 }
0x360b   :  { %v2959_v43 = vpop.eup %2958 }
0x360c   :  { %v1926_v32 = vadd.f32 1.0, %v2959_v43 }
0x360e   :  { %2960 = vrcp.f32 %v1926_v32  ;;  %v1938_v46 = vand.u32 2147483648, %v1926_v32  ;;  %vm1932_vm4 = vweird.f32 %v1926_v32  ;;  %v1936_v47 = vand.u32 2147483647, %v1926_v32 }
0x3610   :  { %v1939_v7 = vor.u32 1.1754944e-38, %v1938_v46  ;;  %vm1937_vm6 = vcmp.eq.f32.partialorder %v1936_v47, 8.507059e+37 }
0x3614   :  { %v2961_v33 = vpop.eup %2960 }
0x3615   :  { %v1928_v44 = vmul.f32 %v2961_v33, %v1926_v32  ;;  %vm1933_vm3 = vweird.f32 %v2961_v33 }
0x3616   :  { %vm1934_vm5 = vmor %vm1932_vm4, %vm1933_vm3 }
0x3617   :  { %v1929_v34 = vsub.f32 1.0, %v1928_v44 }
0x3619   :  { %v1930_v45 = vmul.f32 %v2961_v33, %v1929_v34 }
0x361b   :  { %v1931_v6 = vadd.f32 %v2961_v33, %v1930_v45 }
0x361d   :  { %v1935_v48 = vsel %vm1934_vm5, %v2961_v33, %v1931_v6 }
0x361e   :  { %v1940_v49 = vsel %vm1937_vm6, %v1939_v7, %v1935_v48 }
0x361f   :  { %v1947_v52 = vmul.f32 %v1945_v51, %v1940_v49 }
0x367c   :  { %v1950_v4 = vpop.permute.xlu0 %1949 }
0x367d   :  { %v1952_v50 = vmul.f32 %v1950_v4, %v1940_v49 }
0x367f   :  { %1954 = vrot.lane.b32.xlu2 %v1952_v50, %s3037_s11 }
0x36d9   :  { %v1955_v53 = vpop.permute.xlu2 %1954 }
0x36da   :  { %v1957_v54 = vadd.f32 %v1955_v53, %v1947_v52 }
0x36dc   :  { %2962 = vtanh.f32 %v1957_v54  ;;  %1965 = vrot.lane.b32.xlu2 %v1957_v54, %s3038_s2 }
0x36e2   :  { %v2963_v55 = vpop.eup %2962 }
0x36e3   :  { %1960 = vrot.lane.b32.xlu0 %v2963_v55, %s3036_s10 }
0x3736   :  { %v1966_v56 = vpop.permute.xlu2 %1965 }
0x3737   :  { %1968 = vst.msk [vmem:[#allocation3] sm:$0xff] %vm25_vm0, %v1966_v56 }
0x373e   :  { %v1977_v59 = vld [vmem:[#allocation3] sm:$0xff] }
0x3755   :  { %v1961_v57 = vpop.permute.xlu0 %1960 }
0x3756   :  { %v1963_v58 = vmul.f32 %v1961_v57, %v1940_v49 }
0x3758   :  { %1970 = vrot.lane.b32.xlu1 %v1963_v58, %s3037_s11  ;;  %v2745_v58 = vld [vmem:[%s3793_s0 + $0xd0] sm:$0xff] }
0x3760   :  { %2025 = vrot.lane.b32.xlu1 %v1977_v59, %s3037_s11 }
0x37ca   :  { %v1971_v60 = vpop.permute.xlu1 %1970 }
0x37cb   :  { %1973 = vst.msk [vmem:[#allocation2] sm:$0xff] %vm25_vm0, %v1971_v60 }
0x37cc   :  { %2736 = vst.msk [vmem:[%s3794_s4 + $0xb8] sm:$0xff] %vm25_vm0, %v1971_v60 }
0x37d2   :  { %v1976_v61 = vld [vmem:[#allocation2] sm:$0xff]  ;;  %v2026_v17 = vpop.permute.xlu1 %2025 }
0x37d3   :  { %2738 = vmatmul.msk.f32.vlgmr.msra.gmra.mxu0 %vm25_vm0, %v1976_v61 }
0x3850   :  { %v2000_v63 = vpop.f32.mrf.mxu0 }
0x3851   :  { %v2003_v2 = vadd.f32 %v2737_v62, %v2000_v63 }
0x3853   :  { %2964 = vtanh.f32 %v2003_v2  ;;  %v2739_v8 = vmul.f32 -1.442695, %v2003_v2 }
0x3855   :  { %2966 = vpow2.f32 %v2739_v8 }
0x3859   :  { %v2965_v5 = vpop.eup %2964 }
0x385a   :  { %2030 = vrot.lane.b32.xlu0 %v2965_v5, %s3036_s10 }
0x385b   :  { %v2967_v9 = vpop.eup %2966 }
0x385c   :  { %v2007_v10 = vadd.f32 1.0, %v2967_v9 }
0x385e   :  { %2968 = vrcp.f32 %v2007_v10  ;;  %v2019_v0 = vand.u32 2147483648, %v2007_v10  ;;  %vm2013_vm8 = vweird.f32 %v2007_v10  ;;  %v2017_v37 = vand.u32 2147483647, %v2007_v10 }
0x3860   :  { %v2020_v14 = vor.u32 1.1754944e-38, %v2019_v0  ;;  %vm2018_vm10 = vcmp.eq.f32.partialorder %v2017_v37, 8.507059e+37 }
0x3864   :  { %v2969_v11 = vpop.eup %2968 }
0x3865   :  { %v2009_v12 = vmul.f32 %v2969_v11, %v2007_v10  ;;  %vm2014_vm7 = vweird.f32 %v2969_v11 }
0x3866   :  { %vm2015_vm9 = vmor %vm2013_vm8, %vm2014_vm7 }
0x3867   :  { %v2010_v13 = vsub.f32 1.0, %v2009_v12 }
0x3869   :  { %v2011_v35 = vmul.f32 %v2969_v11, %v2010_v13 }
0x386b   :  { %v2012_v36 = vadd.f32 %v2969_v11, %v2011_v35 }
0x386d   :  { %v2016_v1 = vsel %vm2015_vm9, %v2969_v11, %v2012_v36 }
0x386e   :  { %v2021_v15 = vsel %vm2018_vm10, %v2020_v14, %v2016_v1 }
0x386f   :  { %v2028_v18 = vmul.f32 %v2026_v17, %v2021_v15 }
0x38cc   :  { %v2031_v3 = vpop.permute.xlu0 %2030 }
0x38cd   :  { %v2033_v16 = vmul.f32 %v2031_v3, %v2021_v15 }
0x38cf   :  { %2035 = vrot.lane.b32.xlu2 %v2033_v16, %s3037_s11 }
0x3929   :  { %v2036_v19 = vpop.permute.xlu2 %2035 }
0x392a   :  { %v2038_v20 = vadd.f32 %v2036_v19, %v2028_v18 }
0x392c   :  { %2970 = vtanh.f32 %v2038_v20  ;;  %2046 = vrot.lane.b32.xlu2 %v2038_v20, %s3038_s2 }
0x3932   :  { %v2971_v21 = vpop.eup %2970 }
0x3933   :  { %2041 = vrot.lane.b32.xlu0 %v2971_v21, %s3036_s10 }
0x3986   :  { %v2047_v22 = vpop.permute.xlu2 %2046 }
0x3987   :  { %2049 = vst.msk [vmem:[#allocation3] sm:$0xff] %vm25_vm0, %v2047_v22 }
0x398e   :  { %v2058_v25 = vld [vmem:[#allocation3] sm:$0xff] }
0x39a5   :  { %v2042_v23 = vpop.permute.xlu0 %2041 }
0x39a6   :  { %v2044_v24 = vmul.f32 %v2042_v23, %v2021_v15 }
0x39a8   :  { %2051 = vrot.lane.b32.xlu1 %v2044_v24, %s3037_s11  ;;  %v2749_v24 = vld [vmem:[%s3793_s0 + $0xd8] sm:$0xff] }
0x39b0   :  { %2106 = vrot.lane.b32.xlu1 %v2058_v25, %s3037_s11 }
0x3a1a   :  { %v2052_v26 = vpop.permute.xlu1 %2051 }
0x3a1b   :  { %2054 = vst.msk [vmem:[#allocation2] sm:$0xff] %vm25_vm0, %v2052_v26 }
0x3a1c   :  { %2740 = vst.msk [vmem:[%s3794_s4 + $0xc0] sm:$0xff] %vm25_vm0, %v2052_v26 }
0x3a22   :  { %v2057_v27 = vld [vmem:[#allocation2] sm:$0xff]  ;;  %v2107_v7 = vpop.permute.xlu1 %2106 }
0x3a23   :  { %2742 = vmatmul.msk.f32.vlgmr.msra.gmra.mxu1 %vm25_vm0, %v2057_v27 }
0x3aa0   :  { %v2081_v29 = vpop.f32.mrf.mxu1 }
0x3aa1   :  { %v2084_v30 = vadd.f32 %v2741_v28, %v2081_v29 }
0x3aa3   :  { %2972 = vtanh.f32 %v2084_v30  ;;  %v2743_v38 = vmul.f32 -1.442695, %v2084_v30 }
0x3aa5   :  { %2974 = vpow2.f32 %v2743_v38 }
0x3aa9   :  { %v2973_v31 = vpop.eup %2972 }
0x3aaa   :  { %2111 = vrot.lane.b32.xlu0 %v2973_v31, %s3036_s10 }
0x3aab   :  { %v2975_v39 = vpop.eup %2974 }
0x3aac   :  { %v2088_v40 = vadd.f32 1.0, %v2975_v39 }
0x3aae   :  { %2976 = vrcp.f32 %v2088_v40  ;;  %v2100_v44 = vand.u32 2147483648, %v2088_v40  ;;  %vm2094_vm12 = vweird.f32 %v2088_v40  ;;  %v2098_v34 = vand.u32 2147483647, %v2088_v40 }
0x3ab0   :  { %v2101_v6 = vor.u32 1.1754944e-38, %v2100_v44  ;;  %vm2099_vm14 = vcmp.eq.f32.partialorder %v2098_v34, 8.507059e+37 }
0x3ab4   :  { %v2977_v41 = vpop.eup %2976 }
0x3ab5   :  { %v2090_v42 = vmul.f32 %v2977_v41, %v2088_v40  ;;  %vm2095_vm11 = vweird.f32 %v2977_v41 }
0x3ab6   :  { %vm2096_vm13 = vmor %vm2094_vm12, %vm2095_vm11 }
0x3ab7   :  { %v2091_v43 = vsub.f32 1.0, %v2090_v42 }
0x3ab9   :  { %v2092_v32 = vmul.f32 %v2977_v41, %v2091_v43 }
0x3abb   :  { %v2093_v33 = vadd.f32 %v2977_v41, %v2092_v32 }
0x3abd   :  { %v2097_v45 = vsel %vm2096_vm13, %v2977_v41, %v2093_v33 }
0x3abe   :  { %v2102_v47 = vsel %vm2099_vm14, %v2101_v6, %v2097_v45 }
0x3abf   :  { %v2109_v4 = vmul.f32 %v2107_v7, %v2102_v47 }
0x3b1c   :  { %v2112_v46 = vpop.permute.xlu0 %2111 }
0x3b1d   :  { %v2114_v48 = vmul.f32 %v2112_v46, %v2102_v47 }
0x3b1f   :  { %2116 = vrot.lane.b32.xlu2 %v2114_v48, %s3037_s11 }
0x3b79   :  { %v2117_v49 = vpop.permute.xlu2 %2116 }
0x3b7a   :  { %v2119_v50 = vadd.f32 %v2117_v49, %v2109_v4 }
0x3b7c   :  { %2978 = vtanh.f32 %v2119_v50  ;;  %2127 = vrot.lane.b32.xlu2 %v2119_v50, %s3038_s2 }
0x3b82   :  { %v2979_v51 = vpop.eup %2978 }
0x3b83   :  { %2122 = vrot.lane.b32.xlu0 %v2979_v51, %s3036_s10 }
0x3bd6   :  { %v2128_v52 = vpop.permute.xlu2 %2127 }
0x3bd7   :  { %2130 = vst.msk [vmem:[#allocation3] sm:$0xff] %vm25_vm0, %v2128_v52 }
0x3bde   :  { %v2139_v55 = vld [vmem:[#allocation3] sm:$0xff] }
0x3bf5   :  { %v2123_v53 = vpop.permute.xlu0 %2122 }
0x3bf6   :  { %v2125_v54 = vmul.f32 %v2123_v53, %v2102_v47 }
0x3bf8   :  { %2132 = vrot.lane.b32.xlu1 %v2125_v54, %s3037_s11  ;;  %v2753_v54 = vld [vmem:[%s3793_s0 + $0xe0] sm:$0xff] }
0x3c00   :  { %2187 = vrot.lane.b32.xlu1 %v2139_v55, %s3037_s11 }
0x3c6a   :  { %v2133_v56 = vpop.permute.xlu1 %2132 }
0x3c6b   :  { %2135 = vst.msk [vmem:[#allocation2] sm:$0xff] %vm25_vm0, %v2133_v56 }
0x3c6c   :  { %2744 = vst.msk [vmem:[%s3794_s4 + $0xc8] sm:$0xff] %vm25_vm0, %v2133_v56 }
0x3c72   :  { %v2138_v57 = vld [vmem:[#allocation2] sm:$0xff]  ;;  %v2188_v14 = vpop.permute.xlu1 %2187 }
0x3c73   :  { %2746 = vmatmul.msk.f32.vlgmr.msra.gmra.mxu2 %vm25_vm0, %v2138_v57 }
0x3cf6   :  { %v2162_v59 = vpop.f32.mrf.mxu2 }
0x3cf7   :  { %v2165_v60 = vadd.f32 %v2745_v58, %v2162_v59 }
0x3cf9   :  { %2980 = vtanh.f32 %v2165_v60  ;;  %v2747_v62 = vmul.f32 -1.442695, %v2165_v60 }
0x3cfb   :  { %2982 = vpow2.f32 %v2747_v62 }
0x3cff   :  { %v2981_v61 = vpop.eup %2980 }
0x3d00   :  { %2192 = vrot.lane.b32.xlu0 %v2981_v61, %s3036_s10 }
0x3d01   :  { %v2983_v63 = vpop.eup %2982 }
0x3d02   :  { %v2169_v2 = vadd.f32 1.0, %v2983_v63 }
0x3d04   :  { %2984 = vrcp.f32 %v2169_v2  ;;  %v2181_v12 = vand.u32 2147483648, %v2169_v2  ;;  %vm2175_vm1 = vweird.f32 %v2169_v2  ;;  %v2179_v13 = vand.u32 2147483647, %v2169_v2 }
0x3d06   :  { %v2182_v36 = vor.u32 1.1754944e-38, %v2181_v12  ;;  %vm2180_vm3 = vcmp.eq.f32.partialorder %v2179_v13, 8.507059e+37 }
0x3d0a   :  { %v2985_v5 = vpop.eup %2984 }
0x3d0b   :  { %v2171_v8 = vmul.f32 %v2985_v5, %v2169_v2  ;;  %vm2176_vm15 = vweird.f32 %v2985_v5 }
0x3d0c   :  { %vm2177_vm2 = vmor %vm2175_vm1, %vm2176_vm15 }
0x3d0d   :  { %v2172_v9 = vsub.f32 1.0, %v2171_v8 }
0x3d0f   :  { %v2173_v10 = vmul.f32 %v2985_v5, %v2172_v9 }
0x3d11   :  { %v2174_v11 = vadd.f32 %v2985_v5, %v2173_v10 }
0x3d13   :  { %v2178_v35 = vsel %vm2177_vm2, %v2985_v5, %v2174_v11 }
0x3d14   :  { %v2183_v37 = vsel %vm2180_vm3, %v2182_v36, %v2178_v35 }
0x3d15   :  { %v2190_v3 = vmul.f32 %v2188_v14, %v2183_v37 }
0x3d72   :  { %v2193_v0 = vpop.permute.xlu0 %2192 }
0x3d73   :  { %v2195_v1 = vmul.f32 %v2193_v0, %v2183_v37 }
0x3d75   :  { %2197 = vrot.lane.b32.xlu2 %v2195_v1, %s3037_s11 }
0x3dcf   :  { %v2198_v15 = vpop.permute.xlu2 %2197 }
0x3dd0   :  { %v2200_v16 = vadd.f32 %v2198_v15, %v2190_v3 }
0x3dd2   :  { %2986 = vtanh.f32 %v2200_v16  ;;  %2208 = vrot.lane.b32.xlu2 %v2200_v16, %s3038_s2 }
0x3dd8   :  { %v2987_v17 = vpop.eup %2986 }
0x3dd9   :  { %2203 = vrot.lane.b32.xlu0 %v2987_v17, %s3036_s10 }
0x3e2c   :  { %v2209_v18 = vpop.permute.xlu2 %2208 }
0x3e2d   :  { %2211 = vst.msk [vmem:[#allocation3] sm:$0xff] %vm25_vm0, %v2209_v18 }
0x3e34   :  { %v2220_v21 = vld [vmem:[#allocation3] sm:$0xff] }
0x3e4b   :  { %v2204_v19 = vpop.permute.xlu0 %2203 }
0x3e4c   :  { %v2206_v20 = vmul.f32 %v2204_v19, %v2183_v37 }
0x3e4e   :  { %2213 = vrot.lane.b32.xlu1 %v2206_v20, %s3037_s11  ;;  %v2757_v20 = vld [vmem:[%s3793_s0 + $0xe8] sm:$0xff] }
0x3e56   :  { %2268 = vrot.lane.b32.xlu1 %v2220_v21, %s3037_s11 }
0x3ec0   :  { %v2214_v22 = vpop.permute.xlu1 %2213 }
0x3ec1   :  { %2216 = vst.msk [vmem:[#allocation2] sm:$0xff] %vm25_vm0, %v2214_v22 }
0x3ec2   :  { %2748 = vst.msk [vmem:[%s3794_s4 + $0xd0] sm:$0xff] %vm25_vm0, %v2214_v22 }
0x3ec8   :  { %v2219_v23 = vld [vmem:[#allocation2] sm:$0xff]  ;;  %v2269_v6 = vpop.permute.xlu1 %2268 }
0x3ec9   :  { %2750 = vmatmul.msk.f32.vlgmr.msra.gmra.mxu3 %vm25_vm0, %v2219_v23 }
0x3f4c   :  { %v2243_v25 = vpop.f32.mrf.mxu3 }
0x3f4d   :  { %v2246_v26 = vadd.f32 %v2749_v24, %v2243_v25 }
0x3f4f   :  { %2988 = vtanh.f32 %v2246_v26  ;;  %v2751_v28 = vmul.f32 -1.442695, %v2246_v26 }
0x3f51   :  { %2990 = vpow2.f32 %v2751_v28 }
0x3f55   :  { %v2989_v27 = vpop.eup %2988 }
0x3f56   :  { %2273 = vrot.lane.b32.xlu0 %v2989_v27, %s3036_s10 }
0x3f57   :  { %v2991_v29 = vpop.eup %2990 }
0x3f58   :  { %v2250_v30 = vadd.f32 1.0, %v2991_v29 }
0x3f5a   :  { %2992 = vrcp.f32 %v2250_v30  ;;  %v2262_v42 = vand.u32 2147483648, %v2250_v30  ;;  %vm2256_vm5 = vweird.f32 %v2250_v30  ;;  %v2260_v43 = vand.u32 2147483647, %v2250_v30 }
0x3f5c   :  { %v2263_v33 = vor.u32 1.1754944e-38, %v2262_v42  ;;  %vm2261_vm7 = vcmp.eq.f32.partialorder %v2260_v43, 8.507059e+37 }
0x3f60   :  { %v2993_v31 = vpop.eup %2992 }
0x3f61   :  { %v2252_v38 = vmul.f32 %v2993_v31, %v2250_v30  ;;  %vm2257_vm4 = vweird.f32 %v2993_v31 }
0x3f62   :  { %vm2258_vm6 = vmor %vm2256_vm5, %vm2257_vm4 }
0x3f63   :  { %v2253_v39 = vsub.f32 1.0, %v2252_v38 }
0x3f65   :  { %v2254_v40 = vmul.f32 %v2993_v31, %v2253_v39 }
0x3f67   :  { %v2255_v41 = vadd.f32 %v2993_v31, %v2254_v40 }
0x3f69   :  { %v2259_v32 = vsel %vm2258_vm6, %v2993_v31, %v2255_v41 }
0x3f6a   :  { %v2264_v34 = vsel %vm2261_vm7, %v2263_v33, %v2259_v32 }
0x3f6b   :  { %v2271_v46 = vmul.f32 %v2269_v6, %v2264_v34 }
0x3fc8   :  { %v2274_v44 = vpop.permute.xlu0 %2273 }
0x3fc9   :  { %v2276_v45 = vmul.f32 %v2274_v44, %v2264_v34 }
0x3fcb   :  { %2278 = vrot.lane.b32.xlu2 %v2276_v45, %s3037_s11 }
0x4025   :  { %v2279_v47 = vpop.permute.xlu2 %2278 }
0x4026   :  { %v2281_v48 = vadd.f32 %v2279_v47, %v2271_v46 }
0x4028   :  { %2994 = vtanh.f32 %v2281_v48  ;;  %2289 = vrot.lane.b32.xlu2 %v2281_v48, %s3038_s2 }
0x402e   :  { %v2995_v7 = vpop.eup %2994 }
0x402f   :  { %2284 = vrot.lane.b32.xlu0 %v2995_v7, %s3036_s10 }
0x4082   :  { %v2290_v4 = vpop.permute.xlu2 %2289 }
0x4083   :  { %2292 = vst.msk [vmem:[#allocation3] sm:$0xff] %vm25_vm0, %v2290_v4 }
0x408a   :  { %v2301_v51 = vld [vmem:[#allocation3] sm:$0xff] }
0x40a1   :  { %v2285_v49 = vpop.permute.xlu0 %2284 }
0x40a2   :  { %v2287_v50 = vmul.f32 %v2285_v49, %v2264_v34 }
0x40a4   :  { %2294 = vrot.lane.b32.xlu1 %v2287_v50, %s3037_s11  ;;  %v2761_v50 = vld [vmem:[%s3793_s0 + $0xf0] sm:$0xff] }
0x40ac   :  { %2349 = vrot.lane.b32.xlu1 %v2301_v51, %s3037_s11 }
0x4116   :  { %v2295_v52 = vpop.permute.xlu1 %2294 }
0x4117   :  { %2297 = vst.msk [vmem:[#allocation2] sm:$0xff] %vm25_vm0, %v2295_v52 }
0x4118   :  { %2752 = vst.msk [vmem:[%s3794_s4 + $0xd8] sm:$0xff] %vm25_vm0, %v2295_v52 }
0x411e   :  { %v2300_v53 = vld [vmem:[#allocation2] sm:$0xff]  ;;  %v2350_v36 = vpop.permute.xlu1 %2349 }
0x411f   :  { %2754 = vmatmul.msk.f32.vlgmr.msrb.gmra.mxu0 %vm25_vm0, %v2300_v53 }
0x419c   :  { %v2324_v55 = vpop.f32.mrf.mxu0 }
0x419d   :  { %v2327_v56 = vadd.f32 %v2753_v54, %v2324_v55 }
0x419f   :  { %2996 = vtanh.f32 %v2327_v56  ;;  %v2755_v58 = vmul.f32 -1.442695, %v2327_v56 }
0x41a1   :  { %2998 = vpow2.f32 %v2755_v58 }
0x41a5   :  { %v2997_v57 = vpop.eup %2996 }
0x41a6   :  { %2354 = vrot.lane.b32.xlu0 %v2997_v57, %s3036_s10 }
0x41a7   :  { %v2999_v59 = vpop.eup %2998 }
0x41a8   :  { %v2331_v60 = vadd.f32 1.0, %v2999_v59 }
0x41aa   :  { %3000 = vrcp.f32 %v2331_v60  ;;  %v2343_v8 = vand.u32 2147483648, %v2331_v60  ;;  %vm2337_vm9 = vweird.f32 %v2331_v60  ;;  %v2341_v9 = vand.u32 2147483647, %v2331_v60 }
0x41ac   :  { %v2344_v11 = vor.u32 1.1754944e-38, %v2343_v8  ;;  %vm2342_vm11 = vcmp.eq.f32.partialorder %v2341_v9, 8.507059e+37 }
0x41b0   :  { %v3001_v61 = vpop.eup %3000 }
0x41b1   :  { %v2333_v62 = vmul.f32 %v3001_v61, %v2331_v60  ;;  %vm2338_vm8 = vweird.f32 %v3001_v61 }
0x41b2   :  { %vm2339_vm10 = vmor %vm2337_vm9, %vm2338_vm8 }
0x41b3   :  { %v2334_v63 = vsub.f32 1.0, %v2333_v62 }
0x41b5   :  { %v2335_v2 = vmul.f32 %v3001_v61, %v2334_v63 }
0x41b7   :  { %v2336_v5 = vadd.f32 %v3001_v61, %v2335_v2 }
0x41b9   :  { %v2340_v10 = vsel %vm2339_vm10, %v3001_v61, %v2336_v5 }
0x41ba   :  { %v2345_v13 = vsel %vm2342_vm11, %v2344_v11, %v2340_v10 }
0x41bb   :  { %v2352_v0 = vmul.f32 %v2350_v36, %v2345_v13 }
0x4218   :  { %v2355_v12 = vpop.permute.xlu0 %2354 }
0x4219   :  { %v2357_v35 = vmul.f32 %v2355_v12, %v2345_v13 }
0x421b   :  { %2359 = vrot.lane.b32.xlu2 %v2357_v35, %s3037_s11 }
0x4275   :  { %v2360_v37 = vpop.permute.xlu2 %2359 }
0x4276   :  { %v2362_v1 = vadd.f32 %v2360_v37, %v2352_v0 }
0x4278   :  { %3002 = vtanh.f32 %v2362_v1  ;;  %2370 = vrot.lane.b32.xlu2 %v2362_v1, %s3038_s2 }
0x427e   :  { %v3003_v14 = vpop.eup %3002 }
0x427f   :  { %2365 = vrot.lane.b32.xlu0 %v3003_v14, %s3036_s10 }
0x42d2   :  { %v2371_v3 = vpop.permute.xlu2 %2370 }
0x42d3   :  { %2373 = vst.msk [vmem:[#allocation3] sm:$0xff] %vm25_vm0, %v2371_v3 }
0x42da   :  { %v2382_v17 = vld [vmem:[#allocation3] sm:$0xff] }
0x42f1   :  { %v2366_v15 = vpop.permute.xlu0 %2365 }
0x42f2   :  { %v2368_v16 = vmul.f32 %v2366_v15, %v2345_v13 }
0x42f4   :  { %2375 = vrot.lane.b32.xlu1 %v2368_v16, %s3037_s11  ;;  %v2765_v16 = vld [vmem:[%s3793_s0 + $0xf8] sm:$0xff] }
0x42fc   :  { %2430 = vrot.lane.b32.xlu1 %v2382_v17, %s3037_s11 }
0x4366   :  { %v2376_v18 = vpop.permute.xlu1 %2375 }
0x4367   :  { %2378 = vst.msk [vmem:[#allocation2] sm:$0xff] %vm25_vm0, %v2376_v18 }
0x4368   :  { %2756 = vst.msk [vmem:[%s3794_s4 + $0xe0] sm:$0xff] %vm25_vm0, %v2376_v18 }
0x436e   :  { %v2381_v19 = vld [vmem:[#allocation2] sm:$0xff]  ;;  %v2431_v33 = vpop.permute.xlu1 %2430 }
0x436f   :  { %2758 = vmatmul.msk.f32.vlgmr.msrb.gmra.mxu1 %vm25_vm0, %v2381_v19 }
0x43ec   :  { %v2405_v21 = vpop.f32.mrf.mxu1 }
0x43ed   :  { %v2408_v22 = vadd.f32 %v2757_v20, %v2405_v21 }
0x43ef   :  { %3004 = vtanh.f32 %v2408_v22  ;;  %v2759_v24 = vmul.f32 -1.442695, %v2408_v22 }
0x43f1   :  { %3006 = vpow2.f32 %v2759_v24 }
0x43f5   :  { %v3005_v23 = vpop.eup %3004 }
0x43f6   :  { %2435 = vrot.lane.b32.xlu0 %v3005_v23, %s3036_s10 }
0x43f7   :  { %v3007_v25 = vpop.eup %3006 }
0x43f8   :  { %v2412_v26 = vadd.f32 1.0, %v3007_v25 }
0x43fa   :  { %3008 = vrcp.f32 %v2412_v26  ;;  %v2424_v38 = vand.u32 2147483648, %v2412_v26  ;;  %vm2418_vm13 = vweird.f32 %v2412_v26  ;;  %v2422_v39 = vand.u32 2147483647, %v2412_v26 }
0x43fc   :  { %v2425_v41 = vor.u32 1.1754944e-38, %v2424_v38  ;;  %vm2423_vm15 = vcmp.eq.f32.partialorder %v2422_v39, 8.507059e+37 }
0x4400   :  { %v3009_v27 = vpop.eup %3008 }
0x4401   :  { %v2414_v28 = vmul.f32 %v3009_v27, %v2412_v26  ;;  %vm2419_vm12 = vweird.f32 %v3009_v27 }
0x4402   :  { %vm2420_vm14 = vmor %vm2418_vm13, %vm2419_vm12 }
0x4403   :  { %v2415_v29 = vsub.f32 1.0, %v2414_v28 }
0x4405   :  { %v2416_v30 = vmul.f32 %v3009_v27, %v2415_v29 }
0x4407   :  { %v2417_v31 = vadd.f32 %v3009_v27, %v2416_v30 }
0x4409   :  { %v2421_v40 = vsel %vm2420_vm14, %v3009_v27, %v2417_v31 }
0x440a   :  { %v2426_v43 = vsel %vm2423_vm15, %v2425_v41, %v2421_v40 }
0x440b   :  { %v2433_v44 = vmul.f32 %v2431_v33, %v2426_v43 }
0x4468   :  { %v2436_v42 = vpop.permute.xlu0 %2435 }
0x4469   :  { %v2438_v32 = vmul.f32 %v2436_v42, %v2426_v43 }
0x446b   :  { %2440 = vrot.lane.b32.xlu2 %v2438_v32, %s3037_s11 }
0x44c5   :  { %v2441_v34 = vpop.permute.xlu2 %2440 }
0x44c6   :  { %v2443_v45 = vadd.f32 %v2441_v34, %v2433_v44 }
0x44c8   :  { %3010 = vtanh.f32 %v2443_v45  ;;  %2451 = vrot.lane.b32.xlu2 %v2443_v45, %s3038_s2 }
0x44ce   :  { %v3011_v6 = vpop.eup %3010 }
0x44cf   :  { %2446 = vrot.lane.b32.xlu0 %v3011_v6, %s3036_s10 }
0x4522   :  { %v2452_v46 = vpop.permute.xlu2 %2451 }
0x4523   :  { %2454 = vst.msk [vmem:[#allocation3] sm:$0xff] %vm25_vm0, %v2452_v46 }
0x452a   :  { %v2463_v7 = vld [vmem:[#allocation3] sm:$0xff] }
0x4541   :  { %v2447_v47 = vpop.permute.xlu0 %2446 }
0x4542   :  { %v2449_v48 = vmul.f32 %v2447_v47, %v2426_v43 }
0x4544   :  { %2456 = vrot.lane.b32.xlu1 %v2449_v48, %s3037_s11 }
0x454c   :  { %2511 = vrot.lane.b32.xlu1 %v2463_v7, %s3037_s11 }
0x45b6   :  { %v2457_v4 = vpop.permute.xlu1 %2456 }
0x45b7   :  { %2459 = vst.msk [vmem:[#allocation2] sm:$0xff] %vm25_vm0, %v2457_v4 }
0x45b8   :  { %2760 = vst.msk [vmem:[%s3794_s4 + $0xe8] sm:$0xff] %vm25_vm0, %v2457_v4 }
0x45be   :  { %v2462_v49 = vld [vmem:[#allocation2] sm:$0xff]  ;;  %v2512_v11 = vpop.permute.xlu1 %2511 }
0x45bf   :  { %2762 = vmatmul.msk.f32.vlgmr.msrb.gmra.mxu2 %vm25_vm0, %v2462_v49 }
0x4642   :  { %v2486_v51 = vpop.f32.mrf.mxu2 }
0x4643   :  { %v2489_v52 = vadd.f32 %v2761_v50, %v2486_v51 }
0x4645   :  { %3012 = vtanh.f32 %v2489_v52  ;;  %v2763_v54 = vmul.f32 -1.442695, %v2489_v52 }
0x4647   :  { %3014 = vpow2.f32 %v2763_v54 }
0x464b   :  { %v3013_v53 = vpop.eup %3012 }
0x464c   :  { %2516 = vrot.lane.b32.xlu0 %v3013_v53, %s3036_s10 }
0x464d   :  { %v3015_v55 = vpop.eup %3014 }
0x464e   :  { %v2493_v56 = vadd.f32 1.0, %v3015_v55 }
0x4650   :  { %3016 = vrcp.f32 %v2493_v56  ;;  %v2505_v62 = vand.u32 2147483648, %v2493_v56  ;;  %vm2499_vm2 = vweird.f32 %v2493_v56  ;;  %v2503_v63 = vand.u32 2147483647, %v2493_v56 }
0x4652   :  { %v2506_v5 = vor.u32 1.1754944e-38, %v2505_v62  ;;  %vm2504_vm4 = vcmp.eq.f32.partialorder %v2503_v63, 8.507059e+37 }
0x4656   :  { %v3017_v57 = vpop.eup %3016 }
0x4657   :  { %v2495_v58 = vmul.f32 %v3017_v57, %v2493_v56  ;;  %vm2500_vm1 = vweird.f32 %v3017_v57 }
0x4658   :  { %vm2501_vm3 = vmor %vm2499_vm2, %vm2500_vm1 }
0x4659   :  { %v2496_v59 = vsub.f32 1.0, %v2495_v58 }
0x465b   :  { %v2497_v60 = vmul.f32 %v3017_v57, %v2496_v59 }
0x465d   :  { %v2498_v61 = vadd.f32 %v3017_v57, %v2497_v60 }
0x465f   :  { %v2502_v2 = vsel %vm2501_vm3, %v3017_v57, %v2498_v61 }
0x4660   :  { %v2507_v9 = vsel %vm2504_vm4, %v2506_v5, %v2502_v2 }
0x4661   :  { %v2514_v12 = vmul.f32 %v2512_v11, %v2507_v9 }
0x46be   :  { %v2517_v8 = vpop.permute.xlu0 %2516 }
0x46bf   :  { %v2519_v10 = vmul.f32 %v2517_v8, %v2507_v9 }
0x46c1   :  { %2521 = vrot.lane.b32.xlu2 %v2519_v10, %s3037_s11 }
0x471b   :  { %v2522_v13 = vpop.permute.xlu2 %2521 }
0x471c   :  { %v2524_v35 = vadd.f32 %v2522_v13, %v2514_v12 }
0x471e   :  { %3018 = vtanh.f32 %v2524_v35  ;;  %2532 = vrot.lane.b32.xlu2 %v2524_v35, %s3038_s2 }
0x4724   :  { %v3019_v36 = vpop.eup %3018 }
0x4725   :  { %2527 = vrot.lane.b32.xlu0 %v3019_v36, %s3036_s10 }
0x4778   :  { %v2533_v0 = vpop.permute.xlu2 %2532 }
0x4779   :  { %2535 = vst.msk [vmem:[#allocation3] sm:$0xff] %vm25_vm0, %v2533_v0 }
0x4780   :  { %v2544_v14 = vld [vmem:[#allocation3] sm:$0xff] }
0x4797   :  { %v2528_v37 = vpop.permute.xlu0 %2527 }
0x4798   :  { %v2530_v1 = vmul.f32 %v2528_v37, %v2507_v9 }
0x479a   :  { %2537 = vrot.lane.b32.xlu1 %v2530_v1, %s3037_s11 }
0x47a2   :  { %2592 = vrot.lane.b32.xlu1 %v2544_v14, %s3037_s11 }
0x480c   :  { %v2538_v3 = vpop.permute.xlu1 %2537 }
0x480d   :  { %2540 = vst.msk [vmem:[#allocation2] sm:$0xff] %vm25_vm0, %v2538_v3 }
0x480e   :  { %2764 = vst.msk [vmem:[%s3794_s4 + $0xf0] sm:$0xff] %vm25_vm0, %v2538_v3 }
0x4814   :  { %v2543_v15 = vld [vmem:[#allocation2] sm:$0xff]  ;;  %v2593_v41 = vpop.permute.xlu1 %2592 }
0x4815   :  { %2766 = vmatmul.msk.f32.vlgmr.msrb.gmra.mxu3 %vm25_vm0, %v2543_v15 }
0x4898   :  { %v2567_v17 = vpop.f32.mrf.mxu3 }
0x4899   :  { %v2570_v18 = vadd.f32 %v2765_v16, %v2567_v17 }
0x489b   :  { %3020 = vtanh.f32 %v2570_v18  ;;  %v2767_v20 = vmul.f32 -1.442695, %v2570_v18 }
0x489d   :  { %3022 = vpow2.f32 %v2767_v20 }
0x48a1   :  { %v3021_v19 = vpop.eup %3020 }
0x48a2   :  { %2597 = vrot.lane.b32.xlu0 %v3021_v19, %s3036_s10 }
0x48a3   :  { %v3023_v21 = vpop.eup %3022 }
0x48a4   :  { %v2574_v22 = vadd.f32 1.0, %v3023_v21 }
0x48a6   :  { %3024 = vrcp.f32 %v2574_v22  ;;  %v2586_v28 = vand.u32 2147483648, %v2574_v22  ;;  %vm2580_vm6 = vweird.f32 %v2574_v22  ;;  %v2584_v29 = vand.u32 2147483647, %v2574_v22 }
0x48a8   :  { %v2587_v31 = vor.u32 1.1754944e-38, %v2586_v28  ;;  %vm2585_vm8 = vcmp.eq.f32.partialorder %v2584_v29, 8.507059e+37 }
0x48ac   :  { %v3025_v23 = vpop.eup %3024 }
0x48ad   :  { %v2576_v24 = vmul.f32 %v3025_v23, %v2574_v22  ;;  %vm2581_vm5 = vweird.f32 %v3025_v23 }
0x48ae   :  { %vm2582_vm7 = vmor %vm2580_vm6, %vm2581_vm5 }
0x48af   :  { %v2577_v25 = vsub.f32 1.0, %v2576_v24 }
0x48b1   :  { %v2578_v26 = vmul.f32 %v3025_v23, %v2577_v25 }
0x48b3   :  { %v2579_v27 = vadd.f32 %v3025_v23, %v2578_v26 }
0x48b5   :  { %v2583_v30 = vsel %vm2582_vm7, %v3025_v23, %v2579_v27 }
0x48b6   :  { %v2588_v39 = vsel %vm2585_vm8, %v2587_v31, %v2583_v30 }
0x48b7   :  { %v2595_v42 = vmul.f32 %v2593_v41, %v2588_v39 }
0x4914   :  { %v2598_v38 = vpop.permute.xlu0 %2597 }
0x4915   :  { %v2600_v40 = vmul.f32 %v2598_v38, %v2588_v39 }
0x4917   :  { %2602 = vrot.lane.b32.xlu2 %v2600_v40, %s3037_s11 }
0x4971   :  { %v2603_v43 = vpop.permute.xlu2 %2602 }
0x4972   :  { %v2605_v32 = vadd.f32 %v2603_v43, %v2595_v42 }
0x4974   :  { %3026 = vtanh.f32 %v2605_v32  ;;  %2613 = vrot.lane.b32.xlu1 %v2605_v32, %s3038_s2 }
0x497a   :  { %v3027_v33 = vpop.eup %3026 }
0x497b   :  { %2608 = vrot.lane.b32.xlu0 %v3027_v33, %s3036_s10 }
0x49e6   :  { %v2614_v44 = vpop.permute.xlu1 %2613 }
0x49e7   :  { %2616 = vst.msk [vmem:[#allocation3] sm:$0xff] %vm25_vm0, %v2614_v44 }
0x49ed   :  { %v2609_v34 = vpop.permute.xlu0 %2608 }
0x49ee   :  { %v2629_v45 = vld [vmem:[#allocation3] sm:$0xff]  ;;  %v2611_v6 = vmul.f32 %v2609_v34, %v2588_v39 }
0x49ef   :  { %2630 = vst.msk [vmem:[%s3795_s6] sm:$0xff] %vm25_vm0, %v2629_v45 }
0x49f0   :  { %2618 = vrot.lane.b32.xlu2 %v2611_v6, %s3037_s11 }
0x4a4a   :  { %v2619_v46 = vpop.permute.xlu2 %2618 }
0x4a4b   :  { %2621 = vst.msk [vmem:[#allocation2] sm:$0xff] %vm25_vm0, %v2619_v46 }
0x4a4c   :  { %2768 = vst.msk [vmem:[%s3794_s4 + $0xf8] sm:$0xff] %vm25_vm0, %v2619_v46 }
0x4a52   :  { %v2627_v47 = vld [vmem:[#allocation2] sm:$0xff] }
0x4a53   :  { %2628 = vst.msk [vmem:[%s3796_s5] sm:$0xff] %vm25_vm0, %v2627_v47 }

</bundles_post_ra>
